<compile_context>
chip_gen: v7x
topology: tpu7x:2x2x1
jax: 0.10.0
libtpu: 0.0.40
codegen_flags: <defaults>
</compile_context>

<pallas_src>
import functools
import math

import jax
import jax.numpy as jnp
from jax.experimental import pallas as pl
from jax.experimental.pallas import tpu as pltpu


def _round_up(x, m):
    return (x + m - 1) // m * m


def _pick_block_batch(n, per_image_bytes, budget_bytes, max_bblk=8):
    """Largest divisor of n (<= max_bblk) that fits the VMEM budget, preferring
    to keep >= 2 grid steps so megacore can split the batch axis."""
    divisors = [d for d in range(1, min(n, max_bblk) + 1) if n % d == 0]
    fitting = [d for d in divisors if d * per_image_bytes <= budget_bytes] or [1]
    two_step = [d for d in fitting if n // d >= 2]
    return max(two_step) if two_step else max(fitting)


# --------------------------------------------------------------------------
# Pallas kernel: fused loc+cls 3x3 conv (padding=1) for `bblk` images per step
# --------------------------------------------------------------------------
def _fused_pred_kernel(x_ref, w_ref, b_ref, o_ref, xpad_ref, patch_ref,
                       *, bblk, H, W, C):
    """x_ref    : (bblk, H,  W,  C)    bf16 unpadded NHWC activations
       w_ref    : (9*C, nout_p)        bf16 patch-major fused loc|cls weights (resident)
       b_ref    : (1, nout_p)          f32  fused bias (resident)
       o_ref    : (bblk, H*W, nout_p)  bf16 channel-last conv output
       xpad_ref : (bblk, H+2, W+2, C)  bf16 VMEM scratch (zero halo == conv padding=1)
       patch_ref: (bblk*H*W, 9*C)      bf16 VMEM im2col scratch
    """
    M = bblk * H * W

    # Materialize the 1-px zero halo in VMEM (no pre-padded HBM round trip).
    xpad_ref[...] = jnp.zeros(xpad_ref.shape, xpad_ref.dtype)
    xpad_ref[:, pl.ds(1, H), pl.ds(1, W), :] = x_ref[...]

    # im2col: each of the 9 taps is a shifted in-VMEM slice written ONCE (bf16)
    # into its C-column block of the patch-major scratch.
    for dy in range(3):
        for dx in range(3):
            tap = dy * 3 + dx
            patch = xpad_ref[:, pl.ds(dy, H), pl.ds(dx, W), :]   # (bblk, H, W, C)
            patch_ref[:, pl.ds(tap * C, C)] = patch.reshape(M, C)

    # Single long-K MXU matmul: M = bblk*H*W, K = 9*C, N = nout_p.  The f32
    # accumulator is produced exactly once; bias is fused; store as bf16.
    acc = jnp.dot(patch_ref[...], w_ref[...], preferred_element_type=jnp.float32)
    acc = acc + b_ref[...]                                       # (M, nout_p) + (1, nout_p)
    o_ref[...] = acc.reshape(bblk, H * W, -1).astype(o_ref.dtype)


# --------------------------------------------------------------------------
# Wrapper == PredictionLayerConv.forward
# --------------------------------------------------------------------------
def prediction_layer_conv(x_nchw, w_loc, b_loc, w_cls, b_cls, *,
                          dimensions, num_classes, block_batch=None):
    """x_nchw: (N, C, H, W) f32
       w_loc : (3, 3, C, dimensions*4)            HWIO
       w_cls : (3, 3, C, dimensions*num_classes)  HWIO
       returns (loc (N, H*W*dimensions, 4), cls (N, H*W*dimensions, num_classes)) f32
    """
    N, C, H, W = x_nchw.shape
    n_loc = dimensions * 4
    n_cls = dimensions * num_classes
    nout = n_loc + n_cls
    nout_p = _round_up(nout, 128)
    M = H * W
    Hp, Wp = H + 2, W + 2

    assert w_loc.shape == (3, 3, C, n_loc), "expected HWIO loc weights (PyTorch OIHW -> transpose(2,3,1,0))"
    assert w_cls.shape == (3, 3, C, n_cls), "expected HWIO cls weights (PyTorch OIHW -> transpose(2,3,1,0))"

    # NCHW -> NHWC + bf16 cast (one fused XLA pass).  No spatial pre-pad: the conv
    # halo is handled inside the kernel's VMEM scratch.
    # TODO(synk): if the backbone can emit NHWC activations directly, drop this
    # transpose -- it is a full HBM relayout comparable in cost to the kernel itself.
    x = jnp.transpose(x_nchw, (0, 2, 3, 1)).astype(jnp.bfloat16)

    # Fuse the two heads: shared im2col operand -> one matmul with concatenated
    # output columns; pad Cout (with zeros) to a lane-dense multiple of 128.
    w = jnp.concatenate([w_loc.reshape(9 * C, n_loc),
                         w_cls.reshape(9 * C, n_cls)], axis=1)
    w = jnp.pad(w, ((0, 0), (0, nout_p - nout))).astype(jnp.bfloat16)
    b = jnp.concatenate([b_loc, b_cls]).astype(jnp.float32)
    b = jnp.pad(b, (0, nout_p - nout)).reshape(1, nout_p)

    # VMEM budget: 48 MiB on v7x (64 MiB physical), ~96 MiB on v5e/v6e (128 MiB).
    try:
        vmem_cap = int(pltpu.get_tpu_info().vmem_capacity_bytes)
    except Exception:                                    # pragma: no cover
        vmem_cap = 64 << 20
    vmem_budget = min(int(vmem_cap * 3 // 4), 100 << 20)

    # Weights/bias are double-buffered by Pallas even with a constant index_map.
    fixed_bytes = 2 * (9 * C * nout_p * 2) + 2 * (nout_p * 4) + (2 << 20)
    per_image = (2 * M * C * 2            # double-buffered x block
                 + Hp * Wp * C * 2        # padded VMEM scratch
                 + M * 9 * C * 2          # im2col VMEM scratch
                 + 2 * M * nout_p * 2)    # double-buffered bf16 output block
    bblk = block_batch or _pick_block_batch(N, per_image, vmem_budget - fixed_bytes)
    assert N % bblk == 0
    vmem_bytes = int(min(max(fixed_bytes + bblk * per_image, 32 << 20), vmem_budget))
    # TODO(synk): for very large SSD maps (38x38x512) tile the im2col scratch over H,
    # and add a halo row-split grid axis so a single image can use both v7x TensorCores.

    out = pl.pallas_call(
        functools.partial(_fused_pred_kernel, bblk=bblk, H=H, W=W, C=C),
        out_shape=jax.ShapeDtypeStruct((N, M, nout_p), jnp.bfloat16),
        grid_spec=pltpu.PrefetchScalarGridSpec(
            num_scalar_prefetch=0,
            grid=(N // bblk,),                               # bblk images per step
            in_specs=[
                pl.BlockSpec((bblk, H, W, C), lambda n: (n, 0, 0, 0)),
                pl.BlockSpec((9 * C, nout_p), lambda n: (0, 0)),   # fetched once
                pl.BlockSpec((1, nout_p), lambda n: (0, 0)),       # fetched once
            ],
            out_specs=pl.BlockSpec((bblk, M, nout_p), lambda n: (n, 0, 0)),
            scratch_shapes=[
                pltpu.VMEM((bblk, Hp, Wp, C), jnp.bfloat16),       # padded activations
                pltpu.VMEM((bblk * M, 9 * C), jnp.bfloat16),       # im2col patches
            ],
        ),
        compiler_params=pltpu.CompilerParams(
            dimension_semantics=("parallel",),               # megacore over batch blocks
            vmem_limit_bytes=vmem_bytes,
        ),
    )(x, w, b)

    # Channel-last output == PyTorch .permute(0,2,3,1).contiguous(); then .view(bs,-1,k).
    # Only the real (unpadded) columns are read back and cast to f32.
    loc = out[:, :, :n_loc].astype(jnp.float32).reshape(N, M * dimensions, 4)
    cls = out[:, :, n_loc:nout].astype(jnp.float32).reshape(N, M * dimensions, num_classes)
    return loc, cls


# --------------------------------------------------------------------------
if __name__ == "__main__":
    IN_CHANNELS = 128          # SSD prediction-head style channel count (lane aligned)
    DIMENSIONS = 4             # priors per location
    NUM_CLASSES = 6
    N, H, W = 4, 16, 16        # 4 images -> bblk=2, 2 grid steps (megacore-friendly)

    key = jax.random.PRNGKey(0)
    kx, kwl, kwc, kbl, kbc = jax.random.split(key, 5)

    fan_in = 9 * IN_CHANNELS

    def xavier(k, cout):
        a = math.sqrt(6.0 / (fan_in + 9 * cout))
        return jax.random.uniform(k, (3, 3, IN_CHANNELS, cout), jnp.float32, -a, a)

    w_loc = xavier(kwl, DIMENSIONS * 4)
    w_cls = xavier(kwc, DIMENSIONS * NUM_CLASSES)
    b_loc = 0.1 * jax.random.normal(kbl, (DIMENSIONS * 4,), jnp.float32)
    b_cls = 0.1 * jax.random.normal(kbc, (DIMENSIONS * NUM_CLASSES,), jnp.float32)
    x = jax.random.normal(kx, (N, IN_CHANNELS, H, W), jnp.float32)   # NCHW input

    fwd = jax.jit(functools.partial(prediction_layer_conv,
                                    dimensions=DIMENSIONS,
                                    num_classes=NUM_CLASSES))
    loc, cls = fwd(x, w_loc, b_loc, w_cls, b_cls)
    jax.block_until_ready((loc, cls))

    # Pure-JAX f32 reference (kernel uses bf16 operands/outputs -> loose tolerance).
    def ref_head(wk, bk, k_last):
        y = jax.lax.conv_general_dilated(
            jnp.transpose(x, (0, 2, 3, 1)), wk, (1, 1), ((1, 1), (1, 1)),
            dimension_numbers=("NHWC", "HWIO", "NHWC")) + bk
        return y.reshape(N, -1, k_last)

    loc_ref = ref_head(w_loc, b_loc, 4)
    cls_ref = ref_head(w_cls, b_cls, NUM_CLASSES)

    assert loc.shape == (N, H * W * DIMENSIONS, 4), loc.shape
    assert cls.shape == (N, H * W * DIMENSIONS, NUM_CLASSES), cls.shape
    assert bool(jnp.isfinite(loc).all()) and bool(jnp.isfinite(cls).all())
    assert bool(jnp.allclose(loc, loc_ref, atol=5e-2, rtol=5e-2)), \
        float(jnp.max(jnp.abs(loc - loc_ref)))
    assert bool(jnp.allclose(cls, cls_ref, atol=5e-2, rtol=5e-2)), \
        float(jnp.max(jnp.abs(cls - cls_ref)))
    print("KERNEL_OK")
</pallas_src>

<mosaic_0001>
module attributes {stable_mosaic.version = 11 : i64} {
  func.func @_fused_pred_kernel(%arg0: i32, %arg1: memref<2x16x16x128xbf16, #tpu.memory_space<vmem>>, %arg2: memref<1152x128xbf16, #tpu.memory_space<vmem>>, %arg3: memref<1x128xf32, #tpu.memory_space<vmem>>, %arg4: memref<2x256x128xbf16, #tpu.memory_space<vmem>>, %arg5: memref<2x18x18x128xbf16, #tpu.memory_space<vmem>>, %arg6: memref<512x1152xbf16, #tpu.memory_space<vmem>>) attributes {dimension_semantics = [#tpu.dimension_semantics<parallel>], iteration_bounds = array<i64: 2>, scalar_prefetch = 0 : i64, scratch_operands = 2 : i64, tpu.core_type = #tpu.core_type<tc>, window_params = [{transform_indices = @transform_0, window_bounds = array<i64: 2, 16, 16, 128>}, {pipeline_mode = #tpu.pipeline_mode<synchronous>, transform_indices = @transform_1, window_bounds = array<i64: 1152, 128>}, {pipeline_mode = #tpu.pipeline_mode<synchronous>, transform_indices = @transform_2, window_bounds = array<i64: 1, 128>}, {transform_indices = @transform_3, window_bounds = array<i64: 2, 256, 128>}]} {
    %cst = arith.constant 0.000000e+00 : bf16
    %0 = vector.broadcast %cst : bf16 to vector<2x18x18x128xbf16>
    %c0 = arith.constant 0 : index
    %c0_0 = arith.constant 0 : index
    %c0_1 = arith.constant 0 : index
    %c0_2 = arith.constant 0 : index
    %1 = vector.load %arg5[%c0, %c0_0, %c0_1, %c0_2] : memref<2x18x18x128xbf16, #tpu.memory_space<vmem>>, vector<2x18x18x128xbf16>
    tpu.vector_store %arg5[%c0, %c0_0, %c0_1, %c0_2], %0 {strides = array<i32>} : memref<2x18x18x128xbf16, #tpu.memory_space<vmem>>, vector<2x18x18x128xbf16>,
    %c0_3 = arith.constant 0 : index
    %c0_4 = arith.constant 0 : index
    %c0_5 = arith.constant 0 : index
    %c0_6 = arith.constant 0 : index
    %2 = vector.load %arg1[%c0_3, %c0_4, %c0_5, %c0_6] : memref<2x16x16x128xbf16, #tpu.memory_space<vmem>>, vector<2x16x16x128xbf16>
    %c0_7 = arith.constant 0 : index
    %c1 = arith.constant 1 : index
    %c1_8 = arith.constant 1 : index
    %c0_9 = arith.constant 0 : index
    %3 = vector.load %arg5[%c0_7, %c1, %c1_8, %c0_9] : memref<2x18x18x128xbf16, #tpu.memory_space<vmem>>, vector<2x16x16x128xbf16>
    tpu.vector_store %arg5[%c0_7, %c1, %c1_8, %c0_9], %2 {strides = array<i32>} : memref<2x18x18x128xbf16, #tpu.memory_space<vmem>>, vector<2x16x16x128xbf16>,
    %c0_10 = arith.constant 0 : index
    %c0_11 = arith.constant 0 : index
    %c0_12 = arith.constant 0 : index
    %c0_13 = arith.constant 0 : index
    %4 = vector.load %arg5[%c0_10, %c0_11, %c0_12, %c0_13] : memref<2x18x18x128xbf16, #tpu.memory_space<vmem>>, vector<2x16x16x128xbf16>
    %5 = vector.shape_cast %4 : vector<2x16x16x128xbf16> to vector<512x128xbf16>
    %c0_14 = arith.constant 0 : index
    %c0_15 = arith.constant 0 : index
    %6 = vector.load %arg6[%c0_14, %c0_15] : memref<512x1152xbf16, #tpu.memory_space<vmem>>, vector<512x128xbf16>
    tpu.vector_store %arg6[%c0_14, %c0_15], %5 {strides = array<i32>} : memref<512x1152xbf16, #tpu.memory_space<vmem>>, vector<512x128xbf16>,
    %c0_16 = arith.constant 0 : index
    %c0_17 = arith.constant 0 : index
    %c1_18 = arith.constant 1 : index
    %c0_19 = arith.constant 0 : index
    %7 = vector.load %arg5[%c0_16, %c0_17, %c1_18, %c0_19] : memref<2x18x18x128xbf16, #tpu.memory_space<vmem>>, vector<2x16x16x128xbf16>
    %8 = vector.shape_cast %7 : vector<2x16x16x128xbf16> to vector<512x128xbf16>
    %c0_20 = arith.constant 0 : index
    %c128 = arith.constant 128 : index
    %9 = vector.load %arg6[%c0_20, %c128] : memref<512x1152xbf16, #tpu.memory_space<vmem>>, vector<512x128xbf16>
    tpu.vector_store %arg6[%c0_20, %c128], %8 {strides = array<i32>} : memref<512x1152xbf16, #tpu.memory_space<vmem>>, vector<512x128xbf16>,
    %c0_21 = arith.constant 0 : index
    %c0_22 = arith.constant 0 : index
    %c2 = arith.constant 2 : index
    %c0_23 = arith.constant 0 : index
    %10 = vector.load %arg5[%c0_21, %c0_22, %c2, %c0_23] : memref<2x18x18x128xbf16, #tpu.memory_space<vmem>>, vector<2x16x16x128xbf16>
    %11 = vector.shape_cast %10 : vector<2x16x16x128xbf16> to vector<512x128xbf16>
    %c0_24 = arith.constant 0 : index
    %c256 = arith.constant 256 : index
    %12 = vector.load %arg6[%c0_24, %c256] : memref<512x1152xbf16, #tpu.memory_space<vmem>>, vector<512x128xbf16>
    tpu.vector_store %arg6[%c0_24, %c256], %11 {strides = array<i32>} : memref<512x1152xbf16, #tpu.memory_space<vmem>>, vector<512x128xbf16>,
    %c0_25 = arith.constant 0 : index
    %c1_26 = arith.constant 1 : index
    %c0_27 = arith.constant 0 : index
    %c0_28 = arith.constant 0 : index
    %13 = vector.load %arg5[%c0_25, %c1_26, %c0_27, %c0_28] : memref<2x18x18x128xbf16, #tpu.memory_space<vmem>>, vector<2x16x16x128xbf16>
    %14 = vector.shape_cast %13 : vector<2x16x16x128xbf16> to vector<512x128xbf16>
    %c0_29 = arith.constant 0 : index
    %c384 = arith.constant 384 : index
    %15 = vector.load %arg6[%c0_29, %c384] : memref<512x1152xbf16, #tpu.memory_space<vmem>>, vector<512x128xbf16>
    tpu.vector_store %arg6[%c0_29, %c384], %14 {strides = array<i32>} : memref<512x1152xbf16, #tpu.memory_space<vmem>>, vector<512x128xbf16>,
    %c0_30 = arith.constant 0 : index
    %c1_31 = arith.constant 1 : index
    %c1_32 = arith.constant 1 : index
    %c0_33 = arith.constant 0 : index
    %16 = vector.load %arg5[%c0_30, %c1_31, %c1_32, %c0_33] : memref<2x18x18x128xbf16, #tpu.memory_space<vmem>>, vector<2x16x16x128xbf16>
    %17 = vector.shape_cast %16 : vector<2x16x16x128xbf16> to vector<512x128xbf16>
    %c0_34 = arith.constant 0 : index
    %c512 = arith.constant 512 : index
    %18 = vector.load %arg6[%c0_34, %c512] : memref<512x1152xbf16, #tpu.memory_space<vmem>>, vector<512x128xbf16>
    tpu.vector_store %arg6[%c0_34, %c512], %17 {strides = array<i32>} : memref<512x1152xbf16, #tpu.memory_space<vmem>>, vector<512x128xbf16>,
    %c0_35 = arith.constant 0 : index
    %c1_36 = arith.constant 1 : index
    %c2_37 = arith.constant 2 : index
    %c0_38 = arith.constant 0 : index
    %19 = vector.load %arg5[%c0_35, %c1_36, %c2_37, %c0_38] : memref<2x18x18x128xbf16, #tpu.memory_space<vmem>>, vector<2x16x16x128xbf16>
    %20 = vector.shape_cast %19 : vector<2x16x16x128xbf16> to vector<512x128xbf16>
    %c0_39 = arith.constant 0 : index
    %c640 = arith.constant 640 : index
    %21 = vector.load %arg6[%c0_39, %c640] : memref<512x1152xbf16, #tpu.memory_space<vmem>>, vector<512x128xbf16>
    tpu.vector_store %arg6[%c0_39, %c640], %20 {strides = array<i32>} : memref<512x1152xbf16, #tpu.memory_space<vmem>>, vector<512x128xbf16>,
    %c0_40 = arith.constant 0 : index
    %c2_41 = arith.constant 2 : index
    %c0_42 = arith.constant 0 : index
    %c0_43 = arith.constant 0 : index
    %22 = vector.load %arg5[%c0_40, %c2_41, %c0_42, %c0_43] : memref<2x18x18x128xbf16, #tpu.memory_space<vmem>>, vector<2x16x16x128xbf16>
    %23 = vector.shape_cast %22 : vector<2x16x16x128xbf16> to vector<512x128xbf16>
    %c0_44 = arith.constant 0 : index
    %c768 = arith.constant 768 : index
    %24 = vector.load %arg6[%c0_44, %c768] : memref<512x1152xbf16, #tpu.memory_space<vmem>>, vector<512x128xbf16>
    tpu.vector_store %arg6[%c0_44, %c768], %23 {strides = array<i32>} : memref<512x1152xbf16, #tpu.memory_space<vmem>>, vector<512x128xbf16>,
    %c0_45 = arith.constant 0 : index
    %c2_46 = arith.constant 2 : index
    %c1_47 = arith.constant 1 : index
    %c0_48 = arith.constant 0 : index
    %25 = vector.load %arg5[%c0_45, %c2_46, %c1_47, %c0_48] : memref<2x18x18x128xbf16, #tpu.memory_space<vmem>>, vector<2x16x16x128xbf16>
    %26 = vector.shape_cast %25 : vector<2x16x16x128xbf16> to vector<512x128xbf16>
    %c0_49 = arith.constant 0 : index
    %c896 = arith.constant 896 : index
    %27 = vector.load %arg6[%c0_49, %c896] : memref<512x1152xbf16, #tpu.memory_space<vmem>>, vector<512x128xbf16>
    tpu.vector_store %arg6[%c0_49, %c896], %26 {strides = array<i32>} : memref<512x1152xbf16, #tpu.memory_space<vmem>>, vector<512x128xbf16>,
    %c0_50 = arith.constant 0 : index
    %c2_51 = arith.constant 2 : index
    %c2_52 = arith.constant 2 : index
    %c0_53 = arith.constant 0 : index
    %28 = vector.load %arg5[%c0_50, %c2_51, %c2_52, %c0_53] : memref<2x18x18x128xbf16, #tpu.memory_space<vmem>>, vector<2x16x16x128xbf16>
    %29 = vector.shape_cast %28 : vector<2x16x16x128xbf16> to vector<512x128xbf16>
    %c0_54 = arith.constant 0 : index
    %c1024 = arith.constant 1024 : index
    %30 = vector.load %arg6[%c0_54, %c1024] : memref<512x1152xbf16, #tpu.memory_space<vmem>>, vector<512x128xbf16>
    tpu.vector_store %arg6[%c0_54, %c1024], %29 {strides = array<i32>} : memref<512x1152xbf16, #tpu.memory_space<vmem>>, vector<512x128xbf16>,
    %c0_55 = arith.constant 0 : index
    %c0_56 = arith.constant 0 : index
    %31 = vector.load %arg6[%c0_55, %c0_56] : memref<512x1152xbf16, #tpu.memory_space<vmem>>, vector<512x1152xbf16>
    %c0_57 = arith.constant 0 : index
    %c0_58 = arith.constant 0 : index
    %32 = vector.load %arg2[%c0_57, %c0_58] : memref<1152x128xbf16, #tpu.memory_space<vmem>>, vector<1152x128xbf16>
    %cst_59 = arith.constant dense<0.000000e+00> : vector<512x128xf32>
    %33 = tpu.matmul %31, %32, %cst_59 {dimension_numbers = #tpu.dot_dimension_numbers<[1], [0], [0], [1], [0, 0, 1, 1], [], []>} : vector<512x1152xbf16>, vector<1152x128xbf16>, vector<512x128xf32> -> vector<512x128xf32>
    %c0_60 = arith.constant 0 : index
    %c0_61 = arith.constant 0 : index
    %34 = vector.load %arg3[%c0_60, %c0_61] : memref<1x128xf32, #tpu.memory_space<vmem>>, vector<1x128xf32>
    %35 = vector.broadcast %34 : vector<1x128xf32> to vector<512x128xf32>
    %36 = arith.addf %33, %35 : vector<512x128xf32>
    %37 = vector.shape_cast %36 : vector<512x128xf32> to vector<2x256x128xf32>
    %38 = arith.truncf %37 : vector<2x256x128xf32> to vector<2x256x128xbf16>
    %c0_62 = arith.constant 0 : index
    %c0_63 = arith.constant 0 : index
    %c0_64 = arith.constant 0 : index
    %39 = vector.load %arg4[%c0_62, %c0_63, %c0_64] : memref<2x256x128xbf16, #tpu.memory_space<vmem>>, vector<2x256x128xbf16>
    tpu.vector_store %arg4[%c0_62, %c0_63, %c0_64], %38 {strides = array<i32>} : memref<2x256x128xbf16, #tpu.memory_space<vmem>>, vector<2x256x128xbf16>,
    return
  }
  func.func @transform_0(%arg0: i32) -> (i32, i32, i32, i32) {
    %c0_i32 = arith.constant 0 : i32
    %c0_i32_0 = arith.constant 0 : i32
    %c0_i32_1 = arith.constant 0 : i32
    %c0_i32_2 = arith.constant 0 : i32
    return %arg0, %c0_i32, %c0_i32_0, %c0_i32_1 : i32, i32, i32, i32
  }
  func.func @transform_1(%arg0: i32) -> (i32, i32) {
    %c0_i32 = arith.constant 0 : i32
    %c0_i32_0 = arith.constant 0 : i32
    %c0_i32_1 = arith.constant 0 : i32
    return %c0_i32, %c0_i32_0 : i32, i32
  }
  func.func @transform_2(%arg0: i32) -> (i32, i32) {
    %c0_i32 = arith.constant 0 : i32
    %c0_i32_0 = arith.constant 0 : i32
    %c0_i32_1 = arith.constant 0 : i32
    return %c0_i32, %c0_i32_0 : i32, i32
  }
  func.func @transform_3(%arg0: i32) -> (i32, i32, i32) {
    %c0_i32 = arith.constant 0 : i32
    %c0_i32_0 = arith.constant 0 : i32
    %c0_i32_1 = arith.constant 0 : i32
    return %arg0, %c0_i32, %c0_i32_0 : i32, i32, i32
  }
}

</mosaic_0001>

<bundles_post_ra>
// kernel: prediction_layer_conv.1
= control target key start
LH: loop header
LB: loop body
LE: loop exit
PB: predicated region body
PF: predicated region fallthrough
CT: control target
= control target key end

     0   :  { %s11128_s12 = smov 0   ;;  %s13534_s0 = inlined_call_operand.vmem [shape: bf16[4,16,16,128], index: 0, kind: input, shape index: {}]   ;;  %s13535_s1 = inlined_call_operand.vmem [shape: bf16[1152,128], index: 1, kind: input, shape index: {}]   ;;  %s13536_s2 = inlined_call_operand.vmem [shape: f32[1,128], index: 2, kind: input, shape index: {}]   ;;  %s13537_s3 = inlined_call_operand.vmem [shape: bf16[4,256,128], index: 3, kind: output, shape index: {}]  }
   0x1 LB: > { %s9590_s13 = sadd.s32 4294967295, %s11105_s12   ;;  %p9594_p0 = scmp.ge.s32.totalorder %s11105_s12, 1  ;;  %s11105_s12 = sphi %s11128_s12, %s13_s12  }
   0x2   : > { %p139_p1 = scmp.lt.s32.totalorder %s11105_s12, 3 }
   0x4   : > { %p140_p2 = pnand %p9594_p0, %p139_p1 }
   0x6   : > { %143 = sbr.rel (%p140_p2) target bundleno = 1026 (0x402), region = 32 }
   0xd   : > { %v11139_v0 = vld [vmem:[%s13535_s1] sm:$0xff]   ;;  %v11107_v1 = vmov 0   ;;  %v10928_v3 = vld [vmem:[%s13535_s1 + $0x8] sm:$0xff]   ;;  %v10930_v5 = vld [vmem:[%s13535_s1 + $0x10] sm:$0xff]   ;;  %s9595_s7 = sshll.u32 %s9590_s13, 1  ;;  %vm996_vm0 = vcmask 1043456  }
   0xe   : > { %7767 = vmatprep.subr.bf16.mxu1 %v11107_v1  ;;  %180 = vst [vmem:[#allocation2] sm:$0xf] %v11107_v1  ;;  %181 = vst [vmem:[#allocation2 + $0x4] sm:$0xf] %v11107_v1  ;;  %8056 = vmatprep.subr.bf16.mxu0 %v11107_v1  ;;  %v11254_v2 = vld [vmem:[%s13535_s1 + $0x80] sm:$0xff]   ;;  %v11265_v4 = vld [vmem:[%s13535_s1 + $0x88] sm:$0xff]  }
   0xf   : > { %182 = vst [vmem:[#allocation2 + $0x8] sm:$0x1] %v11107_v1  ;;  %183 = vst [vmem:[#allocation2 + $0xc] sm:$0xf] %v11107_v1  ;;  %7768 = vmatpush1.bf16.msra.mxu1 %v11139_v0  ;;  %8057 = vmatpush1.bf16.msra.mxu0 %v11254_v2  ;;  %v11276_v6 = vld [vmem:[%s13535_s1 + $0x90] sm:$0xff]   ;;  %v10932_v7 = vld [vmem:[%s13535_s1 + $0x18] sm:$0xff]  }
  0x10   : > { %184 = vst [vmem:[#allocation2 + $0x10] sm:$0xf] %v11107_v1  ;;  %185 = vst [vmem:[#allocation2 + $0x14] sm:$0x1] %v11107_v1  ;;  %7769 = vmatprep.subr.bf16.mxu1 %v11107_v1  ;;  %8058 = vmatprep.subr.bf16.mxu0 %v11107_v1  ;;  %v11287_v8 = vld [vmem:[%s13535_s1 + $0x98] sm:$0xff]   ;;  %v10934_v9 = vld [vmem:[%s13535_s1 + $0x20] sm:$0xff]  }
  0x11   : > { %186 = vst [vmem:[#allocation2 + $0x18] sm:$0xf] %v11107_v1  ;;  %187 = vst [vmem:[#allocation2 + $0x1c] sm:$0xf] %v11107_v1  ;;  %v11298_v10 = vld [vmem:[%s13535_s1 + $0xa0] sm:$0xff]   ;;  %v10936_v11 = vld [vmem:[%s13535_s1 + $0x28] sm:$0xff]  }
  0x12   : > { %188 = vst [vmem:[#allocation2 + $0x20] sm:$0x1] %v11107_v1  ;;  %189 = vst [vmem:[#allocation2 + $0x24] sm:$0xf] %v11107_v1  ;;  %v11311_v12 = vld [vmem:[%s13535_s1 + $0xa8] sm:$0xff]   ;;  %p166_p3 = scmp.lt.s32.totalorder %s9595_s7, 3 }
  0x13   : > { %190 = vst [vmem:[#allocation2 + $0x28] sm:$0xf] %v11107_v1  ;;  %191 = vst [vmem:[#allocation2 + $0x2c] sm:$0x1] %v11107_v1  ;;  %7770 = vmatpush1.bf16.msra.mxu1 %v10928_v3  ;;  %8059 = vmatpush1.bf16.msra.mxu0 %v11265_v4  ;;  %v10938_v13 = vld [vmem:[%s13535_s1 + $0x30] sm:$0xff]   ;;  %v10940_v15 = vld [vmem:[%s13535_s1 + $0x38] sm:$0xff]  }
  0x14   : > { %192 = vst [vmem:[#allocation2 + $0x30] sm:$0xf] %v11107_v1  ;;  %193 = vst [vmem:[#allocation2 + $0x34] sm:$0xf] %v11107_v1  ;;  %7771 = vmatprep.subr.bf16.mxu1 %v11107_v1  ;;  %8060 = vmatprep.subr.bf16.mxu0 %v11107_v1  ;;  %v11322_v14 = vld [vmem:[%s13535_s1 + $0xb0] sm:$0xff]   ;;  %s13599_s7 = smov (!%p166_p3, %s9595_s7), 3 }
  0x15   : > { %194 = vst [vmem:[#allocation2 + $0x38] sm:$0x1] %v11107_v1  ;;  %195 = vst [vmem:[#allocation2 + $0x3c] sm:$0xf] %v11107_v1  ;;  %v11335_v16 = vld [vmem:[%s13535_s1 + $0xb8] sm:$0xff]   ;;  %s10124_s21 = sshll.u32 %s13599_s7, 7 }
  0x16   : > { %196 = vst [vmem:[#allocation2 + $0x40] sm:$0xf] %v11107_v1  ;;  %197 = vst [vmem:[#allocation2 + $0x44] sm:$0x1] %v11107_v1  ;;  %v10942_v17 = vld [vmem:[%s13535_s1 + $0x40] sm:$0xff]   ;;  %s11354_s28 = scalar_lea.vmem %s13534_s0, %s10124_s21  ;;  %v10944_v22 = vld [vmem:[%s13535_s1 + $0x48] sm:$0xff]   ;;  %s13345_s6 = scalar_lea.vmem %s13537_s3, %s10124_s21 }
  0x17   : > { %198 = vst [vmem:[#allocation2 + $0x48] sm:$0xf] %v11107_v1  ;;  %199 = vst [vmem:[#allocation2 + $0x4c] sm:$0xf] %v11107_v1  ;;  %7772 = vmatpush1.bf16.msra.mxu1 %v10930_v5  ;;  %8061 = vmatpush1.bf16.msra.mxu0 %v11276_v6  ;;  %v11347_v18 = vld [vmem:[%s13535_s1 + $0xc0] sm:$0xff]   ;;  %vm1003_vm2 = vcmask 1040384  }
  0x18   : > { %200 = vst [vmem:[#allocation2 + $0x50] sm:$0x1] %v11107_v1  ;;  %201 = vst [vmem:[#allocation2 + $0x54] sm:$0xf] %v11107_v1  ;;  %7773 = vmatprep.subr.bf16.mxu1 %v11107_v1  ;;  %8062 = vmatprep.subr.bf16.mxu0 %v11107_v1  ;;  %v1513_v19 = vld [vmem:[#allocation2] sm:$0xf] }
  0x19   : > { %202 = vst [vmem:[#allocation2 + $0x58] sm:$0xf] %v11107_v1  ;;  %203 = vst [vmem:[#allocation2 + $0x5c] sm:$0x1] %v11107_v1  ;;  %v1514_v20 = vld [vmem:[#allocation2 + $0x4] sm:$0xf] }
  0x1a   : > { %204 = vst [vmem:[#allocation2 + $0x60] sm:$0xf] %v11107_v1  ;;  %205 = vst [vmem:[#allocation2 + $0x64] sm:$0xf] %v11107_v1  ;;  %v1515_v21 = vld [vmem:[#allocation2 + $0x8] sm:$0x1] }
  0x1b   : > { %206 = vst [vmem:[#allocation2 + $0x68] sm:$0x1] %v11107_v1  ;;  %207 = vst [vmem:[#allocation2 + $0x6c] sm:$0xf] %v11107_v1  ;;  %7774 = vmatpush1.bf16.msra.mxu1 %v10932_v7  ;;  %8063 = vmatpush1.bf16.msra.mxu0 %v11287_v8  ;;  %vm1609_vm1 = vsmask.f32 3328 }
  0x1c   : > { %208 = vst [vmem:[#allocation2 + $0x70] sm:$0xf] %v11107_v1  ;;  %209 = vst [vmem:[#allocation2 + $0x74] sm:$0x1] %v11107_v1  ;;  %7775 = vmatprep.subr.bf16.mxu1 %v11107_v1  ;;  %8064 = vmatprep.subr.bf16.mxu0 %v11107_v1  ;;  %v1613_v23 = vshrl.u32 %v1513_v19, 16  ;;  %v1616_v24 = vshll.u32 %v1513_v19, 16 }
  0x1d   : > { %210 = vst [vmem:[#allocation2 + $0x78] sm:$0xf] %v11107_v1  ;;  %211 = vst [vmem:[#allocation2 + $0x7c] sm:$0xf] %v11107_v1  ;;  %v11363_v25 = vld [vmem:[%s13535_s1 + $0xc8] sm:$0xff]   ;;  %v1622_v26 = vshll.u32 %v1514_v20, 16 }
  0x1e   : > { %212 = vst [vmem:[#allocation2 + $0x80] sm:$0x1] %v11107_v1  ;;  %213 = vst [vmem:[#allocation2 + $0x84] sm:$0xf] %v11107_v1  ;;  %v1626_v27 = vshrl.u32 %v1514_v20, 16  ;;  %v1632_v28 = vshll.u32 %v1515_v21, 16 }
  0x1f   : > { %214 = vst [vmem:[#allocation2 + $0x88] sm:$0xf] %v11107_v1  ;;  %215 = vst [vmem:[#allocation2 + $0x8c] sm:$0x1] %v11107_v1  ;;  %7776 = vmatpush1.bf16.msra.mxu1 %v10934_v9  ;;  %8065 = vmatpush1.bf16.msra.mxu0 %v11298_v10  ;;  %v288_v29 = vld [vmem:[%s11354_s28] sm:$0xf] }
  0x20   : > { %216 = vst [vmem:[#allocation2 + $0x90] sm:$0xf] %v11107_v1  ;;  %217 = vst [vmem:[#allocation2 + $0x94] sm:$0xf] %v11107_v1  ;;  %7777 = vmatprep.subr.bf16.mxu1 %v11107_v1  ;;  %8066 = vmatprep.subr.bf16.mxu0 %v11107_v1  ;;  %vm1610_vm3 = vsmask.f32 7440 }
  0x21   : > { %218 = vst [vmem:[#allocation2 + $0x98] sm:$0x1] %v11107_v1  ;;  %219 = vst [vmem:[#allocation2 + $0x9c] sm:$0xf] %v11107_v1  ;;  %v1615_v30 = vrot.slane %v1613_v23, 4  ;;  %v1618_v31 = vrot.slane %v1616_v24, 5 }
  0x22   : > { %220 = vst [vmem:[#allocation2 + $0xa0] sm:$0xf] %v11107_v1  ;;  %221 = vst [vmem:[#allocation2 + $0xa4] sm:$0x1] %v11107_v1  ;;  %v289_v32 = vld [vmem:[%s11354_s28 + $0x4] sm:$0xf] }
  0x23   : > { %222 = vst [vmem:[#allocation2 + $0xa8] sm:$0xf] %v11107_v1  ;;  %223 = vst [vmem:[#allocation2 + $0xac] sm:$0xf] %v11107_v1  ;;  %7778 = vmatpush1.bf16.msra.mxu1 %v10936_v11  ;;  %8067 = vmatpush1.bf16.msra.mxu0 %v11311_v12  ;;  %v1624_v33 = vrot.slane %v1622_v26, 5  ;;  %v1628_v34 = vrot.slane %v1626_v27, 4  ;;  %v1619_v36 = vor.u32 %v1618_v31, %v1615_v30 }
  0x24   : > { %224 = vst [vmem:[#allocation2 + $0xb0] sm:$0x1] %v11107_v1  ;;  %225 = vst [vmem:[#allocation2 + $0xb4] sm:$0xf] %v11107_v1  ;;  %7779 = vmatprep.subr.bf16.mxu1 %v11107_v1  ;;  %8068 = vmatprep.subr.bf16.mxu0 %v11107_v1  ;;  %vm352_vm4 = vsmask.f32 256 }
  0x25   : > { %226 = vst [vmem:[#allocation2 + $0xb8] sm:$0xf] %v11107_v1  ;;  %227 = vst [vmem:[#allocation2 + $0xbc] sm:$0x1] %v11107_v1  ;;  %vm353_vm5 = vsmask.f32 4368  ;;  %v1629_v41 = vor.u32 %v1628_v34, %v1624_v33 }
  0x26   : > { %228 = vst [vmem:[#allocation2 + $0xc0] sm:$0xf] %v11107_v1  ;;  %229 = vst [vmem:[#allocation2 + $0xc4] sm:$0xf] %v11107_v1  ;;  %v10946_v35 = vld [vmem:[%s13535_s1 + $0x50] sm:$0xff]   ;;  %v356_v37 = vshrl.u32 %v288_v29, 16 }
  0x27   : > { %230 = vst [vmem:[#allocation2 + $0xc8] sm:$0x1] %v11107_v1  ;;  %231 = vst [vmem:[#allocation2 + $0xcc] sm:$0xf] %v11107_v1  ;;  %7780 = vmatpush1.bf16.msra.mxu1 %v10938_v13  ;;  %8069 = vmatpush1.bf16.msra.mxu0 %v11322_v14  ;;  %v359_v38 = vshll.u32 %v288_v29, 16  ;;  %v364_v39 = vshrl.u32 %v289_v32, 16 }
  0x28   : > { %232 = vst [vmem:[#allocation2 + $0xd0] sm:$0xf] %v11107_v1  ;;  %233 = vst [vmem:[#allocation2 + $0xd4] sm:$0x1] %v11107_v1  ;;  %7781 = vmatprep.subr.bf16.mxu1 %v11107_v1  ;;  %8070 = vmatprep.subr.bf16.mxu0 %v11107_v1  ;;  %v1634_v42 = vrot.slane %v1632_v28, 5  ;;  %v367_v43 = vshll.u32 %v289_v32, 16 }
  0x29   : > { %234 = vst [vmem:[#allocation2 + $0xd8] sm:$0xf] %v11107_v1  ;;  %235 = vst [vmem:[#allocation2 + $0xdc] sm:$0xf] %v11107_v1  ;;  %vm997_vm7 = vsmask.f32 7938 }
  0x2a   : > { %236 = vst [vmem:[#allocation2 + $0xe0] sm:$0x1] %v11107_v1  ;;  %237 = vst [vmem:[#allocation2 + $0xe4] sm:$0xf] %v11107_v1  ;;  %v11384_v44 = vld [vmem:[%s13535_s1 + $0xd0] sm:$0xff]   ;;  %v1620_v45 = vrot.slane %v1619_v36, 4 }
  0x2b   : > { %238 = vst [vmem:[#allocation2 + $0xe8] sm:$0xf] %v11107_v1  ;;  %239 = vst [vmem:[#allocation2 + $0xec] sm:$0x1] %v11107_v1  ;;  %7782 = vmatpush1.bf16.msra.mxu1 %v10940_v15  ;;  %8071 = vmatpush1.bf16.msra.mxu0 %v11335_v16  ;;  %v358_v47 = vrot.slane %v356_v37, 7  ;;  %v366_v48 = vrot.slane %v364_v39, 7 }
  0x2c   : > { %240 = vst [vmem:[#allocation2 + $0xf0] sm:$0xf] %v11107_v1  ;;  %241 = vst [vmem:[#allocation2 + $0xf4] sm:$0xf] %v11107_v1  ;;  %7783 = vmatprep.subr.bf16.mxu1 %v11107_v1  ;;  %8072 = vmatprep.subr.bf16.mxu0 %v11107_v1  ;;  %v10948_v49 = vld [vmem:[%s13535_s1 + $0x58] sm:$0xff]   ;;  %v1630_v50 = vrot.slane %v1629_v41, 4 }
  0x2d   : > { %242 = vst [vmem:[#allocation2 + $0xf8] sm:$0x1] %v11107_v1  ;;  %243 = vst [vmem:[#allocation2 + $0xfc] sm:$0xf] %v11107_v1  ;;  %v999_v52 = vld [vmem:[#allocation2 + $0xc] sm:$0xf]  ;;  %v361_v55 = vor.u32 %v359_v38, %v358_v47  ;;  %v369_v57 = vor.u32 %v367_v43, %v366_v48 }
  0x2e   : > { %244 = vst [vmem:[#allocation2 + $0x100] sm:$0xf] %v11107_v1  ;;  %245 = vst [vmem:[#allocation2 + $0x104] sm:$0x1] %v11107_v1  ;;  %v11404_v53 = vld [vmem:[%s13535_s1 + $0xd8] sm:$0xff]   ;;  %v362_v56 = vrot.slane %v358_v47, 4 }
  0x2f   : > { %246 = vst [vmem:[#allocation2 + $0x108] sm:$0xf] %v11107_v1  ;;  %247 = vst [vmem:[#allocation2 + $0x10c] sm:$0xf] %v11107_v1  ;;  %7784 = vmatpush1.bf16.msra.mxu1 %v10942_v17  ;;  %8073 = vmatpush1.bf16.msra.mxu0 %v11347_v18  ;;  %v11408_v58 = vld [vmem:[#allocation2 + $0x4] sm:$0xf] }
  0x30   : > { %248 = vst [vmem:[#allocation2 + $0x110] sm:$0x1] %v11107_v1  ;;  %249 = vst [vmem:[#allocation2 + $0x114] sm:$0xf] %v11107_v1  ;;  %7785 = vmatprep.subr.bf16.mxu1 %v11107_v1  ;;  %8074 = vmatprep.subr.bf16.mxu0 %v11107_v1  ;;  %v371_v60 = vrot.slane %v366_v48, 4  ;;  %vm2732_vm11 = vcmask 1042432  }
  0x31   : > { %250 = vst [vmem:[#allocation2 + $0x118] sm:$0xf] %v11107_v1  ;;  %251 = vst [vmem:[#allocation2 + $0x11c] sm:$0x1] %v11107_v1  ;;  %v11418_v62 = vld [vmem:[#allocation2] sm:$0xe] }
  0x32   : > { %252 = vst [vmem:[#allocation2 + $0x120] sm:$0xf] %v11107_v1  ;;  %253 = vst [vmem:[#allocation2 + $0x124] sm:$0xf] %v11107_v1  ;;  %vm2733_vm12 = vcmask 1046532   ;;  %v10950_v7 = vld [vmem:[%s13535_s1 + $0x60] sm:$0xff]  }
  0x33   : > { %254 = vst [vmem:[#allocation2 + $0x128] sm:$0x1] %v11107_v1  ;;  %255 = vst [vmem:[#allocation2 + $0x12c] sm:$0xf] %v11107_v1  ;;  %7786 = vmatpush1.bf16.msra.mxu1 %v10944_v22  ;;  %8075 = vmatpush1.bf16.msra.mxu0 %v11363_v25  ;;  %v11426_v5 = vld [vmem:[#allocation2 + $0x8] sm:$0x1] }
  0x34   : > { %256 = vst [vmem:[#allocation2 + $0x130] sm:$0xf] %v11107_v1  ;;  %257 = vst [vmem:[#allocation2 + $0x134] sm:$0x1] %v11107_v1  ;;  %7787 = vmatprep.subr.bf16.mxu1 %v11107_v1  ;;  %8076 = vmatprep.subr.bf16.mxu0 %v11107_v1  ;;  %v2737_v9 = vrot.slane %v11408_v58, 5  ;;  %v11437_v15 = vld [vmem:[%s13535_s1 + $0xe0] sm:$0xff]  }
  0x35   : > { %258 = vst [vmem:[#allocation2 + $0x138] sm:$0xf] %v11107_v1  ;;  %259 = vst [vmem:[#allocation2 + $0x13c] sm:$0xf] %v11107_v1  ;;  %v1005_v11 = vld [vmem:[#allocation2 + $0x14] sm:$0x1] }
  0x36   : > { %260 = vst [vmem:[#allocation2 + $0x140] sm:$0x1] %v11107_v1  ;;  %261 = vst [vmem:[#allocation2 + $0x144] sm:$0xf] %v11107_v1  ;;  %v290_v13 = vld [vmem:[%s11354_s28 + $0x8] sm:$0xf] }
  0x37   : > { %262 = vst [vmem:[#allocation2 + $0x148] sm:$0xf] %v11107_v1  ;;  %263 = vst [vmem:[#allocation2 + $0x14c] sm:$0x1] %v11107_v1  ;;  %7788 = vmatpush1.bf16.msra.mxu1 %v10946_v35  ;;  %8077 = vmatpush1.bf16.msra.mxu0 %v11384_v44  ;;  %v9665_v17 = vrot.slane %v11418_v62, 9  ;;  %v373_v21 = vshrl.u32 %v290_v13, 16 }
  0x38   : > { %264 = vst [vmem:[#allocation2 + $0x150] sm:$0xf] %v11107_v1  ;;  %265 = vst [vmem:[#allocation2 + $0x154] sm:$0xf] %v11107_v1  ;;  %7789 = vmatprep.subr.bf16.mxu1 %v11107_v1  ;;  %8078 = vmatprep.subr.bf16.mxu0 %v11107_v1  ;;  %v291_v20 = vld [vmem:[%s11354_s28 + $0xc] sm:$0xf] }
  0x39   : > { %266 = vst [vmem:[#allocation2 + $0x158] sm:$0x1] %v11107_v1  ;;  %267 = vst [vmem:[#allocation2 + $0x15c] sm:$0xf] %v11107_v1  ;;  %v376_v22 = vshll.u32 %v290_v13, 16  ;;  %v381_v23 = vshrl.u32 %v291_v20, 16 }
  0x3a   : > { %268 = vst [vmem:[#allocation2 + $0x160] sm:$0xf] %v11107_v1  ;;  %269 = vst [vmem:[#allocation2 + $0x164] sm:$0x1] %v11107_v1  ;;  %v384_v24 = vshll.u32 %v291_v20, 16  ;;  %v2740_v26 = vrot.slane %v11426_v5, 5 }
  0x3b   : > { %270 = vst [vmem:[#allocation2 + $0x168] sm:$0xf] %v11107_v1  ;;  %271 = vst [vmem:[#allocation2 + $0x16c] sm:$0xf] %v11107_v1  ;;  %7790 = vmatpush1.bf16.msra.mxu1 %v10948_v49  ;;  %8079 = vmatpush1.bf16.msra.mxu0 %v11404_v53  ;;  %v375_v27 = vrot.slane %v373_v21, 7  ;;  %v2739_v28 = vrot.slane %v2737_v9, 4 }
  0x3c   : > { %272 = vst [vmem:[#allocation2 + $0x170] sm:$0x1] %v11107_v1  ;;  %273 = vst [vmem:[#allocation2 + $0x174] sm:$0xf] %v11107_v1  ;;  %7791 = vmatprep.subr.bf16.mxu1 %v11107_v1  ;;  %8080 = vmatprep.subr.bf16.mxu0 %v11107_v1  ;;  %v383_v29 = vrot.slane %v381_v23, 7  ;;  %v10952_v37 = vld [vmem:[%s13535_s1 + $0x68] sm:$0xff]  }
  0x3d   : > { %274 = vst [vmem:[#allocation2 + $0x178] sm:$0xf] %v11107_v1  ;;  %275 = vst [vmem:[#allocation2 + $0x17c] sm:$0x1] %v11107_v1  ;;  %v1008_v30 = vld [vmem:[#allocation2 + $0x18] sm:$0xf]  ;;  %v378_v32 = vor.u32 %v376_v22, %v375_v27 }
  0x3e   : > { %276 = vst [vmem:[#allocation2 + $0x180] sm:$0xf] %v11107_v1  ;;  %277 = vst [vmem:[#allocation2 + $0x184] sm:$0xf] %v11107_v1  ;;  %v292_v31 = vld [vmem:[%s11354_s28 + $0x10] sm:$0xf]  ;;  %v386_v39 = vor.u32 %v384_v24, %v383_v29 }
  0x3f   : > { %278 = vst [vmem:[#allocation2 + $0x188] sm:$0x1] %v11107_v1  ;;  %279 = vst [vmem:[#allocation2 + $0x18c] sm:$0xf] %v11107_v1  ;;  %v1012_v34 = vld [vmem:[#allocation2 + $0x20] sm:$0x1]  ;;  %7792 = vmatpush1.bf16.msra.mxu1 %v10950_v7  ;;  %8081 = vmatpush1.bf16.msra.mxu0 %v11437_v15 }
  0x40   : > { %280 = vst [vmem:[#allocation2 + $0x190] sm:$0xf] %v11107_v1  ;;  %281 = vst [vmem:[#allocation2 + $0x194] sm:$0x1] %v11107_v1  ;;  %v11451_v35 = vld [vmem:[%s11354_s28 + $0x14] sm:$0xf]  ;;  %7793 = vmatprep.subr.bf16.mxu1 %v11107_v1  ;;  %8082 = vmatprep.subr.bf16.mxu0 %v11107_v1 }
  0x41   : > { %282 = vst [vmem:[#allocation2 + $0x198] sm:$0xf] %v11107_v1  ;;  %283 = vst [vmem:[#allocation2 + $0x19c] sm:$0xf] %v11107_v1  ;;  %v390_v36 = vshrl.u32 %v292_v31, 16  ;;  %v10953_v38 = vld [vmem:[%s13535_s1 + $0xe8] sm:$0xff]  }
  0x42   : > { %284 = vst [vmem:[#allocation2 + $0x1a0] sm:$0x1] %v11107_v1  ;;  %285 = vst [vmem:[#allocation2 + $0x1a4] sm:$0xf] %v11107_v1  ;;  %v388_v41 = vrot.slane %v383_v29, 4  ;;  %v398_v43 = vshrl.u32 %v11451_v35, 16 }
  0x43   : > { %286 = vst [vmem:[#allocation2 + $0x1a8] sm:$0xf] %v11107_v1  ;;  %287 = vst [vmem:[#allocation2 + $0x1ac] sm:$0x1] %v11107_v1  ;;  %v11464_v48 = vrot.slane %v390_v36, 7  ;;  %v10954_v49 = vld [vmem:[%s13535_s1 + $0x70] sm:$0xff]   ;;  %7794 = vmatpush1.bf16.msra.mxu1 %v10952_v37  ;;  %8083 = vmatpush1.bf16.msra.mxu0 %v10953_v38 }
  0x44   : > { %vm11375_vm6 = vmor %vm1609_vm1, %vm1610_vm3  ;;  %v1015_v5 = vld [vmem:[#allocation2 + $0x24] sm:$0xf]  ;;  %7795 = vmatprep.subr.bf16.mxu1 %v11107_v1  ;;  %8084 = vmatprep.subr.bf16.mxu0 %v11107_v1  ;;  %v400_v37 = vrot.slane %v398_v43, 7 }
  0x45   : > { %vm11388_vm8 = vmor %vm352_vm4, %vm353_vm5  ;;  %v1625_v54 = vsel %vm11375_vm6, %v1620_v45, %v1624_v33  ;;  %v1635_v59 = vsel %vm11375_vm6, %v1630_v50, %v1634_v42  ;;  %v379_v33 = vrot.slane %v375_v27, 4  ;;  %v393_v42 = vshll.u32 %v292_v31, 16  ;;  %v10956_v27 = vld [vmem:[%s13535_s1 + $0x78] sm:$0xff]  }
  0x46   : > { %vm11397_vm9 = vmand %vm996_vm0, %vm997_vm7  ;;  %v9633_v63 = vcombine.low %v1625_v54, %v1635_v59  ;;  %v370_v0 = vsel %vm11388_vm8, %v362_v56, %v369_v57  ;;  %v10955_v56 = vld [vmem:[%s13535_s1 + $0xf0] sm:$0xff]   ;;  %v396_v62 = vrot.slane %v11464_v48, 4 }
  0x47   : > { %vm11414_vm10 = vmand %vm1003_vm2, %vm352_vm4  ;;  %v1000_v3 = vsel %vm11397_vm9, %v361_v55, %v999_v52  ;;  %1002 = vst [vmem:[#allocation2 + $0x10] sm:$0xf] %v370_v0  ;;  %v1009_v47 = vsel %vm11397_vm9, %v378_v32, %v1008_v30  ;;  %v387_v54 = vsel %vm11388_vm8, %v379_v33, %v386_v39  ;;  %v395_v13 = vor.u32 %v393_v42, %v11464_v48  ;;  %v10957_v33 = vld [vmem:[%s13535_s1 + $0xf8] sm:$0xff]  }
  0x48   : > { %1001 = vst [vmem:[#allocation2 + $0xc] sm:$0xf] %v1000_v3  ;;  %7799 = vmatprep.mubr.bf16.mxu1 %v9633_v63  ;;  %v1006_v19 = vsel %vm11414_vm10, %v371_v60, %v1005_v11  ;;  %1010 = vst [vmem:[#allocation2 + $0x18] sm:$0xf] %v1009_v47  ;;  %v1013_v55 = vsel %vm11414_vm10, %v388_v41, %v1012_v34  ;;  %7796 = vmatpush1.bf16.msra.mxu1 %v10954_v49 }
  0x49   : > { %1007 = vst [vmem:[#allocation2 + $0x14] sm:$0x1] %v1006_v19  ;;  %vm11479_vm13 = vmor %vm2732_vm11, %vm2733_vm12  ;;  %v401_v19 = vshll.u32 %v11451_v35, 16  ;;  %8085 = vmatpush1.bf16.msra.mxu0 %v10955_v56  ;;  %7797 = vmatprep.subr.bf16.mxu1 %v11107_v1 }
  0x4a   : > { %1011 = vst [vmem:[#allocation2 + $0x1c] sm:$0xf] %v387_v54  ;;  %1014 = vst [vmem:[#allocation2 + $0x20] sm:$0x1] %v1013_v55  ;;  %v2738_v29 = vsel %vm11479_vm13, %v9665_v17, %v2737_v9  ;;  %v2741_v30 = vsel %vm11479_vm13, %v2739_v28, %v2740_v26  ;;  %v1016_v9 = vsel %vm11397_vm9, %v395_v13, %v1015_v5  ;;  %v10959_v17 = vld [vmem:[#allocation2] sm:$0xff]   ;;  %8086 = vmatprep.subr.bf16.mxu0 %v11107_v1 }
  0x4b   : > { %v403_v39 = vor.u32 %v401_v19, %v400_v37  ;;  %1017 = vst [vmem:[#allocation2 + $0x24] sm:$0xf] %v1016_v9  ;;  %v9697_v41 = vcombine.low %v2738_v29, %v2741_v30  ;;  %v10960_v54 = vld [vmem:[%s13535_s1 + $0x100] sm:$0xff]   ;;  %v10961_v29 = vld [vmem:[%s13535_s1 + $0x108] sm:$0xff]  }
  0x4c   : > { %7798 = vmatpush1.bf16.msra.mxu1 %v10956_v27  ;;  %v1019_v27 = vld [vmem:[#allocation2 + $0x2c] sm:$0x1] }
  0x4d   : > { %8087 = vmatpush1.bf16.msra.mxu0 %v10957_v33  ;;  %10501 = vmatprep.subr.bf16.mxu1 %v11107_v1  ;;  %v404_v5 = vsel %vm11388_vm8, %v396_v62, %v403_v39  ;;  %v10964_v39 = vld [vmem:[%s13535_s1 + $0x110] sm:$0xff]  }
  0x4e   : > { %v1517_v52 = vld [vmem:[#allocation2 + $0x10] sm:$0xf]  ;;  %8345 = vmatprep.subr.bf16.mxu0 %v11107_v1  ;;  %1018 = vst [vmem:[#allocation2 + $0x28] sm:$0xf] %v404_v5 }
  0x4f   : > { %v10958_v45 = vld [vmem:[#allocation2 + $0xc] sm:$0xff]   ;;  %v1646_v0 = vshll.u32 %v1517_v52, 16  ;;  %v1650_v3 = vshrl.u32 %v1517_v52, 16  ;;  %v1519_v38 = vld [vmem:[#allocation2 + $0x18] sm:$0xf]  ;;  %7800 = vmatmul.mubr.bf16.vlgmr.msra.gmra.mrb[0].mxu1 %v10959_v17 }
  0x50   : > { %v1516_v50 = vld [vmem:[#allocation2 + $0xc] sm:$0xf]  ;;  %8088 = vmatprep.mubr.bf16.mxu0 %v10958_v45  ;;  %v1518_v59 = vld [vmem:[#allocation2 + $0x14] sm:$0x1]  ;;  %v2544_v24 = vld [vmem:[#allocation2 + $0x10] sm:$0xf]  ;;  %10517 = vmatpush1.bf16.msra.mxu1 %v11254_v2 }
  0x51   : > { %v1637_v60 = vshrl.u32 %v1516_v50, 16  ;;  %v1640_v63 = vshll.u32 %v1516_v50, 16  ;;  %v1656_v7 = vshll.u32 %v1518_v59, 16  ;;  %v11483_v11 = vld [vmem:[#allocation2 + $0xc] sm:$0xe]  ;;  %v1648_v22 = vrot.slane %v1646_v0, 5  ;;  %8089 = vmatmul.mubr.bf16.vlgmr.msra.gmra.mrb[0].mxu0 %v9697_v41  ;;  %10502 = vmatprep.subr.bf16.mxu1 %v11107_v1 }
  0x52   : > { %v1652_v23 = vrot.slane %v1650_v3, 4  ;;  %v2545_v32 = vld [vmem:[#allocation2 + $0x14] sm:$0x1]  ;;  %v2744_v36 = vrot.slane %v2544_v24, 5  ;;  %v9666_v58 = vrot.slane %v11483_v11, 9  ;;  %v1661_v45 = vshrl.u32 %v1519_v38, 16  ;;  %8346 = vmatpush1.bf16.msra.mxu0 %v10960_v54 }
  0x53   : > { %v1639_v20 = vrot.slane %v1637_v60, 4  ;;  %v1642_v21 = vrot.slane %v1640_v63, 5  ;;  %v1658_v31 = vrot.slane %v1656_v7, 5  ;;  %v2747_v42 = vrot.slane %v2545_v32, 5  ;;  %v1520_v43 = vld [vmem:[#allocation2 + $0x1c] sm:$0xf]  ;;  %8347 = vmatprep.subr.bf16.mxu0 %v11107_v1 }
  0x54   : > { %v1653_v35 = vor.u32 %v1652_v23, %v1648_v22  ;;  %v2746_v49 = vrot.slane %v2744_v36, 4  ;;  %v1521_v50 = vld [vmem:[#allocation2 + $0x20] sm:$0x1]  ;;  %v1664_v52 = vshll.u32 %v1519_v38, 16  ;;  %v1663_v56 = vrot.slane %v1661_v45, 4  ;;  %v10962_v63 = vld [vmem:[#allocation2 + $0x18] sm:$0xff]   ;;  %10518 = vmatpush1.bf16.msra.mxu1 %v11265_v4 }
  0x55   : > { %v1643_v34 = vor.u32 %v1642_v21, %v1639_v20  ;;  %v1670_v59 = vshll.u32 %v1520_v43, 16  ;;  %v1674_v60 = vshrl.u32 %v1520_v43, 16  ;;  %v1680_v3 = vshll.u32 %v1521_v50, 16  ;;  %v2546_v11 = vld [vmem:[#allocation2 + $0x18] sm:$0xe]  ;;  %8096 = vmatprep.mubr.bf16.mxu0 %v10962_v63  ;;  %v10963_v38 = vld [vmem:[#allocation2 + $0xc] sm:$0xff]   ;;  %10503 = vmatprep.subr.bf16.mxu1 %v11107_v1 }
  0x56   : > { %v1654_v28 = vrot.slane %v1653_v35, 4  ;;  %v1666_v0 = vrot.slane %v1664_v52, 5  ;;  %v405_v7 = vrot.slane %v400_v37, 4  ;;  %v2547_v20 = vld [vmem:[#allocation2 + $0x1c] sm:$0xf]  ;;  %v2748_v30 = vsel %vm11479_vm13, %v2746_v49, %v2747_v42  ;;  %8348 = vmatpush1.bf16.msra.mxu0 %v10961_v29 }
  0x57   : > { %v1644_v26 = vrot.slane %v1643_v34, 4  ;;  %v1672_v13 = vrot.slane %v1670_v59, 5  ;;  %v1676_v19 = vrot.slane %v1674_v60, 4  ;;  %v2548_v21 = vld [vmem:[#allocation2 + $0x20] sm:$0x1]  ;;  %v2751_v24 = vrot.slane %v2547_v20, 5  ;;  %8349 = vmatprep.subr.bf16.mxu0 %v11107_v1 }
  0x58   : > { %v1659_v48 = vsel %vm11375_vm6, %v1654_v28, %v1658_v31  ;;  %v1667_v23 = vor.u32 %v1666_v0, %v1663_v56  ;;  %v1682_v32 = vrot.slane %v1680_v3, 5  ;;  %v1020_v33 = vsel %vm11414_vm10, %v405_v7, %v1019_v27  ;;  %v1522_v34 = vld [vmem:[#allocation2 + $0x24] sm:$0xf]  ;;  %v295_v17 = vld [vmem:[%s11354_s28 + $0x1c] sm:$0xf]  ;;  %10519 = vmatpush1.bf16.msra.mxu1 %v11276_v6 }
  0x59   : > { %v1649_v47 = vsel %vm11375_vm6, %v1644_v26, %v1648_v22  ;;  %v2745_v22 = vsel %vm11479_vm13, %v9666_v58, %v2744_v36  ;;  %v1677_v31 = vor.u32 %v1676_v19, %v1672_v13  ;;  %v9667_v36 = vrot.slane %v2546_v11, 9  ;;  %1021 = vst [vmem:[#allocation2 + $0x2c] sm:$0x1] %v1020_v33  ;;  %v294_v58 = vld [vmem:[%s11354_s28 + $0x18] sm:$0xf]  ;;  %10504 = vmatprep.subr.bf16.mxu1 %v11107_v1 }
  0x5a   : > { %v9634_v55 = vcombine.low %v1649_v47, %v1659_v48  ;;  %v1668_v35 = vrot.slane %v1667_v23, 4  ;;  %v2754_v37 = vrot.slane %v2548_v21, 5  ;;  %v1685_v2 = vshrl.u32 %v1522_v34, 16  ;;  %v1022_v52 = vld [vmem:[#allocation2 + $0x30] sm:$0xf]  ;;  %v10965_v21 = vld [vmem:[%s13535_s1 + $0x118] sm:$0xff]   ;;  %8350 = vmatpush1.bf16.msra.mxu0 %v10964_v39 }
  0x5b   : > { %v1678_v62 = vrot.slane %v1677_v31, 4  ;;  %v1688_v9 = vshll.u32 %v1522_v34, 16  ;;  %v407_v26 = vshrl.u32 %v294_v58, 16  ;;  %v410_v28 = vshll.u32 %v294_v58, 16  ;;  %v1523_v59 = vld [vmem:[#allocation2 + $0x28] sm:$0xf]  ;;  %8351 = vmatprep.subr.bf16.mxu0 %v11107_v1 }
  0x5c   : > { %7807 = vmatprep.mubr.bf16.mxu1 %v9634_v55  ;;  %v1673_v41 = vsel %vm11375_vm6, %v1668_v35, %v1672_v13  ;;  %v2753_v42 = vrot.slane %v2751_v24, 4  ;;  %v1687_v43 = vrot.slane %v1685_v2, 4  ;;  %v415_v45 = vshrl.u32 %v295_v17, 16  ;;  %v10966_v55 = vld [vmem:[#allocation2 + $0x24] sm:$0xff]   ;;  %10520 = vmatpush1.bf16.msra.mxu1 %v11287_v8 }
  0x5d   : > { %v9698_v47 = vcombine.low %v2745_v22, %v2748_v30  ;;  %v1683_v48 = vsel %vm11375_vm6, %v1678_v62, %v1682_v32  ;;  %v1690_v49 = vrot.slane %v1688_v9, 5  ;;  %v409_v50 = vrot.slane %v407_v26, 7  ;;  %v2549_v5 = vld [vmem:[#allocation2 + $0x24] sm:$0xe]  ;;  %7808 = vmatmul.mubr.bf16.gmra.mrb[4].mxu1 %v10963_v38  ;;  %v2550_v20 = vld [vmem:[#allocation2 + $0x28] sm:$0xf]  ;;  %10505 = vmatprep.subr.bf16.mxu1 %v11107_v1 }
  0x5e   : > { %v9635_v54 = vcombine.low %v1673_v41, %v1683_v48  ;;  %v11544_v56 = vsel %vm11479_vm13, %v9667_v36, %v2751_v24  ;;  %v417_v60 = vrot.slane %v415_v45, 7  ;;  %v1694_v0 = vshll.u32 %v1523_v59, 16  ;;  %v10967_v30 = vld [vmem:[#allocation2 + $0x18] sm:$0xff]   ;;  %v10968_v38 = vld [vmem:[%s13535_s1 + $0x120] sm:$0xff]   ;;  %8352 = vmatpush1.bf16.msra.mxu0 %v10965_v21  ;;  %v10969_v8 = vld [vmem:[%s13535_s1 + $0x128] sm:$0xff]  }
  0x5f   : > { %v1691_v63 = vor.u32 %v1690_v49, %v1687_v43  ;;  %v1698_v3 = vshrl.u32 %v1523_v59, 16  ;;  %v412_v4 = vor.u32 %v410_v28, %v409_v50  ;;  %v2755_v7 = vsel %vm11479_vm13, %v2753_v42, %v2754_v37  ;;  %8097 = vmatmul.mubr.bf16.gmra.mrb[4].mxu0 %v9698_v47  ;;  %v1026_v26 = vld [vmem:[#allocation2 + $0x38] sm:$0x1]  ;;  %v296_v28 = vld [vmem:[%s11354_s28 + $0x20] sm:$0xf]  ;;  %8353 = vmatprep.subr.bf16.mxu0 %v11107_v1 }
  0x60   : > { %v413_v11 = vrot.slane %v409_v50, 4  ;;  %v418_v13 = vshll.u32 %v295_v17, 16  ;;  %v422_v19 = vrot.slane %v417_v60, 4  ;;  %7815 = vmatprep.mubr.bf16.mxu1 %v9635_v54  ;;  %v1524_v22 = vld [vmem:[#allocation2 + $0x2c] sm:$0x1]  ;;  %v1696_v24 = vrot.slane %v1694_v0, 5  ;;  %8104 = vmatprep.mubr.bf16.mxu0 %v10966_v55 }
  0x61   : > { %v1692_v23 = vrot.slane %v1691_v63, 4  ;;  %v1700_v27 = vrot.slane %v1698_v3, 4  ;;  %v1023_v29 = vsel %vm11397_vm9, %v412_v4, %v1022_v52  ;;  %v1704_v31 = vshll.u32 %v1524_v22, 16  ;;  %v2551_v33 = vld [vmem:[#allocation2 + $0x2c] sm:$0x1]  ;;  %10521 = vmatpush1.bf16.msra.mxu1 %v11298_v10 }
  0x62   : > { %v420_v32 = vor.u32 %v418_v13, %v417_v60  ;;  %1024 = vst [vmem:[#allocation2 + $0x30] sm:$0xf] %v1023_v29  ;;  %v2758_v34 = vrot.slane %v2550_v20, 5  ;;  %v9699_v35 = vcombine.low %v11544_v56, %v2755_v7  ;;  %v9668_v37 = vrot.slane %v2549_v5, 9  ;;  %v297_v41 = vld [vmem:[%s11354_s28 + $0x24] sm:$0xf]  ;;  %8354 = vmatpush1.bf16.msra.mxu0 %v10968_v38  ;;  %10506 = vmatprep.subr.bf16.mxu1 %v11107_v1 }
  0x63   : > { %v1701_v36 = vor.u32 %v1700_v27, %v1696_v24  ;;  %v2761_v2 = vrot.slane %v2551_v33, 5  ;;  %v1697_v58 = vsel %vm11375_vm6, %v1692_v23, %v1696_v24  ;;  %v1706_v62 = vrot.slane %v1704_v31, 5  ;;  %v1029_v48 = vld [vmem:[#allocation2 + $0x3c] sm:$0xf]  ;;  %v1033_v55 = vld [vmem:[#allocation2 + $0x44] sm:$0x1]  ;;  %8355 = vmatprep.subr.bf16.mxu0 %v11107_v1 }
  0x64   : > { %v421_v9 = vsel %vm11388_vm8, %v413_v11, %v420_v32  ;;  %v2760_v17 = vrot.slane %v2758_v34, 4  ;;  %v1027_v6 = vsel %vm11414_vm10, %v422_v19, %v1026_v26  ;;  %v424_v42 = vshrl.u32 %v296_v28, 16  ;;  %v10971_v11 = vld [vmem:[#allocation2 + $0x24] sm:$0xff]  }
  0x65   : > { %v1702_v39 = vrot.slane %v1701_v36, 4  ;;  %1025 = vst [vmem:[#allocation2 + $0x34] sm:$0xf] %v421_v9  ;;  %v427_v43 = vshll.u32 %v296_v28, 16  ;;  %1028 = vst [vmem:[#allocation2 + $0x38] sm:$0x1] %v1027_v6  ;;  %7816 = vmatmul.mubr.bf16.gmra.mrb[8].mxu1 %v10967_v30  ;;  %v2759_v56 = vsel %vm11479_vm13, %v9668_v37, %v2758_v34 }
  0x66   : > { %v432_v45 = vshrl.u32 %v297_v41, 16  ;;  %v435_v47 = vshll.u32 %v297_v41, 16  ;;  %v426_v50 = vrot.slane %v424_v42, 7  ;;  %v2762_v59 = vsel %vm11479_vm13, %v2760_v17, %v2761_v2  ;;  %v298_v20 = vld [vmem:[%s11354_s28 + $0x28] sm:$0xf]  ;;  %v10972_v30 = vld [vmem:[%s13535_s1 + $0x130] sm:$0xff]   ;;  %8356 = vmatpush1.bf16.msra.mxu0 %v10969_v8  ;;  %10522 = vmatpush1.bf16.msra.mxu1 %v11311_v12 }
  0x67   : > { %v1707_v49 = vsel %vm11375_vm6, %v1702_v39, %v1706_v62  ;;  %8105 = vmatmul.mubr.bf16.gmra.mrb[8].mxu0 %v9699_v35  ;;  %v9700_v29 = vcombine.low %v2759_v56, %v2762_v59  ;;  %v11596_v34 = vld [vmem:[%s11354_s28 + $0x2c] sm:$0xf]  ;;  %8357 = vmatprep.subr.bf16.mxu0 %v11107_v1  ;;  %v441_v38 = vshrl.u32 %v298_v20, 16  ;;  %v444_v39 = vshll.u32 %v298_v20, 16 }
  0x68   : > { %v9636_v52 = vcombine.low %v1697_v58, %v1707_v49  ;;  %v434_v54 = vrot.slane %v432_v45, 7  ;;  %v429_v63 = vor.u32 %v427_v43, %v426_v50  ;;  %v430_v0 = vrot.slane %v426_v50, 4  ;;  %10507 = vmatprep.subr.bf16.mxu1 %v11107_v1  ;;  %v10973_v45 = vld [vmem:[%s13535_s1 + $0x138] sm:$0xff]  }
  0x69   : > { %v1525_v60 = vld [vmem:[#allocation2 + $0x30] sm:$0xf]  ;;  %v443_v12 = vrot.slane %v441_v38, 7 }
  0x6a   : > { %7823 = vmatprep.mubr.bf16.mxu1 %v9636_v52  ;;  %v1709_v3 = vshrl.u32 %v1525_v60, 16  ;;  %v1712_v4 = vshll.u32 %v1525_v60, 16  ;;  %v437_v5 = vor.u32 %v435_v47, %v434_v54  ;;  %v439_v7 = vrot.slane %v434_v54, 4  ;;  %v2552_v19 = vld [vmem:[#allocation2 + $0x30] sm:$0xe]  ;;  %8358 = vmatpush1.bf16.msra.mxu0 %v10972_v30 }
  0x6b   : > { %v1030_v13 = vsel %vm11397_vm9, %v429_v63, %v1029_v48  ;;  %v9669_v37 = vrot.slane %v2552_v19, 9  ;;  %v449_v47 = vshrl.u32 %v11596_v34, 16  ;;  %8359 = vmatprep.subr.bf16.mxu0 %v11107_v1  ;;  %v452_v54 = vshll.u32 %v11596_v34, 16  ;;  %10523 = vmatpush1.bf16.msra.mxu1 %v11322_v14  ;;  %v10976_v14 = vld [vmem:[%s13535_s1 + $0x140] sm:$0xff]   ;;  %v300_v38 = vld [vmem:[%s11354_s28 + $0x30] sm:$0xf] }
  0x6c   : > { %v10970_v21 = vld [vmem:[#allocation2 + $0x30] sm:$0xff]   ;;  %v1711_v23 = vrot.slane %v1709_v3, 4  ;;  %v438_v24 = vsel %vm11388_vm8, %v430_v0, %v437_v5  ;;  %1031 = vst [vmem:[#allocation2 + $0x3c] sm:$0xf] %v1030_v13  ;;  %v1034_v27 = vsel %vm11414_vm10, %v439_v7, %v1033_v55  ;;  %v1527_v31 = vld [vmem:[#allocation2 + $0x38] sm:$0x1]  ;;  %v446_v0 = vor.u32 %v444_v39, %v443_v12  ;;  %10508 = vmatprep.subr.bf16.mxu1 %v11107_v1 }
  0x6d   : > { %v1526_v22 = vld [vmem:[#allocation2 + $0x34] sm:$0xf]  ;;  %v1714_v10 = vrot.slane %v1712_v4, 5  ;;  %1032 = vst [vmem:[#allocation2 + $0x40] sm:$0xf] %v438_v24  ;;  %8112 = vmatprep.mubr.bf16.mxu0 %v10970_v21  ;;  %v1728_v35 = vshll.u32 %v1527_v31, 16  ;;  %7824 = vmatmul.mubr.bf16.gmra.mrb[12].mxu1 %v10971_v11 }
  0x6e   : > { %v1718_v32 = vshll.u32 %v1526_v22, 16  ;;  %v1722_v33 = vshrl.u32 %v1526_v22, 16  ;;  %1035 = vst [vmem:[#allocation2 + $0x44] sm:$0x1] %v1034_v27  ;;  %v2553_v36 = vld [vmem:[#allocation2 + $0x34] sm:$0xf]  ;;  %8360 = vmatpush1.bf16.msra.mxu0 %v10973_v45 }
  0x6f   : > { %v1715_v2 = vor.u32 %v1714_v10, %v1711_v23  ;;  %v2554_v9 = vld [vmem:[#allocation2 + $0x38] sm:$0x1]  ;;  %v2765_v17 = vrot.slane %v2553_v36, 5  ;;  %v1730_v26 = vrot.slane %v1728_v35, 5  ;;  %8113 = vmatmul.mubr.bf16.gmra.mrb[12].mxu0 %v9700_v29  ;;  %v1036_v55 = vld [vmem:[#allocation2 + $0x48] sm:$0xf]  ;;  %8361 = vmatprep.subr.bf16.mxu0 %v11107_v1 }
  0x70   : > { %v1720_v58 = vrot.slane %v1718_v32, 5  ;;  %v1724_v62 = vrot.slane %v1722_v33, 4  ;;  %v2768_v28 = vrot.slane %v2554_v9, 5  ;;  %v10975_v3 = vld [vmem:[#allocation2 + $0x30] sm:$0xff]   ;;  %v447_v21 = vrot.slane %v443_v12, 4  ;;  %10524 = vmatpush1.bf16.msra.mxu1 %v11335_v16  ;;  %v10977_v16 = vld [vmem:[%s13535_s1 + $0x148] sm:$0xff]  }
  0x71   : > { %v1716_v6 = vrot.slane %v1715_v2, 4  ;;  %v2766_v42 = vsel %vm11479_vm13, %v9669_v37, %v2765_v17  ;;  %v2767_v43 = vrot.slane %v2765_v17, 4  ;;  %v451_v27 = vrot.slane %v449_v47, 7  ;;  %10509 = vmatprep.subr.bf16.mxu1 %v11107_v1  ;;  %v301_v39 = vld [vmem:[%s11354_s28 + $0x34] sm:$0xf] }
  0x72   : > { %v1725_v41 = vor.u32 %v1724_v62, %v1720_v58  ;;  %v1037_v30 = vsel %vm11397_vm9, %v446_v0, %v1036_v55  ;;  %8362 = vmatpush1.bf16.msra.mxu0 %v10976_v14  ;;  %v1040_v62 = vld [vmem:[#allocation2 + $0x50] sm:$0x1]  ;;  %v466_v47 = vshrl.u32 %v301_v39, 16 }
  0x73   : > { %v1721_v48 = vsel %vm11375_vm6, %v1716_v6, %v1720_v58  ;;  %v2769_v50 = vsel %vm11479_vm13, %v2767_v43, %v2768_v28  ;;  %v1528_v52 = vld [vmem:[#allocation2 + $0x3c] sm:$0xf]  ;;  %v454_v34 = vor.u32 %v452_v54, %v451_v27  ;;  %v456_v35 = vrot.slane %v451_v27, 4  ;;  %1038 = vst [vmem:[#allocation2 + $0x48] sm:$0xf] %v1037_v30  ;;  %8363 = vmatprep.subr.bf16.mxu0 %v11107_v1 }
  0x74   : > { %v1726_v49 = vrot.slane %v1725_v41, 4  ;;  %v10974_v56 = vld [vmem:[#allocation2 + $0x3c] sm:$0xff]   ;;  %v9701_v59 = vcombine.low %v2766_v42, %v2769_v50  ;;  %v1733_v63 = vshrl.u32 %v1528_v52, 16  ;;  %v1736_v5 = vshll.u32 %v1528_v52, 16  ;;  %10525 = vmatpush1.bf16.msra.mxu1 %v11347_v18  ;;  %v10980_v50 = vld [vmem:[%s13535_s1 + $0x150] sm:$0xff]  }
  0x75   : > { %v1529_v60 = vld [vmem:[#allocation2 + $0x40] sm:$0xf]  ;;  %v1530_v4 = vld [vmem:[#allocation2 + $0x44] sm:$0x1]  ;;  %8120 = vmatprep.mubr.bf16.mxu0 %v10974_v56  ;;  %v2555_v31 = vld [vmem:[#allocation2 + $0x3c] sm:$0xe]  ;;  %v1041_v28 = vsel %vm11414_vm10, %v456_v35, %v1040_v62  ;;  %10510 = vmatprep.subr.bf16.mxu1 %v11107_v1 }
  0x76   : > { %v1731_v8 = vsel %vm11375_vm6, %v1726_v49, %v1730_v26  ;;  %v1742_v7 = vshll.u32 %v1529_v60, 16  ;;  %v1746_v11 = vshrl.u32 %v1529_v60, 16  ;;  %v1735_v19 = vrot.slane %v1733_v63, 4  ;;  %v2556_v10 = vld [vmem:[#allocation2 + $0x40] sm:$0xf]  ;;  %8364 = vmatpush1.bf16.msra.mxu0 %v10977_v16 }
  0x77   : > { %v9637_v13 = vcombine.low %v1721_v48, %v1731_v8  ;;  %v1752_v20 = vshll.u32 %v1530_v4, 16  ;;  %v1738_v22 = vrot.slane %v1736_v5, 5  ;;  %8121 = vmatmul.mubr.bf16.gmra.mrb[16].mxu0 %v9701_v59  ;;  %v2557_v36 = vld [vmem:[#allocation2 + $0x44] sm:$0x1]  ;;  %v9670_v37 = vrot.slane %v2555_v31, 9  ;;  %v10979_v6 = vld [vmem:[#allocation2 + $0x3c] sm:$0xff]   ;;  %8365 = vmatprep.subr.bf16.mxu0 %v11107_v1 }
  0x78   : > { %v1744_v23 = vrot.slane %v1742_v7, 5  ;;  %v1748_v24 = vrot.slane %v1746_v11, 4  ;;  %v2772_v2 = vrot.slane %v2556_v10, 5  ;;  %v2775_v58 = vrot.slane %v2557_v36, 5  ;;  %1042 = vst [vmem:[#allocation2 + $0x50] sm:$0x1] %v1041_v28  ;;  %10526 = vmatpush1.bf16.msra.mxu1 %v11363_v25 }
  0x79   : > { %7831 = vmatprep.mubr.bf16.mxu1 %v9637_v13  ;;  %v1754_v29 = vrot.slane %v1752_v20, 5  ;;  %v1739_v32 = vor.u32 %v1738_v22, %v1735_v19  ;;  %v455_v26 = vsel %vm11388_vm8, %v447_v21, %v454_v34  ;;  %v458_v42 = vshrl.u32 %v300_v38, 16  ;;  %v1043_v49 = vld [vmem:[#allocation2 + $0x54] sm:$0xf]  ;;  %v1047_v59 = vld [vmem:[#allocation2 + $0x5c] sm:$0x1]  ;;  %10511 = vmatprep.subr.bf16.mxu1 %v11107_v1 }
  0x7a   : > { %7832 = vmatmul.mubr.bf16.gmra.mrb[16].mxu1 %v10975_v3  ;;  %v1749_v33 = vor.u32 %v1748_v24, %v1744_v23  ;;  %1039 = vst [vmem:[#allocation2 + $0x4c] sm:$0xf] %v455_v26  ;;  %v2774_v41 = vrot.slane %v2772_v2, 4  ;;  %v461_v43 = vshll.u32 %v300_v38, 16  ;;  %v469_v48 = vshll.u32 %v301_v39, 16  ;;  %v10981_v4 = vld [vmem:[%s13535_s1 + $0x158] sm:$0xff]   ;;  %8366 = vmatpush1.bf16.msra.mxu0 %v10980_v50 }
  0x7b   : > { %v1740_v9 = vrot.slane %v1739_v32, 4  ;;  %v460_v52 = vrot.slane %v458_v42, 7  ;;  %v2773_v54 = vsel %vm11479_vm13, %v9670_v37, %v2772_v2  ;;  %v468_v56 = vrot.slane %v466_v47, 7  ;;  %v302_v60 = vld [vmem:[%s11354_s28 + $0x38] sm:$0xf]  ;;  %8367 = vmatprep.subr.bf16.mxu0 %v11107_v1 }
  0x7c   : > { %v1750_v17 = vrot.slane %v1749_v33, 4  ;;  %v2776_v55 = vsel %vm11479_vm13, %v2774_v41, %v2775_v58  ;;  %v1531_v63 = vld [vmem:[#allocation2 + $0x48] sm:$0xf]  ;;  %v475_v3 = vshrl.u32 %v302_v60, 16  ;;  %v303_v20 = vld [vmem:[%s11354_s28 + $0x3c] sm:$0xf]  ;;  %10527 = vmatpush1.bf16.msra.mxu1 %v11384_v44 }
  0x7d   : > { %v1745_v45 = vsel %vm11375_vm6, %v1740_v9, %v1744_v23  ;;  %v463_v0 = vor.u32 %v461_v43, %v460_v52  ;;  %v464_v8 = vrot.slane %v460_v52, 4  ;;  %v1757_v5 = vshrl.u32 %v1531_v63, 16  ;;  %v2558_v19 = vld [vmem:[#allocation2 + $0x48] sm:$0xe]  ;;  %10512 = vmatprep.subr.bf16.mxu1 %v11107_v1  ;;  %v10984_v9 = vld [vmem:[%s13535_s1 + $0x160] sm:$0xff]  }
  0x7e   : > { %v1755_v12 = vsel %vm11375_vm6, %v1750_v17, %v1754_v29  ;;  %v1760_v7 = vshll.u32 %v1531_v63, 16  ;;  %v471_v11 = vor.u32 %v469_v48, %v468_v56  ;;  %v473_v13 = vrot.slane %v468_v56, 4  ;;  %8368 = vmatpush1.bf16.msra.mxu0 %v10981_v4  ;;  %v1050_v39 = vld [vmem:[#allocation2 + $0x60] sm:$0xf] }
  0x7f   : > { %v9638_v18 = vcombine.low %v1745_v45, %v1755_v12  ;;  %v9702_v14 = vcombine.low %v2773_v54, %v2776_v55  ;;  %v1044_v25 = vsel %vm11397_vm9, %v463_v0, %v1043_v49  ;;  %v11658_v21 = vrot.slane %v475_v3, 7  ;;  %v1533_v31 = vld [vmem:[#allocation2 + $0x50] sm:$0x1]  ;;  %8369 = vmatprep.subr.bf16.mxu0 %v11107_v1 }
  0x80   : > { %v478_v22 = vshll.u32 %v302_v60, 16  ;;  %v1759_v27 = vrot.slane %v1757_v5, 4  ;;  %v472_v29 = vsel %vm11388_vm8, %v464_v8, %v471_v11  ;;  %1045 = vst [vmem:[#allocation2 + $0x54] sm:$0xf] %v1044_v25  ;;  %v1048_v30 = vsel %vm11414_vm10, %v473_v13, %v1047_v59  ;;  %v2560_v62 = vld [vmem:[#allocation2 + $0x50] sm:$0x1]  ;;  %10528 = vmatpush1.bf16.msra.mxu1 %v11404_v53 }
  0x81   : > { %7839 = vmatprep.mubr.bf16.mxu1 %v9638_v18  ;;  %v10978_v23 = vld [vmem:[#allocation2 + $0x48] sm:$0xff]   ;;  %v1762_v10 = vrot.slane %v1760_v7, 5  ;;  %1046 = vst [vmem:[#allocation2 + $0x58] sm:$0xf] %v472_v29  ;;  %1049 = vst [vmem:[#allocation2 + $0x5c] sm:$0x1] %v1048_v30  ;;  %10513 = vmatprep.subr.bf16.mxu1 %v11107_v1 }
  0x82   : > { %7840 = vmatmul.mubr.bf16.gmra.mrb[20].mxu1 %v10979_v6  ;;  %v1532_v24 = vld [vmem:[#allocation2 + $0x4c] sm:$0xf]  ;;  %8128 = vmatprep.mubr.bf16.mxu0 %v10978_v23  ;;  %v1776_v34 = vshll.u32 %v1533_v31, 16  ;;  %v9671_v36 = vrot.slane %v2558_v19, 9  ;;  %v480_v16 = vor.u32 %v478_v22, %v11658_v21  ;;  %v2782_v26 = vrot.slane %v2560_v62, 5 }
  0x83   : > { %v1766_v32 = vshll.u32 %v1532_v24, 16  ;;  %v1770_v33 = vshrl.u32 %v1532_v24, 16  ;;  %v2559_v35 = vld [vmem:[#allocation2 + $0x4c] sm:$0xf]  ;;  %8129 = vmatmul.mubr.bf16.gmra.mrb[20].mxu0 %v9702_v14  ;;  %v1763_v37 = vor.u32 %v1762_v10, %v1759_v27  ;;  %v481_v28 = vrot.slane %v11658_v21, 4 }
  0x84   : > { %v2779_v44 = vrot.slane %v2559_v35, 5  ;;  %v1778_v17 = vrot.slane %v1776_v34, 5  ;;  %v483_v38 = vshrl.u32 %v303_v20, 16  ;;  %v486_v12 = vshll.u32 %v303_v20, 16  ;;  %v10985_v18 = vld [vmem:[%s13535_s1 + $0x168] sm:$0xff]   ;;  %8370 = vmatpush1.bf16.msra.mxu0 %v10984_v9  ;;  %10529 = vmatpush1.bf16.msra.mxu1 %v11437_v15  ;;  %v10988_v15 = vld [vmem:[%s13535_s1 + $0x170] sm:$0xff]  }
  0x85   : > { %v1768_v2 = vrot.slane %v1766_v32, 5  ;;  %v1772_v58 = vrot.slane %v1770_v33, 4  ;;  %v1764_v6 = vrot.slane %v1763_v37, 4  ;;  %v1051_v47 = vsel %vm11397_vm9, %v480_v16, %v1050_v39  ;;  %v10983_v63 = vld [vmem:[#allocation2 + $0x48] sm:$0xff]   ;;  %8371 = vmatprep.subr.bf16.mxu0 %v11107_v1  ;;  %10514 = vmatprep.subr.bf16.mxu1 %v11107_v1  ;;  %v10989_v9 = vld [vmem:[%s13535_s1 + $0x178] sm:$0xff]  }
  0x86   : > { %v2780_v42 = vsel %vm11479_vm13, %v9671_v36, %v2779_v44  ;;  %v2781_v43 = vrot.slane %v2779_v44, 4  ;;  %v485_v45 = vrot.slane %v483_v38, 7  ;;  %1052 = vst [vmem:[#allocation2 + $0x60] sm:$0xf] %v1051_v47  ;;  %v1054_v32 = vld [vmem:[#allocation2 + $0x68] sm:$0x1] }
  0x87   : > { %v1773_v41 = vor.u32 %v1772_v58, %v1768_v2  ;;  %v1769_v48 = vsel %vm11375_vm6, %v1764_v6, %v1768_v2  ;;  %v1534_v50 = vld [vmem:[#allocation2 + $0x54] sm:$0xf]  ;;  %v4431_v33 = vld [vmem:[#allocation2 + $0xc] sm:$0xe]  ;;  %v4432_v36 = vld [vmem:[#allocation2 + $0x10] sm:$0xf] }
  0x88   : > { %v2783_v53 = vsel %vm11479_vm13, %v2781_v43, %v2782_v26  ;;  %v10982_v52 = vld [vmem:[#allocation2 + $0x54] sm:$0xff]   ;;  %v1781_v56 = vshrl.u32 %v1534_v50, 16  ;;  %v488_v59 = vor.u32 %v486_v12, %v485_v45  ;;  %v1536_v0 = vld [vmem:[#allocation2 + $0x5c] sm:$0x1]  ;;  %v1784_v8 = vshll.u32 %v1534_v50, 16  ;;  %8372 = vmatpush1.bf16.msra.mxu0 %v10985_v18  ;;  %v11094_v16 = vld [vmem:[%s13535_s1 + $0xe8] sm:$0xff]  }
  0x89   : > { %v1774_v49 = vrot.slane %v1773_v41, 4  ;;  %v9703_v54 = vcombine.low %v2780_v42, %v2783_v53  ;;  %v1535_v55 = vld [vmem:[#allocation2 + $0x58] sm:$0xf]  ;;  %8136 = vmatprep.mubr.bf16.mxu0 %v10982_v52  ;;  %v1800_v11 = vshll.u32 %v1536_v0, 16  ;;  %v490_v20 = vrot.slane %v485_v45, 4  ;;  %8373 = vmatprep.subr.bf16.mxu0 %v11107_v1  ;;  %v11095_v52 = vld [vmem:[%s13535_s1 + $0xf0] sm:$0xff]  }
  0x8a   : > { %v1790_v3 = vshll.u32 %v1535_v55, 16  ;;  %v1794_v4 = vshrl.u32 %v1535_v55, 16  ;;  %v1783_v7 = vrot.slane %v1781_v56, 4  ;;  %v489_v13 = vsel %vm11388_vm8, %v481_v28, %v488_v59  ;;  %v2561_v21 = vld [vmem:[#allocation2 + $0x54] sm:$0xe]  ;;  %10530 = vmatpush1.bf16.msra.mxu1 %v11094_v16 }
  0x8b   : > { %v1779_v60 = vsel %vm11375_vm6, %v1774_v49, %v1778_v17  ;;  %8137 = vmatmul.mubr.bf16.gmra.mrb[24].mxu0 %v9703_v54  ;;  %v1786_v14 = vrot.slane %v1784_v8, 5  ;;  %1053 = vst [vmem:[#allocation2 + $0x64] sm:$0xf] %v489_v13  ;;  %v1802_v22 = vrot.slane %v1800_v11, 5  ;;  %v2562_v23 = vld [vmem:[#allocation2 + $0x58] sm:$0xf]  ;;  %v1055_v34 = vsel %vm11414_vm10, %v490_v20, %v1054_v32  ;;  %10515 = vmatprep.subr.bf16.mxu1 %v11107_v1 }
  0x8c   : > { %v9639_v5 = vcombine.low %v1769_v48, %v1779_v60  ;;  %v1792_v25 = vrot.slane %v1790_v3, 5  ;;  %v1796_v19 = vrot.slane %v1794_v4, 4  ;;  %v2563_v24 = vld [vmem:[#allocation2 + $0x5c] sm:$0x1]  ;;  %v9672_v27 = vrot.slane %v2561_v21, 9  ;;  %8374 = vmatpush1.bf16.msra.mxu0 %v10988_v15  ;;  %v10987_v41 = vld [vmem:[#allocation2 + $0x54] sm:$0xff]  }
  0x8d   : > { %v1787_v29 = vor.u32 %v1786_v14, %v1783_v7  ;;  %v2786_v31 = vrot.slane %v2562_v23, 5  ;;  %v2789_v10 = vrot.slane %v2563_v24, 5  ;;  %v1537_v35 = vld [vmem:[#allocation2 + $0x60] sm:$0xf]  ;;  %1056 = vst [vmem:[#allocation2 + $0x68] sm:$0x1] %v1055_v34  ;;  %8375 = vmatprep.subr.bf16.mxu0 %v11107_v1 }
  0x8e   : > { %7847 = vmatprep.mubr.bf16.mxu1 %v9639_v5  ;;  %v1797_v30 = vor.u32 %v1796_v19, %v1792_v25  ;;  %v4433_v44 = vld [vmem:[#allocation2 + $0x14] sm:$0x1]  ;;  %v1805_v17 = vshrl.u32 %v1537_v35, 16  ;;  %v1808_v26 = vshll.u32 %v1537_v35, 16  ;;  %v9793_v28 = vrot.slane %v4431_v33, 9  ;;  %10531 = vmatpush1.bf16.msra.mxu1 %v11095_v52  ;;  %v11096_v19 = vld [vmem:[%s13535_s1 + $0xf8] sm:$0xff]  }
  0x8f   : > { %7848 = vmatmul.mubr.bf16.gmra.mrb[24].mxu1 %v10983_v63  ;;  %v1788_v37 = vrot.slane %v1787_v29, 4  ;;  %v2787_v58 = vsel %vm11479_vm13, %v9672_v27, %v2786_v31  ;;  %v2788_v62 = vrot.slane %v2786_v31, 4  ;;  %v4625_v38 = vrot.slane %v4432_v36, 5  ;;  %v3407_v45 = vld [vmem:[#allocation2 + $0xc] sm:$0xf]  ;;  %10516 = vmatprep.subr.bf16.mxu1 %v11107_v1 }
  0x90   : > { %v1798_v2 = vrot.slane %v1797_v30, 4  ;;  %v4628_v43 = vrot.slane %v4433_v44, 5  ;;  %v3408_v12 = vld [vmem:[#allocation2 + $0x10] sm:$0xf]  ;;  %v1807_v18 = vrot.slane %v1805_v17, 4  ;;  %v1810_v54 = vrot.slane %v1808_v26, 5  ;;  %8376 = vmatpush1.bf16.msra.mxu0 %v10989_v9 }
  0x91   : > { %v1793_v39 = vsel %vm11375_vm6, %v1788_v37, %v1792_v25  ;;  %v2790_v42 = vsel %vm11479_vm13, %v2788_v62, %v2789_v10  ;;  %v4626_v50 = vsel %vm11479_vm13, %v9793_v28, %v4625_v38  ;;  %v4627_v59 = vrot.slane %v4625_v38, 4  ;;  %v3409_v60 = vld [vmem:[#allocation2 + $0x14] sm:$0x1]  ;;  %8634 = vmatprep.subr.bf16.mxu0 %v11107_v1  ;;  %v304_v24 = vld [vmem:[%s11354_s28 + $0x40] sm:$0xf] }
  0x92   : > { %v1803_v6 = vsel %vm11375_vm6, %v1798_v2, %v1802_v22  ;;  %v10986_v48 = vld [vmem:[#allocation2 + $0x60] sm:$0xff]   ;;  %v9704_v49 = vcombine.low %v2787_v58, %v2790_v42  ;;  %v3504_v63 = vshrl.u32 %v3407_v45, 16  ;;  %v3507_v0 = vshll.u32 %v3407_v45, 16  ;;  %10532 = vmatpush1.bf16.msra.mxu1 %v11096_v19  ;;  %v1057_v58 = vld [vmem:[#allocation2 + $0x6c] sm:$0xf] }
  0x93   : > { %v9640_v47 = vcombine.low %v1793_v39, %v1803_v6  ;;  %v1538_v53 = vld [vmem:[#allocation2 + $0x64] sm:$0xf]  ;;  %8144 = vmatprep.mubr.bf16.mxu0 %v10986_v48  ;;  %v3513_v8 = vshll.u32 %v3408_v12, 16  ;;  %v1811_v3 = vor.u32 %v1810_v54, %v1807_v18  ;;  %v4629_v7 = vsel %vm11479_vm13, %v4627_v59, %v4628_v43  ;;  %v4434_v26 = vld [vmem:[#allocation2 + $0x18] sm:$0xe] }
  0x94   : > { %v1814_v55 = vshll.u32 %v1538_v53, 16  ;;  %v1818_v56 = vshrl.u32 %v1538_v53, 16  ;;  %8145 = vmatmul.mubr.bf16.gmra.mrb[28].mxu0 %v9704_v49  ;;  %v1539_v11 = vld [vmem:[#allocation2 + $0x68] sm:$0x1]  ;;  %v9825_v13 = vcombine.low %v4626_v50, %v4629_v7  ;;  %v3506_v15 = vrot.slane %v3504_v63, 4  ;;  %v10990_v36 = vld [vmem:[#allocation2 + $0x60] sm:$0xff]  }
  0x95   : > { %7855 = vmatprep.mubr.bf16.mxu1 %v9640_v47  ;;  %v3509_v14 = vrot.slane %v3507_v0, 5  ;;  %v3515_v25 = vrot.slane %v3513_v8, 5  ;;  %v1812_v20 = vrot.slane %v1811_v3, 4  ;;  %v1824_v22 = vshll.u32 %v1539_v11, 16  ;;  %v305_v30 = vld [vmem:[%s11354_s28 + $0x44] sm:$0xf] }
  0x96   : > { %v1816_v4 = vrot.slane %v1814_v55, 5  ;;  %v1820_v5 = vrot.slane %v1818_v56, 4  ;;  %v3517_v23 = vshrl.u32 %v3408_v12, 16  ;;  %8377 = vmatprep.mubr.bf16.mxu0 %v9825_v13  ;;  %v3523_v29 = vshll.u32 %v3409_v60, 16  ;;  %v4435_v28 = vld [vmem:[#allocation2 + $0x1c] sm:$0xf] }
  0x97   : > { %7856 = vmatmul.mubr.bf16.gmra.mrb[28].mxu1 %v10987_v41  ;;  %v3510_v27 = vor.u32 %v3509_v14, %v3506_v15  ;;  %v492_v31 = vshrl.u32 %v304_v24, 16  ;;  %v495_v10 = vshll.u32 %v304_v24, 16  ;;  %v1826_v34 = vrot.slane %v1824_v22, 5  ;;  %v4436_v42 = vld [vmem:[#allocation2 + $0x20] sm:$0x1] }
  0x98   : > { %v1821_v21 = vor.u32 %v1820_v5, %v1816_v4  ;;  %v1817_v32 = vsel %vm11375_vm6, %v1812_v20, %v1816_v4  ;;  %v3519_v35 = vrot.slane %v3517_v23, 4  ;;  %v500_v2 = vshrl.u32 %v305_v30, 16  ;;  %v3410_v43 = vld [vmem:[#allocation2 + $0x18] sm:$0xf]  ;;  %v1061_v47 = vld [vmem:[#allocation2 + $0x74] sm:$0x1] }
  0x99   : > { %v3511_v16 = vrot.slane %v3510_v27, 4  ;;  %v494_v37 = vrot.slane %v492_v31, 7  ;;  %v3525_v9 = vrot.slane %v3523_v29, 5  ;;  %v503_v17 = vshll.u32 %v305_v30, 16  ;;  %v3411_v50 = vld [vmem:[#allocation2 + $0x1c] sm:$0xf] }
  0x9a   : > { %v1822_v33 = vrot.slane %v1821_v21, 4  ;;  %v3520_v44 = vor.u32 %v3519_v35, %v3515_v25  ;;  %v502_v12 = vrot.slane %v500_v2, 7  ;;  %v9794_v48 = vrot.slane %v4434_v26, 9  ;;  %v10991_v56 = vld [vmem:[%s13535_s1 + $0x180] sm:$0xff]   ;;  %v306_v8 = vld [vmem:[%s11354_s28 + $0x48] sm:$0xf] }
  0x9b   : > { %v3516_v39 = vsel %vm11375_vm6, %v3511_v16, %v3515_v25  ;;  %v497_v6 = vor.u32 %v495_v10, %v494_v37  ;;  %v498_v41 = vrot.slane %v494_v37, 4  ;;  %v4632_v49 = vrot.slane %v4435_v28, 5  ;;  %v3412_v0 = vld [vmem:[#allocation2 + $0x20] sm:$0x1]  ;;  %v307_v25 = vld [vmem:[%s11354_s28 + $0x4c] sm:$0xf] }
  0x9c   : > { %v1827_v62 = vsel %vm11375_vm6, %v1822_v33, %v1826_v34  ;;  %v3521_v45 = vrot.slane %v3520_v44, 4  ;;  %v4635_v18 = vrot.slane %v4436_v42, 5  ;;  %v3528_v52 = vshrl.u32 %v3410_v43, 16  ;;  %v4437_v23 = vld [vmem:[#allocation2 + $0x24] sm:$0xe]  ;;  %v10994_v10 = vld [vmem:[%s13535_s1 + $0x188] sm:$0xff]  }
  0x9d   : > { %v9641_v38 = vcombine.low %v1817_v32, %v1827_v62  ;;  %v1058_v53 = vsel %vm11397_vm9, %v497_v6, %v1057_v58  ;;  %v3531_v54 = vshll.u32 %v3410_v43, 16  ;;  %v505_v59 = vor.u32 %v503_v17, %v502_v12  ;;  %v4438_v24 = vld [vmem:[#allocation2 + $0x28] sm:$0xf]  ;;  %v1064_v37 = vld [vmem:[#allocation2 + $0x78] sm:$0xf] }
  0x9e   : > { %v3526_v55 = vsel %vm11375_vm6, %v3521_v45, %v3525_v9  ;;  %v507_v60 = vrot.slane %v502_v12, 4  ;;  %1059 = vst [vmem:[#allocation2 + $0x6c] sm:$0xf] %v1058_v53  ;;  %v4633_v63 = vsel %vm11479_vm13, %v9794_v48, %v4632_v49  ;;  %v4634_v4 = vrot.slane %v4632_v49, 4  ;;  %v1068_v26 = vld [vmem:[#allocation2 + $0x80] sm:$0x1] }
  0x9f   : > { %7863 = vmatprep.mubr.bf16.mxu1 %v9641_v38  ;;  %v9761_v3 = vcombine.low %v3516_v39, %v3526_v55  ;;  %v3530_v5 = vrot.slane %v3528_v52, 4  ;;  %v3533_v7 = vrot.slane %v3531_v54, 5  ;;  %v506_v11 = vsel %vm11388_vm8, %v498_v41, %v505_v59  ;;  %v4439_v28 = vld [vmem:[#allocation2 + $0x2c] sm:$0x1]  ;;  %v10997_v38 = vld [vmem:[%s13535_s1 + $0x190] sm:$0xff]  }
  0xa0   : > { %7864 = vmatmul.mubr.bf16.gmra.mrb[32].mxu1 %v10990_v36  ;;  %v1062_v13 = vsel %vm11414_vm10, %v507_v60, %v1061_v47  ;;  %v3537_v15 = vshll.u32 %v3411_v50, 16  ;;  %v3541_v14 = vshrl.u32 %v3411_v50, 16  ;;  %1060 = vst [vmem:[#allocation2 + $0x70] sm:$0xf] %v506_v11  ;;  %v4636_v19 = vsel %vm11479_vm13, %v4634_v4, %v4635_v18  ;;  %v3413_v43 = vld [vmem:[#allocation2 + $0x24] sm:$0xf] }
  0xa1   : > { %8378 = vmatmul.mubr.bf16.vlgmr.msra.gmra.mrb[0].mxu0 %v9761_v3  ;;  %1063 = vst [vmem:[#allocation2 + $0x74] sm:$0x1] %v1062_v13  ;;  %v3534_v20 = vor.u32 %v3533_v7, %v3530_v5  ;;  %v3547_v21 = vshll.u32 %v3412_v0, 16  ;;  %v509_v22 = vshrl.u32 %v306_v8, 16  ;;  %v9826_v27 = vcombine.low %v4633_v63, %v4636_v19  ;;  %v3414_v49 = vld [vmem:[#allocation2 + $0x28] sm:$0xf] }
  0xa2   : > { %8635 = vmatpush1.bf16.msra.mxu0 %v10991_v56  ;;  %v3539_v29 = vrot.slane %v3537_v15, 5  ;;  %v3543_v30 = vrot.slane %v3541_v14, 4  ;;  %v512_v31 = vshll.u32 %v306_v8, 16  ;;  %v517_v35 = vshrl.u32 %v307_v25, 16  ;;  %v11000_v5 = vld [vmem:[%s13535_s1 + $0x198] sm:$0xff]  }
  0xa3   : > { %v3535_v32 = vrot.slane %v3534_v20, 4  ;;  %v3549_v33 = vrot.slane %v3547_v21, 5  ;;  %v511_v34 = vrot.slane %v509_v22, 7  ;;  %8636 = vmatprep.subr.bf16.mxu0 %v11107_v1  ;;  %8385 = vmatprep.mubr.bf16.mxu0 %v9826_v27  ;;  %v520_v16 = vshll.u32 %v307_v25, 16  ;;  %v3415_v15 = vld [vmem:[#allocation2 + $0x2c] sm:$0x1] }
  0xa4   : > { %v3544_v36 = vor.u32 %v3543_v30, %v3539_v29  ;;  %v9795_v2 = vrot.slane %v4437_v23, 9  ;;  %v4639_v58 = vrot.slane %v4438_v24, 5  ;;  %v519_v17 = vrot.slane %v517_v35, 7 }
  0xa5   : > { %v1540_v62 = vld [vmem:[#allocation2 + $0x6c] sm:$0xf]  ;;  %v3540_v44 = vsel %vm11375_vm6, %v3535_v32, %v3539_v29  ;;  %v514_v9 = vor.u32 %v512_v31, %v511_v34  ;;  %v515_v42 = vrot.slane %v511_v34, 4  ;;  %v4642_v4 = vrot.slane %v4439_v28, 5  ;;  %v11003_v32 = vld [vmem:[%s13535_s1 + $0x1a0] sm:$0xff]  }
  0xa6   : > { %v1829_v39 = vshrl.u32 %v1540_v62, 16  ;;  %v1832_v6 = vshll.u32 %v1540_v62, 16  ;;  %v3545_v41 = vrot.slane %v3544_v36, 4  ;;  %8637 = vmatpush1.bf16.msra.mxu0 %v10994_v10  ;;  %v522_v45 = vor.u32 %v520_v16, %v519_v17  ;;  %v308_v10 = vld [vmem:[%s11354_s28 + $0x50] sm:$0xf] }
  0xa7   : > { %v524_v12 = vrot.slane %v519_v17, 4  ;;  %v1065_v47 = vsel %vm11397_vm9, %v514_v9, %v1064_v37  ;;  %v4641_v48 = vrot.slane %v4639_v58, 4  ;;  %8638 = vmatprep.subr.bf16.mxu0 %v11107_v1  ;;  %v1541_v53 = vld [vmem:[#allocation2 + $0x70] sm:$0xf]  ;;  %v4640_v55 = vsel %vm11479_vm13, %v9795_v2, %v4639_v58  ;;  %v309_v17 = vld [vmem:[%s11354_s28 + $0x54] sm:$0xf] }
  0xa8   : > { %v1542_v18 = vld [vmem:[#allocation2 + $0x74] sm:$0x1]  ;;  %v1831_v50 = vrot.slane %v1829_v39, 4  ;;  %v1834_v52 = vrot.slane %v1832_v6, 5  ;;  %v3550_v54 = vsel %vm11375_vm6, %v3545_v41, %v3549_v33  ;;  %1066 = vst [vmem:[#allocation2 + $0x78] sm:$0xf] %v1065_v47  ;;  %v523_v8 = vsel %vm11388_vm8, %v515_v42, %v522_v45 }
  0xa9   : > { %v1838_v56 = vshll.u32 %v1541_v53, 16  ;;  %v1842_v59 = vshrl.u32 %v1541_v53, 16  ;;  %v1848_v60 = vshll.u32 %v1542_v18, 16  ;;  %v9762_v63 = vcombine.low %v3540_v44, %v3550_v54  ;;  %1067 = vst [vmem:[#allocation2 + $0x7c] sm:$0xf] %v523_v8  ;;  %v10992_v44 = vld [vmem:[#allocation2 + $0x6c] sm:$0xff]  }
  0xaa   : > { %v1835_v0 = vor.u32 %v1834_v52, %v1831_v50  ;;  %v1069_v3 = vsel %vm11414_vm10, %v524_v12, %v1068_v26  ;;  %8639 = vmatpush1.bf16.msra.mxu0 %v10997_v38  ;;  %v3552_v14 = vshrl.u32 %v3413_v43, 16  ;;  %v4643_v19 = vsel %vm11479_vm13, %v4641_v48, %v4642_v4  ;;  %v11006_v38 = vld [vmem:[%s13535_s1 + $0x1a8] sm:$0xff]   ;;  %v1071_v50 = vld [vmem:[#allocation2 + $0x84] sm:$0xf]  ;;  %v4442_v4 = vld [vmem:[#allocation2 + $0x38] sm:$0x1] }
  0xab   : > { %v1840_v7 = vrot.slane %v1838_v56, 5  ;;  %v1844_v11 = vrot.slane %v1842_v59, 4  ;;  %v1850_v13 = vrot.slane %v1848_v60, 5  ;;  %8386 = vmatmul.mubr.bf16.gmra.mrb[4].mxu0 %v9762_v63  ;;  %1070 = vst [vmem:[#allocation2 + $0x80] sm:$0x1] %v1069_v3  ;;  %8640 = vmatprep.subr.bf16.mxu0 %v11107_v1  ;;  %v3555_v20 = vshll.u32 %v3413_v43, 16 }
  0xac   : > { %v1836_v25 = vrot.slane %v1835_v0, 4  ;;  %v3561_v21 = vshll.u32 %v3414_v49, 16  ;;  %v9827_v23 = vcombine.low %v4640_v55, %v4643_v19  ;;  %v3554_v24 = vrot.slane %v3552_v14, 4  ;;  %v4440_v59 = vld [vmem:[#allocation2 + $0x30] sm:$0xe] }
  0xad   : > { %v1845_v22 = vor.u32 %v1844_v11, %v1840_v7  ;;  %v3565_v27 = vshrl.u32 %v3414_v49, 16  ;;  %v3557_v29 = vrot.slane %v3555_v20, 5  ;;  %v3571_v31 = vshll.u32 %v3415_v15, 16  ;;  %v4441_v3 = vld [vmem:[#allocation2 + $0x34] sm:$0xf] }
  0xae   : > { %v3563_v30 = vrot.slane %v3561_v21, 5  ;;  %8641 = vmatpush1.bf16.msra.mxu0 %v11000_v5  ;;  %v1841_v33 = vsel %vm11375_vm6, %v1836_v25, %v1840_v7  ;;  %8393 = vmatprep.mubr.bf16.mxu0 %v9827_v23  ;;  %v526_v26 = vshrl.u32 %v308_v10, 16  ;;  %v529_v28 = vshll.u32 %v308_v10, 16  ;;  %v3416_v15 = vld [vmem:[#allocation2 + $0x30] sm:$0xf] }
  0xaf   : > { %v1846_v34 = vrot.slane %v1845_v22, 4  ;;  %v1543_v35 = vld [vmem:[#allocation2 + $0x78] sm:$0xf]  ;;  %v3567_v36 = vrot.slane %v3565_v27, 4  ;;  %8642 = vmatprep.subr.bf16.mxu0 %v11107_v1  ;;  %v3558_v2 = vor.u32 %v3557_v29, %v3554_v24  ;;  %v3573_v58 = vrot.slane %v3571_v31, 5 }
  0xb0   : > { %v1853_v16 = vshrl.u32 %v1543_v35, 16  ;;  %v1856_v37 = vshll.u32 %v1543_v35, 16  ;;  %v1544_v6 = vld [vmem:[#allocation2 + $0x7c] sm:$0xf]  ;;  %v528_v18 = vrot.slane %v526_v26, 7  ;;  %v534_v56 = vshrl.u32 %v309_v17, 16 }
  0xb1   : > { %v1851_v62 = vsel %vm11375_vm6, %v1846_v34, %v1850_v13  ;;  %v3568_v9 = vor.u32 %v3567_v36, %v3563_v30  ;;  %v1862_v45 = vshll.u32 %v1544_v6, 16  ;;  %v1866_v12 = vshrl.u32 %v1544_v6, 16  ;;  %v3417_v14 = vld [vmem:[#allocation2 + $0x34] sm:$0xf]  ;;  %v1075_v21 = vld [vmem:[#allocation2 + $0x8c] sm:$0x1] }
  0xb2   : > { %v9642_v39 = vcombine.low %v1841_v33, %v1851_v62  ;;  %v1545_v41 = vld [vmem:[#allocation2 + $0x80] sm:$0x1]  ;;  %v1855_v42 = vrot.slane %v1853_v16, 4  ;;  %v1858_v43 = vrot.slane %v1856_v37, 5  ;;  %8643 = vmatpush1.bf16.msra.mxu0 %v11003_v32  ;;  %v3559_v49 = vrot.slane %v3558_v2, 4  ;;  %v10993_v35 = vld [vmem:[#allocation2 + $0x78] sm:$0xff]  }
  0xb3   : > { %v1872_v47 = vshll.u32 %v1545_v41, 16  ;;  %8644 = vmatprep.subr.bf16.mxu0 %v11107_v1  ;;  %v3569_v53 = vrot.slane %v3568_v9, 4  ;;  %v1864_v52 = vrot.slane %v1862_v45, 5  ;;  %v1868_v54 = vrot.slane %v1866_v12, 4  ;;  %v310_v2 = vld [vmem:[%s11354_s28 + $0x58] sm:$0xf] }
  0xb4   : > { %7871 = vmatprep.mubr.bf16.mxu1 %v9642_v39  ;;  %v1859_v48 = vor.u32 %v1858_v43, %v1855_v42  ;;  %v3564_v63 = vsel %vm11375_vm6, %v3559_v49, %v3563_v30  ;;  %v531_v8 = vor.u32 %v529_v28, %v528_v18  ;;  %v532_v11 = vrot.slane %v528_v18, 4  ;;  %v3418_v30 = vld [vmem:[#allocation2 + $0x38] sm:$0x1]  ;;  %v1078_v49 = vld [vmem:[#allocation2 + $0x90] sm:$0xf] }
  0xb5   : > { %7872 = vmatmul.mubr.bf16.gmra.mrb[36].mxu1 %v10992_v44  ;;  %v1874_v55 = vrot.slane %v1872_v47, 5  ;;  %v3574_v0 = vsel %vm11375_vm6, %v3569_v53, %v3573_v58  ;;  %v1869_v5 = vor.u32 %v1868_v54, %v1864_v52  ;;  %v536_v13 = vrot.slane %v534_v56, 7 }
  0xb6   : > { %v1860_v60 = vrot.slane %v1859_v48, 4  ;;  %8645 = vmatpush1.bf16.msra.mxu0 %v11006_v38  ;;  %v9763_v7 = vcombine.low %v3564_v63, %v3574_v0  ;;  %v537_v19 = vshll.u32 %v309_v17, 16  ;;  %v1072_v20 = vsel %vm11397_vm9, %v531_v8, %v1071_v50  ;;  %v311_v17 = vld [vmem:[%s11354_s28 + $0x5c] sm:$0xf]  ;;  %v4444_v8 = vld [vmem:[#allocation2 + $0x40] sm:$0xf] }
  0xb7   : > { %8646 = vmatprep.subr.bf16.mxu0 %v11107_v1  ;;  %v9796_v22 = vrot.slane %v4440_v59, 9  ;;  %v1870_v23 = vrot.slane %v1869_v5, 4  ;;  %v541_v24 = vrot.slane %v536_v13, 4  ;;  %1073 = vst [vmem:[#allocation2 + $0x84] sm:$0xf] %v1072_v20  ;;  %v4646_v27 = vrot.slane %v4441_v3, 5 }
  0xb8   : > { %v1865_v25 = vsel %vm11375_vm6, %v1860_v60, %v1864_v52  ;;  %8394 = vmatmul.mubr.bf16.gmra.mrb[8].mxu0 %v9763_v7  ;;  %v4649_v29 = vrot.slane %v4442_v4, 5  ;;  %v539_v31 = vor.u32 %v537_v19, %v536_v13  ;;  %v3576_v10 = vshrl.u32 %v3416_v15, 16  ;;  %v4443_v59 = vld [vmem:[#allocation2 + $0x3c] sm:$0xe]  ;;  %v1082_v13 = vld [vmem:[#allocation2 + $0x98] sm:$0x1] }
  0xb9   : > { %v3579_v32 = vshll.u32 %v3416_v15, 16  ;;  %v3585_v33 = vshll.u32 %v3417_v14, 16  ;;  %v1875_v34 = vsel %vm11375_vm6, %v1870_v23, %v1874_v55  ;;  %v1076_v36 = vsel %vm11414_vm10, %v541_v24, %v1075_v21  ;;  %v4445_v24 = vld [vmem:[#allocation2 + $0x44] sm:$0x1] }
  0xba   : > { %v4647_v16 = vsel %vm11479_vm13, %v9796_v22, %v4646_v27  ;;  %v4648_v37 = vrot.slane %v4646_v27, 4  ;;  %v9643_v58 = vcombine.low %v1865_v25, %v1875_v34  ;;  %v540_v62 = vsel %vm11388_vm8, %v532_v11, %v539_v31  ;;  %1077 = vst [vmem:[#allocation2 + $0x8c] sm:$0x1] %v1076_v36  ;;  %v3419_v27 = vld [vmem:[#allocation2 + $0x3c] sm:$0xf] }
  0xbb   : > { %v3578_v44 = vrot.slane %v3576_v10, 4  ;;  %v3581_v9 = vrot.slane %v3579_v32, 5  ;;  %1074 = vst [vmem:[#allocation2 + $0x88] sm:$0xf] %v540_v62  ;;  %v3587_v28 = vrot.slane %v3585_v33, 5  ;;  %v3589_v38 = vshrl.u32 %v3417_v14, 16 }
  0xbc   : > { %v4650_v26 = vsel %vm11479_vm13, %v4648_v37, %v4649_v29  ;;  %v3595_v39 = vshll.u32 %v3418_v30, 16  ;;  %7879 = vmatprep.mubr.bf16.mxu1 %v9643_v58  ;;  %v543_v42 = vshrl.u32 %v310_v2, 16  ;;  %v546_v43 = vshll.u32 %v310_v2, 16  ;;  %v3420_v32 = vld [vmem:[#allocation2 + $0x40] sm:$0xf] }
  0xbd   : > { %v9828_v6 = vcombine.low %v4647_v16, %v4650_v26  ;;  %v3582_v41 = vor.u32 %v3581_v9, %v3578_v44  ;;  %7880 = vmatmul.mubr.bf16.gmra.mrb[40].mxu1 %v10993_v35  ;;  %v3591_v45 = vrot.slane %v3589_v38, 4  ;;  %v551_v47 = vshrl.u32 %v311_v17, 16  ;;  %v3421_v16 = vld [vmem:[#allocation2 + $0x44] sm:$0x1]  ;;  %v312_v44 = vld [vmem:[%s11354_s28 + $0x60] sm:$0xf] }
  0xbe   : > { %v3597_v12 = vrot.slane %v3595_v39, 5  ;;  %v554_v48 = vshll.u32 %v311_v17, 16  ;;  %v1546_v53 = vld [vmem:[#allocation2 + $0x84] sm:$0xf]  ;;  %v545_v50 = vrot.slane %v543_v42, 7  ;;  %v9797_v19 = vrot.slane %v4443_v59, 9 }
  0xbf   : > { %8401 = vmatprep.mubr.bf16.mxu0 %v9828_v6  ;;  %v3583_v18 = vrot.slane %v3582_v41, 4  ;;  %v1877_v52 = vshrl.u32 %v1546_v53, 16  ;;  %v1880_v54 = vshll.u32 %v1546_v53, 16  ;;  %v3592_v55 = vor.u32 %v3591_v45, %v3587_v28  ;;  %v11009_v38 = vld [vmem:[%s13535_s1 + $0x1b0] sm:$0xff]   ;;  %v313_v59 = vld [vmem:[%s11354_s28 + $0x64] sm:$0xf] }
  0xc0   : > { %v553_v56 = vrot.slane %v551_v47, 7  ;;  %v548_v63 = vor.u32 %v546_v43, %v545_v50  ;;  %v549_v0 = vrot.slane %v545_v50, 4  ;;  %v4653_v36 = vrot.slane %v4444_v8, 5  ;;  %8647 = vmatpush1.bf16.msra.mxu0 %v11009_v38 }
  0xc1   : > { %v3588_v60 = vsel %vm11375_vm6, %v3583_v18, %v3587_v28  ;;  %v1548_v3 = vld [vmem:[#allocation2 + $0x8c] sm:$0x1]  ;;  %v1879_v4 = vrot.slane %v1877_v52, 4  ;;  %v1882_v5 = vrot.slane %v1880_v54, 5  ;;  %v3593_v7 = vrot.slane %v3592_v55, 4  ;;  %8648 = vmatprep.subr.bf16.mxu0 %v11107_v1 }
  0xc2   : > { %v556_v11 = vor.u32 %v554_v48, %v553_v56  ;;  %v1547_v15 = vld [vmem:[#allocation2 + $0x88] sm:$0xf]  ;;  %v1896_v14 = vshll.u32 %v1548_v3, 16  ;;  %v1079_v25 = vsel %vm11397_vm9, %v548_v63, %v1078_v49  ;;  %v558_v10 = vrot.slane %v553_v56, 4 }
  0xc3   : > { %v1883_v20 = vor.u32 %v1882_v5, %v1879_v4  ;;  %v1886_v21 = vshll.u32 %v1547_v15, 16  ;;  %v1890_v22 = vshrl.u32 %v1547_v15, 16  ;;  %v3598_v23 = vsel %vm11375_vm6, %v3593_v7, %v3597_v12  ;;  %1080 = vst [vmem:[#allocation2 + $0x90] sm:$0xf] %v1079_v25  ;;  %v10995_v54 = vld [vmem:[#allocation2 + $0x84] sm:$0xff]  }
  0xc4   : > { %v1898_v29 = vrot.slane %v1896_v14, 5  ;;  %v9764_v30 = vcombine.low %v3588_v60, %v3598_v23  ;;  %v557_v31 = vsel %vm11388_vm8, %v549_v0, %v556_v11  ;;  %v1083_v37 = vsel %vm11414_vm10, %v558_v10, %v1082_v13  ;;  %v1085_v13 = vld [vmem:[#allocation2 + $0x9c] sm:$0xf] }
  0xc5   : > { %v1884_v33 = vrot.slane %v1883_v20, 4  ;;  %v1888_v34 = vrot.slane %v1886_v21, 5  ;;  %v1892_v35 = vrot.slane %v1890_v22, 4  ;;  %1081 = vst [vmem:[#allocation2 + $0x94] sm:$0xf] %v557_v31  ;;  %v4656_v2 = vrot.slane %v4445_v24, 5 }
  0xc6   : > { %8402 = vmatmul.mubr.bf16.gmra.mrb[12].mxu0 %v9764_v30  ;;  %v3600_v58 = vshrl.u32 %v3419_v27, 16  ;;  %v3603_v62 = vshll.u32 %v3419_v27, 16  ;;  %1084 = vst [vmem:[#allocation2 + $0x98] sm:$0x1] %v1083_v37  ;;  %v4654_v26 = vsel %vm11479_vm13, %v9797_v19, %v4653_v36  ;;  %v4655_v28 = vrot.slane %v4653_v36, 4 }
  0xc7   : > { %v1889_v9 = vsel %vm11375_vm6, %v1884_v33, %v1888_v34  ;;  %v1893_v17 = vor.u32 %v1892_v35, %v1888_v34  ;;  %v3609_v41 = vshll.u32 %v3420_v32, 16  ;;  %v3613_v42 = vshrl.u32 %v3420_v32, 16  ;;  %v4446_v27 = vld [vmem:[#allocation2 + $0x48] sm:$0xe]  ;;  %v4447_v32 = vld [vmem:[#allocation2 + $0x4c] sm:$0xf] }
  0xc8   : > { %v3602_v39 = vrot.slane %v3600_v58, 4  ;;  %v3605_v6 = vrot.slane %v3603_v62, 5  ;;  %v4657_v45 = vsel %vm11479_vm13, %v4655_v28, %v4656_v2  ;;  %v3619_v12 = vshll.u32 %v3421_v16, 16  ;;  %v4448_v33 = vld [vmem:[#allocation2 + $0x50] sm:$0x1] }
  0xc9   : > { %v1894_v43 = vrot.slane %v1893_v17, 4  ;;  %v560_v47 = vshrl.u32 %v312_v44, 16  ;;  %v9829_v49 = vcombine.low %v4654_v26, %v4657_v45  ;;  %v3611_v18 = vrot.slane %v3609_v41, 5  ;;  %v3422_v37 = vld [vmem:[#allocation2 + $0x48] sm:$0xf] }
  0xca   : > { %v1549_v48 = vld [vmem:[#allocation2 + $0x90] sm:$0xf]  ;;  %v3606_v53 = vor.u32 %v3605_v6, %v3602_v39  ;;  %v3615_v50 = vrot.slane %v3613_v42, 4  ;;  %v3621_v3 = vrot.slane %v3619_v12, 5  ;;  %v563_v20 = vshll.u32 %v312_v44, 16 }
  0xcb   : > { %v1899_v52 = vsel %vm11375_vm6, %v1894_v43, %v1898_v29  ;;  %v1901_v55 = vshrl.u32 %v1549_v48, 16  ;;  %v1904_v56 = vshll.u32 %v1549_v48, 16  ;;  %8409 = vmatprep.mubr.bf16.mxu0 %v9829_v49  ;;  %v562_v19 = vrot.slane %v560_v47, 7  ;;  %v1089_v28 = vld [vmem:[#allocation2 + $0xa4] sm:$0x1] }
  0xcc   : > { %v9644_v60 = vcombine.low %v1889_v9, %v1899_v52  ;;  %v1550_v63 = vld [vmem:[#allocation2 + $0x94] sm:$0xf]  ;;  %v3607_v0 = vrot.slane %v3606_v53, 4  ;;  %v3616_v8 = vor.u32 %v3615_v50, %v3611_v18  ;;  %v568_v10 = vshrl.u32 %v313_v59, 16  ;;  %v3423_v9 = vld [vmem:[#allocation2 + $0x4c] sm:$0xf] }
  0xcd   : > { %v1903_v4 = vrot.slane %v1901_v55, 4  ;;  %v1906_v5 = vrot.slane %v1904_v56, 5  ;;  %v1910_v7 = vshll.u32 %v1550_v63, 16  ;;  %v1914_v11 = vshrl.u32 %v1550_v63, 16  ;;  %v1551_v15 = vld [vmem:[#allocation2 + $0x98] sm:$0x1] }
  0xce   : > { %7887 = vmatprep.mubr.bf16.mxu1 %v9644_v60  ;;  %v3612_v14 = vsel %vm11375_vm6, %v3607_v0, %v3611_v18  ;;  %v3617_v25 = vrot.slane %v3616_v8, 4  ;;  %v1920_v24 = vshll.u32 %v1551_v15, 16  ;;  %v565_v30 = vor.u32 %v563_v20, %v562_v19  ;;  %v3424_v42 = vld [vmem:[#allocation2 + $0x50] sm:$0x1]  ;;  %v314_v18 = vld [vmem:[%s11354_s28 + $0x68] sm:$0xf] }
  0xcf   : > { %7888 = vmatmul.mubr.bf16.gmra.mrb[44].mxu1 %v10995_v54  ;;  %v1907_v21 = vor.u32 %v1906_v5, %v1903_v4  ;;  %v1912_v22 = vrot.slane %v1910_v7, 5  ;;  %v1916_v23 = vrot.slane %v1914_v11, 4  ;;  %v566_v31 = vrot.slane %v562_v19, 4  ;;  %v10996_v47 = vld [vmem:[#allocation2 + $0x90] sm:$0xff]   ;;  %v315_v56 = vld [vmem:[%s11354_s28 + $0x6c] sm:$0xf] }
  0xd0   : > { %v3622_v29 = vsel %vm11375_vm6, %v3617_v25, %v3621_v3  ;;  %v1922_v36 = vrot.slane %v1920_v24, 5  ;;  %v570_v2 = vrot.slane %v568_v10, 7  ;;  %v571_v58 = vshll.u32 %v313_v59, 16  ;;  %v1092_v15 = vld [vmem:[#allocation2 + $0xa8] sm:$0xf] }
  0xd1   : > { %v1908_v34 = vrot.slane %v1907_v21, 4  ;;  %v1917_v35 = vor.u32 %v1916_v23, %v1912_v22  ;;  %v9765_v16 = vcombine.low %v3612_v14, %v3622_v29  ;;  %v1086_v62 = vsel %vm11397_vm9, %v565_v30, %v1085_v13  ;;  %v4449_v14 = vld [vmem:[#allocation2 + $0x54] sm:$0xe] }
  0xd2   : > { %v9798_v44 = vrot.slane %v4446_v27, 9  ;;  %1087 = vst [vmem:[#allocation2 + $0x9c] sm:$0xf] %v1086_v62  ;;  %v4660_v38 = vrot.slane %v4447_v32, 5  ;;  %v4663_v39 = vrot.slane %v4448_v33, 5  ;;  %v573_v6 = vor.u32 %v571_v58, %v570_v2 }
  0xd3   : > { %v1913_v17 = vsel %vm11375_vm6, %v1908_v34, %v1912_v22  ;;  %v1918_v26 = vrot.slane %v1917_v35, 4  ;;  %8410 = vmatmul.mubr.bf16.gmra.mrb[16].mxu0 %v9765_v16  ;;  %v575_v41 = vrot.slane %v570_v2, 4  ;;  %v3624_v43 = vshrl.u32 %v3422_v37, 16  ;;  %v4450_v27 = vld [vmem:[#allocation2 + $0x58] sm:$0xf] }
  0xd4   : > { %v3627_v45 = vshll.u32 %v3422_v37, 16  ;;  %v4661_v48 = vsel %vm11479_vm13, %v9798_v44, %v4660_v38  ;;  %v4662_v49 = vrot.slane %v4660_v38, 4  ;;  %v3633_v53 = vshll.u32 %v3423_v9, 16  ;;  %v1096_v35 = vld [vmem:[#allocation2 + $0xb0] sm:$0x1] }
  0xd5   : > { %v1923_v12 = vsel %vm11375_vm6, %v1918_v26, %v1922_v36  ;;  %v574_v52 = vsel %vm11388_vm8, %v566_v31, %v573_v6  ;;  %v1090_v54 = vsel %vm11414_vm10, %v575_v41, %v1089_v28  ;;  %v3626_v55 = vrot.slane %v3624_v43, 4  ;;  %v4451_v44 = vld [vmem:[#allocation2 + $0x5c] sm:$0x1]  ;;  %v3425_v38 = vld [vmem:[#allocation2 + $0x54] sm:$0xf] }
  0xd6   : > { %v9645_v50 = vcombine.low %v1913_v17, %v1923_v12  ;;  %1088 = vst [vmem:[#allocation2 + $0xa0] sm:$0xf] %v574_v52  ;;  %1091 = vst [vmem:[#allocation2 + $0xa4] sm:$0x1] %v1090_v54  ;;  %v4664_v59 = vsel %vm11479_vm13, %v4662_v49, %v4663_v39  ;;  %v3629_v60 = vrot.slane %v3627_v45, 5  ;;  %v3635_v63 = vrot.slane %v3633_v53, 5 }
  0xd7   : > { %v3637_v0 = vshrl.u32 %v3423_v9, 16  ;;  %v9830_v8 = vcombine.low %v4661_v48, %v4664_v59  ;;  %v3643_v3 = vshll.u32 %v3424_v42, 16  ;;  %v577_v4 = vshrl.u32 %v314_v18, 16  ;;  %v3426_v43 = vld [vmem:[#allocation2 + $0x58] sm:$0xf] }
  0xd8   : > { %7895 = vmatprep.mubr.bf16.mxu1 %v9645_v50  ;;  %v580_v5 = vshll.u32 %v314_v18, 16  ;;  %v3630_v7 = vor.u32 %v3629_v60, %v3626_v55  ;;  %v585_v13 = vshrl.u32 %v315_v56, 16  ;;  %v588_v20 = vshll.u32 %v315_v56, 16  ;;  %v3427_v45 = vld [vmem:[#allocation2 + $0x5c] sm:$0x1] }
  0xd9   : > { %7896 = vmatmul.mubr.bf16.gmra.mrb[48].mxu1 %v10996_v47  ;;  %v3639_v11 = vrot.slane %v3637_v0, 4  ;;  %v1552_v25 = vld [vmem:[#allocation2 + $0x9c] sm:$0xf]  ;;  %8417 = vmatprep.mubr.bf16.mxu0 %v9830_v8  ;;  %v579_v19 = vrot.slane %v577_v4, 7  ;;  %v3645_v29 = vrot.slane %v3643_v3, 5  ;;  %v9799_v36 = vrot.slane %v4449_v14, 9 }
  0xda   : > { %v1925_v21 = vshrl.u32 %v1552_v25, 16  ;;  %v1928_v22 = vshll.u32 %v1552_v25, 16  ;;  %v3631_v23 = vrot.slane %v3630_v7, 4  ;;  %v587_v10 = vrot.slane %v585_v13, 7  ;;  %v316_v54 = vld [vmem:[%s11354_s28 + $0x70] sm:$0xf] }
  0xdb   : > { %v3640_v24 = vor.u32 %v3639_v11, %v3635_v63  ;;  %v582_v30 = vor.u32 %v580_v5, %v579_v19  ;;  %v583_v31 = vrot.slane %v579_v19, 4  ;;  %v4667_v42 = vrot.slane %v4450_v27, 5  ;;  %v11012_v13 = vld [vmem:[%s13535_s1 + $0x1b8] sm:$0xff]  }
  0xdc   : > { %v1927_v32 = vrot.slane %v1925_v21, 4  ;;  %v1930_v33 = vrot.slane %v1928_v22, 5  ;;  %v3636_v2 = vsel %vm11375_vm6, %v3631_v23, %v3635_v63  ;;  %v590_v58 = vor.u32 %v588_v20, %v587_v10  ;;  %8649 = vmatpush1.bf16.msra.mxu0 %v11012_v13 }
  0xdd   : > { %v3641_v34 = vrot.slane %v3640_v24, 4  ;;  %v1553_v16 = vld [vmem:[#allocation2 + $0xa0] sm:$0xf]  ;;  %v1554_v37 = vld [vmem:[#allocation2 + $0xa4] sm:$0x1]  ;;  %v1093_v62 = vsel %vm11397_vm9, %v582_v30, %v1092_v15  ;;  %v592_v41 = vrot.slane %v587_v10, 4  ;;  %v4668_v50 = vsel %vm11479_vm13, %v9799_v36, %v4667_v42  ;;  %8650 = vmatprep.subr.bf16.mxu0 %v11107_v1 }
  0xde   : > { %v1931_v9 = vor.u32 %v1930_v33, %v1927_v32  ;;  %v1934_v17 = vshll.u32 %v1553_v16, 16  ;;  %v1938_v26 = vshrl.u32 %v1553_v16, 16  ;;  %v1944_v28 = vshll.u32 %v1554_v37, 16  ;;  %1094 = vst [vmem:[#allocation2 + $0xa8] sm:$0xf] %v1093_v62  ;;  %v10998_v21 = vld [vmem:[#allocation2 + $0x9c] sm:$0xff]  }
  0xdf   : > { %v3646_v39 = vsel %vm11375_vm6, %v3641_v34, %v3645_v29  ;;  %v591_v6 = vsel %vm11388_vm8, %v583_v31, %v590_v58  ;;  %v1097_v18 = vsel %vm11414_vm10, %v592_v41, %v1096_v35  ;;  %v4669_v52 = vrot.slane %v4667_v42, 4  ;;  %v317_v10 = vld [vmem:[%s11354_s28 + $0x74] sm:$0xf]  ;;  %v4453_v42 = vld [vmem:[#allocation2 + $0x64] sm:$0xf] }
  0xe0   : > { %v1932_v12 = vrot.slane %v1931_v9, 4  ;;  %v1936_v47 = vrot.slane %v1934_v17, 5  ;;  %v1940_v48 = vrot.slane %v1938_v26, 4  ;;  %v1946_v49 = vrot.slane %v1944_v28, 5  ;;  %1095 = vst [vmem:[#allocation2 + $0xac] sm:$0xf] %v591_v6 }
  0xe1   : > { %v9766_v53 = vcombine.low %v3636_v2, %v3646_v39  ;;  %1098 = vst [vmem:[#allocation2 + $0xb0] sm:$0x1] %v1097_v18  ;;  %v4670_v59 = vrot.slane %v4451_v44, 5  ;;  %v3648_v60 = vshrl.u32 %v3425_v38, 16  ;;  %v3651_v63 = vshll.u32 %v3425_v38, 16 }
  0xe2   : > { %v1937_v55 = vsel %vm11375_vm6, %v1932_v12, %v1936_v47  ;;  %v1941_v56 = vor.u32 %v1940_v48, %v1936_v47  ;;  %v3657_v0 = vshll.u32 %v3426_v43, 16  ;;  %v3661_v8 = vshrl.u32 %v3426_v43, 16  ;;  %v1099_v36 = vld [vmem:[#allocation2 + $0xb4] sm:$0xf]  ;;  %v4452_v28 = vld [vmem:[#allocation2 + $0x60] sm:$0xe] }
  0xe3   : > { %8418 = vmatmul.mubr.bf16.gmra.mrb[20].mxu0 %v9766_v53  ;;  %v3667_v3 = vshll.u32 %v3427_v45, 16  ;;  %v4671_v5 = vsel %vm11479_vm13, %v4669_v52, %v4670_v59  ;;  %v3650_v7 = vrot.slane %v3648_v60, 4  ;;  %v594_v11 = vshrl.u32 %v316_v54, 16  ;;  %v4454_v43 = vld [vmem:[#allocation2 + $0x68] sm:$0x1] }
  0xe4   : > { %v1942_v4 = vrot.slane %v1941_v56, 4  ;;  %v9831_v14 = vcombine.low %v4668_v50, %v4671_v5  ;;  %v3653_v25 = vrot.slane %v3651_v63, 5  ;;  %v3659_v19 = vrot.slane %v3657_v0, 5  ;;  %v1103_v63 = vld [vmem:[#allocation2 + $0xbc] sm:$0x1] }
  0xe5   : > { %v1555_v15 = vld [vmem:[#allocation2 + $0xa8] sm:$0xf]  ;;  %v3663_v24 = vrot.slane %v3661_v8, 4  ;;  %v3669_v31 = vrot.slane %v3667_v3, 5  ;;  %v596_v58 = vrot.slane %v594_v11, 7  ;;  %v597_v62 = vshll.u32 %v316_v54, 16 }
  0xe6   : > { %v1947_v20 = vsel %vm11375_vm6, %v1942_v4, %v1946_v49  ;;  %v1949_v22 = vshrl.u32 %v1555_v15, 16  ;;  %v1952_v23 = vshll.u32 %v1555_v15, 16  ;;  %8425 = vmatprep.mubr.bf16.mxu0 %v9831_v14  ;;  %v3654_v30 = vor.u32 %v3653_v25, %v3650_v7  ;;  %v3428_v49 = vld [vmem:[#allocation2 + $0x60] sm:$0xf]  ;;  %v3429_v54 = vld [vmem:[#allocation2 + $0x64] sm:$0xf] }
  0xe7   : > { %v9646_v27 = vcombine.low %v1937_v55, %v1947_v20  ;;  %v1556_v29 = vld [vmem:[#allocation2 + $0xac] sm:$0xf]  ;;  %v3664_v2 = vor.u32 %v3663_v24, %v3659_v19  ;;  %v599_v6 = vor.u32 %v597_v62, %v596_v58  ;;  %v600_v41 = vrot.slane %v596_v58, 4  ;;  %v3430_v3 = vld [vmem:[#allocation2 + $0x68] sm:$0x1] }
  0xe8   : > { %v1951_v32 = vrot.slane %v1949_v22, 4  ;;  %v1954_v33 = vrot.slane %v1952_v23, 5  ;;  %v1958_v34 = vshll.u32 %v1556_v29, 16  ;;  %v1962_v35 = vshrl.u32 %v1556_v29, 16  ;;  %v1557_v16 = vld [vmem:[#allocation2 + $0xb0] sm:$0x1] }
  0xe9   : > { %7903 = vmatprep.mubr.bf16.mxu1 %v9646_v27  ;;  %v3655_v37 = vrot.slane %v3654_v30, 4  ;;  %v1968_v26 = vshll.u32 %v1557_v16, 16  ;;  %v3665_v39 = vrot.slane %v3664_v2, 4  ;;  %v602_v48 = vshrl.u32 %v317_v10, 16  ;;  %v10999_v11 = vld [vmem:[#allocation2 + $0xa8] sm:$0xff]  }
  0xea   : > { %7904 = vmatmul.mubr.bf16.gmra.mrb[52].mxu1 %v10998_v21  ;;  %v1955_v44 = vor.u32 %v1954_v33, %v1951_v32  ;;  %v1960_v9 = vrot.slane %v1958_v34, 5  ;;  %v1964_v17 = vrot.slane %v1962_v35, 4  ;;  %v605_v18 = vshll.u32 %v317_v10, 16  ;;  %v1561_v25 = vld [vmem:[#allocation2 + $0xd8] sm:$0xf] }
  0xeb   : > { %v3660_v38 = vsel %vm11375_vm6, %v3655_v37, %v3659_v19  ;;  %v1970_v47 = vrot.slane %v1968_v26, 5  ;;  %v3670_v53 = vsel %vm11375_vm6, %v3665_v39, %v3669_v31  ;;  %v1100_v50 = vsel %vm11397_vm9, %v599_v6, %v1099_v36  ;;  %v1562_v23 = vld [vmem:[#allocation2 + $0xdc] sm:$0xf]  ;;  %v1563_v36 = vld [vmem:[#allocation2 + $0xe0] sm:$0x1] }
  0xec   : > { %v1956_v45 = vrot.slane %v1955_v44, 4  ;;  %v1965_v12 = vor.u32 %v1964_v17, %v1960_v9  ;;  %v9800_v52 = vrot.slane %v4452_v28, 9  ;;  %v9767_v59 = vcombine.low %v3660_v38, %v3670_v53  ;;  %1101 = vst [vmem:[#allocation2 + $0xb4] sm:$0xf] %v1100_v50  ;;  %v4455_v28 = vld [vmem:[#allocation2 + $0x6c] sm:$0xe] }
  0xed   : > { %v604_v60 = vrot.slane %v602_v48, 7  ;;  %v4674_v0 = vrot.slane %v4453_v42, 5  ;;  %v4677_v8 = vrot.slane %v4454_v43, 5  ;;  %v3672_v4 = vshrl.u32 %v3428_v49, 16  ;;  %v4456_v53 = vld [vmem:[#allocation2 + $0x70] sm:$0xf] }
  0xee   : > { %v1961_v55 = vsel %vm11375_vm6, %v1956_v45, %v1960_v9  ;;  %v1966_v56 = vrot.slane %v1965_v12, 4  ;;  %v3675_v5 = vshll.u32 %v3428_v49, 16  ;;  %8426 = vmatmul.mubr.bf16.gmra.mrb[24].mxu0 %v9767_v59  ;;  %v3681_v14 = vshll.u32 %v3429_v54, 16 }
  0xef   : > { %v607_v13 = vor.u32 %v605_v18, %v604_v60  ;;  %v609_v15 = vrot.slane %v604_v60, 4  ;;  %v4675_v20 = vsel %vm11479_vm13, %v9800_v52, %v4674_v0  ;;  %v4676_v21 = vrot.slane %v4674_v0, 4 }
  0xf0   : > { %v1971_v7 = vsel %vm11375_vm6, %v1966_v56, %v1970_v47  ;;  %v3674_v22 = vrot.slane %v3672_v4, 4  ;;  %v3677_v29 = vrot.slane %v3675_v5, 5  ;;  %v3683_v30 = vrot.slane %v3681_v14, 5  ;;  %v3431_v5 = vld [vmem:[#allocation2 + $0x6c] sm:$0xf] }
  0xf1   : > { %v9647_v19 = vcombine.low %v1961_v55, %v1971_v7  ;;  %v608_v24 = vsel %vm11388_vm8, %v600_v41, %v607_v13  ;;  %v1104_v27 = vsel %vm11414_vm10, %v609_v15, %v1103_v63  ;;  %v4678_v31 = vsel %vm11479_vm13, %v4676_v21, %v4677_v8  ;;  %v4457_v63 = vld [vmem:[#allocation2 + $0x74] sm:$0x1]  ;;  %v3432_v14 = vld [vmem:[#allocation2 + $0x70] sm:$0xf] }
  0xf2   : > { %1102 = vst [vmem:[#allocation2 + $0xb8] sm:$0xf] %v608_v24  ;;  %1105 = vst [vmem:[#allocation2 + $0xbc] sm:$0x1] %v1104_v27  ;;  %v3685_v10 = vshrl.u32 %v3429_v54, 16  ;;  %v3691_v32 = vshll.u32 %v3430_v3, 16  ;;  %v9832_v34 = vcombine.low %v4675_v20, %v4678_v31  ;;  %v3678_v35 = vor.u32 %v3677_v29, %v3674_v22 }
  0xf3   : > { %7911 = vmatprep.mubr.bf16.mxu1 %v9647_v19  ;;  %v1997_v33 = vshrl.u32 %v1561_v25, 16  ;;  %v2000_v16 = vshll.u32 %v1561_v25, 16  ;;  %v2006_v37 = vshll.u32 %v1562_v23, 16  ;;  %v1558_v2 = vld [vmem:[#allocation2 + $0xb4] sm:$0xf]  ;;  %v2010_v41 = vshrl.u32 %v1562_v23, 16 }
  0xf4   : > { %7912 = vmatmul.mubr.bf16.gmra.mrb[56].mxu1 %v10999_v11  ;;  %v3687_v58 = vrot.slane %v3685_v10, 4  ;;  %v3693_v62 = vrot.slane %v3691_v32, 5  ;;  %v1973_v44 = vshrl.u32 %v1558_v2, 16  ;;  %v1976_v9 = vshll.u32 %v1558_v2, 16  ;;  %8433 = vmatprep.mubr.bf16.mxu0 %v9832_v34  ;;  %v3433_v24 = vld [vmem:[#allocation2 + $0x74] sm:$0x1] }
  0xf5   : > { %v3679_v17 = vrot.slane %v3678_v35, 4  ;;  %v1999_v26 = vrot.slane %v1997_v33, 4  ;;  %v2002_v39 = vrot.slane %v2000_v16, 5  ;;  %v2008_v6 = vrot.slane %v2006_v37, 5  ;;  %v320_v33 = vld [vmem:[%s11354_s28 + $0x80] sm:$0xf] }
  0xf6   : > { %v3688_v38 = vor.u32 %v3687_v58, %v3683_v30  ;;  %v1975_v42 = vrot.slane %v1973_v44, 4  ;;  %v1978_v43 = vrot.slane %v1976_v9, 5  ;;  %v2016_v12 = vshll.u32 %v1563_v36, 16  ;;  %v321_v34 = vld [vmem:[%s11354_s28 + $0x84] sm:$0xf] }
  0xf7   : > { %v3684_v45 = vsel %vm11375_vm6, %v3679_v17, %v3683_v30  ;;  %v2003_v48 = vor.u32 %v2002_v39, %v1999_v26  ;;  %v2012_v49 = vrot.slane %v2010_v41, 4  ;;  %v9801_v18 = vrot.slane %v4455_v28, 9  ;;  %v4458_v2 = vld [vmem:[#allocation2 + $0x78] sm:$0xe]  ;;  %v4459_v17 = vld [vmem:[#allocation2 + $0x7c] sm:$0xf] }
  0xf8   : > { %v3689_v47 = vrot.slane %v3688_v38, 4  ;;  %v1979_v54 = vor.u32 %v1978_v43, %v1975_v42  ;;  %v2018_v15 = vrot.slane %v2016_v12, 5  ;;  %v4681_v20 = vrot.slane %v4456_v53, 5  ;;  %v11015_v26 = vld [vmem:[%s13535_s1 + $0x1c0] sm:$0xff]   ;;  %v3434_v43 = vld [vmem:[#allocation2 + $0x78] sm:$0xf] }
  0xf9   : > { %v1559_v50 = vld [vmem:[#allocation2 + $0xb8] sm:$0xf]  ;;  %v1560_v52 = vld [vmem:[#allocation2 + $0xbc] sm:$0x1]  ;;  %v2004_v3 = vrot.slane %v2003_v48, 4  ;;  %v2013_v4 = vor.u32 %v2012_v49, %v2008_v6  ;;  %v4684_v21 = vrot.slane %v4457_v63, 5  ;;  %8651 = vmatpush1.bf16.msra.mxu0 %v11015_v26 }
  0xfa   : > { %v1982_v55 = vshll.u32 %v1559_v50, 16  ;;  %v1986_v56 = vshrl.u32 %v1559_v50, 16  ;;  %v1992_v59 = vshll.u32 %v1560_v52, 16  ;;  %v3694_v60 = vsel %vm11375_vm6, %v3689_v47, %v3693_v62  ;;  %v11001_v38 = vld [vmem:[#allocation2 + $0xb4] sm:$0xff]   ;;  %v4460_v42 = vld [vmem:[#allocation2 + $0x80] sm:$0x1]  ;;  %8652 = vmatprep.subr.bf16.mxu0 %v11107_v1 }
  0xfb   : > { %v1980_v0 = vrot.slane %v1979_v54, 4  ;;  %v9768_v8 = vcombine.low %v3684_v45, %v3694_v60  ;;  %v2009_v25 = vsel %vm11375_vm6, %v2004_v3, %v2008_v6  ;;  %v2014_v19 = vrot.slane %v2013_v4, 4  ;;  %v1113_v54 = vld [vmem:[#allocation2 + $0xe4] sm:$0xf]  ;;  %v3435_v3 = vld [vmem:[#allocation2 + $0x7c] sm:$0xf] }
  0xfc   : > { %v1984_v7 = vrot.slane %v1982_v55, 5  ;;  %v1988_v11 = vrot.slane %v1986_v56, 4  ;;  %v1994_v13 = vrot.slane %v1992_v59, 5  ;;  %v3696_v27 = vshrl.u32 %v3431_v5, 16  ;;  %v3437_v26 = vld [vmem:[#allocation2 + $0x84] sm:$0xf] }
  0xfd   : > { %8434 = vmatmul.mubr.bf16.gmra.mrb[28].mxu0 %v9768_v8  ;;  %v3699_v29 = vshll.u32 %v3431_v5, 16  ;;  %v2019_v30 = vsel %vm11375_vm6, %v2014_v19, %v2018_v15  ;;  %v4682_v31 = vsel %vm11479_vm13, %v9801_v18, %v4681_v20  ;;  %v4683_v10 = vrot.slane %v4681_v20, 4  ;;  %v1117_v5 = vld [vmem:[#allocation2 + $0xec] sm:$0x1]  ;;  %v3436_v19 = vld [vmem:[#allocation2 + $0x80] sm:$0x1] }
  0xfe   : > { %v1985_v22 = vsel %vm11375_vm6, %v1980_v0, %v1984_v7  ;;  %v1989_v23 = vor.u32 %v1988_v11, %v1984_v7  ;;  %v3705_v32 = vshll.u32 %v3432_v14, 16  ;;  %v9649_v36 = vcombine.low %v2009_v25, %v2019_v30  ;;  %v11002_v30 = vld [vmem:[#allocation2 + $0xd8] sm:$0xff]  }
  0xff   : > { %v3698_v16 = vrot.slane %v3696_v27, 4  ;;  %v3701_v37 = vrot.slane %v3699_v29, 5  ;;  %v4685_v58 = vsel %vm11479_vm13, %v4683_v10, %v4684_v21  ;;  %v3709_v44 = vshrl.u32 %v3432_v14, 16  ;;  %v322_v27 = vld [vmem:[%s11354_s28 + $0x88] sm:$0xf] }
 0x100   : > { %v1990_v35 = vrot.slane %v1989_v23, 4  ;;  %v3707_v62 = vrot.slane %v3705_v32, 5  ;;  %v3715_v9 = vshll.u32 %v3433_v24, 16  ;;  %v9833_v39 = vcombine.low %v4682_v31, %v4685_v58  ;;  %v323_v29 = vld [vmem:[%s11354_s28 + $0x8c] sm:$0xf] }
 0x101   : > { %v3702_v6 = vor.u32 %v3701_v37, %v3698_v16  ;;  %v628_v41 = vshrl.u32 %v320_v33, 16  ;;  %v3711_v12 = vrot.slane %v3709_v44, 4  ;;  %v631_v48 = vshll.u32 %v320_v33, 16  ;;  %v4463_v58 = vld [vmem:[#allocation2 + $0x8c] sm:$0x1] }
 0x102   : > { %v1995_v28 = vsel %vm11375_vm6, %v1990_v35, %v1994_v13  ;;  %v3717_v47 = vrot.slane %v3715_v9, 5  ;;  %8441 = vmatprep.mubr.bf16.mxu0 %v9833_v39  ;;  %v636_v18 = vshrl.u32 %v321_v34, 16  ;;  %v639_v50 = vshll.u32 %v321_v34, 16  ;;  %v4461_v34 = vld [vmem:[#allocation2 + $0x84] sm:$0xe] }
 0x103   : > { %v9648_v45 = vcombine.low %v1985_v22, %v1995_v28  ;;  %v3703_v49 = vrot.slane %v3702_v6, 4  ;;  %v630_v53 = vrot.slane %v628_v41, 7  ;;  %v3712_v52 = vor.u32 %v3711_v12, %v3707_v62  ;;  %v4462_v35 = vld [vmem:[#allocation2 + $0x88] sm:$0xf] }
 0x104   : > { %v9802_v55 = vrot.slane %v4458_v2, 9  ;;  %v4688_v56 = vrot.slane %v4459_v17, 5  ;;  %v4691_v59 = vrot.slane %v4460_v42, 5  ;;  %v638_v8 = vrot.slane %v636_v18, 7 }
 0x105   : > { %7919 = vmatprep.mubr.bf16.mxu1 %v9648_v45  ;;  %v3708_v60 = vsel %vm11375_vm6, %v3703_v49, %v3707_v62  ;;  %v633_v63 = vor.u32 %v631_v48, %v630_v53  ;;  %v634_v0 = vrot.slane %v630_v53, 4  ;;  %v3713_v4 = vrot.slane %v3712_v52, 4  ;;  %v1124_v49 = vld [vmem:[#allocation2 + $0xf8] sm:$0x1] }
 0x106   : > { %7920 = vmatmul.mubr.bf16.gmra.mrb[60].mxu1 %v11001_v38  ;;  %v4689_v7 = vsel %vm11479_vm13, %v9802_v55, %v4688_v56  ;;  %v4690_v11 = vrot.slane %v4688_v56, 4  ;;  %v3720_v13 = vshrl.u32 %v3434_v43, 16  ;;  %v641_v15 = vor.u32 %v639_v50, %v638_v8 }
 0x107   : > { %7927 = vmatprep.mubr.bf16.mxu1 %v9649_v36  ;;  %v643_v14 = vrot.slane %v638_v8, 4  ;;  %v1114_v25 = vsel %vm11397_vm9, %v633_v63, %v1113_v54  ;;  %v3723_v20 = vshll.u32 %v3434_v43, 16  ;;  %v3718_v21 = vsel %vm11375_vm6, %v3713_v4, %v3717_v47  ;;  %v1120_v43 = vld [vmem:[#allocation2 + $0xf0] sm:$0xf] }
 0x108   : > { %1115 = vst [vmem:[#allocation2 + $0xe4] sm:$0xf] %v1114_v25  ;;  %v4692_v22 = vsel %vm11479_vm13, %v4690_v11, %v4691_v59  ;;  %v3722_v23 = vrot.slane %v3720_v13, 4  ;;  %v3729_v24 = vshll.u32 %v3435_v3, 16  ;;  %v9769_v31 = vcombine.low %v3708_v60, %v3718_v21 }
 0x109   : > { %v642_v10 = vsel %vm11388_vm8, %v634_v0, %v641_v15  ;;  %v1118_v32 = vsel %vm11414_vm10, %v643_v14, %v1117_v5  ;;  %v9834_v33 = vcombine.low %v4689_v7, %v4692_v22  ;;  %v3725_v36 = vrot.slane %v3723_v20, 5 }
 0x10a   : > { %1116 = vst [vmem:[#allocation2 + $0xe8] sm:$0xf] %v642_v10  ;;  %1119 = vst [vmem:[#allocation2 + $0xec] sm:$0x1] %v1118_v32  ;;  %v3731_v16 = vrot.slane %v3729_v24, 5  ;;  %v3733_v37 = vshrl.u32 %v3435_v3, 16  ;;  %8442 = vmatmul.mubr.bf16.gmra.mrb[32].mxu0 %v9769_v31 }
 0x10b   : > { %v3739_v2 = vshll.u32 %v3436_v19, 16  ;;  %v645_v62 = vshrl.u32 %v322_v27, 16  ;;  %v648_v44 = vshll.u32 %v322_v27, 16  ;;  %v653_v9 = vshrl.u32 %v323_v29, 16  ;;  %8449 = vmatprep.mubr.bf16.mxu0 %v9834_v33  ;;  %v3438_v19 = vld [vmem:[#allocation2 + $0x88] sm:$0xf] }
 0x10c   : > { %v656_v17 = vshll.u32 %v323_v29, 16  ;;  %v3726_v28 = vor.u32 %v3725_v36, %v3722_v23  ;;  %v3735_v38 = vrot.slane %v3733_v37, 4  ;;  %v9803_v6 = vrot.slane %v4461_v34, 9  ;;  %v3439_v31 = vld [vmem:[#allocation2 + $0x8c] sm:$0x1] }
 0x10d   : > { %v3741_v39 = vrot.slane %v3739_v2, 5  ;;  %v647_v41 = vrot.slane %v645_v62, 7  ;;  %v655_v42 = vrot.slane %v653_v9, 7  ;;  %v4695_v45 = vrot.slane %v4462_v35, 5  ;;  %v324_v10 = vld [vmem:[%s11354_s28 + $0x90] sm:$0xf] }
 0x10e   : > { %7928 = vmatmul.mubr.bf16.gmra.mrb[64].mxu1 %v11002_v30  ;;  %v4698_v12 = vrot.slane %v4463_v58, 5  ;;  %v3727_v47 = vrot.slane %v3726_v28, 4  ;;  %v3736_v48 = vor.u32 %v3735_v38, %v3731_v16  ;;  %v3744_v53 = vshrl.u32 %v3437_v26, 16 }
 0x10f   : > { %v3747_v18 = vshll.u32 %v3437_v26, 16  ;;  %v1564_v50 = vld [vmem:[#allocation2 + $0xe4] sm:$0xf]  ;;  %v650_v52 = vor.u32 %v648_v44, %v647_v41  ;;  %v651_v54 = vrot.slane %v647_v41, 4  ;;  %v658_v55 = vor.u32 %v656_v17, %v655_v42 }
 0x110   : > { %v660_v56 = vrot.slane %v655_v42, 4  ;;  %v2021_v59 = vshrl.u32 %v1564_v50, 16  ;;  %v2024_v60 = vshll.u32 %v1564_v50, 16  ;;  %v3732_v63 = vsel %vm11375_vm6, %v3727_v47, %v3731_v16  ;;  %v325_v42 = vld [vmem:[%s11354_s28 + $0x94] sm:$0xf] }
 0x111   : > { %v3737_v0 = vrot.slane %v3736_v48, 4  ;;  %v1565_v8 = vld [vmem:[#allocation2 + $0xe8] sm:$0xf]  ;;  %v1566_v3 = vld [vmem:[#allocation2 + $0xec] sm:$0x1]  ;;  %v659_v4 = vsel %vm11388_vm8, %v651_v54, %v658_v55  ;;  %v1121_v5 = vsel %vm11397_vm9, %v650_v52, %v1120_v43  ;;  %v4696_v11 = vsel %vm11479_vm13, %v9803_v6, %v4695_v45 }
 0x112   : > { %v1125_v7 = vsel %vm11414_vm10, %v660_v56, %v1124_v49  ;;  %v2023_v13 = vrot.slane %v2021_v59, 4  ;;  %v2026_v15 = vrot.slane %v2024_v60, 5  ;;  %v2030_v14 = vshll.u32 %v1565_v8, 16  ;;  %1122 = vst [vmem:[#allocation2 + $0xf0] sm:$0xf] %v1121_v5 }
 0x113   : > { %v2034_v25 = vshrl.u32 %v1565_v8, 16  ;;  %1123 = vst [vmem:[#allocation2 + $0xf4] sm:$0xf] %v659_v4  ;;  %1126 = vst [vmem:[#allocation2 + $0xf8] sm:$0x1] %v1125_v7  ;;  %v2040_v20 = vshll.u32 %v1566_v3, 16  ;;  %v3742_v21 = vsel %vm11375_vm6, %v3737_v0, %v3741_v39 }
 0x114   : > { %v4697_v22 = vrot.slane %v4695_v45, 4  ;;  %v3746_v23 = vrot.slane %v3744_v53, 4  ;;  %v2027_v24 = vor.u32 %v2026_v15, %v2023_v13  ;;  %v2032_v27 = vrot.slane %v2030_v14, 5  ;;  %v11004_v45 = vld [vmem:[#allocation2 + $0xe4] sm:$0xff]   ;;  %v4464_v49 = vld [vmem:[#allocation2 + $0x90] sm:$0xe] }
 0x115   : > { %v2036_v29 = vrot.slane %v2034_v25, 4  ;;  %v9770_v30 = vcombine.low %v3732_v63, %v3742_v21  ;;  %v2042_v32 = vrot.slane %v2040_v20, 5  ;;  %v3749_v34 = vrot.slane %v3747_v18, 5  ;;  %v4465_v60 = vld [vmem:[#allocation2 + $0x94] sm:$0xf]  ;;  %v11018_v63 = vld [vmem:[%s13535_s1 + $0x1c8] sm:$0xff]  }
 0x116   : > { %v4699_v33 = vsel %vm11479_vm13, %v4697_v22, %v4698_v12  ;;  %v3753_v35 = vshll.u32 %v3438_v19, 16  ;;  %v2028_v36 = vrot.slane %v2027_v24, 4  ;;  %v3757_v2 = vshrl.u32 %v3438_v19, 16  ;;  %v1127_v15 = vld [vmem:[#allocation2 + $0xfc] sm:$0xf]  ;;  %8653 = vmatpush1.bf16.msra.mxu0 %v11018_v63 }
 0x117   : > { %v2037_v16 = vor.u32 %v2036_v29, %v2032_v27  ;;  %8450 = vmatmul.mubr.bf16.gmra.mrb[36].mxu0 %v9770_v30  ;;  %v9835_v37 = vcombine.low %v4696_v11, %v4699_v33  ;;  %v3750_v58 = vor.u32 %v3749_v34, %v3746_v23  ;;  %v3763_v44 = vshll.u32 %v3439_v31, 16  ;;  %v4466_v19 = vld [vmem:[#allocation2 + $0x98] sm:$0x1]  ;;  %8654 = vmatprep.subr.bf16.mxu0 %v11107_v1  ;;  %v3440_v29 = vld [vmem:[#allocation2 + $0x90] sm:$0xf] }
 0x118   : > { %v3755_v62 = vrot.slane %v3753_v35, 5  ;;  %v662_v9 = vshrl.u32 %v324_v10, 16  ;;  %v2033_v17 = vsel %vm11375_vm6, %v2028_v36, %v2032_v27  ;;  %v3759_v28 = vrot.slane %v3757_v2, 4  ;;  %v3441_v34 = vld [vmem:[#allocation2 + $0x94] sm:$0xf] }
 0x119   : > { %v2038_v26 = vrot.slane %v2037_v16, 4  ;;  %8457 = vmatprep.mubr.bf16.mxu0 %v9835_v37  ;;  %v665_v38 = vshll.u32 %v324_v10, 16  ;;  %v1567_v39 = vld [vmem:[#allocation2 + $0xf0] sm:$0xf]  ;;  %v3751_v52 = vrot.slane %v3750_v58, 4  ;;  %v3765_v4 = vrot.slane %v3763_v44, 5 }
 0x11a   : > { %v1568_v6 = vld [vmem:[#allocation2 + $0xf4] sm:$0xf]  ;;  %v1569_v41 = vld [vmem:[#allocation2 + $0xf8] sm:$0x1]  ;;  %v2045_v12 = vshrl.u32 %v1567_v39, 16  ;;  %v2048_v47 = vshll.u32 %v1567_v39, 16  ;;  %v3760_v59 = vor.u32 %v3759_v28, %v3755_v62 }
 0x11b   : > { %v2043_v43 = vsel %vm11375_vm6, %v2038_v26, %v2042_v32  ;;  %v2054_v48 = vshll.u32 %v1568_v6, 16  ;;  %v2058_v18 = vshrl.u32 %v1568_v6, 16  ;;  %v2064_v50 = vshll.u32 %v1569_v41, 16  ;;  %v1131_v32 = vld [vmem:[#allocation2 + $0x104] sm:$0x1]  ;;  %v11005_v44 = vld [vmem:[#allocation2 + $0xf0] sm:$0xff]  }
 0x11c   : > { %v9650_v53 = vcombine.low %v2033_v17, %v2043_v43  ;;  %v2047_v54 = vrot.slane %v2045_v12, 4  ;;  %v2050_v55 = vrot.slane %v2048_v47, 5  ;;  %v3756_v3 = vsel %vm11375_vm6, %v3751_v52, %v3755_v62  ;;  %v3442_v2 = vld [vmem:[#allocation2 + $0x98] sm:$0x1]  ;;  %v327_v28 = vld [vmem:[%s11354_s28 + $0x9c] sm:$0xf] }
 0x11d   : > { %v2056_v56 = vrot.slane %v2054_v48, 5  ;;  %v2060_v0 = vrot.slane %v2058_v18, 4  ;;  %v2066_v8 = vrot.slane %v2064_v50, 5  ;;  %v3761_v7 = vrot.slane %v3760_v59, 4  ;;  %v326_v58 = vld [vmem:[%s11354_s28 + $0x98] sm:$0xf] }
 0x11e   : > { %7935 = vmatprep.mubr.bf16.mxu1 %v9650_v53  ;;  %v2051_v5 = vor.u32 %v2050_v55, %v2047_v54  ;;  %v664_v11 = vrot.slane %v662_v9, 7  ;;  %v670_v13 = vshrl.u32 %v325_v42, 16  ;;  %v673_v25 = vshll.u32 %v325_v42, 16  ;;  %v4467_v42 = vld [vmem:[#allocation2 + $0x9c] sm:$0xe] }
 0x11f   : > { %7936 = vmatmul.mubr.bf16.gmra.mrb[68].mxu1 %v11004_v45  ;;  %v2061_v14 = vor.u32 %v2060_v0, %v2056_v56  ;;  %v9804_v20 = vrot.slane %v4464_v49, 9  ;;  %v4702_v21 = vrot.slane %v4465_v60, 5  ;;  %v3766_v23 = vsel %vm11375_vm6, %v3761_v7, %v3765_v4  ;;  %v11977_v43 = vld [vmem:[#allocation2 + $0xa0] sm:$0xf]  ;;  %v11983_v49 = vld [vmem:[#allocation2 + $0xa4] sm:$0x1] }
 0x120   : > { %v2052_v22 = vrot.slane %v2051_v5, 4  ;;  %v667_v24 = vor.u32 %v665_v38, %v664_v11  ;;  %v668_v27 = vrot.slane %v664_v11, 4  ;;  %v9771_v31 = vcombine.low %v3756_v3, %v3766_v23  ;;  %v3443_v63 = vld [vmem:[#allocation2 + $0x9c] sm:$0xf] }
 0x121   : > { %v2062_v30 = vrot.slane %v2061_v14, 4  ;;  %v672_v10 = vrot.slane %v670_v13, 7  ;;  %v4703_v33 = vsel %vm11479_vm13, %v9804_v20, %v4702_v21  ;;  %v4704_v16 = vrot.slane %v4702_v21, 4  ;;  %v1134_v13 = vld [vmem:[#allocation2 + $0x108] sm:$0xf] }
 0x122   : > { %v2057_v35 = vsel %vm11375_vm6, %v2052_v22, %v2056_v56  ;;  %v1128_v36 = vsel %vm11397_vm9, %v667_v24, %v1127_v15  ;;  %v4705_v37 = vrot.slane %v4466_v19, 5  ;;  %8458 = vmatmul.mubr.bf16.gmra.mrb[40].mxu0 %v9771_v31  ;;  %v3768_v26 = vshrl.u32 %v3440_v29, 16  ;;  %v11985_v53 = vpop.f32.mrb[0].mxu1 }
 0x123   : > { %v2067_v62 = vsel %vm11375_vm6, %v2062_v30, %v2066_v8  ;;  %v675_v9 = vor.u32 %v673_v25, %v672_v10  ;;  %v677_v17 = vrot.slane %v672_v10, 4  ;;  %1129 = vst [vmem:[#allocation2 + $0xfc] sm:$0xf] %v1128_v36  ;;  %v3771_v6 = vshll.u32 %v3440_v29, 16  ;;  %v7803_v5 = vpop.f32.mrb[1].mxu1 }
 0x124   : > { %v9651_v38 = vcombine.low %v2057_v35, %v2067_v62  ;;  %v4706_v39 = vsel %vm11479_vm13, %v4704_v16, %v4705_v37  ;;  %v3777_v41 = vshll.u32 %v3441_v34, 16  ;;  %v3770_v48 = vrot.slane %v3768_v26, 4  ;;  %v11989_v29 = vpop.f32.mrb[2].mxu1 }
 0x125   : > { %v676_v45 = vsel %vm11388_vm8, %v668_v27, %v675_v9  ;;  %v1132_v12 = vsel %vm11414_vm10, %v677_v17, %v1131_v32  ;;  %v9836_v47 = vcombine.low %v4703_v33, %v4706_v39  ;;  %v3773_v18 = vrot.slane %v3771_v6, 5  ;;  %v1138_v33 = vld [vmem:[#allocation2 + $0x110] sm:$0x1]  ;;  %v3445_v6 = vld [vmem:[#allocation2 + $0xa4] sm:$0x1] }
 0x126   : > { %7943 = vmatprep.mubr.bf16.mxu1 %v9651_v38  ;;  %1130 = vst [vmem:[#allocation2 + $0x100] sm:$0xf] %v676_v45  ;;  %1133 = vst [vmem:[#allocation2 + $0x104] sm:$0x1] %v1132_v12  ;;  %v3779_v50 = vrot.slane %v3777_v41, 5  ;;  %v3781_v52 = vshrl.u32 %v3441_v34, 16 }
 0x127   : > { %v3787_v54 = vshll.u32 %v3442_v2, 16  ;;  %7944 = vmatmul.mubr.bf16.gmra.mrb[72].mxu1 %v11005_v44  ;;  %8465 = vmatprep.mubr.bf16.mxu0 %v9836_v47  ;;  %v679_v55 = vshrl.u32 %v326_v58, 16  ;;  %v682_v56 = vshll.u32 %v326_v58, 16  ;;  %v687_v59 = vshrl.u32 %v327_v28, 16  ;;  %v3444_v34 = vld [vmem:[#allocation2 + $0xa0] sm:$0xf] }
 0x128   : > { %v690_v60 = vshll.u32 %v327_v28, 16  ;;  %v3774_v0 = vor.u32 %v3773_v18, %v3770_v48  ;;  %v3783_v8 = vrot.slane %v3781_v52, 4  ;;  %v9805_v4 = vrot.slane %v4467_v42, 9  ;;  %v328_v18 = vld [vmem:[%s11354_s28 + $0xa0] sm:$0xf] }
 0x129   : > { %v3789_v3 = vrot.slane %v3787_v54, 5  ;;  %v681_v7 = vrot.slane %v679_v55, 7  ;;  %v689_v11 = vrot.slane %v687_v59, 7  ;;  %v4709_v15 = vrot.slane %v11977_v43, 5 }
 0x12a   : > { %v4712_v14 = vrot.slane %v11983_v49, 5  ;;  %v1570_v25 = vld [vmem:[#allocation2 + $0xfc] sm:$0xf]  ;;  %v3775_v19 = vrot.slane %v3774_v0, 4  ;;  %v3784_v20 = vor.u32 %v3783_v8, %v3779_v50  ;;  %v3792_v21 = vshrl.u32 %v3443_v63, 16 }
 0x12b   : > { %v2069_v22 = vshrl.u32 %v1570_v25, 16  ;;  %v2072_v23 = vshll.u32 %v1570_v25, 16  ;;  %v684_v24 = vor.u32 %v682_v56, %v681_v7  ;;  %v685_v27 = vrot.slane %v681_v7, 4  ;;  %v12007_v56 = vld [vmem:[%s11354_s28 + $0xa4] sm:$0xf] }
 0x12c   : > { %v3780_v30 = vsel %vm11375_vm6, %v3775_v19, %v3779_v50  ;;  %v3785_v31 = vrot.slane %v3784_v20, 4  ;;  %v692_v10 = vor.u32 %v690_v60, %v689_v11  ;;  %v694_v32 = vrot.slane %v689_v11, 4 }
 0x12d   : > { %v1571_v35 = vld [vmem:[#allocation2 + $0x100] sm:$0xf]  ;;  %v1572_v36 = vld [vmem:[#allocation2 + $0x104] sm:$0x1]  ;;  %v2071_v16 = vrot.slane %v2069_v22, 4  ;;  %v2074_v37 = vrot.slane %v2072_v23, 5  ;;  %v1135_v2 = vsel %vm11397_vm9, %v684_v24, %v1134_v13  ;;  %v4710_v58 = vsel %vm11479_vm13, %v9805_v4, %v4709_v15 }
 0x12e   : > { %v2078_v62 = vshll.u32 %v1571_v35, 16  ;;  %v2082_v44 = vshrl.u32 %v1571_v35, 16  ;;  %v2088_v9 = vshll.u32 %v1572_v36, 16  ;;  %v3790_v17 = vsel %vm11375_vm6, %v3785_v31, %v3789_v3  ;;  %1136 = vst [vmem:[#allocation2 + $0x108] sm:$0xf] %v1135_v2  ;;  %v11007_v25 = vld [vmem:[#allocation2 + $0xfc] sm:$0xff]  }
 0x12f   : > { %v2075_v26 = vor.u32 %v2074_v37, %v2071_v16  ;;  %v9772_v28 = vcombine.low %v3780_v30, %v3790_v17  ;;  %v693_v38 = vsel %vm11388_vm8, %v685_v27, %v692_v10  ;;  %v1139_v39 = vsel %vm11414_vm10, %v694_v32, %v1138_v33  ;;  %v1141_v32 = vld [vmem:[#allocation2 + $0x114] sm:$0xf]  ;;  %v4470_v33 = vld [vmem:[#allocation2 + $0xa8] sm:$0xe]  ;;  %v4471_v2 = vld [vmem:[#allocation2 + $0xac] sm:$0xf] }
 0x130   : > { %v2080_v41 = vrot.slane %v2078_v62, 5  ;;  %v2084_v42 = vrot.slane %v2082_v44, 4  ;;  %v2090_v43 = vrot.slane %v2088_v9, 5  ;;  %1137 = vst [vmem:[#allocation2 + $0x10c] sm:$0xf] %v693_v38  ;;  %v4711_v45 = vrot.slane %v4709_v15, 4 }
 0x131   : > { %1140 = vst [vmem:[#allocation2 + $0x110] sm:$0x1] %v1139_v39  ;;  %v2076_v12 = vrot.slane %v2075_v26, 4  ;;  %8466 = vmatmul.mubr.bf16.gmra.mrb[44].mxu0 %v9772_v28  ;;  %v3794_v47 = vrot.slane %v3792_v21, 4  ;;  %v3795_v48 = vshll.u32 %v3443_v63, 16  ;;  %v3801_v49 = vshll.u32 %v3444_v34, 16 }
 0x132   : > { %v2085_v50 = vor.u32 %v2084_v42, %v2080_v41  ;;  %v4713_v52 = vsel %vm11479_vm13, %v4711_v45, %v4712_v14  ;;  %v3805_v54 = vshrl.u32 %v3444_v34, 16  ;;  %v3811_v55 = vshll.u32 %v3445_v6, 16  ;;  %v7806_v34 = vpop.f32.mrb[3].mxu1  ;;  %v4472_v17 = vld [vmem:[#allocation2 + $0xb0] sm:$0x1] }
 0x133   : > { %v2081_v59 = vsel %vm11375_vm6, %v2076_v12, %v2080_v41  ;;  %v9837_v60 = vcombine.low %v4710_v58, %v4713_v52  ;;  %v3797_v0 = vrot.slane %v3795_v48, 5  ;;  %v3803_v8 = vrot.slane %v3801_v49, 5  ;;  %v12014_v26 = vpop.f32.mrb[4].mxu1  ;;  %v3446_v48 = vld [vmem:[#allocation2 + $0xa8] sm:$0xf] }
 0x134   : > { %v2086_v3 = vrot.slane %v2085_v50, 4  ;;  %v3807_v4 = vrot.slane %v3805_v54, 4  ;;  %v3813_v5 = vrot.slane %v3811_v55, 5  ;;  %v696_v63 = vshrl.u32 %v328_v18, 16  ;;  %v7811_v41 = vpop.f32.mrb[5].mxu1 }
 0x135   : > { %v1573_v7 = vld [vmem:[#allocation2 + $0x108] sm:$0xf]  ;;  %8473 = vmatprep.mubr.bf16.mxu0 %v9837_v60  ;;  %v3798_v11 = vor.u32 %v3797_v0, %v3794_v47  ;;  %v699_v13 = vshll.u32 %v328_v18, 16  ;;  %v704_v15 = vshrl.u32 %v12007_v56, 16  ;;  %v1145_v47 = vld [vmem:[#allocation2 + $0x11c] sm:$0x1] }
 0x136   : > { %v2091_v14 = vsel %vm11375_vm6, %v2086_v3, %v2090_v43  ;;  %v2093_v19 = vshrl.u32 %v1573_v7, 16  ;;  %v2096_v20 = vshll.u32 %v1573_v7, 16  ;;  %v3808_v21 = vor.u32 %v3807_v4, %v3803_v8  ;;  %v3447_v54 = vld [vmem:[#allocation2 + $0xac] sm:$0xf]  ;;  %v12023_v55 = vpop.f32.mrb[6].mxu1 }
 0x137   : > { %v9652_v22 = vcombine.low %v2081_v59, %v2091_v14  ;;  %v1574_v23 = vld [vmem:[#allocation2 + $0x10c] sm:$0xf]  ;;  %v3799_v36 = vrot.slane %v3798_v11, 4  ;;  %v698_v37 = vrot.slane %v696_v63, 7  ;;  %v706_v9 = vrot.slane %v704_v15, 7  ;;  %v7814_v3 = vpop.f32.mrb[7].mxu1 }
 0x138   : > { %v1575_v24 = vld [vmem:[#allocation2 + $0x110] sm:$0x1]  ;;  %v2095_v27 = vrot.slane %v2093_v19, 4  ;;  %v2098_v30 = vrot.slane %v2096_v20, 5  ;;  %v2102_v31 = vshll.u32 %v1574_v23, 16  ;;  %v2106_v10 = vshrl.u32 %v1574_v23, 16 }
 0x139   : > { %7951 = vmatprep.mubr.bf16.mxu1 %v9652_v22  ;;  %v2112_v35 = vshll.u32 %v1575_v24, 16  ;;  %v3809_v16 = vrot.slane %v3808_v21, 4  ;;  %v3804_v38 = vsel %vm11375_vm6, %v3799_v36, %v3803_v8  ;;  %v701_v6 = vor.u32 %v699_v13, %v698_v37  ;;  %v11008_v13 = vld [vmem:[#allocation2 + $0x108] sm:$0xff]   ;;  %v4473_v41 = vld [vmem:[#allocation2 + $0xb4] sm:$0xe] }
 0x13a   : > { %7952 = vmatmul.mubr.bf16.gmra.mrb[76].mxu1 %v11007_v25  ;;  %v2099_v58 = vor.u32 %v2098_v30, %v2095_v27  ;;  %v2104_v62 = vrot.slane %v2102_v31, 5  ;;  %v2108_v44 = vrot.slane %v2106_v10, 4  ;;  %v702_v12 = vrot.slane %v698_v37, 4  ;;  %v330_v19 = vld [vmem:[%s11354_s28 + $0xa8] sm:$0xf] }
 0x13b   : > { %v2114_v28 = vrot.slane %v2112_v35, 5  ;;  %v3814_v39 = vsel %vm11375_vm6, %v3809_v16, %v3813_v5  ;;  %v707_v49 = vshll.u32 %v12007_v56, 16  ;;  %v711_v18 = vrot.slane %v706_v9, 4  ;;  %v3448_v5 = vld [vmem:[#allocation2 + $0xb0] sm:$0x1] }
 0x13c   : > { %v2100_v42 = vrot.slane %v2099_v58, 4  ;;  %v2109_v43 = vor.u32 %v2108_v44, %v2104_v62  ;;  %v9773_v45 = vcombine.low %v3804_v38, %v3814_v39  ;;  %v1142_v50 = vsel %vm11397_vm9, %v701_v6, %v1141_v32  ;;  %v331_v24 = vld [vmem:[%s11354_s28 + $0xac] sm:$0xf]  ;;  %v11021_v32 = vld [vmem:[%s13535_s1 + $0x1d0] sm:$0xff]   ;;  %v1148_v58 = vld [vmem:[#allocation2 + $0x120] sm:$0xf] }
 0x13d   : > { %v9806_v52 = vrot.slane %v4470_v33, 9  ;;  %1143 = vst [vmem:[#allocation2 + $0x114] sm:$0xf] %v1142_v50  ;;  %v4716_v0 = vrot.slane %v4471_v2, 5  ;;  %v4719_v8 = vrot.slane %v4472_v17, 5  ;;  %v709_v4 = vor.u32 %v707_v49, %v706_v9  ;;  %8655 = vmatpush1.bf16.msra.mxu0 %v11021_v32 }
 0x13e   : > { %v2105_v59 = vsel %vm11375_vm6, %v2100_v42, %v2104_v62  ;;  %v2110_v60 = vrot.slane %v2109_v43, 4  ;;  %8474 = vmatmul.mubr.bf16.gmra.mrb[48].mxu0 %v9773_v45  ;;  %v1146_v56 = vsel %vm11414_vm10, %v711_v18, %v1145_v47  ;;  %v3816_v63 = vshrl.u32 %v3446_v48, 16  ;;  %8656 = vmatprep.subr.bf16.mxu0 %v11107_v1  ;;  %v1152_v6 = vld [vmem:[#allocation2 + $0x128] sm:$0x1]  ;;  %v12043_v42 = vpop.f32.mrb[8].mxu1 }
 0x13f   : > { %v3819_v7 = vshll.u32 %v3446_v48, 16  ;;  %1147 = vst [vmem:[#allocation2 + $0x11c] sm:$0x1] %v1146_v56  ;;  %v4717_v15 = vsel %vm11479_vm13, %v9806_v52, %v4716_v0  ;;  %v4718_v14 = vrot.slane %v4716_v0, 4  ;;  %v3825_v25 = vshll.u32 %v3447_v54, 16 }
 0x140   : > { %v2115_v11 = vsel %vm11375_vm6, %v2110_v60, %v2114_v28  ;;  %v710_v21 = vsel %vm11388_vm8, %v702_v12, %v709_v4  ;;  %v3818_v22 = vrot.slane %v3816_v63, 4  ;;  %v3829_v31 = vshrl.u32 %v3447_v54, 16  ;;  %v4474_v49 = vld [vmem:[#allocation2 + $0xb8] sm:$0xf] }
 0x141   : > { %v9653_v20 = vcombine.low %v2105_v59, %v2115_v11  ;;  %v3821_v23 = vrot.slane %v3819_v7, 5  ;;  %1144 = vst [vmem:[#allocation2 + $0x118] sm:$0xf] %v710_v21  ;;  %v4720_v27 = vsel %vm11479_vm13, %v4718_v14, %v4719_v8  ;;  %v3827_v30 = vrot.slane %v3825_v25, 5  ;;  %v4475_v59 = vld [vmem:[#allocation2 + $0xbc] sm:$0x1] }
 0x142   : > { %v3835_v10 = vshll.u32 %v3448_v5, 16  ;;  %v9838_v33 = vcombine.low %v4717_v15, %v4720_v27  ;;  %v713_v35 = vshrl.u32 %v330_v19, 16  ;;  %v716_v36 = vshll.u32 %v330_v19, 16  ;;  %v3449_v11 = vld [vmem:[#allocation2 + $0xb4] sm:$0xf] }
 0x143   : > { %7959 = vmatprep.mubr.bf16.mxu1 %v9653_v20  ;;  %v3822_v34 = vor.u32 %v3821_v23, %v3818_v22  ;;  %v3831_v16 = vrot.slane %v3829_v31, 4  ;;  %v721_v37 = vshrl.u32 %v331_v24, 16  ;;  %v724_v2 = vshll.u32 %v331_v24, 16  ;;  %v3450_v20 = vld [vmem:[#allocation2 + $0xb8] sm:$0xf] }
 0x144   : > { %7960 = vmatmul.mubr.bf16.gmra.mrb[80].mxu1 %v11008_v13  ;;  %v1576_v62 = vld [vmem:[#allocation2 + $0x114] sm:$0xf]  ;;  %8481 = vmatprep.mubr.bf16.mxu0 %v9838_v33  ;;  %v715_v9 = vrot.slane %v713_v35, 7  ;;  %v3837_v12 = vrot.slane %v3835_v10, 5  ;;  %v9807_v4 = vrot.slane %v4473_v41, 9  ;;  %v7819_v13 = vpop.f32.mrb[9].mxu1 }
 0x145   : > { %v3823_v44 = vrot.slane %v3822_v34, 4  ;;  %v2117_v17 = vshrl.u32 %v1576_v62, 16  ;;  %v2120_v28 = vshll.u32 %v1576_v62, 16  ;;  %v3832_v38 = vor.u32 %v3831_v16, %v3827_v30  ;;  %v12055_v21 = vpop.f32.mrb[10].mxu1  ;;  %v333_v13 = vld [vmem:[%s11354_s28 + $0xb4] sm:$0xf] }
 0x146   : > { %v723_v39 = vrot.slane %v721_v37, 7  ;;  %v1578_v43 = vld [vmem:[#allocation2 + $0x11c] sm:$0x1]  ;;  %v718_v47 = vor.u32 %v716_v36, %v715_v9  ;;  %v719_v48 = vrot.slane %v715_v9, 4  ;;  %v4723_v19 = vrot.slane %v4474_v49, 5  ;;  %v7822_v31 = vpop.f32.mrb[11].mxu1 }
 0x147   : > { %v3828_v45 = vsel %vm11375_vm6, %v3823_v44, %v3827_v30  ;;  %v2119_v18 = vrot.slane %v2117_v17, 4  ;;  %v2122_v50 = vrot.slane %v2120_v28, 5  ;;  %v2136_v52 = vshll.u32 %v1578_v43, 16  ;;  %v3451_v30 = vld [vmem:[#allocation2 + $0xbc] sm:$0x1]  ;;  %v12059_v35 = vpop.f32.mrb[12].mxu1 }
 0x148   : > { %v3833_v54 = vrot.slane %v3832_v38, 4  ;;  %v1577_v60 = vld [vmem:[#allocation2 + $0x118] sm:$0xf]  ;;  %v726_v0 = vor.u32 %v724_v2, %v723_v39  ;;  %v728_v8 = vrot.slane %v723_v39, 4  ;;  %v1149_v3 = vsel %vm11397_vm9, %v718_v47, %v1148_v58  ;;  %v7827_v17 = vpop.f32.mrb[13].mxu1 }
 0x149   : > { %v2123_v56 = vor.u32 %v2122_v50, %v2119_v18  ;;  %v2126_v5 = vshll.u32 %v1577_v60, 16  ;;  %v2130_v63 = vshrl.u32 %v1577_v60, 16  ;;  %v2138_v7 = vrot.slane %v2136_v52, 5  ;;  %1150 = vst [vmem:[#allocation2 + $0x120] sm:$0xf] %v1149_v3  ;;  %v12065_v41 = vpop.f32.mrb[14].mxu1 }
 0x14a   : > { %v3838_v15 = vsel %vm11375_vm6, %v3833_v54, %v3837_v12  ;;  %v727_v14 = vsel %vm11388_vm8, %v719_v48, %v726_v0  ;;  %v1153_v25 = vsel %vm11414_vm10, %v728_v8, %v1152_v6  ;;  %v4724_v10 = vsel %vm11479_vm13, %v9807_v4, %v4723_v19  ;;  %v11010_v48 = vld [vmem:[#allocation2 + $0x114] sm:$0xff]   ;;  %v332_v52 = vld [vmem:[%s11354_s28 + $0xb0] sm:$0xf] }
 0x14b   : > { %v2124_v22 = vrot.slane %v2123_v56, 4  ;;  %v2128_v23 = vrot.slane %v2126_v5, 5  ;;  %v2132_v24 = vrot.slane %v2130_v63, 4  ;;  %v9774_v27 = vcombine.low %v3828_v45, %v3838_v15  ;;  %1151 = vst [vmem:[#allocation2 + $0x124] sm:$0xf] %v727_v14  ;;  %v7830_v5 = vpop.f32.mrb[15].mxu1 }
 0x14c   : > { %1154 = vst [vmem:[#allocation2 + $0x128] sm:$0x1] %v1153_v25  ;;  %v4725_v32 = vrot.slane %v4723_v19, 4  ;;  %v4726_v33 = vrot.slane %v4475_v59, 5  ;;  %v3840_v34 = vshrl.u32 %v3449_v11, 16  ;;  %v3843_v37 = vshll.u32 %v3449_v11, 16 }
 0x14d   : > { %v2129_v36 = vsel %vm11375_vm6, %v2124_v22, %v2128_v23  ;;  %v2133_v16 = vor.u32 %v2132_v24, %v2128_v23  ;;  %8482 = vmatmul.mubr.bf16.gmra.mrb[52].mxu0 %v9774_v27  ;;  %v3849_v2 = vshll.u32 %v3450_v20, 16  ;;  %v3853_v44 = vshrl.u32 %v3450_v20, 16  ;;  %v318_v22 = vld [vmem:[%s11354_s28 + $0x78] sm:$0xf]  ;;  %v12081_v17 = vpop.f32.mrb[16].mxu1 }
 0x14e   : > { %v4727_v58 = vsel %vm11479_vm13, %v4725_v32, %v4726_v33  ;;  %v3842_v62 = vrot.slane %v3840_v34, 4  ;;  %v3859_v9 = vshll.u32 %v3451_v30, 16  ;;  %v3845_v39 = vrot.slane %v3843_v37, 5  ;;  %v11024_v23 = vld [vmem:[%s13535_s1 + $0x1d8] sm:$0xff]  }
 0x14f   : > { %v2134_v28 = vrot.slane %v2133_v16, 4  ;;  %v9839_v38 = vcombine.low %v4724_v10, %v4727_v58  ;;  %v3851_v6 = vrot.slane %v3849_v2, 5  ;;  %v3855_v45 = vrot.slane %v3853_v44, 4  ;;  %v319_v16 = vld [vmem:[%s11354_s28 + $0x7c] sm:$0xf]  ;;  %8657 = vmatpush1.bf16.msra.mxu0 %v11024_v23 }
 0x150   : > { %v1579_v43 = vld [vmem:[#allocation2 + $0x120] sm:$0xf]  ;;  %v3861_v12 = vrot.slane %v3859_v9, 5  ;;  %v3846_v50 = vor.u32 %v3845_v39, %v3842_v62  ;;  %v730_v15 = vshrl.u32 %v332_v52, 16  ;;  %v733_v20 = vshll.u32 %v332_v52, 16  ;;  %8658 = vmatprep.subr.bf16.mxu0 %v11107_v1 }
 0x151   : > { %v2139_v47 = vsel %vm11375_vm6, %v2134_v28, %v2138_v7  ;;  %v2141_v49 = vshrl.u32 %v1579_v43, 16  ;;  %v2144_v18 = vshll.u32 %v1579_v43, 16  ;;  %8489 = vmatprep.mubr.bf16.mxu0 %v9839_v38  ;;  %v3856_v0 = vor.u32 %v3855_v45, %v3851_v6  ;;  %v1159_v62 = vld [vmem:[#allocation2 + $0x134] sm:$0x1]  ;;  %v334_v9 = vld [vmem:[%s11354_s28 + $0xb8] sm:$0xf] }
 0x152   : > { %v9654_v54 = vcombine.low %v2129_v36, %v2139_v47  ;;  %v1580_v59 = vld [vmem:[#allocation2 + $0x124] sm:$0xf]  ;;  %v3847_v7 = vrot.slane %v3846_v50, 4  ;;  %v732_v31 = vrot.slane %v730_v15, 7  ;;  %v738_v34 = vshrl.u32 %v333_v13, 16 }
 0x153   : > { %v1581_v60 = vld [vmem:[#allocation2 + $0x128] sm:$0x1]  ;;  %v2143_v8 = vrot.slane %v2141_v49, 4  ;;  %v2146_v3 = vrot.slane %v2144_v18, 5  ;;  %v2150_v4 = vshll.u32 %v1580_v59, 16  ;;  %v2154_v56 = vshrl.u32 %v1580_v59, 16 }
 0x154   : > { %7967 = vmatprep.mubr.bf16.mxu1 %v9654_v54  ;;  %v2160_v63 = vshll.u32 %v1581_v60, 16  ;;  %v3857_v11 = vrot.slane %v3856_v0, 4  ;;  %v3852_v27 = vsel %vm11375_vm6, %v3847_v7, %v3851_v6  ;;  %v1155_v36 = vld [vmem:[#allocation2 + $0x12c] sm:$0xf]  ;;  %v735_v37 = vor.u32 %v733_v20, %v732_v31  ;;  %v1106_v43 = vld [vmem:[#allocation2 + $0xc0] sm:$0xf] }
 0x155   : > { %7968 = vmatmul.mubr.bf16.gmra.mrb[84].mxu1 %v11010_v48  ;;  %v2147_v14 = vor.u32 %v2146_v3, %v2143_v8  ;;  %v2152_v25 = vrot.slane %v2150_v4, 5  ;;  %v2156_v19 = vrot.slane %v2154_v56, 4  ;;  %v736_v2 = vrot.slane %v732_v31, 4  ;;  %v335_v45 = vld [vmem:[%s11354_s28 + $0xbc] sm:$0xf]  ;;  %v11011_v47 = vld [vmem:[#allocation2 + $0x120] sm:$0xff]  }
 0x156   : > { %v2162_v24 = vrot.slane %v2160_v63, 5  ;;  %v3862_v30 = vsel %vm11375_vm6, %v3857_v11, %v3861_v12  ;;  %v741_v58 = vshll.u32 %v333_v13, 16  ;;  %v611_v44 = vshrl.u32 %v318_v22, 16  ;;  %v7835_v12 = vpop.f32.mrb[17].mxu1  ;;  %v1110_v0 = vld [vmem:[#allocation2 + $0xc8] sm:$0x1] }
 0x157   : > { %v2148_v10 = vrot.slane %v2147_v14, 4  ;;  %v2157_v32 = vor.u32 %v2156_v19, %v2152_v25  ;;  %v9775_v33 = vcombine.low %v3852_v27, %v3862_v30  ;;  %v740_v39 = vrot.slane %v738_v34, 7  ;;  %v12089_v52 = vpop.f32.mrb[18].mxu1  ;;  %v1162_v63 = vld [vmem:[#allocation2 + $0x138] sm:$0xf] }
 0x158   : > { %v614_v6 = vshll.u32 %v318_v22, 16  ;;  %v1156_v48 = vsel %vm11397_vm9, %v735_v37, %v1155_v36  ;;  %v613_v49 = vrot.slane %v611_v44, 7  ;;  %v619_v18 = vshrl.u32 %v319_v16, 16  ;;  %v4479_v7 = vld [vmem:[#allocation2 + $0xe4] sm:$0xe]  ;;  %v7838_v11 = vpop.f32.mrb[19].mxu1 }
 0x159   : > { %v2153_v28 = vsel %vm11375_vm6, %v2148_v10, %v2152_v25  ;;  %v2158_v38 = vrot.slane %v2157_v32, 4  ;;  %8490 = vmatmul.mubr.bf16.gmra.mrb[56].mxu0 %v9775_v33  ;;  %v622_v50 = vshll.u32 %v319_v16, 16  ;;  %v743_v59 = vor.u32 %v741_v58, %v740_v39  ;;  %1157 = vst [vmem:[#allocation2 + $0x12c] sm:$0xf] %v1156_v48  ;;  %v4480_v19 = vld [vmem:[#allocation2 + $0xe8] sm:$0xf] }
 0x15a   : > { %v745_v60 = vrot.slane %v740_v39, 4  ;;  %v747_v8 = vshrl.u32 %v334_v9, 16  ;;  %v616_v4 = vor.u32 %v614_v6, %v613_v49  ;;  %v617_v56 = vrot.slane %v613_v49, 4  ;;  %v4481_v20 = vld [vmem:[#allocation2 + $0xec] sm:$0x1] }
 0x15b   : > { %v2163_v54 = vsel %vm11375_vm6, %v2158_v38, %v2162_v24  ;;  %v621_v5 = vrot.slane %v619_v18, 7  ;;  %v744_v13 = vsel %vm11388_vm8, %v736_v2, %v743_v59  ;;  %v750_v25 = vshll.u32 %v334_v9, 16  ;;  %v3455_v30 = vld [vmem:[#allocation2 + $0xe4] sm:$0xf]  ;;  %v1166_v33 = vld [vmem:[#allocation2 + $0x140] sm:$0x1] }
 0x15c   : > { %v9655_v3 = vcombine.low %v2153_v28, %v2163_v54  ;;  %v1160_v15 = vsel %vm11414_vm10, %v745_v60, %v1159_v62  ;;  %v749_v14 = vrot.slane %v747_v8, 7  ;;  %1158 = vst [vmem:[#allocation2 + $0x130] sm:$0xf] %v744_v13  ;;  %v1107_v24 = vsel %vm11397_vm9, %v616_v4, %v1106_v43  ;;  %v12105_v12 = vld [vmem:[#allocation2 + $0xe8] sm:$0xf]  ;;  %v12115_v54 = vpop.f32.mrb[20].mxu1 }
 0x15d   : > { %1161 = vst [vmem:[#allocation2 + $0x134] sm:$0x1] %v1160_v15  ;;  %v624_v22 = vor.u32 %v622_v50, %v621_v5  ;;  %v626_v23 = vrot.slane %v621_v5, 4  ;;  %v755_v27 = vshrl.u32 %v335_v45, 16  ;;  %1108 = vst [vmem:[#allocation2 + $0xc0] sm:$0xf] %v1107_v24 }
 0x15e   : > { %7975 = vmatprep.mubr.bf16.mxu1 %v9655_v3  ;;  %v752_v31 = vor.u32 %v750_v25, %v749_v14  ;;  %v753_v10 = vrot.slane %v749_v14, 4  ;;  %v758_v32 = vshll.u32 %v335_v45, 16  ;;  %v9809_v34 = vrot.slane %v4479_v7, 9 }
 0x15f   : > { %7976 = vmatmul.mubr.bf16.gmra.mrb[88].mxu1 %v11011_v47  ;;  %v625_v36 = vsel %vm11388_vm8, %v617_v56, %v624_v22  ;;  %v1111_v16 = vsel %vm11414_vm10, %v626_v23, %v1110_v0  ;;  %v757_v37 = vrot.slane %v755_v27, 7  ;;  %v4737_v2 = vrot.slane %v4480_v19, 5 }
 0x160   : > { %1109 = vst [vmem:[#allocation2 + $0xc4] sm:$0xf] %v625_v36  ;;  %1112 = vst [vmem:[#allocation2 + $0xc8] sm:$0x1] %v1111_v16  ;;  %v1163_v58 = vsel %vm11397_vm9, %v752_v31, %v1162_v63  ;;  %v4740_v62 = vrot.slane %v4481_v20, 5  ;;  %v3888_v44 = vshrl.u32 %v3455_v30, 16 }
 0x161   : > { %v3891_v9 = vshll.u32 %v3455_v30, 16  ;;  %v1582_v28 = vld [vmem:[#allocation2 + $0x12c] sm:$0xf]  ;;  %v760_v38 = vor.u32 %v758_v32, %v757_v37  ;;  %v762_v39 = vrot.slane %v757_v37, 4  ;;  %1164 = vst [vmem:[#allocation2 + $0x138] sm:$0xf] %v1163_v58  ;;  %v12113_v50 = vsel %vm11479_vm13, %v9809_v34, %v4737_v2 }
 0x162   : > { %v4739_v6 = vrot.slane %v4737_v2, 4  ;;  %v2165_v43 = vshrl.u32 %v1582_v28, 16  ;;  %v2168_v45 = vshll.u32 %v1582_v28, 16  ;;  %v3890_v47 = vrot.slane %v3888_v44, 4  ;;  %v7843_v2 = vpop.f32.mrb[21].mxu1 }
 0x163   : > { %v3893_v48 = vrot.slane %v3891_v9, 5  ;;  %v761_v49 = vsel %vm11388_vm8, %v753_v10, %v760_v38  ;;  %v1167_v18 = vsel %vm11414_vm10, %v762_v39, %v1166_v33  ;;  %v1583_v59 = vld [vmem:[#allocation2 + $0x130] sm:$0xf]  ;;  %v3897_v11 = vshll.u32 %v12105_v12, 16 }
 0x164   : > { %v1584_v60 = vld [vmem:[#allocation2 + $0x134] sm:$0x1]  ;;  %v2167_v0 = vrot.slane %v2165_v43, 4  ;;  %v2170_v8 = vrot.slane %v2168_v45, 5  ;;  %1165 = vst [vmem:[#allocation2 + $0x13c] sm:$0xf] %v761_v49  ;;  %v12119_v3 = vsel %vm11479_vm13, %v4739_v6, %v4740_v62 }
 0x165   : > { %1168 = vst [vmem:[#allocation2 + $0x140] sm:$0x1] %v1167_v18  ;;  %v3894_v4 = vor.u32 %v3893_v48, %v3890_v47  ;;  %v2174_v56 = vshll.u32 %v1583_v59, 16  ;;  %v2178_v5 = vshrl.u32 %v1583_v59, 16  ;;  %v2184_v63 = vshll.u32 %v1584_v60, 16  ;;  %v11013_v47 = vld [vmem:[#allocation2 + $0x12c] sm:$0xff]  }
 0x166   : > { %v4476_v7 = vld [vmem:[#allocation2 + $0xc0] sm:$0xe]  ;;  %v2171_v13 = vor.u32 %v2170_v8, %v2167_v0  ;;  %v9841_v32 = vcombine.low %v12113_v50, %v12119_v3  ;;  %v338_v3 = vld [vmem:[%s11354_s28 + $0xc8] sm:$0xf] }
 0x167   : > { %v9808_v15 = vrot.slane %v4476_v7, 9  ;;  %v3452_v14 = vld [vmem:[#allocation2 + $0xc0] sm:$0xf]  ;;  %v12122_v25 = vrot.slane %v3894_v4, 4  ;;  %v2176_v19 = vrot.slane %v2174_v56, 5  ;;  %v2180_v20 = vrot.slane %v2178_v5, 4 }
 0x168   : > { %v2186_v22 = vrot.slane %v2184_v63, 5  ;;  %v4477_v23 = vld [vmem:[#allocation2 + $0xc4] sm:$0xf]  ;;  %v3864_v24 = vshrl.u32 %v3452_v14, 16  ;;  %v2172_v27 = vrot.slane %v2171_v13, 4  ;;  %v3867_v37 = vshll.u32 %v3452_v14, 16 }
 0x169   : > { %v4478_v30 = vld [vmem:[#allocation2 + $0xc8] sm:$0x1]  ;;  %v4730_v31 = vrot.slane %v4477_v23, 5  ;;  %v3453_v10 = vld [vmem:[#allocation2 + $0xc4] sm:$0xf]  ;;  %v2181_v33 = vor.u32 %v2180_v20, %v2176_v19  ;;  %v12134_v5 = vpop.f32.mrb[22].mxu1 }
 0x16a   : > { %v4733_v34 = vrot.slane %v4478_v30, 5  ;;  %v3454_v36 = vld [vmem:[#allocation2 + $0xc8] sm:$0x1]  ;;  %v3866_v16 = vrot.slane %v3864_v24, 4  ;;  %v2177_v58 = vsel %vm11375_vm6, %v2172_v27, %v2176_v19  ;;  %v3873_v9 = vshll.u32 %v3453_v10, 16  ;;  %v7846_v14 = vpop.f32.mrb[23].mxu1 }
 0x16b   : > { %v4731_v62 = vsel %vm11479_vm13, %v9808_v15, %v4730_v31  ;;  %v4732_v44 = vrot.slane %v4730_v31, 4  ;;  %v1585_v28 = vld [vmem:[#allocation2 + $0x138] sm:$0xf]  ;;  %v2182_v38 = vrot.slane %v2181_v33, 4  ;;  %v3869_v39 = vrot.slane %v3867_v37, 5 }
 0x16c   : > { %v3877_v6 = vshrl.u32 %v3453_v10, 16  ;;  %v3883_v43 = vshll.u32 %v3454_v36, 16  ;;  %v3875_v48 = vrot.slane %v3873_v9, 5  ;;  %v1586_v49 = vld [vmem:[#allocation2 + $0x13c] sm:$0xf]  ;;  %v2189_v18 = vshrl.u32 %v1585_v28, 16 }
 0x16d   : > { %v4734_v45 = vsel %vm11479_vm13, %v4732_v44, %v4733_v34  ;;  %v2192_v59 = vshll.u32 %v1585_v28, 16  ;;  %v2187_v60 = vsel %vm11375_vm6, %v2182_v38, %v2186_v22  ;;  %v3870_v8 = vor.u32 %v3869_v39, %v3866_v16  ;;  %v1587_v56 = vld [vmem:[#allocation2 + $0x140] sm:$0x1]  ;;  %v3457_v27 = vld [vmem:[#allocation2 + $0xec] sm:$0x1] }
 0x16e   : > { %v9840_v0 = vcombine.low %v4731_v62, %v4734_v45  ;;  %v3879_v4 = vrot.slane %v3877_v6, 4  ;;  %v9656_v63 = vcombine.low %v2177_v58, %v2187_v60  ;;  %v3885_v7 = vrot.slane %v3883_v43, 5  ;;  %v11027_v22 = vld [vmem:[%s13535_s1 + $0x1e0] sm:$0xff]   ;;  %v12146_v62 = vpop.f32.mrb[24].mxu1 }
 0x16f   : > { %v2191_v13 = vrot.slane %v2189_v18, 4  ;;  %v2194_v15 = vrot.slane %v2192_v59, 5  ;;  %v3871_v19 = vrot.slane %v3870_v8, 4  ;;  %v2198_v23 = vshll.u32 %v1586_v49, 16  ;;  %v336_v34 = vld [vmem:[%s11354_s28 + $0xc0] sm:$0xf]  ;;  %8659 = vmatpush1.bf16.msra.mxu0 %v11027_v22 }
 0x170   : > { %8497 = vmatprep.mubr.bf16.mxu0 %v9840_v0  ;;  %v3880_v20 = vor.u32 %v3879_v4, %v3875_v48  ;;  %v2202_v24 = vshrl.u32 %v1586_v49, 16  ;;  %7983 = vmatprep.mubr.bf16.mxu1 %v9656_v63  ;;  %v2208_v31 = vshll.u32 %v1587_v56, 16  ;;  %v3899_v10 = vrot.slane %v3897_v11, 5  ;;  %v11028_v36 = vld [vmem:[%s13535_s1 + $0x200] sm:$0xff]   ;;  %v7851_v38 = vpop.f32.mrb[25].mxu1 }
 0x171   : > { %v2195_v30 = vor.u32 %v2194_v15, %v2191_v13  ;;  %v3901_v33 = vshrl.u32 %v12105_v12, 16  ;;  %7984 = vmatmul.mubr.bf16.gmra.mrb[92].mxu1 %v11013_v47  ;;  %v3876_v16 = vsel %vm11375_vm6, %v3871_v19, %v3875_v48  ;;  %v2200_v2 = vrot.slane %v2198_v23, 5  ;;  %v337_v28 = vld [vmem:[%s11354_s28 + $0xc4] sm:$0xf]  ;;  %10421 = vmatprep.subr.bf16.mxu1 %v11028_v36  ;;  %v4482_v47 = vld [vmem:[#allocation2 + $0xf0] sm:$0xe] }
 0x172   : > { %v3881_v37 = vrot.slane %v3880_v20, 4  ;;  %v2204_v58 = vrot.slane %v2202_v24, 4  ;;  %v2210_v9 = vrot.slane %v2208_v31, 5  ;;  %v3900_v12 = vsel %vm11375_vm6, %v12122_v25, %v3899_v10  ;;  %8660 = vmatprep.subr.bf16.mxu0 %v11107_v1  ;;  %v4483_v48 = vld [vmem:[#allocation2 + $0xf4] sm:$0xf]  ;;  %v12157_v0 = vpop.f32.mrb[26].mxu1 }
 0x173   : > { %v2196_v44 = vrot.slane %v2195_v30, 4  ;;  %v3903_v11 = vrot.slane %v3901_v33, 4  ;;  %v3907_v43 = vshll.u32 %v3457_v27, 16  ;;  %v764_v45 = vshrl.u32 %v336_v34, 16  ;;  %v1169_v60 = vld [vmem:[#allocation2 + $0x144] sm:$0xf] }
 0x174   : > { %v3886_v39 = vsel %vm11375_vm6, %v3881_v37, %v3885_v7  ;;  %v2205_v6 = vor.u32 %v2204_v58, %v2200_v2  ;;  %v767_v25 = vshll.u32 %v336_v34, 16  ;;  %v772_v63 = vshrl.u32 %v337_v28, 16  ;;  %v4484_v13 = vld [vmem:[#allocation2 + $0xf8] sm:$0x1]  ;;  %v3458_v7 = vld [vmem:[#allocation2 + $0xf0] sm:$0xf] }
 0x175   : > { %v9776_v49 = vcombine.low %v3876_v16, %v3886_v39  ;;  %v2201_v18 = vsel %vm11375_vm6, %v2196_v44, %v2200_v2  ;;  %v3904_v59 = vor.u32 %v3903_v11, %v3899_v10  ;;  %v3909_v4 = vrot.slane %v3907_v43, 5  ;;  %v3459_v15 = vld [vmem:[#allocation2 + $0xf4] sm:$0xf]  ;;  %v1173_v20 = vld [vmem:[#allocation2 + $0x14c] sm:$0x1]  ;;  %v11014_v30 = vld [vmem:[#allocation2 + $0x138] sm:$0xff]  }
 0x176   : > { %v2206_v8 = vrot.slane %v2205_v6, 4  ;;  %v766_v56 = vrot.slane %v764_v45, 7  ;;  %v775_v19 = vshll.u32 %v337_v28, 16  ;;  %v9810_v23 = vrot.slane %v4482_v47, 9  ;;  %v3460_v27 = vld [vmem:[#allocation2 + $0xf8] sm:$0x1] }
 0x177   : > { %8498 = vmatmul.mubr.bf16.gmra.mrb[60].mxu0 %v9776_v49  ;;  %v3905_v14 = vrot.slane %v3904_v59, 4  ;;  %v4744_v24 = vrot.slane %v4483_v48, 5  ;;  %v774_v33 = vrot.slane %v772_v63, 7  ;;  %v7854_v2 = vpop.f32.mrb[27].mxu1  ;;  %v4747_v11 = vrot.slane %v4484_v13, 5 }
 0x178   : > { %v2211_v22 = vsel %vm11375_vm6, %v2206_v8, %v2210_v9  ;;  %8505 = vmatprep.mubr.bf16.mxu0 %v9841_v32  ;;  %v769_v31 = vor.u32 %v767_v25, %v766_v56  ;;  %v770_v10 = vrot.slane %v766_v56, 4  ;;  %v339_v32 = vld [vmem:[%s11354_s28 + $0xcc] sm:$0xf]  ;;  %v3912_v28 = vshrl.u32 %v3458_v7, 16  ;;  %v4485_v6 = vld [vmem:[#allocation2 + $0xfc] sm:$0xe] }
 0x179   : > { %v9657_v34 = vcombine.low %v2201_v18, %v2211_v22  ;;  %v3910_v36 = vsel %vm11375_vm6, %v3905_v14, %v3909_v4  ;;  %v4745_v16 = vsel %vm11479_vm13, %v9810_v23, %v4744_v24  ;;  %v4746_v37 = vrot.slane %v4744_v24, 4  ;;  %v12172_v43 = vld [vmem:[#allocation2 + $0x100] sm:$0xf]  ;;  %v12178_v49 = vld [vmem:[#allocation2 + $0x104] sm:$0x1]  ;;  %v12180_v18 = vpop.f32.mrb[28].mxu1 }
 0x17a   : > { %v9777_v58 = vcombine.low %v3900_v12, %v3910_v36  ;;  %v777_v44 = vor.u32 %v775_v19, %v774_v33  ;;  %v779_v9 = vrot.slane %v774_v33, 4  ;;  %v1170_v50 = vsel %vm11397_vm9, %v769_v31, %v1169_v60  ;;  %v7859_v4 = vpop.f32.mrb[29].mxu1  ;;  %v12184_v14 = vld [vmem:[#allocation2 + $0xfc] sm:$0xf]  ;;  %v1176_v31 = vld [vmem:[#allocation2 + $0x150] sm:$0xf] }
 0x17b   : > { %7991 = vmatprep.mubr.bf16.mxu1 %v9657_v34  ;;  %1171 = vst [vmem:[#allocation2 + $0x144] sm:$0xf] %v1170_v50  ;;  %v3915_v38 = vshll.u32 %v3458_v7, 16  ;;  %v3921_v39 = vshll.u32 %v3459_v15, 16  ;;  %v3925_v47 = vshrl.u32 %v3459_v15, 16  ;;  %v3931_v48 = vshll.u32 %v3460_v27, 16 }
 0x17c   : > { %7992 = vmatmul.mubr.bf16.gmra.mrb[96].mxu1 %v11014_v30  ;;  %v778_v12 = vsel %vm11388_vm8, %v770_v10, %v777_v44  ;;  %v1174_v45 = vsel %vm11414_vm10, %v779_v9, %v1173_v20  ;;  %v4748_v59 = vsel %vm11479_vm13, %v4746_v37, %v4747_v11  ;;  %v3914_v25 = vrot.slane %v3912_v28, 4  ;;  %v12186_v15 = vpop.f32.mrb[30].mxu1  ;;  %v11031_v34 = vld [vmem:[%s13535_s1 + $0x1e8] sm:$0xff]  }
 0x17d   : > { %1172 = vst [vmem:[#allocation2 + $0x148] sm:$0xf] %v778_v12  ;;  %1175 = vst [vmem:[#allocation2 + $0x14c] sm:$0x1] %v1174_v45  ;;  %v3917_v60 = vrot.slane %v3915_v38, 5  ;;  %v3923_v8 = vrot.slane %v3921_v39, 5  ;;  %v9842_v56 = vcombine.low %v4745_v16, %v4748_v59  ;;  %8661 = vmatpush1.bf16.msra.mxu0 %v11031_v34 }
 0x17e   : > { %v3927_v63 = vrot.slane %v3925_v47, 4  ;;  %v3933_v13 = vrot.slane %v3931_v48, 5  ;;  %v781_v7 = vshrl.u32 %v338_v3, 16  ;;  %v784_v20 = vshll.u32 %v338_v3, 16  ;;  %v7862_v27 = vpop.f32.mrb[31].mxu1  ;;  %8662 = vmatprep.subr.bf16.mxu0 %v11107_v1 }
 0x17f   : > { %8506 = vmatmul.mubr.bf16.gmra.mrb[64].mxu0 %v9777_v58  ;;  %v3918_v19 = vor.u32 %v3917_v60, %v3914_v25  ;;  %v789_v23 = vshrl.u32 %v339_v32, 16  ;;  %v792_v24 = vshll.u32 %v339_v32, 16  ;;  %v9811_v10 = vrot.slane %v4485_v6, 9  ;;  %v1180_v59 = vld [vmem:[#allocation2 + $0x158] sm:$0x1] }
 0x180   : > { %8513 = vmatprep.mubr.bf16.mxu0 %v9842_v56  ;;  %v3928_v22 = vor.u32 %v3927_v63, %v3923_v8  ;;  %v783_v30 = vrot.slane %v781_v7, 7  ;;  %v4751_v33 = vrot.slane %v12172_v43, 5  ;;  %v4754_v37 = vrot.slane %v12178_v49, 5  ;;  %v3462_v56 = vld [vmem:[#allocation2 + $0x100] sm:$0xf] }
 0x181   : > { %v3919_v36 = vrot.slane %v3918_v19, 4  ;;  %v791_v16 = vrot.slane %v789_v23, 7  ;;  %v3936_v2 = vshrl.u32 %v12184_v14, 16 }
 0x182   : > { %v1588_v58 = vld [vmem:[#allocation2 + $0x144] sm:$0xf]  ;;  %v3929_v44 = vrot.slane %v3928_v22, 4  ;;  %v786_v9 = vor.u32 %v784_v20, %v783_v30  ;;  %v787_v50 = vrot.slane %v783_v30, 4  ;;  %v4752_v12 = vsel %vm11479_vm13, %v9811_v10, %v4751_v33  ;;  %v340_v30 = vld [vmem:[%s11354_s28 + $0xd0] sm:$0xf] }
 0x183   : > { %v2213_v3 = vshrl.u32 %v1588_v58, 16  ;;  %v2216_v32 = vshll.u32 %v1588_v58, 16  ;;  %v3924_v11 = vsel %vm11375_vm6, %v3919_v36, %v3923_v8  ;;  %v794_v28 = vor.u32 %v792_v24, %v791_v16  ;;  %v3463_v20 = vld [vmem:[#allocation2 + $0x104] sm:$0x1] }
 0x184   : > { %v1589_v38 = vld [vmem:[#allocation2 + $0x148] sm:$0xf]  ;;  %v1590_v39 = vld [vmem:[#allocation2 + $0x14c] sm:$0x1]  ;;  %v3934_v6 = vsel %vm11375_vm6, %v3929_v44, %v3933_v13  ;;  %v1177_v43 = vsel %vm11397_vm9, %v786_v9, %v1176_v31  ;;  %v796_v4 = vrot.slane %v791_v16, 4  ;;  %v4753_v19 = vrot.slane %v4751_v33, 4 }
 0x185   : > { %v2215_v45 = vrot.slane %v2213_v3, 4  ;;  %v2218_v47 = vrot.slane %v2216_v32, 5  ;;  %v2222_v48 = vshll.u32 %v1589_v38, 16  ;;  %v2226_v49 = vshrl.u32 %v1589_v38, 16  ;;  %1178 = vst [vmem:[#allocation2 + $0x150] sm:$0xf] %v1177_v43 }
 0x186   : > { %v2232_v25 = vshll.u32 %v1590_v39, 16  ;;  %v9778_v60 = vcombine.low %v3924_v11, %v3934_v6  ;;  %v795_v8 = vsel %vm11388_vm8, %v787_v50, %v794_v28  ;;  %v1181_v24 = vsel %vm11414_vm10, %v796_v4, %v1180_v59  ;;  %v341_v6 = vld [vmem:[%s11354_s28 + $0xd4] sm:$0xf] }
 0x187   : > { %v2219_v63 = vor.u32 %v2218_v47, %v2215_v45  ;;  %v2224_v13 = vrot.slane %v2222_v48, 5  ;;  %v2228_v7 = vrot.slane %v2226_v49, 4  ;;  %1179 = vst [vmem:[#allocation2 + $0x154] sm:$0xf] %v795_v8  ;;  %v3938_v27 = vrot.slane %v3936_v2, 4 }
 0x188   : > { %v2234_v23 = vrot.slane %v2232_v25, 5  ;;  %8514 = vmatmul.mubr.bf16.gmra.mrb[68].mxu0 %v9778_v60  ;;  %v3939_v22 = vshll.u32 %v12184_v14, 16  ;;  %1182 = vst [vmem:[#allocation2 + $0x158] sm:$0x1] %v1181_v24  ;;  %v4755_v34 = vsel %vm11479_vm13, %v4753_v19, %v4754_v37  ;;  %v3945_v36 = vshll.u32 %v3462_v56, 16  ;;  %v11016_v37 = vld [vmem:[#allocation2 + $0x144] sm:$0xff]  }
 0x189   : > { %v2220_v31 = vrot.slane %v2219_v63, 4  ;;  %v2229_v10 = vor.u32 %v2228_v7, %v2224_v13  ;;  %v9843_v16 = vcombine.low %v4752_v12, %v4755_v34  ;;  %v3949_v58 = vshrl.u32 %v3462_v56, 16  ;;  %v11035_v12 = vld [vmem:[%s13535_s1 + $0x1f0] sm:$0xff]   ;;  %v1183_v56 = vld [vmem:[#allocation2 + $0x15c] sm:$0xf] }
 0x18a   : > { %v3941_v33 = vrot.slane %v3939_v22, 5  ;;  %v3955_v44 = vshll.u32 %v3463_v20, 16  ;;  %v3947_v2 = vrot.slane %v3945_v36, 5  ;;  %v798_v3 = vshrl.u32 %v340_v30, 16  ;;  %v4488_v63 = vld [vmem:[#allocation2 + $0x108] sm:$0xe]  ;;  %8663 = vmatpush1.bf16.msra.mxu0 %v11035_v12 }
 0x18b   : > { %v2225_v9 = vsel %vm11375_vm6, %v2220_v31, %v2224_v13  ;;  %v2230_v50 = vrot.slane %v2229_v10, 4  ;;  %8521 = vmatprep.mubr.bf16.mxu0 %v9843_v16  ;;  %v3951_v11 = vrot.slane %v3949_v58, 4  ;;  %v801_v20 = vshll.u32 %v340_v30, 16  ;;  %8664 = vmatprep.subr.bf16.mxu0 %v11107_v1  ;;  %v4489_v10 = vld [vmem:[#allocation2 + $0x10c] sm:$0xf] }
 0x18c   : > { %v1591_v14 = vld [vmem:[#allocation2 + $0x150] sm:$0xf]  ;;  %v3942_v32 = vor.u32 %v3941_v33, %v3938_v27  ;;  %v12216_v43 = vrot.slane %v798_v3, 7  ;;  %v3957_v59 = vrot.slane %v3955_v44, 5  ;;  %v806_v16 = vshrl.u32 %v341_v6, 16 }
 0x18d   : > { %v2235_v28 = vsel %vm11375_vm6, %v2230_v50, %v2234_v23  ;;  %v2237_v38 = vshrl.u32 %v1591_v14, 16  ;;  %v2240_v39 = vshll.u32 %v1591_v14, 16  ;;  %v3952_v49 = vor.u32 %v3951_v11, %v3947_v2  ;;  %v4490_v58 = vld [vmem:[#allocation2 + $0x110] sm:$0x1]  ;;  %v3464_v44 = vld [vmem:[#allocation2 + $0x108] sm:$0xf] }
 0x18e   : > { %v9658_v45 = vcombine.low %v2225_v9, %v2235_v28  ;;  %v1592_v47 = vld [vmem:[#allocation2 + $0x154] sm:$0xf]  ;;  %v3943_v48 = vrot.slane %v3942_v32, 4  ;;  %v804_v23 = vrot.slane %v12216_v43, 4  ;;  %v803_v36 = vor.u32 %v801_v20, %v12216_v43  ;;  %v3465_v28 = vld [vmem:[#allocation2 + $0x10c] sm:$0xf] }
 0x18f   : > { %v2239_v25 = vrot.slane %v2237_v38, 4  ;;  %v2242_v60 = vrot.slane %v2240_v39, 5  ;;  %v2246_v8 = vshll.u32 %v1592_v47, 16  ;;  %v2250_v4 = vshrl.u32 %v1592_v47, 16  ;;  %v1593_v13 = vld [vmem:[#allocation2 + $0x158] sm:$0x1] }
 0x190   : > { %7999 = vmatprep.mubr.bf16.mxu1 %v9658_v45  ;;  %v3948_v7 = vsel %vm11375_vm6, %v3943_v48, %v3947_v2  ;;  %v3953_v19 = vrot.slane %v3952_v49, 4  ;;  %v2256_v31 = vshll.u32 %v1593_v13, 16  ;;  %v809_v33 = vshll.u32 %v341_v6, 16  ;;  %v1187_v2 = vld [vmem:[#allocation2 + $0x164] sm:$0x1] }
 0x191   : > { %8000 = vmatmul.mubr.bf16.gmra.mrb[100].mxu1 %v11016_v37  ;;  %v2243_v24 = vor.u32 %v2242_v60, %v2239_v25  ;;  %v2248_v27 = vrot.slane %v2246_v8, 5  ;;  %v2252_v22 = vrot.slane %v2250_v4, 4  ;;  %v808_v3 = vrot.slane %v806_v16, 7  ;;  %v3466_v6 = vld [vmem:[#allocation2 + $0x110] sm:$0x1] }
 0x192   : > { %v3958_v34 = vsel %vm11375_vm6, %v3953_v19, %v3957_v59  ;;  %v2258_v50 = vrot.slane %v2256_v31, 5  ;;  %v1184_v14 = vsel %vm11397_vm9, %v803_v36, %v1183_v56  ;;  %v9812_v32 = vrot.slane %v4488_v63, 9  ;;  %v342_v12 = vld [vmem:[%s11354_s28 + $0xd8] sm:$0xf]  ;;  %v343_v45 = vld [vmem:[%s11354_s28 + $0xdc] sm:$0xf] }
 0x193   : > { %v2244_v30 = vrot.slane %v2243_v24, 4  ;;  %v2253_v9 = vor.u32 %v2252_v22, %v2248_v27  ;;  %v9779_v1 = vcombine.low %v3948_v7, %v3958_v34  ;;  %v4758_v11 = vrot.slane %v4489_v10, 5  ;;  %1185 = vst [vmem:[#allocation2 + $0x15c] sm:$0xf] %v1184_v14  ;;  %v11017_v60 = vld [vmem:[#allocation2 + $0x150] sm:$0xff]  }
 0x194   : > { %v4761_v39 = vrot.slane %v4490_v58, 5  ;;  %v3960_v43 = vshrl.u32 %v3464_v44, 16  ;;  %v811_v47 = vor.u32 %v809_v33, %v808_v3  ;;  %v813_v48 = vrot.slane %v808_v3, 4  ;;  %v4491_v20 = vld [vmem:[#allocation2 + $0x114] sm:$0xe] }
 0x195   : > { %v2249_v37 = vsel %vm11375_vm6, %v2244_v30, %v2248_v27  ;;  %v2254_v38 = vrot.slane %v2253_v9, 4  ;;  %8522 = vmatmul.mubr.bf16.gmra.mrb[72].mxu0 %v9779_v1  ;;  %v4759_v49 = vsel %vm11479_vm13, %v9812_v32, %v4758_v11  ;;  %v4760_v59 = vrot.slane %v4758_v11, 4  ;;  %v4492_v10 = vld [vmem:[#allocation2 + $0x118] sm:$0xf]  ;;  %v1190_v11 = vld [vmem:[#allocation2 + $0x168] sm:$0xf] }
 0x196   : > { %v3962_v8 = vrot.slane %v3960_v43, 4  ;;  %v3963_v4 = vshll.u32 %v3464_v44, 16  ;;  %v3969_v56 = vshll.u32 %v3465_v28, 16  ;;  %v812_v13 = vsel %vm11388_vm8, %v804_v23, %v811_v47  ;;  %v1194_v47 = vld [vmem:[#allocation2 + $0x170] sm:$0x1] }
 0x197   : > { %v2259_v25 = vsel %vm11375_vm6, %v2254_v38, %v2258_v50  ;;  %v1188_v7 = vsel %vm11414_vm10, %v813_v48, %v1187_v2  ;;  %v4762_v19 = vsel %vm11479_vm13, %v4760_v59, %v4761_v39  ;;  %1186 = vst [vmem:[#allocation2 + $0x160] sm:$0xf] %v812_v13  ;;  %v3973_v31 = vshrl.u32 %v3465_v28, 16  ;;  %v11038_v28 = vld [vmem:[%s13535_s1 + $0x1f8] sm:$0xff]  }
 0x198   : > { %v9659_v63 = vcombine.low %v2249_v37, %v2259_v25  ;;  %1189 = vst [vmem:[#allocation2 + $0x164] sm:$0x1] %v1188_v7  ;;  %v9844_v24 = vcombine.low %v4759_v49, %v4762_v19  ;;  %v3965_v27 = vrot.slane %v3963_v4, 5  ;;  %v3971_v22 = vrot.slane %v3969_v56, 5  ;;  %v4493_v48 = vld [vmem:[#allocation2 + $0x11c] sm:$0x1]  ;;  %8665 = vmatpush1.bf16.msra.mxu0 %v11038_v28 }
 0x199   : > { %v3979_v34 = vshll.u32 %v3466_v6, 16  ;;  %v815_v36 = vshrl.u32 %v342_v12, 16  ;;  %v818_v16 = vshll.u32 %v342_v12, 16  ;;  %v823_v33 = vshrl.u32 %v343_v45, 16  ;;  %v3467_v19 = vld [vmem:[#allocation2 + $0x114] sm:$0xf] }
 0x19a   : > { %8007 = vmatprep.mubr.bf16.mxu1 %v9659_v63  ;;  %8529 = vmatprep.mubr.bf16.mxu0 %v9844_v24  ;;  %v3966_v23 = vor.u32 %v3965_v27, %v3962_v8  ;;  %v3975_v58 = vrot.slane %v3973_v31, 4  ;;  %v826_v44 = vshll.u32 %v343_v45, 16  ;;  %v9813_v30 = vrot.slane %v4491_v20, 9  ;;  %v1594_v9 = vld [vmem:[#allocation2 + $0x15c] sm:$0xf] }
 0x19b   : > { %8008 = vmatmul.mubr.bf16.gmra.mrb[104].mxu1 %v11017_v60  ;;  %v3981_v50 = vrot.slane %v3979_v34, 5  ;;  %v817_v1 = vrot.slane %v815_v36, 7  ;;  %v2261_v2 = vshrl.u32 %v1594_v9, 16  ;;  %v2264_v3 = vshll.u32 %v1594_v9, 16  ;;  %v3468_v31 = vld [vmem:[#allocation2 + $0x118] sm:$0xf] }
 0x19c   : > { %v3967_v14 = vrot.slane %v3966_v23, 4  ;;  %v3976_v32 = vor.u32 %v3975_v58, %v3971_v22  ;;  %v825_v39 = vrot.slane %v823_v33, 7  ;;  %v4765_v6 = vrot.slane %v4492_v10, 5  ;;  %v3469_v33 = vld [vmem:[#allocation2 + $0x11c] sm:$0x1] }
 0x19d   : > { %v820_v37 = vor.u32 %v818_v16, %v817_v1  ;;  %v821_v38 = vrot.slane %v817_v1, 4  ;;  %v2263_v43 = vrot.slane %v2261_v2, 4  ;;  %v2266_v12 = vrot.slane %v2264_v3, 5 }
 0x19e   : > { %v3977_v45 = vrot.slane %v3976_v32, 4  ;;  %v1595_v49 = vld [vmem:[#allocation2 + $0x160] sm:$0xf]  ;;  %v3972_v25 = vsel %vm11375_vm6, %v3967_v14, %v3971_v22  ;;  %v828_v60 = vor.u32 %v826_v44, %v825_v39  ;;  %v4766_v4 = vsel %vm11479_vm13, %v9813_v30, %v4765_v6 }
 0x19f   : > { %v1596_v59 = vld [vmem:[#allocation2 + $0x164] sm:$0x1]  ;;  %v1191_v8 = vsel %vm11397_vm9, %v820_v37, %v1190_v11  ;;  %v2267_v56 = vor.u32 %v2266_v12, %v2263_v43  ;;  %v2270_v63 = vshll.u32 %v1595_v49, 16  ;;  %v2274_v13 = vshrl.u32 %v1595_v49, 16 }
 0x1a0   : > { %v2280_v7 = vshll.u32 %v1596_v59, 16  ;;  %1192 = vst [vmem:[#allocation2 + $0x168] sm:$0xf] %v1191_v8  ;;  %v3982_v20 = vsel %vm11375_vm6, %v3977_v45, %v3981_v50  ;;  %v829_v24 = vsel %vm11388_vm8, %v821_v38, %v828_v60  ;;  %v830_v27 = vrot.slane %v825_v39, 4 }
 0x1a1   : > { %v4767_v22 = vrot.slane %v4765_v6, 4  ;;  %v2268_v10 = vrot.slane %v2267_v56, 4  ;;  %v2272_v34 = vrot.slane %v2270_v63, 5  ;;  %v2276_v36 = vrot.slane %v2274_v13, 4  ;;  %1193 = vst [vmem:[#allocation2 + $0x16c] sm:$0xf] %v829_v24 }
 0x1a2   : > { %v2282_v16 = vrot.slane %v2280_v7, 5  ;;  %v9780_v23 = vcombine.low %v3972_v25, %v3982_v20  ;;  %v1195_v58 = vsel %vm11414_vm10, %v830_v27, %v1194_v47  ;;  %v4768_v44 = vrot.slane %v4493_v48, 5  ;;  %v344_v6 = vld [vmem:[%s11354_s28 + $0xe0] sm:$0xf]  ;;  %v345_v20 = vld [vmem:[%s11354_s28 + $0xe4] sm:$0xf] }
 0x1a3   : > { %v3984_v30 = vshrl.u32 %v3467_v19, 16  ;;  %v2273_v9 = vsel %vm11375_vm6, %v2268_v10, %v2272_v34  ;;  %v2277_v50 = vor.u32 %v2276_v36, %v2272_v34  ;;  %1196 = vst [vmem:[#allocation2 + $0x170] sm:$0x1] %v1195_v58  ;;  %v3987_v1 = vshll.u32 %v3467_v19, 16  ;;  %v11019_v47 = vld [vmem:[#allocation2 + $0x15c] sm:$0xff]  }
 0x1a4   : > { %v3993_v2 = vshll.u32 %v3468_v31, 16  ;;  %8530 = vmatmul.mubr.bf16.gmra.mrb[76].mxu0 %v9780_v23  ;;  %v4769_v3 = vsel %vm11479_vm13, %v4767_v22, %v4768_v44  ;;  %v3997_v32 = vshrl.u32 %v3468_v31, 16  ;;  %v4003_v11 = vshll.u32 %v3469_v33, 16  ;;  %v1197_v24 = vld [vmem:[#allocation2 + $0x174] sm:$0xf] }
 0x1a5   : > { %v3986_v14 = vrot.slane %v3984_v30, 4  ;;  %v2278_v28 = vrot.slane %v2277_v50, 4  ;;  %v9845_v37 = vcombine.low %v4766_v4, %v4769_v3  ;;  %v3989_v38 = vrot.slane %v3987_v1, 5  ;;  %v4494_v58 = vld [vmem:[#allocation2 + $0x120] sm:$0xe] }
 0x1a6   : > { %v3995_v39 = vrot.slane %v3993_v2, 5  ;;  %v3999_v12 = vrot.slane %v3997_v32, 4  ;;  %v4005_v56 = vrot.slane %v4003_v11, 5  ;;  %v832_v63 = vshrl.u32 %v344_v6, 16  ;;  %v4495_v1 = vld [vmem:[#allocation2 + $0x124] sm:$0xf] }
 0x1a7   : > { %v1597_v43 = vld [vmem:[#allocation2 + $0x168] sm:$0xf]  ;;  %v2283_v45 = vsel %vm11375_vm6, %v2278_v28, %v2282_v16  ;;  %8537 = vmatprep.mubr.bf16.mxu0 %v9845_v37  ;;  %v3990_v59 = vor.u32 %v3989_v38, %v3986_v14  ;;  %v835_v34 = vshll.u32 %v344_v6, 16  ;;  %v3470_v28 = vld [vmem:[#allocation2 + $0x120] sm:$0xf]  ;;  %v840_v38 = vshrl.u32 %v345_v20, 16 }
 0x1a8   : > { %v2285_v48 = vshrl.u32 %v1597_v43, 16  ;;  %v2288_v49 = vshll.u32 %v1597_v43, 16  ;;  %v9660_v25 = vcombine.low %v2273_v9, %v2283_v45  ;;  %v1598_v60 = vld [vmem:[#allocation2 + $0x16c] sm:$0xf]  ;;  %v4000_v8 = vor.u32 %v3999_v12, %v3995_v39  ;;  %v4496_v2 = vld [vmem:[#allocation2 + $0x128] sm:$0x1] }
 0x1a9   : > { %v2294_v7 = vshll.u32 %v1598_v60, 16  ;;  %v2298_v19 = vshrl.u32 %v1598_v60, 16  ;;  %v3991_v22 = vrot.slane %v3990_v59, 4  ;;  %v834_v10 = vrot.slane %v832_v63, 7  ;;  %v3471_v37 = vld [vmem:[#allocation2 + $0x124] sm:$0xf] }
 0x1aa   : > { %v2287_v4 = vrot.slane %v2285_v48, 4  ;;  %v2290_v13 = vrot.slane %v2288_v49, 5  ;;  %8015 = vmatprep.mubr.bf16.mxu1 %v9660_v25  ;;  %v1599_v27 = vld [vmem:[#allocation2 + $0x170] sm:$0x1]  ;;  %v4001_v31 = vrot.slane %v4000_v8, 4  ;;  %v843_v6 = vshll.u32 %v345_v20, 16 }
 0x1ab   : > { %8016 = vmatmul.mubr.bf16.gmra.mrb[108].mxu1 %v11019_v47  ;;  %v2296_v16 = vrot.slane %v2294_v7, 5  ;;  %v2300_v33 = vrot.slane %v2298_v19, 4  ;;  %v2304_v23 = vshll.u32 %v1599_v27, 16  ;;  %v3996_v44 = vsel %vm11375_vm6, %v3991_v22, %v3995_v39  ;;  %v11020_v47 = vld [vmem:[#allocation2 + $0x168] sm:$0xff]   ;;  %v1201_v48 = vld [vmem:[#allocation2 + $0x17c] sm:$0x1] }
 0x1ac   : > { %v2291_v36 = vor.u32 %v2290_v13, %v2287_v4  ;;  %v4006_v30 = vsel %vm11375_vm6, %v4001_v31, %v4005_v56  ;;  %v837_v9 = vor.u32 %v835_v34, %v834_v10  ;;  %v838_v50 = vrot.slane %v834_v10, 4  ;;  %v3472_v25 = vld [vmem:[#allocation2 + $0x128] sm:$0x1] }
 0x1ad   : > { %v2301_v14 = vor.u32 %v2300_v33, %v2296_v16  ;;  %v2306_v32 = vrot.slane %v2304_v23, 5  ;;  %v9781_v11 = vcombine.low %v3996_v44, %v4006_v30  ;;  %v9814_v12 = vrot.slane %v4494_v58, 9  ;;  %v346_v31 = vld [vmem:[%s11354_s28 + $0xe8] sm:$0xf]  ;;  %v347_v33 = vld [vmem:[%s11354_s28 + $0xec] sm:$0xf] }
 0x1ae   : > { %v2292_v3 = vrot.slane %v2291_v36, 4  ;;  %v1198_v43 = vsel %vm11397_vm9, %v837_v9, %v1197_v24  ;;  %v4772_v49 = vrot.slane %v4495_v1, 5  ;;  %v4775_v59 = vrot.slane %v4496_v2, 5 }
 0x1af   : > { %v2302_v45 = vrot.slane %v2301_v14, 4  ;;  %8538 = vmatmul.mubr.bf16.gmra.mrb[80].mxu0 %v9781_v11  ;;  %1199 = vst [vmem:[#allocation2 + $0x174] sm:$0xf] %v1198_v43  ;;  %v842_v60 = vrot.slane %v840_v38, 7  ;;  %v4008_v8 = vshrl.u32 %v3470_v28, 16  ;;  %v4011_v56 = vshll.u32 %v3470_v28, 16 }
 0x1b0   : > { %v2297_v39 = vsel %vm11375_vm6, %v2292_v3, %v2296_v16  ;;  %v4017_v63 = vshll.u32 %v3471_v37, 16  ;;  %v4773_v13 = vsel %vm11479_vm13, %v9814_v12, %v4772_v49  ;;  %v4774_v7 = vrot.slane %v4772_v49, 4  ;;  %v4497_v14 = vld [vmem:[#allocation2 + $0x12c] sm:$0xe]  ;;  %v4498_v43 = vld [vmem:[#allocation2 + $0x130] sm:$0xf] }
 0x1b1   : > { %v2307_v4 = vsel %vm11375_vm6, %v2302_v45, %v2306_v32  ;;  %v4021_v19 = vshrl.u32 %v3471_v37, 16  ;;  %v845_v24 = vor.u32 %v843_v6, %v842_v60  ;;  %v847_v27 = vrot.slane %v842_v60, 4 }
 0x1b2   : > { %v9661_v20 = vcombine.low %v2297_v39, %v2307_v4  ;;  %v4010_v22 = vrot.slane %v4008_v8, 4  ;;  %v4776_v10 = vsel %vm11479_vm13, %v4774_v7, %v4775_v59  ;;  %v4013_v34 = vrot.slane %v4011_v56, 5  ;;  %v1204_v8 = vld [vmem:[#allocation2 + $0x180] sm:$0xf]  ;;  %v1208_v7 = vld [vmem:[#allocation2 + $0x188] sm:$0x1] }
 0x1b3   : > { %v4019_v36 = vrot.slane %v4017_v63, 5  ;;  %v4023_v16 = vrot.slane %v4021_v19, 4  ;;  %v846_v23 = vsel %vm11388_vm8, %v838_v50, %v845_v24  ;;  %v1202_v58 = vsel %vm11414_vm10, %v847_v27, %v1201_v48 }
 0x1b4   : > { %8023 = vmatprep.mubr.bf16.mxu1 %v9661_v20  ;;  %v9846_v44 = vcombine.low %v4773_v13, %v4776_v10  ;;  %v4027_v30 = vshll.u32 %v3472_v25, 16  ;;  %1200 = vst [vmem:[#allocation2 + $0x178] sm:$0xf] %v846_v23  ;;  %1203 = vst [vmem:[#allocation2 + $0x17c] sm:$0x1] %v1202_v58  ;;  %v4014_v9 = vor.u32 %v4013_v34, %v4010_v22  ;;  %v849_v2 = vshrl.u32 %v346_v31, 16 }
 0x1b5   : > { %8024 = vmatmul.mubr.bf16.gmra.mrb[112].mxu1 %v11020_v47  ;;  %v4024_v1 = vor.u32 %v4023_v16, %v4019_v36  ;;  %v852_v3 = vshll.u32 %v346_v31, 16  ;;  %v857_v28 = vshrl.u32 %v347_v33, 16  ;;  %v860_v45 = vshll.u32 %v347_v33, 16  ;;  %v4499_v47 = vld [vmem:[#allocation2 + $0x134] sm:$0x1] }
 0x1b6   : > { %v1600_v32 = vld [vmem:[#allocation2 + $0x174] sm:$0xf]  ;;  %8545 = vmatprep.mubr.bf16.mxu0 %v9846_v44  ;;  %v4029_v11 = vrot.slane %v4027_v30, 5  ;;  %v4015_v50 = vrot.slane %v4014_v9, 4  ;;  %v851_v12 = vrot.slane %v849_v2, 7  ;;  %v9815_v48 = vrot.slane %v4497_v14, 9 }
 0x1b7   : > { %v2309_v37 = vshrl.u32 %v1600_v32, 16  ;;  %v2312_v38 = vshll.u32 %v1600_v32, 16  ;;  %v4025_v6 = vrot.slane %v4024_v1, 4  ;;  %v859_v39 = vrot.slane %v857_v28, 7  ;;  %v3473_v22 = vld [vmem:[#allocation2 + $0x12c] sm:$0xf] }
 0x1b8   : > { %v4020_v25 = vsel %vm11375_vm6, %v4015_v50, %v4019_v36  ;;  %v854_v63 = vor.u32 %v852_v3, %v851_v12  ;;  %v855_v4 = vrot.slane %v851_v12, 4  ;;  %v4779_v24 = vrot.slane %v4498_v43, 5  ;;  %v3474_v44 = vld [vmem:[#allocation2 + $0x130] sm:$0xf]  ;;  %v3475_v28 = vld [vmem:[#allocation2 + $0x134] sm:$0x1] }
 0x1b9   : > { %v2311_v49 = vrot.slane %v2309_v37, 4  ;;  %v2314_v59 = vrot.slane %v2312_v38, 5  ;;  %v4030_v60 = vsel %vm11375_vm6, %v4025_v6, %v4029_v11  ;;  %v862_v13 = vor.u32 %v860_v45, %v859_v39  ;;  %v348_v3 = vld [vmem:[%s11354_s28 + $0xf0] sm:$0xf]  ;;  %v349_v12 = vld [vmem:[%s11354_s28 + $0xf4] sm:$0xf] }
 0x1ba   : > { %v9782_v56 = vcombine.low %v4020_v25, %v4030_v60  ;;  %v864_v20 = vrot.slane %v859_v39, 4  ;;  %v4782_v27 = vrot.slane %v4499_v47, 5  ;;  %v1205_v36 = vsel %vm11397_vm9, %v854_v63, %v1204_v8 }
 0x1bb   : > { %v2315_v19 = vor.u32 %v2314_v59, %v2311_v49  ;;  %v1601_v31 = vld [vmem:[#allocation2 + $0x178] sm:$0xf]  ;;  %v1602_v10 = vld [vmem:[#allocation2 + $0x17c] sm:$0x1]  ;;  %v863_v34 = vsel %vm11388_vm8, %v855_v4, %v862_v13  ;;  %1206 = vst [vmem:[#allocation2 + $0x180] sm:$0xf] %v1205_v36  ;;  %v4780_v9 = vsel %vm11479_vm13, %v9815_v48, %v4779_v24 }
 0x1bc   : > { %8546 = vmatmul.mubr.bf16.gmra.mrb[84].mxu0 %v9782_v56  ;;  %v2318_v33 = vshll.u32 %v1601_v31, 16  ;;  %v2322_v23 = vshrl.u32 %v1601_v31, 16  ;;  %v2328_v58 = vshll.u32 %v1602_v10, 16  ;;  %1207 = vst [vmem:[#allocation2 + $0x184] sm:$0xf] %v863_v34  ;;  %v1209_v30 = vsel %vm11414_vm10, %v864_v20, %v1208_v7 }
 0x1bd   : > { %v2316_v16 = vrot.slane %v2315_v19, 4  ;;  %v4781_v1 = vrot.slane %v4779_v24, 4  ;;  %v4032_v2 = vshrl.u32 %v3473_v22, 16  ;;  %1210 = vst [vmem:[#allocation2 + $0x188] sm:$0x1] %v1209_v30  ;;  %v4035_v37 = vshll.u32 %v3473_v22, 16 }
 0x1be   : > { %v2320_v14 = vrot.slane %v2318_v33, 5  ;;  %v2324_v32 = vrot.slane %v2322_v23, 4  ;;  %v2330_v11 = vrot.slane %v2328_v58, 5  ;;  %v4041_v6 = vshll.u32 %v3474_v44, 16  ;;  %v11022_v24 = vld [vmem:[#allocation2 + $0x174] sm:$0xff]  }
 0x1bf   : > { %v4783_v38 = vsel %vm11479_vm13, %v4781_v1, %v4782_v27  ;;  %v4034_v50 = vrot.slane %v4032_v2, 4  ;;  %v4045_v43 = vshrl.u32 %v3474_v44, 16  ;;  %v4037_v48 = vrot.slane %v4035_v37, 5  ;;  %v4500_v1 = vld [vmem:[#allocation2 + $0x138] sm:$0xe] }
 0x1c0   : > { %v2321_v39 = vsel %vm11375_vm6, %v2316_v16, %v2320_v14  ;;  %v2325_v45 = vor.u32 %v2324_v32, %v2320_v14  ;;  %v9847_v47 = vcombine.low %v4780_v9, %v4783_v38  ;;  %v4043_v49 = vrot.slane %v4041_v6, 5  ;;  %v1211_v9 = vld [vmem:[#allocation2 + $0x18c] sm:$0xf] }
 0x1c1   : > { %v4047_v59 = vrot.slane %v4045_v43, 4  ;;  %v4051_v25 = vshll.u32 %v3475_v28, 16  ;;  %v866_v60 = vshrl.u32 %v348_v3, 16  ;;  %v4038_v56 = vor.u32 %v4037_v48, %v4034_v50  ;;  %v4501_v28 = vld [vmem:[#allocation2 + $0x13c] sm:$0xf] }
 0x1c2   : > { %v2326_v8 = vrot.slane %v2325_v45, 4  ;;  %8553 = vmatprep.mubr.bf16.mxu0 %v9847_v47  ;;  %v869_v63 = vshll.u32 %v348_v3, 16  ;;  %v874_v4 = vshrl.u32 %v349_v12, 16  ;;  %v1603_v13 = vld [vmem:[#allocation2 + $0x180] sm:$0xf]  ;;  %v877_v6 = vshll.u32 %v349_v12, 16 }
 0x1c3   : > { %v1604_v7 = vld [vmem:[#allocation2 + $0x184] sm:$0xf]  ;;  %v4048_v19 = vor.u32 %v4047_v59, %v4043_v49  ;;  %v2333_v27 = vshrl.u32 %v1603_v13, 16  ;;  %v2336_v22 = vshll.u32 %v1603_v13, 16  ;;  %v4039_v16 = vrot.slane %v4038_v56, 4 }
 0x1c4   : > { %v2331_v20 = vsel %vm11375_vm6, %v2326_v8, %v2330_v11  ;;  %v2342_v31 = vshll.u32 %v1604_v7, 16  ;;  %v1605_v34 = vld [vmem:[#allocation2 + $0x188] sm:$0x1]  ;;  %v2346_v36 = vshrl.u32 %v1604_v7, 16  ;;  %v4053_v14 = vrot.slane %v4051_v25, 5 }
 0x1c5   : > { %v9662_v10 = vcombine.low %v2321_v39, %v2331_v20  ;;  %v4049_v33 = vrot.slane %v4048_v19, 4  ;;  %v2335_v23 = vrot.slane %v2333_v27, 4  ;;  %v2338_v58 = vrot.slane %v2336_v22, 5  ;;  %v1215_v11 = vld [vmem:[#allocation2 + $0x194] sm:$0x1] }
 0x1c6   : > { %v2344_v44 = vrot.slane %v2342_v31, 5  ;;  %v2352_v30 = vshll.u32 %v1605_v34, 16  ;;  %v2348_v2 = vrot.slane %v2346_v36, 4  ;;  %v4044_v3 = vsel %vm11375_vm6, %v4039_v16, %v4043_v49  ;;  %v4502_v43 = vld [vmem:[#allocation2 + $0x140] sm:$0x1] }
 0x1c7   : > { %8031 = vmatprep.mubr.bf16.mxu1 %v9662_v10  ;;  %v868_v32 = vrot.slane %v866_v60, 7  ;;  %v2339_v37 = vor.u32 %v2338_v58, %v2335_v23  ;;  %v876_v50 = vrot.slane %v874_v4, 7  ;;  %v4054_v45 = vsel %vm11375_vm6, %v4049_v33, %v4053_v14  ;;  %v3476_v59 = vld [vmem:[#allocation2 + $0x138] sm:$0xf]  ;;  %v3477_v8 = vld [vmem:[#allocation2 + $0x13c] sm:$0xf] }
 0x1c8   : > { %8032 = vmatmul.mubr.bf16.gmra.mrb[116].mxu1 %v11022_v24  ;;  %v2354_v38 = vrot.slane %v2352_v30, 5  ;;  %v2349_v39 = vor.u32 %v2348_v2, %v2344_v44  ;;  %v9783_v49 = vcombine.low %v4044_v3, %v4054_v45  ;;  %v3478_v13 = vld [vmem:[#allocation2 + $0x140] sm:$0x1]  ;;  %v4503_v7 = vld [vmem:[#allocation2 + $0x144] sm:$0xe]  ;;  %v9816_v12 = vrot.slane %v4500_v1, 9 }
 0x1c9   : > { %v871_v47 = vor.u32 %v869_v63, %v868_v32  ;;  %v872_v48 = vrot.slane %v868_v32, 4  ;;  %v2340_v56 = vrot.slane %v2339_v37, 4  ;;  %v879_v25 = vor.u32 %v877_v6, %v876_v50  ;;  %v12319_v31 = vld [vmem:[#allocation2 + $0x60] sm:$0xe]  ;;  %v4504_v23 = vld [vmem:[#allocation2 + $0x148] sm:$0xf] }
 0x1ca   : > { %v881_v60 = vrot.slane %v876_v50, 4  ;;  %v2350_v19 = vrot.slane %v2349_v39, 4  ;;  %v4786_v20 = vrot.slane %v4501_v28, 5  ;;  %8554 = vmatmul.mubr.bf16.gmra.mrb[88].mxu0 %v9783_v49  ;;  %v4789_v22 = vrot.slane %v4502_v43, 5  ;;  %v11023_v34 = vld [vmem:[#allocation2 + $0x180] sm:$0xff]  }
 0x1cb   : > { %v1212_v4 = vsel %vm11397_vm9, %v871_v47, %v1211_v9  ;;  %v2345_v24 = vsel %vm11375_vm6, %v2340_v56, %v2344_v44  ;;  %v880_v63 = vsel %vm11388_vm8, %v872_v48, %v879_v25  ;;  %v4056_v33 = vshrl.u32 %v3476_v59, 16  ;;  %v12325_v58 = vld [vmem:[#allocation2 + $0x64] sm:$0xf]  ;;  %v4505_v2 = vld [vmem:[#allocation2 + $0x14c] sm:$0x1] }
 0x1cc   : > { %1213 = vst [vmem:[#allocation2 + $0x18c] sm:$0xf] %v1212_v4  ;;  %v1216_v27 = vsel %vm11414_vm10, %v881_v60, %v1215_v11  ;;  %v2355_v10 = vsel %vm11375_vm6, %v2350_v19, %v2354_v38  ;;  %1214 = vst [vmem:[#allocation2 + $0x190] sm:$0xf] %v880_v63  ;;  %v4787_v36 = vsel %vm11479_vm13, %v9816_v12, %v4786_v20  ;;  %v4788_v16 = vrot.slane %v4786_v20, 4 }
 0x1cd   : > { %1217 = vst [vmem:[#allocation2 + $0x194] sm:$0x1] %v1216_v27  ;;  %v9663_v44 = vcombine.low %v2345_v24, %v2355_v10  ;;  %v4059_v30 = vshll.u32 %v3476_v59, 16  ;;  %v4065_v9 = vshll.u32 %v3477_v8, 16  ;;  %v4069_v1 = vshrl.u32 %v3477_v8, 16 }
 0x1ce   : > { %v4790_v3 = vsel %vm11479_vm13, %v4788_v16, %v4789_v22  ;;  %v4058_v14 = vrot.slane %v4056_v33, 4  ;;  %v4075_v32 = vshll.u32 %v3478_v13, 16  ;;  %v9817_v11 = vrot.slane %v4503_v7, 9  ;;  %v2566_v28 = vld [vmem:[#allocation2 + $0x68] sm:$0x1] }
 0x1cf   : > { %8039 = vmatprep.mubr.bf16.mxu1 %v9663_v44  ;;  %v9848_v37 = vcombine.low %v4787_v36, %v4790_v3  ;;  %v4061_v38 = vrot.slane %v4059_v30, 5  ;;  %v4067_v50 = vrot.slane %v4065_v9, 5  ;;  %v4071_v6 = vrot.slane %v4069_v1, 4  ;;  %v3479_v43 = vld [vmem:[#allocation2 + $0x144] sm:$0xf] }
 0x1d0   : > { %8040 = vmatmul.mubr.bf16.gmra.mrb[120].mxu1 %v11023_v34  ;;  %v4077_v39 = vrot.slane %v4075_v32, 5  ;;  %v4793_v45 = vrot.slane %v4504_v23, 5  ;;  %v4796_v47 = vrot.slane %v4505_v2, 5  ;;  %v9673_v48 = vrot.slane %v12319_v31, 9  ;;  %v3480_v44 = vld [vmem:[#allocation2 + $0x148] sm:$0xf] }
 0x1d1   : > { %8561 = vmatprep.mubr.bf16.mxu0 %v9848_v37  ;;  %v4062_v59 = vor.u32 %v4061_v38, %v4058_v14  ;;  %v4072_v8 = vor.u32 %v4071_v6, %v4067_v50  ;;  %v2793_v56 = vrot.slane %v12325_v58, 5  ;;  %v2796_v49 = vrot.slane %v2566_v28, 5  ;;  %v3481_v3 = vld [vmem:[#allocation2 + $0x14c] sm:$0x1]  ;;  %v4506_v14 = vld [vmem:[#allocation2 + $0x150] sm:$0xe] }
 0x1d2   : > { %v4795_v60 = vrot.slane %v4793_v45, 4  ;;  %v4080_v13 = vshrl.u32 %v3479_v43, 16  ;;  %v4794_v20 = vsel %vm11479_vm13, %v9817_v11, %v4793_v45  ;;  %v4083_v37 = vshll.u32 %v3479_v43, 16  ;;  %v4507_v38 = vld [vmem:[#allocation2 + $0x154] sm:$0xf] }
 0x1d3   : > { %v1606_v25 = vld [vmem:[#allocation2 + $0x18c] sm:$0xf]  ;;  %v1607_v7 = vld [vmem:[#allocation2 + $0x190] sm:$0xf]  ;;  %v4063_v34 = vrot.slane %v4062_v59, 4  ;;  %v4073_v36 = vrot.slane %v4072_v8, 4  ;;  %v12341_v59 = vsel %vm11479_vm13, %v9673_v48, %v2793_v56 }
 0x1d4   : > { %v1608_v19 = vld [vmem:[#allocation2 + $0x194] sm:$0x1]  ;;  %v2357_v4 = vshrl.u32 %v1606_v25, 16  ;;  %v2360_v12 = vshll.u32 %v1606_v25, 16  ;;  %v2366_v24 = vshll.u32 %v1607_v7, 16  ;;  %v2370_v63 = vshrl.u32 %v1607_v7, 16 }
 0x1d5   : > { %v2376_v27 = vshll.u32 %v1608_v19, 16  ;;  %v4797_v22 = vsel %vm11479_vm13, %v4795_v60, %v4796_v47  ;;  %v4068_v9 = vsel %vm11375_vm6, %v4063_v34, %v4067_v50  ;;  %v4078_v1 = vsel %vm11375_vm6, %v4073_v36, %v4077_v39  ;;  %v4508_v6 = vld [vmem:[#allocation2 + $0x158] sm:$0x1]  ;;  %v2567_v45 = vld [vmem:[#allocation2 + $0x6c] sm:$0xe] }
 0x1d6   : > { %v2359_v31 = vrot.slane %v2357_v4, 4  ;;  %v2362_v10 = vrot.slane %v2360_v12, 5  ;;  %v2368_v16 = vrot.slane %v2366_v24, 5  ;;  %v2372_v33 = vrot.slane %v2370_v63, 4  ;;  %v2568_v25 = vld [vmem:[#allocation2 + $0x70] sm:$0xf] }
 0x1d7   : > { %v2378_v23 = vrot.slane %v2376_v27, 5  ;;  %v9849_v58 = vcombine.low %v4794_v20, %v4797_v22  ;;  %v2795_v2 = vrot.slane %v2793_v56, 4  ;;  %v9784_v11 = vcombine.low %v4068_v9, %v4078_v1  ;;  %v2569_v43 = vld [vmem:[#allocation2 + $0x74] sm:$0x1]  ;;  %v3482_v19 = vld [vmem:[#allocation2 + $0x150] sm:$0xf] }
 0x1d8   : > { %v2363_v30 = vor.u32 %v2362_v10, %v2359_v31  ;;  %v2373_v32 = vor.u32 %v2372_v33, %v2368_v16  ;;  %v4082_v28 = vrot.slane %v4080_v13, 4  ;;  %v4089_v8 = vshll.u32 %v3480_v44, 16  ;;  %v11025_v24 = vld [vmem:[#allocation2 + $0x18c] sm:$0xff]   ;;  %v3483_v33 = vld [vmem:[#allocation2 + $0x154] sm:$0xf] }
 0x1d9   : > { %v4093_v50 = vshrl.u32 %v3480_v44, 16  ;;  %8562 = vmatmul.mubr.bf16.gmra.mrb[92].mxu0 %v9784_v11  ;;  %v12345_v39 = vsel %vm11479_vm13, %v2795_v2, %v2796_v49  ;;  %v4085_v7 = vrot.slane %v4083_v37, 5  ;;  %v4099_v13 = vshll.u32 %v3481_v3, 16  ;;  %v11026_v31 = vld [vmem:[#allocation2 + $0x6c] sm:$0xff]   ;;  %v3484_v9 = vld [vmem:[#allocation2 + $0x158] sm:$0x1] }
 0x1da   : > { %v2364_v47 = vrot.slane %v2363_v30, 4  ;;  %v2374_v60 = vrot.slane %v2373_v32, 4  ;;  %8569 = vmatprep.mubr.bf16.mxu0 %v9849_v58  ;;  %v4091_v12 = vrot.slane %v4089_v8, 5  ;;  %v9818_v56 = vrot.slane %v4506_v14, 9  ;;  %v4509_v1 = vld [vmem:[#allocation2 + $0x15c] sm:$0xe] }
 0x1db   : > { %v4095_v48 = vrot.slane %v4093_v50, 4  ;;  %v4086_v63 = vor.u32 %v4085_v7, %v4082_v28  ;;  %v4101_v27 = vrot.slane %v4099_v13, 5  ;;  %v4800_v22 = vrot.slane %v4507_v38, 5  ;;  %v4510_v32 = vld [vmem:[#allocation2 + $0x160] sm:$0xf] }
 0x1dc   : > { %v2369_v4 = vsel %vm11375_vm6, %v2364_v47, %v2368_v16  ;;  %v2379_v20 = vsel %vm11375_vm6, %v2374_v60, %v2378_v23  ;;  %v4803_v34 = vrot.slane %v4508_v6, 5  ;;  %v9674_v36 = vrot.slane %v2567_v45, 9  ;;  %v4511_v6 = vld [vmem:[#allocation2 + $0x164] sm:$0x1]  ;;  %v2570_v45 = vld [vmem:[#allocation2 + $0x78] sm:$0xe] }
 0x1dd   : > { %v9664_v49 = vcombine.low %v2369_v4, %v2379_v20  ;;  %v4096_v10 = vor.u32 %v4095_v48, %v4091_v12  ;;  %v4087_v44 = vrot.slane %v4086_v63, 4  ;;  %v4801_v16 = vsel %vm11479_vm13, %v9818_v56, %v4800_v22  ;;  %v2571_v13 = vld [vmem:[#allocation2 + $0x7c] sm:$0xf]  ;;  %v2572_v56 = vld [vmem:[#allocation2 + $0x80] sm:$0x1] }
 0x1de   : > { %v4802_v58 = vrot.slane %v4800_v22, 4  ;;  %v2800_v30 = vrot.slane %v2568_v25, 5  ;;  %v2803_v2 = vrot.slane %v2569_v43, 5  ;;  %v4104_v3 = vshrl.u32 %v3482_v19, 16  ;;  %v11029_v43 = vld [vmem:[#allocation2 + $0x78] sm:$0xff]  }
 0x1df   : > { %8047 = vmatprep.mubr.bf16.mxu1 %v9664_v49  ;;  %v4097_v23 = vrot.slane %v4096_v10, 4  ;;  %v4107_v14 = vshll.u32 %v3482_v19, 16  ;;  %v9705_v11 = vcombine.low %v12341_v59, %v12345_v39  ;;  %v4092_v28 = vsel %vm11375_vm6, %v4087_v44, %v4091_v12  ;;  %v3485_v22 = vld [vmem:[#allocation2 + $0x15c] sm:$0xf]  ;;  %v11033_v49 = vld [vmem:[%s13535_s1 + $0x208] sm:$0xff]  }
 0x1e0   : > { %8048 = vmatmul.mubr.bf16.gmra.mrb[124].mxu1 %v11025_v24  ;;  %v4804_v37 = vsel %vm11479_vm13, %v4802_v58, %v4803_v34  ;;  %v2802_v38 = vrot.slane %v2800_v30, 4  ;;  %v4106_v50 = vrot.slane %v4104_v3, 4  ;;  %v12363_v59 = vsel %vm11479_vm13, %v9674_v36, %v2800_v30 }
 0x1e1   : > { %8152 = vmatprep.mubr.bf16.mxu1 %v11026_v31  ;;  %v4102_v47 = vsel %vm11375_vm6, %v4097_v23, %v4101_v27  ;;  %v9850_v8 = vcombine.low %v4801_v16, %v4804_v37  ;;  %v4109_v25 = vrot.slane %v4107_v14, 5  ;;  %v4113_v39 = vshll.u32 %v3483_v33, 16 }
 0x1e2   : > { %v9785_v60 = vcombine.low %v4092_v28, %v4102_v47  ;;  %v4117_v7 = vshrl.u32 %v3483_v33, 16  ;;  %v12367_v19 = vsel %vm11479_vm13, %v2802_v38, %v2803_v2  ;;  %v4123_v12 = vshll.u32 %v3484_v9, 16  ;;  %v3486_v33 = vld [vmem:[#allocation2 + $0x160] sm:$0xf]  ;;  %v3487_v9 = vld [vmem:[#allocation2 + $0x164] sm:$0x1] }
 0x1e3   : > { %v4110_v4 = vor.u32 %v4109_v25, %v4106_v50  ;;  %v9819_v48 = vrot.slane %v4509_v1, 9  ;;  %v4115_v20 = vrot.slane %v4113_v39, 5  ;;  %v4807_v63 = vrot.slane %v4510_v32, 5  ;;  %v4512_v1 = vld [vmem:[#allocation2 + $0x168] sm:$0xe]  ;;  %v11097_v47 = vld [vmem:[%s13535_s1 + $0x200] sm:$0xff]  }
 0x1e4   : > { %8570 = vmatmul.mubr.bf16.gmra.mrb[96].mxu0 %v9785_v60  ;;  %v4119_v24 = vrot.slane %v4117_v7, 4  ;;  %v4810_v27 = vrot.slane %v4511_v6, 5  ;;  %v4125_v10 = vrot.slane %v4123_v12, 5  ;;  %v9675_v34 = vrot.slane %v2570_v45, 9  ;;  %v12378_v32 = vld [vmem:[#allocation2 + $0x84] sm:$0xe] }
 0x1e5   : > { %8577 = vmatprep.mubr.bf16.mxu0 %v9850_v8  ;;  %v4111_v31 = vrot.slane %v4110_v4, 4  ;;  %v2807_v36 = vrot.slane %v2571_v13, 5  ;;  %v4808_v16 = vsel %vm11479_vm13, %v9819_v48, %v4807_v63  ;;  %v4809_v58 = vrot.slane %v4807_v63, 4  ;;  %v2574_v45 = vld [vmem:[#allocation2 + $0x88] sm:$0xf] }
 0x1e6   : > { %v4120_v44 = vor.u32 %v4119_v24, %v4115_v20  ;;  %v2810_v30 = vrot.slane %v2572_v56, 5  ;;  %v9706_v23 = vcombine.low %v12363_v59, %v12367_v19  ;;  %v4128_v14 = vshrl.u32 %v3485_v22, 16  ;;  %v4513_v60 = vld [vmem:[#allocation2 + $0x16c] sm:$0xf]  ;;  %v4514_v59 = vld [vmem:[#allocation2 + $0x170] sm:$0x1] }
 0x1e7   : > { %v4116_v2 = vsel %vm11375_vm6, %v4111_v31, %v4115_v20  ;;  %v2809_v3 = vrot.slane %v2807_v36, 4  ;;  %v4811_v37 = vsel %vm11479_vm13, %v4809_v58, %v4810_v27  ;;  %v4131_v38 = vshll.u32 %v3485_v22, 16  ;;  %v2575_v4 = vld [vmem:[#allocation2 + $0x8c] sm:$0x1]  ;;  %v3488_v24 = vld [vmem:[#allocation2 + $0x168] sm:$0xf] }
 0x1e8   : > { %8153 = vmatmul.mubr.bf16.vlgmr.msra.gmra.mrb[32].mxu1 %v9705_v11  ;;  %v4121_v28 = vrot.slane %v4120_v44, 4  ;;  %v4137_v6 = vshll.u32 %v3486_v33, 16  ;;  %v9851_v8 = vcombine.low %v4808_v16, %v4811_v37  ;;  %v12387_v50 = vsel %vm11479_vm13, %v9675_v34, %v2807_v36  ;;  %v11030_v34 = vld [vmem:[#allocation2 + $0x84] sm:$0xff]  }
 0x1e9   : > { %10422 = vmatpush3.bf16.msra.mxu1 %v11097_v47  ;;  %8160 = vmatprep.mubr.bf16.mxu1 %v11029_v43  ;;  %v4130_v25 = vrot.slane %v4128_v14, 4  ;;  %v4141_v11 = vshrl.u32 %v3486_v33, 16  ;;  %v12393_v7 = vsel %vm11479_vm13, %v2809_v3, %v2810_v30  ;;  %v4133_v13 = vrot.slane %v4131_v38, 5  ;;  %v11039_v43 = vld [vmem:[%s13535_s1 + $0x210] sm:$0xff]   ;;  %v4516_v14 = vld [vmem:[#allocation2 + $0x178] sm:$0xf] }
 0x1ea   : > { %v4126_v39 = vsel %vm11375_vm6, %v4121_v28, %v4125_v10  ;;  %v4139_v19 = vrot.slane %v4137_v6, 5  ;;  %10423 = vmatprep.subr.bf16.mxu1 %v11033_v49  ;;  %v4147_v56 = vshll.u32 %v3487_v9, 16  ;;  %v9820_v20 = vrot.slane %v4512_v1, 9  ;;  %v3489_v10 = vld [vmem:[#allocation2 + $0x16c] sm:$0xf] }
 0x1eb   : > { %v9786_v12 = vcombine.low %v4116_v2, %v4126_v39  ;;  %v4143_v48 = vrot.slane %v4141_v11, 4  ;;  %v4134_v63 = vor.u32 %v4133_v13, %v4130_v25  ;;  %v4814_v27 = vrot.slane %v4513_v60, 5  ;;  %v3490_v1 = vld [vmem:[#allocation2 + $0x170] sm:$0x1]  ;;  %v4515_v3 = vld [vmem:[#allocation2 + $0x174] sm:$0xe] }
 0x1ec   : > { %v4817_v22 = vrot.slane %v4514_v59, 5  ;;  %v9676_v31 = vrot.slane %v12378_v32, 9  ;;  %v4149_v33 = vrot.slane %v4147_v56, 5  ;;  %v2814_v44 = vrot.slane %v2574_v45, 5  ;;  %v11045_v32 = vld [vmem:[%s13535_s1 + $0x218] sm:$0xff]  }
 0x1ed   : > { %8578 = vmatmul.mubr.bf16.gmra.mrb[100].mxu0 %v9786_v12  ;;  %v4144_v36 = vor.u32 %v4143_v48, %v4139_v19  ;;  %v2817_v16 = vrot.slane %v2575_v4, 5  ;;  %10424 = vmatpush3.bf16.msra.mxu1 %v11033_v49  ;;  %v4135_v58 = vrot.slane %v4134_v63, 4  ;;  %v4815_v30 = vsel %vm11479_vm13, %v9820_v20, %v4814_v27  ;;  %v2576_v6 = vld [vmem:[#allocation2 + $0x90] sm:$0xe]  ;;  %v2577_v45 = vld [vmem:[#allocation2 + $0x94] sm:$0xf] }
 0x1ee   : > { %8585 = vmatprep.mubr.bf16.mxu0 %v9851_v8  ;;  %v4816_v9 = vrot.slane %v4814_v27, 4  ;;  %v4152_v2 = vshrl.u32 %v3488_v24, 16  ;;  %10425 = vmatprep.subr.bf16.mxu1 %v11039_v43  ;;  %v9707_v28 = vcombine.low %v12387_v50, %v12393_v7  ;;  %v2816_v49 = vrot.slane %v2814_v44, 4  ;;  %v4517_v7 = vld [vmem:[#allocation2 + $0x17c] sm:$0x1]  ;;  %v11052_v12 = vld [vmem:[%s13535_s1 + $0x220] sm:$0xff]  }
 0x1ef   : > { %v4145_v37 = vrot.slane %v4144_v36, 4  ;;  %v4155_v38 = vshll.u32 %v3488_v24, 16  ;;  %v4140_v47 = vsel %vm11375_vm6, %v4135_v58, %v4139_v19  ;;  %v4161_v11 = vshll.u32 %v3489_v10, 16  ;;  %v12423_v63 = vld [vmem:[#allocation2 + $0x98] sm:$0x1] }
 0x1f0   : > { %8161 = vmatmul.mubr.bf16.gmra.mrb[36].mxu1 %v9706_v23  ;;  %v4818_v8 = vsel %vm11479_vm13, %v4816_v9, %v4817_v22  ;;  %v4154_v25 = vrot.slane %v4152_v2, 4  ;;  %v12414_v50 = vsel %vm11479_vm13, %v9676_v31, %v2814_v44  ;;  %v12418_v13 = vsel %vm11479_vm13, %v2816_v49, %v2817_v16  ;;  %v3491_v27 = vld [vmem:[#allocation2 + $0x174] sm:$0xf]  ;;  %v3492_v36 = vld [vmem:[#allocation2 + $0x178] sm:$0xf]  ;;  %v11059_v9 = vld [vmem:[%s13535_s1 + $0x228] sm:$0xff]  }
 0x1f1   : > { %8168 = vmatprep.mubr.bf16.mxu1 %v11030_v34  ;;  %v4150_v60 = vsel %vm11375_vm6, %v4145_v37, %v4149_v33  ;;  %v9852_v59 = vcombine.low %v4815_v30, %v4818_v8  ;;  %v4157_v39 = vrot.slane %v4155_v38, 5  ;;  %10426 = vmatpush3.bf16.msra.mxu1 %v11039_v43  ;;  %v4163_v19 = vrot.slane %v4161_v11, 5  ;;  %v11032_v33 = vld [vmem:[#allocation2 + $0x90] sm:$0xff]   ;;  %v3493_v58 = vld [vmem:[#allocation2 + $0x17c] sm:$0x1] }
 0x1f2   : > { %v9787_v23 = vcombine.low %v4140_v47, %v4150_v60  ;;  %v4165_v4 = vshrl.u32 %v3489_v10, 16  ;;  %10427 = vmatprep.subr.bf16.mxu1 %v11045_v32  ;;  %v4171_v56 = vshll.u32 %v3490_v1, 16  ;;  %v9821_v20 = vrot.slane %v4515_v3, 9  ;;  %v4518_v30 = vld [vmem:[#allocation2 + $0x180] sm:$0xe] }
 0x1f3   : > { %v4158_v48 = vor.u32 %v4157_v39, %v4154_v25  ;;  %v4821_v24 = vrot.slane %v4516_v14, 5  ;;  %v4824_v22 = vrot.slane %v4517_v7, 5  ;;  %v9677_v31 = vrot.slane %v2576_v6, 9  ;;  %v2579_v6 = vld [vmem:[#allocation2 + $0x9c] sm:$0xe] }
 0x1f4   : > { %v4167_v43 = vrot.slane %v4165_v4, 4  ;;  %v2821_v34 = vrot.slane %v2577_v45, 5  ;;  %v9708_v10 = vcombine.low %v12414_v50, %v12418_v13  ;;  %v4173_v2 = vrot.slane %v4171_v56, 5  ;;  %v2580_v45 = vld [vmem:[#allocation2 + $0xa0] sm:$0xf] }
 0x1f5   : > { %8586 = vmatmul.mubr.bf16.gmra.mrb[104].mxu0 %v9787_v23  ;;  %v4159_v44 = vrot.slane %v4158_v48, 4  ;;  %v4823_v16 = vrot.slane %v4821_v24, 4  ;;  %10428 = vmatpush3.bf16.msra.mxu1 %v11045_v32  ;;  %v4822_v3 = vsel %vm11479_vm13, %v9821_v20, %v4821_v24  ;;  %v4176_v32 = vshrl.u32 %v3491_v27, 16  ;;  %v4519_v60 = vld [vmem:[#allocation2 + $0x184] sm:$0xf] }
 0x1f6   : > { %8593 = vmatprep.mubr.bf16.mxu0 %v9852_v59  ;;  %v4168_v1 = vor.u32 %v4167_v43, %v4163_v19  ;;  %v2823_v14 = vrot.slane %v2821_v34, 4  ;;  %10429 = vmatprep.subr.bf16.mxu1 %v11052_v12  ;;  %v12436_v49 = vsel %vm11479_vm13, %v9677_v31, %v2821_v34  ;;  %v4179_v38 = vshll.u32 %v3491_v27, 16  ;;  %v4520_v4 = vld [vmem:[#allocation2 + $0x188] sm:$0x1]  ;;  %v2581_v24 = vld [vmem:[#allocation2 + $0xa4] sm:$0x1] }
 0x1f7   : > { %v4825_v37 = vsel %vm11479_vm13, %v4823_v16, %v4824_v22  ;;  %v4164_v47 = vsel %vm11375_vm6, %v4159_v44, %v4163_v19  ;;  %v2824_v25 = vrot.slane %v12423_v63, 5  ;;  %v4185_v11 = vshll.u32 %v3492_v36, 16  ;;  %v11034_v27 = vld [vmem:[#allocation2 + $0x9c] sm:$0xff]   ;;  %v3495_v34 = vld [vmem:[#allocation2 + $0x184] sm:$0xf] }
 0x1f8   : > { %8169 = vmatmul.mubr.bf16.gmra.mrb[40].mxu1 %v9707_v28  ;;  %v4169_v8 = vrot.slane %v4168_v1, 4  ;;  %v9853_v59 = vcombine.low %v4822_v3, %v4825_v37  ;;  %v4178_v39 = vrot.slane %v4176_v32, 4  ;;  %v4181_v7 = vrot.slane %v4179_v38, 5  ;;  %v3494_v31 = vld [vmem:[#allocation2 + $0x180] sm:$0xf]  ;;  %v11066_v38 = vld [vmem:[%s13535_s1 + $0x230] sm:$0xff]  }
 0x1f9   : > { %8176 = vmatprep.mubr.bf16.mxu1 %v11032_v33  ;;  %v4189_v23 = vshrl.u32 %v3492_v36, 16  ;;  %10430 = vmatpush3.bf16.msra.mxu1 %v11052_v12  ;;  %v4187_v56 = vrot.slane %v4185_v11, 5  ;;  %v4195_v28 = vshll.u32 %v3493_v58, 16  ;;  %v9822_v20 = vrot.slane %v4518_v30, 9  ;;  %v4521_v11 = vld [vmem:[#allocation2 + $0x18c] sm:$0xe] }
 0x1fa   : > { %v4174_v48 = vsel %vm11375_vm6, %v4169_v8, %v4173_v2  ;;  %10431 = vmatprep.subr.bf16.mxu1 %v11059_v9  ;;  %v4182_v63 = vor.u32 %v4181_v7, %v4178_v39  ;;  %v4828_v22 = vrot.slane %v4519_v60, 5  ;;  %v4831_v44 = vrot.slane %v4520_v4, 5  ;;  %v3496_v8 = vld [vmem:[#allocation2 + $0x188] sm:$0x1]  ;;  %v2582_v60 = vld [vmem:[#allocation2 + $0xa8] sm:$0xe] }
 0x1fb   : > { %v9788_v19 = vcombine.low %v4164_v47, %v4174_v48  ;;  %v4191_v43 = vrot.slane %v4189_v23, 4  ;;  %v4197_v33 = vrot.slane %v4195_v28, 5  ;;  %v9678_v36 = vrot.slane %v2579_v6, 9  ;;  %v4522_v23 = vld [vmem:[#allocation2 + $0x190] sm:$0xf] }
 0x1fc   : > { %v2828_v16 = vrot.slane %v2580_v45, 5  ;;  %v4183_v12 = vrot.slane %v4182_v63, 4  ;;  %v4829_v58 = vsel %vm11479_vm13, %v9822_v20, %v4828_v22  ;;  %v4830_v30 = vrot.slane %v4828_v22, 4  ;;  %v4523_v4 = vld [vmem:[#allocation2 + $0x194] sm:$0x1] }
 0x1fd   : > { %8594 = vmatmul.mubr.bf16.gmra.mrb[108].mxu0 %v9788_v19  ;;  %v4192_v1 = vor.u32 %v4191_v43, %v4187_v56  ;;  %10432 = vmatpush3.bf16.msra.mxu1 %v11059_v9  ;;  %v2825_v2 = vsel %vm11479_vm13, %v2823_v14, %v2824_v25  ;;  %v2831_v37 = vrot.slane %v2581_v24, 5  ;;  %v4200_v32 = vshrl.u32 %v3494_v31, 16  ;;  %v3497_v28 = vld [vmem:[#allocation2 + $0x18c] sm:$0xf]  ;;  %v3498_v43 = vld [vmem:[#allocation2 + $0x190] sm:$0xf] }
 0x1fe   : > { %8601 = vmatprep.mubr.bf16.mxu0 %v9853_v59  ;;  %v2830_v3 = vrot.slane %v2828_v16, 4  ;;  %v4188_v6 = vsel %vm11375_vm6, %v4183_v12, %v4187_v56  ;;  %v4832_v47 = vsel %vm11479_vm13, %v4830_v30, %v4831_v44  ;;  %v4203_v9 = vshll.u32 %v3494_v31, 16  ;;  %v2583_v59 = vld [vmem:[#allocation2 + $0xac] sm:$0xf]  ;;  %10433 = vmatprep.subr.bf16.mxu1 %v11066_v38 }
 0x1ff   : > { %v4193_v45 = vrot.slane %v4192_v1, 4  ;;  %v9854_v14 = vcombine.low %v4829_v58, %v4832_v47  ;;  %v12459_v25 = vsel %vm11479_vm13, %v9678_v36, %v2828_v16  ;;  %v4202_v39 = vrot.slane %v4200_v32, 4  ;;  %v11036_v36 = vld [vmem:[#allocation2 + $0xa8] sm:$0xff]  }
 0x200   : > { %8177 = vmatmul.mubr.bf16.gmra.mrb[44].mxu1 %v9708_v10  ;;  %v4209_v7 = vshll.u32 %v3495_v34, 16  ;;  %v12465_v56 = vsel %vm11479_vm13, %v2830_v3, %v2831_v37  ;;  %v4205_v50 = vrot.slane %v4203_v9, 5  ;;  %v4213_v13 = vshrl.u32 %v3495_v34, 16  ;;  %v2584_v10 = vld [vmem:[#allocation2 + $0xb0] sm:$0x1] }
 0x201   : > { %8184 = vmatprep.mubr.bf16.mxu1 %v11034_v27  ;;  %v4198_v48 = vsel %vm11375_vm6, %v4193_v45, %v4197_v33  ;;  %10434 = vmatpush3.bf16.msra.mxu1 %v11066_v38  ;;  %v4219_v19 = vshll.u32 %v3496_v8, 16  ;;  %v9823_v63 = vrot.slane %v4521_v11, 9  ;;  %v4835_v31 = vrot.slane %v4522_v23, 5  ;;  %v350_v37 = vld [vmem:[%s11354_s28 + $0xf8] sm:$0xf] }
 0x202   : > { %v9789_v20 = vcombine.low %v4188_v6, %v4198_v48  ;;  %v4211_v24 = vrot.slane %v4209_v7, 5  ;;  %v4206_v22 = vor.u32 %v4205_v50, %v4202_v39  ;;  %v4215_v27 = vrot.slane %v4213_v13, 4  ;;  %v3499_v8 = vld [vmem:[#allocation2 + $0x194] sm:$0x1]  ;;  %v351_v11 = vld [vmem:[%s11354_s28 + $0xfc] sm:$0xf] }
 0x203   : > { %v4838_v44 = vrot.slane %v4523_v4, 5  ;;  %v9709_v33 = vcombine.low %v12436_v49, %v2825_v2  ;;  %v4221_v16 = vrot.slane %v4219_v19, 5  ;;  %v9679_v12 = vrot.slane %v2582_v60, 9  ;;  %v12482_v39 = vld [vmem:[#allocation2 + $0xb4] sm:$0xe] }
 0x204   : > { %v2835_v1 = vrot.slane %v2583_v59, 5  ;;  %v9710_v34 = vcombine.low %v12459_v25, %v12465_v56  ;;  %v4207_v58 = vrot.slane %v4206_v22, 4  ;;  %v4216_v30 = vor.u32 %v4215_v27, %v4211_v24  ;;  %v2586_v7 = vld [vmem:[#allocation2 + $0xb8] sm:$0xf]  ;;  %v2587_v50 = vld [vmem:[#allocation2 + $0xbc] sm:$0x1] }
 0x205   : > { %8602 = vmatmul.mubr.bf16.gmra.mrb[112].mxu0 %v9789_v20  ;;  %v4837_v3 = vrot.slane %v4835_v31, 4  ;;  %v4836_v32 = vsel %vm11479_vm13, %v9823_v63, %v4835_v31  ;;  %v2838_v38 = vrot.slane %v2584_v10, 5  ;;  %v4224_v6 = vshrl.u32 %v3497_v28, 16  ;;  %v5296_v13 = vld [vmem:[#allocation2 + $0x18] sm:$0xf] }
 0x206   : > { %8609 = vmatprep.mubr.bf16.mxu0 %v9854_v14  ;;  %v4227_v49 = vshll.u32 %v3497_v28, 16  ;;  %v4212_v2 = vsel %vm11375_vm6, %v4207_v58, %v4211_v24  ;;  %v4217_v45 = vrot.slane %v4216_v30, 4  ;;  %v4233_v9 = vshll.u32 %v3498_v43, 16  ;;  %v1218_v31 = vld [vmem:[#allocation2 + $0x198] sm:$0xf] }
 0x207   : > { %v4839_v47 = vsel %vm11479_vm13, %v4837_v3, %v4838_v44  ;;  %v12480_v60 = vsel %vm11479_vm13, %v9679_v12, %v2835_v1  ;;  %v2837_v59 = vrot.slane %v2835_v1, 4  ;;  %v4226_v14 = vrot.slane %v4224_v6, 4  ;;  %v1222_v58 = vld [vmem:[#allocation2 + $0x1a0] sm:$0x1] }
 0x208   : > { %8185 = vmatmul.mubr.bf16.gmra.mrb[48].mxu1 %v9709_v33  ;;  %v4229_v25 = vrot.slane %v4227_v49, 5  ;;  %v4222_v23 = vsel %vm11375_vm6, %v4217_v45, %v4221_v16  ;;  %v9855_v4 = vcombine.low %v4836_v32, %v4839_v47  ;;  %v4235_v48 = vrot.slane %v4233_v9, 5  ;;  %v5297_v49 = vld [vmem:[#allocation2 + $0x1c] sm:$0xf]  ;;  %v5298_v9 = vld [vmem:[#allocation2 + $0x20] sm:$0x1] }
 0x209   : > { %8192 = vmatprep.mubr.bf16.mxu1 %v11036_v36  ;;  %v4237_v56 = vshrl.u32 %v3498_v43, 16  ;;  %v9790_v10 = vcombine.low %v4212_v2, %v4222_v23  ;;  %v4243_v20 = vshll.u32 %v3499_v8, 16  ;;  %v883_v24 = vshrl.u32 %v350_v37, 16  ;;  %v11037_v43 = vld [vmem:[#allocation2 + $0xb4] sm:$0xff]   ;;  %v5299_v23 = vld [vmem:[#allocation2 + $0x24] sm:$0xf] }
 0x20a   : > { %v4230_v28 = vor.u32 %v4229_v25, %v4226_v14  ;;  %v886_v63 = vshll.u32 %v350_v37, 16  ;;  %v891_v22 = vshrl.u32 %v351_v11, 16  ;;  %v894_v27 = vshll.u32 %v351_v11, 16  ;;  %v2589_v11 = vld [vmem:[#allocation2 + $0xdc] sm:$0xf] }
 0x20b   : > { %v4239_v19 = vrot.slane %v4237_v56, 4  ;;  %v12488_v44 = vsel %vm11479_vm13, %v2837_v59, %v2838_v38  ;;  %v4245_v36 = vrot.slane %v4243_v20, 5  ;;  %v885_v16 = vrot.slane %v883_v24, 7 }
 0x20c   : > { %v4231_v33 = vrot.slane %v4230_v28, 4  ;;  %v893_v1 = vrot.slane %v891_v22, 7  ;;  %v9680_v30 = vrot.slane %v12482_v39, 9  ;;  %v2842_v3 = vrot.slane %v2586_v7, 5  ;;  %v2588_v7 = vld [vmem:[#allocation2 + $0xd8] sm:$0xe] }
 0x20d   : > { %8610 = vmatmul.mubr.bf16.gmra.mrb[116].mxu0 %v9790_v10  ;;  %v4240_v12 = vor.u32 %v4239_v19, %v4235_v48  ;;  %v888_v37 = vor.u32 %v886_v63, %v885_v16  ;;  %v889_v32 = vrot.slane %v885_v16, 4  ;;  %v2845_v6 = vrot.slane %v2587_v50, 5  ;;  %v2590_v19 = vld [vmem:[#allocation2 + $0xe0] sm:$0x1] }
 0x20e   : > { %8617 = vmatprep.mubr.bf16.mxu0 %v9855_v4  ;;  %v5393_v2 = vshrl.u32 %v5296_v13, 16  ;;  %v4236_v38 = vsel %vm11375_vm6, %v4231_v33, %v4235_v48  ;;  %v896_v47 = vor.u32 %v894_v27, %v893_v1  ;;  %v898_v8 = vrot.slane %v893_v1, 4  ;;  %v12495_v4 = vld [vmem:[#allocation2 + $0x28] sm:$0xf] }
 0x20f   : > { %v4241_v45 = vrot.slane %v4240_v12, 4  ;;  %v1219_v59 = vsel %vm11397_vm9, %v888_v37, %v1218_v31  ;;  %v2844_v14 = vrot.slane %v2842_v3, 4  ;;  %v5396_v39 = vshll.u32 %v5296_v13, 16  ;;  %v11040_v31 = vld [vmem:[#allocation2 + $0xc0] sm:$0xff]  }
 0x210   : > { %8193 = vmatmul.mubr.bf16.gmra.mrb[52].mxu1 %v9710_v34  ;;  %v5395_v25 = vrot.slane %v5393_v2, 4  ;;  %v897_v56 = vsel %vm11388_vm8, %v889_v32, %v896_v47  ;;  %1220 = vst [vmem:[#allocation2 + $0x198] sm:$0xf] %v1219_v59  ;;  %v1223_v34 = vsel %vm11414_vm10, %v898_v8, %v1222_v58  ;;  %v5402_v51 = vshll.u32 %v5297_v49, 16 }
 0x211   : > { %8200 = vmatprep.mubr.bf16.mxu1 %v11037_v43  ;;  %v4246_v48 = vsel %vm11375_vm6, %v4241_v45, %v4245_v36  ;;  %1221 = vst [vmem:[#allocation2 + $0x19c] sm:$0xf] %v897_v56  ;;  %1224 = vst [vmem:[#allocation2 + $0x1a0] sm:$0x1] %v1223_v34  ;;  %v5398_v13 = vrot.slane %v5396_v39, 5  ;;  %v5406_v10 = vshrl.u32 %v5297_v49, 16  ;;  %v9711_v28 = vcombine.low %v12480_v60, %v12488_v44 }
 0x212   : > { %v9791_v50 = vcombine.low %v4236_v38, %v4246_v48  ;;  %v12507_v20 = vsel %vm11479_vm13, %v9680_v30, %v2842_v3  ;;  %v12509_v24 = vrot.slane %v5402_v51, 5  ;;  %v5412_v46 = vshll.u32 %v5298_v9, 16  ;;  %v2592_v51 = vld [vmem:[#allocation2 + $0xe8] sm:$0xf] }
 0x213   : > { %v12513_v61 = vsel %vm11479_vm13, %v2844_v14, %v2845_v6  ;;  %v5399_v63 = vor.u32 %v5398_v13, %v5395_v25  ;;  %v5408_v22 = vrot.slane %v5406_v10, 4  ;;  %v2849_v27 = vrot.slane %v2589_v11, 5  ;;  %v5301_v11 = vld [vmem:[#allocation2 + $0x2c] sm:$0x1] }
 0x214   : > { %v9681_v33 = vrot.slane %v2588_v7, 9  ;;  %v5417_v36 = vshrl.u32 %v5299_v23, 16  ;;  %v5420_v60 = vshll.u32 %v5299_v23, 16  ;;  %v5426_v44 = vshll.u32 %v12495_v4, 16 }
 0x215   : > { %8618 = vmatmul.mubr.bf16.gmra.mrb[120].mxu0 %v9791_v50  ;;  %v5400_v16 = vrot.slane %v5399_v63, 4  ;;  %v5409_v43 = vor.u32 %v5408_v22, %v12509_v24  ;;  %v5414_v12 = vrot.slane %v5412_v46, 5  ;;  %v2852_v1 = vrot.slane %v2590_v19, 5  ;;  %v2591_v22 = vld [vmem:[#allocation2 + $0xe4] sm:$0xe] }
 0x216   : > { %v2851_v58 = vrot.slane %v2849_v27, 4  ;;  %v5419_v30 = vrot.slane %v5417_v36, 4  ;;  %v5422_v3 = vrot.slane %v5420_v60, 5  ;;  %v12517_v37 = vrot.slane %v5426_v44, 5  ;;  %v11073_v44 = vld [vmem:[%s13535_s1 + $0x238] sm:$0xff]  }
 0x217   : > { %v4524_v32 = vld [vmem:[#allocation2 + $0x198] sm:$0xe]  ;;  %v5410_v49 = vrot.slane %v5409_v43, 4  ;;  %v5430_v2 = vshrl.u32 %v12495_v4, 16  ;;  %v9712_v8 = vcombine.low %v12507_v20, %v12513_v61  ;;  %v5405_v7 = vsel %vm11375_vm6, %v5400_v16, %v12509_v24  ;;  %v5302_v20 = vld [vmem:[#allocation2 + $0x30] sm:$0xf]  ;;  %10435 = vmatprep.subr.bf16.mxu1 %v11073_v44 }
 0x218   : > { %8201 = vmatmul.mubr.bf16.gmra.mrb[56].mxu1 %v9711_v28  ;;  %v3500_v6 = vld [vmem:[#allocation2 + $0x198] sm:$0xf]  ;;  %v4525_v38 = vld [vmem:[#allocation2 + $0x19c] sm:$0xf]  ;;  %v4526_v45 = vld [vmem:[#allocation2 + $0x1a0] sm:$0x1]  ;;  %v12527_v23 = vsel %vm11479_vm13, %v9681_v33, %v2849_v27  ;;  %v5423_v28 = vor.u32 %v5422_v3, %v5419_v30  ;;  %v2853_v33 = vsel %vm11479_vm13, %v2851_v58, %v2852_v1 }
 0x219   : > { %8208 = vmatprep.mubr.bf16.mxu1 %v11040_v31  ;;  %v9824_v47 = vrot.slane %v4524_v32, 9  ;;  %v4248_v9 = vshrl.u32 %v3500_v6, 16  ;;  %v4842_v59 = vrot.slane %v4525_v38, 5  ;;  %v4845_v14 = vrot.slane %v4526_v45, 5  ;;  %v3501_v25 = vld [vmem:[#allocation2 + $0x19c] sm:$0xf]  ;;  %10436 = vmatpush3.bf16.msra.mxu1 %v11073_v44 }
 0x21a   : > { %v3502_v39 = vld [vmem:[#allocation2 + $0x1a0] sm:$0x1]  ;;  %v4251_v48 = vshll.u32 %v3500_v6, 16  ;;  %v4257_v56 = vshll.u32 %v3501_v25, 16  ;;  %v4261_v34 = vshrl.u32 %v3501_v25, 16  ;;  %v11041_v24 = vld [vmem:[#allocation2 + $0xe4] sm:$0xff]   ;;  %v5415_v63 = vsel %vm11375_vm6, %v5410_v49, %v5414_v12 }
 0x21b   : > { %v4250_v4 = vrot.slane %v4248_v9, 4  ;;  %v4843_v50 = vsel %vm11479_vm13, %v9824_v47, %v4842_v59  ;;  %v4844_v13 = vrot.slane %v4842_v59, 4  ;;  %v4267_v10 = vshll.u32 %v3502_v39, 16  ;;  %v2593_v27 = vld [vmem:[#allocation2 + $0xec] sm:$0x1]  ;;  %v11043_v25 = vld [vmem:[#allocation2 + $0xf0] sm:$0xff]  }
 0x21c   : > { %v4253_v46 = vrot.slane %v4251_v48, 5  ;;  %v4259_v19 = vrot.slane %v4257_v56, 5  ;;  %v4263_v61 = vrot.slane %v4261_v34, 4  ;;  %v5432_v36 = vrot.slane %v5430_v2, 4  ;;  %v5303_v32 = vld [vmem:[#allocation2 + $0x34] sm:$0xf] }
 0x21d   : > { %v4846_v31 = vsel %vm11479_vm13, %v4844_v13, %v4845_v14  ;;  %v5436_v60 = vshll.u32 %v5301_v11, 16  ;;  %v4269_v3 = vrot.slane %v4267_v10, 5  ;;  %v9889_v12 = vcombine.low %v5405_v7, %v5415_v63  ;;  %v5305_v48 = vld [vmem:[#allocation2 + $0x3c] sm:$0xf] }
 0x21e   : > { %v9856_v16 = vcombine.low %v4843_v50, %v4846_v31  ;;  %v4254_v43 = vor.u32 %v4253_v46, %v4250_v4  ;;  %v4264_v30 = vor.u32 %v4263_v61, %v4259_v19  ;;  %v5424_v6 = vrot.slane %v5423_v28, 4  ;;  %v5304_v4 = vld [vmem:[#allocation2 + $0x38] sm:$0x1]  ;;  %v5306_v28 = vld [vmem:[#allocation2 + $0x40] sm:$0xf] }
 0x21f   : > { %v5433_v49 = vor.u32 %v5432_v36, %v12517_v37  ;;  %v2856_v38 = vrot.slane %v2592_v51, 5  ;;  %v5441_v2 = vshrl.u32 %v5302_v20, 16  ;;  %v5444_v45 = vshll.u32 %v5302_v20, 16  ;;  %v2596_v36 = vld [vmem:[#allocation2 + $0xf8] sm:$0x1] }
 0x220   : > { %8209 = vmatmul.mubr.bf16.gmra.mrb[60].mxu1 %v9712_v8  ;;  %8625 = vmatprep.mubr.bf16.mxu0 %v9856_v16  ;;  %v4255_v1 = vrot.slane %v4254_v43, 4  ;;  %v4265_v58 = vrot.slane %v4264_v30, 4  ;;  %v5438_v47 = vrot.slane %v5436_v60, 5  ;;  %v9682_v9 = vrot.slane %v2591_v22, 9  ;;  %v11042_v60 = vld [vmem:[#allocation2 + $0x18] sm:$0xff]  }
 0x221   : > { %8216 = vmatprep.mubr.bf16.mxu1 %v11041_v24  ;;  %v2859_v11 = vrot.slane %v2593_v27, 5  ;;  %v5450_v59 = vshll.u32 %v5303_v32, 16  ;;  %v5434_v39 = vrot.slane %v5433_v49, 4  ;;  %v2858_v7 = vrot.slane %v2856_v38, 4  ;;  %v5307_v43 = vld [vmem:[#allocation2 + $0x44] sm:$0x1] }
 0x222   : > { %v4260_v8 = vsel %vm11375_vm6, %v4255_v1, %v4259_v19  ;;  %v4270_v14 = vsel %vm11375_vm6, %v4265_v58, %v4269_v3  ;;  %v9713_v34 = vcombine.low %v12527_v23, %v2853_v33  ;;  %v5443_v51 = vrot.slane %v5441_v2, 4  ;;  %v2595_v19 = vld [vmem:[#allocation2 + $0xf4] sm:$0xf]  ;;  %v2594_v33 = vld [vmem:[#allocation2 + $0xf0] sm:$0xe] }
 0x223   : > { %v9792_v56 = vcombine.low %v4260_v8, %v4270_v14  ;;  %v5446_v50 = vrot.slane %v5444_v45, 5  ;;  %v12546_v13 = vrot.slane %v5450_v59, 5  ;;  %v5454_v10 = vshrl.u32 %v5303_v32, 16  ;;  %v5308_v30 = vld [vmem:[#allocation2 + $0x48] sm:$0xf] }
 0x224   : > { %v5429_v20 = vsel %vm11375_vm6, %v5424_v6, %v12517_v37  ;;  %v2857_v46 = vsel %vm11479_vm13, %v9682_v9, %v2856_v38  ;;  %v5439_v61 = vsel %vm11375_vm6, %v5434_v39, %v5438_v47  ;;  %v5465_v24 = vshrl.u32 %v5305_v48, 16  ;;  %v5309_v1 = vld [vmem:[#allocation2 + $0x4c] sm:$0xf]  ;;  %v11046_v9 = vld [vmem:[#allocation2 + $0xfc] sm:$0xff]  }
 0x225   : > { %8626 = vmatmul.mubr.bf16.gmra.mrb[124].mxu0 %v9792_v56  ;;  %v5456_v23 = vrot.slane %v5454_v10, 4  ;;  %v5468_v63 = vshll.u32 %v5305_v48, 16  ;;  %v2860_v22 = vsel %vm11479_vm13, %v2858_v7, %v2859_v11  ;;  %v5447_v27 = vor.u32 %v5446_v50, %v5443_v51  ;;  %v2598_v7 = vld [vmem:[#allocation2 + $0x100] sm:$0xf]  ;;  %v2597_v10 = vld [vmem:[#allocation2 + $0xfc] sm:$0xe] }
 0x226   : > { %8666 = vmatprep.mubr.bf16.mxu0 %v9889_v12  ;;  %v5460_v31 = vshll.u32 %v5304_v4, 16  ;;  %v5474_v37 = vshll.u32 %v5306_v28, 16  ;;  %v2863_v16 = vrot.slane %v2595_v19, 5  ;;  %v5467_v3 = vrot.slane %v5465_v24, 4  ;;  %v5310_v24 = vld [vmem:[#allocation2 + $0x50] sm:$0x1] }
 0x227   : > { %v5457_v44 = vor.u32 %v5456_v23, %v12546_v13  ;;  %v5470_v32 = vrot.slane %v5468_v63, 5  ;;  %v5478_v6 = vshrl.u32 %v5306_v28, 16  ;;  %v9890_v49 = vcombine.low %v5429_v20, %v5439_v61  ;;  %v2599_v28 = vld [vmem:[#allocation2 + $0x104] sm:$0x1] }
 0x228   : > { %8217 = vmatmul.mubr.bf16.gmra.mrb[64].mxu1 %v9713_v34  ;;  %v12558_v12 = vrot.slane %v5474_v37, 5  ;;  %v9714_v38 = vcombine.low %v2857_v46, %v2860_v22  ;;  %v5448_v58 = vrot.slane %v5447_v27, 4  ;;  %v5462_v45 = vrot.slane %v5460_v31, 5  ;;  %v11044_v34 = vld [vmem:[#allocation2 + $0x24] sm:$0xff]   ;;  %v2601_v31 = vld [vmem:[#allocation2 + $0x10c] sm:$0xf] }
 0x229   : > { %8224 = vmatprep.mubr.bf16.mxu1 %v11043_v25  ;;  %v5458_v2 = vrot.slane %v5457_v44, 4  ;;  %v5480_v47 = vrot.slane %v5478_v6, 4  ;;  %v9683_v11 = vrot.slane %v2594_v33, 9  ;;  %v2865_v59 = vrot.slane %v2863_v16, 4 }
 0x22a   : > { %v2866_v8 = vrot.slane %v2596_v36, 5  ;;  %v5484_v14 = vshll.u32 %v5307_v43, 16  ;;  %v5471_v25 = vor.u32 %v5470_v32, %v5467_v3  ;;  %v5489_v4 = vshrl.u32 %v5308_v30, 16  ;;  %v5312_v43 = vld [vmem:[#allocation2 + $0x58] sm:$0xf] }
 0x22b   : > { %v5481_v39 = vor.u32 %v5480_v47, %v12558_v12  ;;  %v5492_v48 = vshll.u32 %v5308_v30, 16  ;;  %v5498_v56 = vshll.u32 %v5309_v1, 16  ;;  %v5453_v51 = vsel %vm11375_vm6, %v5448_v58, %v12546_v13  ;;  %v11048_v30 = vld [vmem:[#allocation2 + $0x108] sm:$0xff]  }
 0x22c   : > { %v5463_v50 = vsel %vm11375_vm6, %v5458_v2, %v5462_v45  ;;  %v5502_v20 = vshrl.u32 %v5309_v1, 16  ;;  %v2864_v46 = vsel %vm11479_vm13, %v9683_v11, %v2863_v16  ;;  %v2867_v19 = vsel %vm11479_vm13, %v2865_v59, %v2866_v8  ;;  %v2600_v58 = vld [vmem:[#allocation2 + $0x108] sm:$0xe]  ;;  %v2602_v45 = vld [vmem:[#allocation2 + $0x110] sm:$0x1] }
 0x22d   : > { %8667 = vmatmul.mubr.bf16.vlgmr.msra.gmra.mrb[0].mxu0 %v11042_v60  ;;  %v5486_v61 = vrot.slane %v5484_v14, 5  ;;  %v2870_v23 = vrot.slane %v2598_v7, 5  ;;  %v5472_v63 = vrot.slane %v5471_v25, 4  ;;  %v5482_v22 = vrot.slane %v5481_v39, 4  ;;  %v5311_v60 = vld [vmem:[#allocation2 + $0x54] sm:$0xf] }
 0x22e   : > { %8674 = vmatprep.mubr.bf16.mxu0 %v9890_v49  ;;  %v5491_v27 = vrot.slane %v5489_v4, 4  ;;  %v5494_v13 = vrot.slane %v5492_v48, 5  ;;  %v9891_v33 = vcombine.low %v5453_v51, %v5463_v50  ;;  %v12570_v36 = vrot.slane %v5498_v56, 5  ;;  %v5314_v39 = vld [vmem:[#allocation2 + $0x60] sm:$0xf]  ;;  %v11047_v4 = vld [vmem:[#allocation2 + $0x30] sm:$0xff]  }
 0x22f   : > { %v5504_v37 = vrot.slane %v5502_v20, 4  ;;  %v9715_v44 = vcombine.low %v2864_v46, %v2867_v19  ;;  %v9684_v16 = vrot.slane %v2597_v10, 9  ;;  %v2872_v3 = vrot.slane %v2870_v23, 4  ;;  %v5315_v7 = vld [vmem:[#allocation2 + $0x64] sm:$0xf] }
 0x230   : > { %8225 = vmatmul.mubr.bf16.gmra.mrb[68].mxu1 %v9714_v38  ;;  %v2873_v32 = vrot.slane %v2599_v28, 5  ;;  %v5477_v6 = vsel %vm11375_vm6, %v5472_v63, %v12558_v12  ;;  %v5487_v49 = vsel %vm11375_vm6, %v5482_v22, %v5486_v61  ;;  %v5495_v38 = vor.u32 %v5494_v13, %v5491_v27  ;;  %v5313_v50 = vld [vmem:[#allocation2 + $0x5c] sm:$0x1]  ;;  %v2604_v63 = vld [vmem:[#allocation2 + $0x118] sm:$0xf] }
 0x231   : > { %8232 = vmatprep.mubr.bf16.mxu1 %v11046_v9  ;;  %v5508_v1 = vshll.u32 %v5310_v24, 16  ;;  %v5505_v2 = vor.u32 %v5504_v37, %v12570_v36  ;;  %v2877_v47 = vrot.slane %v2601_v31, 5  ;;  %v5513_v9 = vshrl.u32 %v5311_v60, 16  ;;  %v11050_v24 = vld [vmem:[#allocation2 + $0x114] sm:$0xff]  }
 0x232   : > { %v5516_v11 = vshll.u32 %v5311_v60, 16  ;;  %v5522_v59 = vshll.u32 %v5312_v43, 16  ;;  %v5526_v8 = vshrl.u32 %v5312_v43, 16  ;;  %v2871_v12 = vsel %vm11479_vm13, %v9684_v16, %v2870_v23  ;;  %v11049_v43 = vld [vmem:[#allocation2 + $0x3c] sm:$0xff]  }
 0x233   : > { %v2874_v14 = vsel %vm11479_vm13, %v2872_v3, %v2873_v32  ;;  %v9685_v25 = vrot.slane %v2600_v58, 9  ;;  %v9892_v48 = vcombine.low %v5477_v6, %v5487_v49  ;;  %v5496_v56 = vrot.slane %v5495_v38, 4  ;;  %v2603_v32 = vld [vmem:[#allocation2 + $0x114] sm:$0xe]  ;;  %v2605_v49 = vld [vmem:[#allocation2 + $0x11c] sm:$0x1] }
 0x234   : > { %v2880_v51 = vrot.slane %v2602_v45, 5  ;;  %v5506_v10 = vrot.slane %v5505_v2, 4  ;;  %v2879_v28 = vrot.slane %v2877_v47, 4  ;;  %v5515_v20 = vrot.slane %v5513_v9, 4 }
 0x235   : > { %8675 = vmatmul.mubr.bf16.gmra.mrb[4].mxu0 %v11044_v34  ;;  %v5510_v34 = vrot.slane %v5508_v1, 5  ;;  %v5518_v46 = vrot.slane %v5516_v11, 5  ;;  %v9716_v19 = vcombine.low %v2871_v12, %v2874_v14  ;;  %v12582_v61 = vrot.slane %v5522_v59, 5  ;;  %v5316_v1 = vld [vmem:[#allocation2 + $0x68] sm:$0x1] }
 0x236   : > { %8682 = vmatprep.mubr.bf16.mxu0 %v9891_v33  ;;  %v5528_v23 = vrot.slane %v5526_v8, 4  ;;  %v5537_v22 = vshrl.u32 %v5314_v39, 16  ;;  %v5540_v27 = vshll.u32 %v5314_v39, 16  ;;  %v5546_v13 = vshll.u32 %v5315_v7, 16  ;;  %v2607_v59 = vld [vmem:[#allocation2 + $0x124] sm:$0xf] }
 0x237   : > { %v5550_v31 = vshrl.u32 %v5315_v7, 16  ;;  %v5501_v33 = vsel %vm11375_vm6, %v5496_v56, %v12570_v36  ;;  %v2878_v37 = vsel %vm11479_vm13, %v9685_v25, %v2877_v47  ;;  %v2881_v60 = vsel %vm11479_vm13, %v2879_v28, %v2880_v51  ;;  %v5317_v8 = vld [vmem:[#allocation2 + $0x6c] sm:$0xf]  ;;  %v5318_v7 = vld [vmem:[#allocation2 + $0x70] sm:$0xf] }
 0x238   : > { %8233 = vmatmul.mubr.bf16.gmra.mrb[72].mxu1 %v9715_v44  ;;  %v5532_v44 = vshll.u32 %v5313_v50, 16  ;;  %v5519_v16 = vor.u32 %v5518_v46, %v5515_v20  ;;  %v5529_v3 = vor.u32 %v5528_v23, %v12582_v61  ;;  %v2884_v6 = vrot.slane %v2604_v63, 5  ;;  %v2608_v51 = vld [vmem:[#allocation2 + $0x128] sm:$0x1] }
 0x239   : > { %8240 = vmatprep.mubr.bf16.mxu1 %v11048_v30  ;;  %v5511_v30 = vsel %vm11375_vm6, %v5506_v10, %v5510_v34  ;;  %v5539_v36 = vrot.slane %v5537_v22, 4  ;;  %v5542_v38 = vrot.slane %v5540_v27, 5  ;;  %v12594_v58 = vrot.slane %v5546_v13, 5  ;;  %v2606_v34 = vld [vmem:[#allocation2 + $0x120] sm:$0xe] }
 0x23a   : > { %v5552_v2 = vrot.slane %v5550_v31, 4  ;;  %v9893_v45 = vcombine.low %v5501_v33, %v5511_v30  ;;  %v9717_v47 = vcombine.low %v2878_v37, %v2881_v60  ;;  %v5534_v9 = vrot.slane %v5532_v44, 5  ;;  %v11051_v37 = vld [vmem:[#allocation2 + $0x48] sm:$0xff]  }
 0x23b   : > { %v9686_v11 = vrot.slane %v2603_v32, 9  ;;  %v5520_v12 = vrot.slane %v5519_v16, 4  ;;  %v5530_v14 = vrot.slane %v5529_v3, 4  ;;  %v2886_v25 = vrot.slane %v2884_v6, 4 }
 0x23c   : > { %v2887_v39 = vrot.slane %v2605_v49, 5  ;;  %v5556_v56 = vshll.u32 %v5316_v1, 16  ;;  %v5553_v50 = vor.u32 %v5552_v2, %v12594_v58  ;;  %v2891_v10 = vrot.slane %v2607_v59, 5  ;;  %v5319_v49 = vld [vmem:[#allocation2 + $0x74] sm:$0x1] }
 0x23d   : > { %8683 = vmatmul.mubr.bf16.gmra.mrb[8].mxu0 %v11047_v4  ;;  %v11053_v4 = vld [vmem:[#allocation2 + $0x120] sm:$0xff]   ;;  %v5561_v28 = vshrl.u32 %v5317_v8, 16  ;;  %v5564_v20 = vshll.u32 %v5317_v8, 16  ;;  %v5570_v46 = vshll.u32 %v5318_v7, 16  ;;  %v5525_v23 = vsel %vm11375_vm6, %v5520_v12, %v12582_v61  ;;  %v2610_v1 = vld [vmem:[#allocation2 + $0x130] sm:$0xf] }
 0x23e   : > { %8690 = vmatprep.mubr.bf16.mxu0 %v9892_v48  ;;  %v5543_v48 = vor.u32 %v5542_v38, %v5539_v36  ;;  %v2885_v63 = vsel %vm11479_vm13, %v9686_v11, %v2884_v6  ;;  %v2888_v22 = vsel %vm11479_vm13, %v2886_v25, %v2887_v39  ;;  %v5558_v13 = vrot.slane %v5556_v56, 5  ;;  %v5320_v6 = vld [vmem:[#allocation2 + $0x78] sm:$0xf]  ;;  %v11055_v36 = vld [vmem:[#allocation2 + $0x12c] sm:$0xff]   ;;  %v5321_v2 = vld [vmem:[#allocation2 + $0x7c] sm:$0xf] }
 0x23f   : > { %v9687_v31 = vrot.slane %v2606_v34, 9  ;;  %v2894_v33 = vrot.slane %v2608_v51, 5  ;;  %v5554_v60 = vrot.slane %v5553_v50, 4  ;;  %v2893_v44 = vrot.slane %v2891_v10, 4  ;;  %v2609_v12 = vld [vmem:[#allocation2 + $0x12c] sm:$0xe] }
 0x240   : > { %8241 = vmatmul.mubr.bf16.gmra.mrb[76].mxu1 %v9716_v19  ;;  %v5574_v19 = vshrl.u32 %v5318_v7, 16  ;;  %v5544_v27 = vrot.slane %v5543_v48, 4  ;;  %v5566_v30 = vrot.slane %v5564_v20, 5  ;;  %v12606_v16 = vrot.slane %v5570_v46, 5  ;;  %v11054_v48 = vld [vmem:[#allocation2 + $0x54] sm:$0xff]  }
 0x241   : > { %8248 = vmatprep.mubr.bf16.mxu1 %v11050_v24  ;;  %v5535_v24 = vsel %vm11375_vm6, %v5530_v14, %v5534_v9  ;;  %v9718_v32 = vcombine.low %v2885_v63, %v2888_v22  ;;  %v2892_v38 = vsel %vm11479_vm13, %v9687_v31, %v2891_v10  ;;  %v2895_v9 = vsel %vm11479_vm13, %v2893_v44, %v2894_v33  ;;  %v5323_v10 = vld [vmem:[#allocation2 + $0x84] sm:$0xf]  ;;  %v11057_v20 = vld [vmem:[#allocation2 + $0x138] sm:$0xff]  }
 0x242   : > { %v9894_v61 = vcombine.low %v5525_v23, %v5535_v24  ;;  %v5576_v3 = vrot.slane %v5574_v19, 4  ;;  %v5580_v8 = vshll.u32 %v5319_v49, 16  ;;  %v5585_v14 = vshrl.u32 %v5320_v6, 16  ;;  %v5322_v23 = vld [vmem:[#allocation2 + $0x80] sm:$0x1] }
 0x243   : > { %v5588_v25 = vshll.u32 %v5320_v6, 16  ;;  %v2898_v39 = vrot.slane %v2610_v1, 5  ;;  %v5594_v7 = vshll.u32 %v5321_v2, 16  ;;  %v9719_v34 = vcombine.low %v2892_v38, %v2895_v9  ;;  %v2613_v33 = vld [vmem:[#allocation2 + $0x13c] sm:$0xf] }
 0x244   : > { %v5577_v59 = vor.u32 %v5576_v3, %v12606_v16  ;;  %v9688_v50 = vrot.slane %v2609_v12, 9  ;;  %v5582_v19 = vrot.slane %v5580_v8, 5  ;;  %v5587_v24 = vrot.slane %v5585_v14, 4  ;;  %v2612_v49 = vld [vmem:[#allocation2 + $0x138] sm:$0xe] }
 0x245   : > { %8691 = vmatmul.mubr.bf16.gmra.mrb[12].mxu0 %v11049_v43  ;;  %v5563_v43 = vrot.slane %v5561_v28, 4  ;;  %v5324_v28 = vld [vmem:[#allocation2 + $0x88] sm:$0xf]  ;;  %v5590_v63 = vrot.slane %v5588_v25, 5  ;;  %v2900_v22 = vrot.slane %v2898_v39, 4  ;;  %v2905_v6 = vrot.slane %v2613_v33, 5 }
 0x246   : > { %8698 = vmatprep.mubr.bf16.mxu0 %v9893_v45  ;;  %v5549_v45 = vsel %vm11375_vm6, %v5544_v27, %v12594_v58  ;;  %v2611_v58 = vld [vmem:[#allocation2 + $0x134] sm:$0x1]  ;;  %v5578_v46 = vrot.slane %v5577_v59, 4  ;;  %v5618_v44 = vshll.u32 %v5324_v28, 16  ;;  %v11056_v59 = vld [vmem:[#allocation2 + $0x60] sm:$0xff]   ;;  %v9689_v12 = vrot.slane %v2612_v49, 9 }
 0x247   : > { %v5567_v11 = vor.u32 %v5566_v30, %v5563_v43  ;;  %v2901_v27 = vrot.slane %v2611_v58, 5  ;;  %v5622_v43 = vshrl.u32 %v5324_v28, 16  ;;  %v5591_v3 = vor.u32 %v5590_v63, %v5587_v24  ;;  %v2616_v14 = vld [vmem:[#allocation2 + $0x148] sm:$0xf]  ;;  %v5326_v25 = vld [vmem:[#allocation2 + $0x90] sm:$0xf] }
 0x248   : > { %8249 = vmatmul.mubr.bf16.gmra.mrb[80].mxu1 %v9717_v47  ;;  %v5559_v47 = vsel %vm11375_vm6, %v5554_v60, %v5558_v13  ;;  %v12618_v13 = vrot.slane %v5594_v7, 5  ;;  %v5612_v60 = vshll.u32 %v5323_v10, 16  ;;  %v12630_v9 = vrot.slane %v5618_v44, 5  ;;  %v5327_v58 = vld [vmem:[#allocation2 + $0x94] sm:$0xf] }
 0x249   : > { %8256 = vmatprep.mubr.bf16.mxu1 %v11053_v4  ;;  %v5598_v4 = vshrl.u32 %v5321_v2, 16  ;;  %v9895_v56 = vcombine.low %v5549_v45, %v5559_v47  ;;  %v5568_v51 = vrot.slane %v5567_v11, 4  ;;  %v2902_v38 = vsel %vm11479_vm13, %v2900_v22, %v2901_v27  ;;  %v2614_v2 = vld [vmem:[#allocation2 + $0x140] sm:$0x1] }
 0x24a   : > { %v5614_v47 = vrot.slane %v5612_v60, 5  ;;  %v5624_v11 = vrot.slane %v5622_v43, 4  ;;  %v5592_v7 = vrot.slane %v5591_v3, 4  ;;  %v5636_v24 = vshll.u32 %v5326_v25, 16 }
 0x24b   : > { %v5600_v31 = vrot.slane %v5598_v4, 4  ;;  %v5573_v30 = vsel %vm11375_vm6, %v5568_v51, %v12606_v16  ;;  %v5325_v16 = vld [vmem:[#allocation2 + $0x8c] sm:$0x1]  ;;  %v2907_v4 = vrot.slane %v2905_v6, 4  ;;  %v5642_v63 = vshll.u32 %v5327_v58, 16 }
 0x24c   : > { %v5628_v51 = vshll.u32 %v5325_v16, 16  ;;  %v5625_v28 = vor.u32 %v5624_v11, %v12630_v9  ;;  %v5646_v22 = vshrl.u32 %v5327_v58, 16  ;;  %v5597_v27 = vsel %vm11375_vm6, %v5592_v7, %v12618_v13  ;;  %v5329_v16 = vld [vmem:[#allocation2 + $0x9c] sm:$0xf] }
 0x24d   : > { %8699 = vmatmul.mubr.bf16.gmra.mrb[16].mxu0 %v11051_v37  ;;  %v5609_v37 = vshrl.u32 %v5323_v10, 16  ;;  %v5601_v1 = vor.u32 %v5600_v31, %v12618_v13  ;;  %v2906_v31 = vsel %vm11479_vm13, %v9689_v12, %v2905_v6  ;;  %v5638_v13 = vrot.slane %v5636_v24, 5 }
 0x24e   : > { %8706 = vmatprep.mubr.bf16.mxu0 %v9894_v61  ;;  %v5583_v61 = vsel %vm11375_vm6, %v5578_v46, %v5582_v19  ;;  %v2912_v46 = vrot.slane %v2616_v14, 5  ;;  %v2617_v19 = vld [vmem:[#allocation2 + $0x14c] sm:$0x1]  ;;  %v5630_v60 = vrot.slane %v5628_v51, 5  ;;  %v5648_v6 = vrot.slane %v5646_v22, 4 }
 0x24f   : > { %v5611_v45 = vrot.slane %v5609_v37, 4  ;;  %v9896_v8 = vcombine.low %v5573_v30, %v5583_v61  ;;  %v5626_v30 = vrot.slane %v5625_v28, 4  ;;  %v2915_v3 = vrot.slane %v2617_v19, 5  ;;  %v5332_v28 = vld [vmem:[#allocation2 + $0xa8] sm:$0xf] }
 0x250   : > { %8257 = vmatmul.mubr.bf16.gmra.mrb[84].mxu1 %v9718_v32  ;;  %v5604_v32 = vshll.u32 %v5322_v23, 16  ;;  %v5633_v23 = vshrl.u32 %v5326_v25, 16  ;;  %v2914_v61 = vrot.slane %v2912_v46, 4  ;;  %v2622_v22 = vld [vmem:[#allocation2 + $0x160] sm:$0xf] }
 0x251   : > { %8264 = vmatprep.mubr.bf16.mxu1 %v11055_v36  ;;  %v2899_v36 = vsel %vm11479_vm13, %v9688_v50, %v2898_v39  ;;  %v11060_v50 = vld [vmem:[#allocation2 + $0x144] sm:$0xff]   ;;  %v5615_v10 = vor.u32 %v5614_v47, %v5611_v45  ;;  %v5330_v45 = vld [vmem:[#allocation2 + $0xa0] sm:$0xf]  ;;  %v11062_v47 = vld [vmem:[#allocation2 + $0x150] sm:$0xff]  }
 0x252   : > { %v5606_v39 = vrot.slane %v5604_v32, 5  ;;  %v11058_v32 = vld [vmem:[#allocation2 + $0x6c] sm:$0xff]   ;;  %v5635_v49 = vrot.slane %v5633_v23, 4  ;;  %v2916_v12 = vsel %vm11479_vm13, %v2914_v61, %v2915_v3  ;;  %v5666_v58 = vshll.u32 %v5330_v45, 16  ;;  %v11064_v61 = vld [vmem:[#allocation2 + $0x15c] sm:$0xff]  }
 0x253   : > { %v5616_v43 = vrot.slane %v5615_v10, 4  ;;  %v5331_v10 = vld [vmem:[#allocation2 + $0xa4] sm:$0x1] }
 0x254   : > { %v5639_v14 = vor.u32 %v5638_v13, %v5635_v49 }
 0x255   : > { %8707 = vmatmul.mubr.bf16.gmra.mrb[20].mxu0 %v11054_v48  ;;  %v2908_v48 = vrot.slane %v2614_v2, 5  ;;  %v5621_v11 = vsel %vm11375_vm6, %v5616_v43, %v12630_v9  ;;  %v5670_v9 = vshrl.u32 %v5330_v45, 16  ;;  %v2926_v45 = vrot.slane %v2622_v22, 5 }
 0x256   : > { %8714 = vmatprep.mubr.bf16.mxu0 %v9895_v56  ;;  %v9720_v56 = vcombine.low %v2899_v36, %v2902_v38  ;;  %v12642_v36 = vrot.slane %v5642_v63, 5  ;;  %v5640_v23 = vrot.slane %v5639_v14, 4  ;;  %v11063_v14 = vld [vmem:[#allocation2 + $0x84] sm:$0xff]  }
 0x257   : > { %v2909_v37 = vsel %vm11479_vm13, %v2907_v4, %v2908_v48  ;;  %v5657_v4 = vshrl.u32 %v5329_v16, 16  ;;  %v5660_v48 = vshll.u32 %v5329_v16, 16  ;;  %v2621_v16 = vld [vmem:[#allocation2 + $0x15c] sm:$0xe] }
 0x258   : > { %8265 = vmatmul.mubr.bf16.gmra.mrb[88].mxu1 %v9719_v34  ;;  %v5602_v34 = vrot.slane %v5601_v1, 4  ;;  %v5328_v1 = vld [vmem:[#allocation2 + $0x98] sm:$0x1]  ;;  %v9721_v2 = vcombine.low %v2906_v31, %v2909_v37  ;;  %v5649_v25 = vor.u32 %v5648_v6, %v12642_v36  ;;  %v5672_v37 = vrot.slane %v5670_v9, 4 }
 0x259   : > { %8272 = vmatprep.mubr.bf16.mxu1 %v11057_v20  ;;  %v2615_v20 = vld [vmem:[#allocation2 + $0x144] sm:$0xe]  ;;  %v5652_v7 = vshll.u32 %v5328_v1, 16  ;;  %v5662_v31 = vrot.slane %v5660_v48, 5  ;;  %v5645_v13 = vsel %vm11375_vm6, %v5640_v23, %v12642_v36  ;;  %v5676_v6 = vshll.u32 %v5331_v10, 16 }
 0x25a   : > { %v5607_v33 = vsel %vm11375_vm6, %v5602_v34, %v5606_v39  ;;  %v9690_v44 = vrot.slane %v2615_v20, 9  ;;  %v2619_v39 = vld [vmem:[#allocation2 + $0x154] sm:$0xf]  ;;  %v2620_v34 = vld [vmem:[#allocation2 + $0x158] sm:$0x1]  ;;  %v5650_v24 = vrot.slane %v5649_v25, 4 }
 0x25b   : > { %v9897_v38 = vcombine.low %v5597_v27, %v5607_v33  ;;  %v5333_v20 = vld [vmem:[#allocation2 + $0xac] sm:$0xf]  ;;  %v5654_v63 = vrot.slane %v5652_v7, 5  ;;  %v5659_v27 = vrot.slane %v5657_v4, 4  ;;  %v12654_v33 = vrot.slane %v5666_v58, 5 }
 0x25c   : > { %v5690_v43 = vshll.u32 %v5333_v20, 16  ;;  %v2922_v49 = vrot.slane %v2620_v34, 5  ;;  %v5334_v7 = vld [vmem:[#allocation2 + $0xb0] sm:$0x1]  ;;  %v5678_v48 = vrot.slane %v5676_v6, 5  ;;  %v9692_v58 = vrot.slane %v2621_v16, 9 }
 0x25d   : > { %8715 = vmatmul.mubr.bf16.gmra.mrb[24].mxu0 %v11056_v59  ;;  %v5631_v59 = vsel %vm11375_vm6, %v5626_v30, %v5630_v60  ;;  %v5681_v60 = vshrl.u32 %v5332_v28, 16  ;;  %v5694_v30 = vshrl.u32 %v5333_v20, 16  ;;  %v5663_v1 = vor.u32 %v5662_v31, %v5659_v27  ;;  %v5336_v9 = vld [vmem:[#allocation2 + $0xb8] sm:$0xf]  ;;  %v11067_v20 = vld [vmem:[#allocation2 + $0x168] sm:$0xff]  }
 0x25e   : > { %8722 = vmatprep.mubr.bf16.mxu0 %v9896_v8  ;;  %v2913_v8 = vsel %vm11479_vm13, %v9690_v44, %v2912_v46  ;;  %v9898_v51 = vcombine.low %v5621_v11, %v5631_v59  ;;  %v11061_v46 = vld [vmem:[#allocation2 + $0x78] sm:$0xff]   ;;  %v5684_v44 = vshll.u32 %v5332_v28, 16  ;;  %v5700_v23 = vshll.u32 %v5334_v7, 16 }
 0x25f   : > { %v9722_v19 = vcombine.low %v2913_v8, %v2916_v12  ;;  %v5683_v11 = vrot.slane %v5681_v60, 4  ;;  %v12662_v8 = vrot.slane %v5690_v43, 5  ;;  %v5696_v12 = vrot.slane %v5694_v30, 4  ;;  %v11065_v43 = vld [vmem:[#allocation2 + $0x90] sm:$0xff]  }
 0x260   : > { %8273 = vmatmul.mubr.bf16.gmra.mrb[92].mxu1 %v9720_v56  ;;  %v2618_v56 = vld [vmem:[#allocation2 + $0x150] sm:$0xe]  ;;  %v5686_v59 = vrot.slane %v5684_v44, 5  ;;  %v5714_v22 = vshll.u32 %v5336_v9, 16  ;;  %v5718_v27 = vshrl.u32 %v5336_v9, 16  ;;  %v2927_v60 = vsel %vm11479_vm13, %v9692_v58, %v2926_v45 }
 0x261   : > { %8280 = vmatprep.mubr.bf16.mxu1 %v11060_v50  ;;  %v2919_v50 = vrot.slane %v2619_v39, 5  ;;  %v9691_v3 = vrot.slane %v2618_v56, 9  ;;  %v5335_v39 = vld [vmem:[#allocation2 + $0xb4] sm:$0xf]  ;;  %v5664_v56 = vrot.slane %v5663_v1, 4 }
 0x262   : > { %v5720_v1 = vrot.slane %v5718_v27, 4  ;;  %v2627_v58 = vld [vmem:[#allocation2 + $0x174] sm:$0xe]  ;;  %v2628_v9 = vld [vmem:[#allocation2 + $0x178] sm:$0xf] }
 0x263   : > { %v2920_v36 = vsel %vm11479_vm13, %v9691_v3, %v2919_v50  ;;  %v5669_v31 = vsel %vm11375_vm6, %v5664_v56, %v12654_v33  ;;  %v5702_v3 = vrot.slane %v5700_v23, 5  ;;  %v9694_v23 = vrot.slane %v2627_v58, 9 }
 0x265   : > { %8723 = vmatmul.mubr.bf16.gmra.mrb[28].mxu0 %v11058_v32  ;;  %v2921_v32 = vrot.slane %v2919_v50, 4  ;;  %v2625_v50 = vld [vmem:[#allocation2 + $0x16c] sm:$0xf] }
 0x266   : > { %8730 = vmatprep.mubr.bf16.mxu0 %v9897_v38  ;;  %v5655_v38 = vsel %vm11375_vm6, %v5650_v24, %v5654_v63  ;;  %v5705_v24 = vshrl.u32 %v5335_v39, 16  ;;  %v5708_v63 = vshll.u32 %v5335_v39, 16 }
 0x267   : > { %v2923_v25 = vsel %vm11479_vm13, %v2921_v32, %v2922_v49  ;;  %v9899_v4 = vcombine.low %v5645_v13, %v5655_v38  ;;  %v2624_v32 = vld [vmem:[#allocation2 + $0x168] sm:$0xe]  ;;  %v2933_v49 = vrot.slane %v2625_v50, 5  ;;  %v2626_v13 = vld [vmem:[#allocation2 + $0x170] sm:$0x1]  ;;  %v12678_v38 = vrot.slane %v5714_v22, 5 }
 0x268   : > { %8281 = vmatmul.mubr.bf16.gmra.mrb[96].mxu1 %v9721_v2  ;;  %v5673_v2 = vor.u32 %v5672_v37, %v12654_v33  ;;  %v9723_v28 = vcombine.low %v2920_v36, %v2923_v25  ;;  %v5707_v6 = vrot.slane %v5705_v24, 4  ;;  %v5710_v33 = vrot.slane %v5708_v63, 5  ;;  %v11069_v25 = vld [vmem:[#allocation2 + $0x174] sm:$0xff]   ;;  %v5342_v24 = vld [vmem:[#allocation2 + $0xd0] sm:$0xf] }
 0x269   : > { %8288 = vmatprep.mubr.bf16.mxu1 %v11062_v47  ;;  %v2623_v47 = vld [vmem:[#allocation2 + $0x164] sm:$0x1]  ;;  %v2936_v36 = vrot.slane %v2626_v13, 5  ;;  %v2940_v50 = vrot.slane %v2628_v9, 5  ;;  %v5766_v13 = vshrl.u32 %v5342_v24, 16 }
 0x26a   : > { %v5674_v34 = vrot.slane %v5673_v2, 4  ;;  %v2929_v10 = vrot.slane %v2623_v47, 5  ;;  %v5337_v2 = vld [vmem:[#allocation2 + $0xbc] sm:$0x1]  ;;  %v5338_v47 = vld [vmem:[#allocation2 + $0xc0] sm:$0xf]  ;;  %v5711_v39 = vor.u32 %v5710_v33, %v5707_v6 }
 0x26b   : > { %v5729_v56 = vshrl.u32 %v5338_v47, 16  ;;  %v2942_v33 = vrot.slane %v2940_v50, 4  ;;  %v5768_v9 = vrot.slane %v5766_v13, 4  ;;  %v5346_v13 = vld [vmem:[#allocation2 + $0xf8] sm:$0x1] }
 0x26c   : > { %v5679_v37 = vsel %vm11375_vm6, %v5674_v34, %v5678_v48  ;;  %v5724_v48 = vshll.u32 %v5337_v2, 16  ;;  %v5732_v34 = vshll.u32 %v5338_v47, 16  ;;  %v5712_v22 = vrot.slane %v5711_v39, 4  ;;  %v5344_v39 = vld [vmem:[#allocation2 + $0xf0] sm:$0xf] }
 0x26d   : > { %8731 = vmatmul.mubr.bf16.gmra.mrb[32].mxu0 %v11061_v46  ;;  %v5687_v46 = vor.u32 %v5686_v59, %v5683_v11  ;;  %v9900_v16 = vcombine.low %v5669_v31, %v5679_v37  ;;  %v5339_v11 = vld [vmem:[#allocation2 + $0xc4] sm:$0xf]  ;;  %v11068_v37 = vld [vmem:[#allocation2 + $0x9c] sm:$0xff]   ;;  %v2941_v47 = vsel %vm11479_vm13, %v9694_v23, %v2940_v50  ;;  %v11070_v23 = vld [vmem:[#allocation2 + $0xa8] sm:$0xff]  }
 0x26e   : > { %8738 = vmatprep.mubr.bf16.mxu0 %v9898_v51  ;;  %v2928_v51 = vrot.slane %v2926_v45, 4  ;;  %v5726_v31 = vrot.slane %v5724_v48, 5 }
 0x26f   : > { %v5688_v30 = vrot.slane %v5687_v46, 4 }
 0x270   : > { %8289 = vmatmul.mubr.bf16.gmra.mrb[100].mxu1 %v9722_v19  ;;  %v5697_v19 = vor.u32 %v5696_v12, %v12662_v8  ;;  %v2930_v44 = vsel %vm11479_vm13, %v2928_v51, %v2929_v10  ;;  %v9693_v12 = vrot.slane %v2624_v32, 9  ;;  %v5738_v51 = vshll.u32 %v5339_v11, 16 }
 0x271   : > { %8296 = vmatprep.mubr.bf16.mxu1 %v11064_v61  ;;  %v9724_v45 = vcombine.low %v2927_v60, %v2930_v44  ;;  %v5693_v59 = vsel %vm11375_vm6, %v5688_v30, %v12662_v8  ;;  %v5742_v10 = vshrl.u32 %v5339_v11, 16  ;;  %v2629_v8 = vld [vmem:[#allocation2 + $0x17c] sm:$0x1]  ;;  %v5731_v60 = vrot.slane %v5729_v56, 4  ;;  %v2630_v11 = vld [vmem:[#allocation2 + $0x180] sm:$0xe] }
 0x272   : > { %v5698_v61 = vrot.slane %v5697_v19, 4  ;;  %v2934_v46 = vsel %vm11479_vm13, %v9693_v12, %v2933_v49  ;;  %v5734_v44 = vrot.slane %v5732_v34, 5  ;;  %v9695_v34 = vrot.slane %v2630_v11, 9 }
 0x273   : > { %v5744_v30 = vrot.slane %v5742_v10, 4 }
 0x274   : > { %v5703_v7 = vsel %vm11375_vm6, %v5698_v61, %v5702_v3  ;;  %v5340_v61 = vld [vmem:[#allocation2 + $0xc8] sm:$0x1] }
 0x275   : > { %8739 = vmatmul.mubr.bf16.gmra.mrb[36].mxu0 %v11063_v14  ;;  %v2935_v14 = vrot.slane %v2933_v49, 4  ;;  %v9901_v63 = vcombine.low %v5693_v59, %v5703_v7  ;;  %v5762_v49 = vshll.u32 %v5342_v24, 16  ;;  %v2632_v59 = vld [vmem:[#allocation2 + $0x188] sm:$0x1]  ;;  %v5343_v7 = vld [vmem:[#allocation2 + $0xd4] sm:$0x1] }
 0x276   : > { %8746 = vmatprep.mubr.bf16.mxu0 %v9899_v4  ;;  %v5721_v4 = vor.u32 %v5720_v1, %v12678_v38  ;;  %v2943_v1 = vrot.slane %v2629_v8, 5  ;;  %v2950_v10 = vrot.slane %v2632_v59, 5  ;;  %v2634_v8 = vld [vmem:[#allocation2 + $0x190] sm:$0xf]  ;;  %v5347_v59 = vld [vmem:[#allocation2 + $0xfc] sm:$0xf] }
 0x277   : > { %v2937_v19 = vsel %vm11479_vm13, %v2935_v14, %v2936_v36  ;;  %v5735_v14 = vor.u32 %v5734_v44, %v5731_v60  ;;  %v2633_v60 = vld [vmem:[#allocation2 + $0x18c] sm:$0xe] }
 0x278   : > { %8297 = vmatmul.mubr.bf16.gmra.mrb[104].mxu1 %v9723_v28  ;;  %v12686_v28 = vld [vmem:[#allocation2 + $0x184] sm:$0xf]  ;;  %v5722_v27 = vrot.slane %v5721_v4, 4  ;;  %v9725_v6 = vcombine.low %v2934_v46, %v2937_v19  ;;  %v5345_v4 = vld [vmem:[#allocation2 + $0xf4] sm:$0xf]  ;;  %v2944_v56 = vsel %vm11479_vm13, %v2942_v33, %v2943_v1  ;;  %v9696_v11 = vrot.slane %v2633_v60, 9 }
 0x279   : > { %8304 = vmatprep.mubr.bf16.mxu1 %v11067_v20  ;;  %v5341_v20 = vld [vmem:[#allocation2 + $0xcc] sm:$0xf]  ;;  %v2947_v2 = vrot.slane %v12686_v28, 5  ;;  %v5777_v28 = vshrl.u32 %v5344_v39, 16  ;;  %v5786_v46 = vshll.u32 %v5345_v4, 16  ;;  %v5790_v19 = vshrl.u32 %v5345_v4, 16 }
 0x27a   : > { %v5753_v3 = vshrl.u32 %v5341_v20, 16  ;;  %v5756_v32 = vshll.u32 %v5341_v20, 16  ;;  %v5727_v12 = vsel %vm11375_vm6, %v5722_v27, %v5726_v31  ;;  %v5780_v20 = vshll.u32 %v5344_v39, 16 }
 0x27b   : > { %v5736_v24 = vrot.slane %v5735_v14, 4  ;;  %v9726_v44 = vcombine.low %v2941_v47, %v2944_v56  ;;  %v12716_v1 = vrot.slane %v5786_v46, 5  ;;  %v12720_v47 = vld [vmem:[#allocation2 + $0x28] sm:$0xf]  ;;  %v6320_v56 = vld [vmem:[#allocation2 + $0x18] sm:$0xe] }
 0x27c   : > { %v5755_v48 = vrot.slane %v5753_v3, 4  ;;  %v5758_v58 = vrot.slane %v5756_v32, 5  ;;  %v2635_v32 = vld [vmem:[#allocation2 + $0x194] sm:$0x1]  ;;  %v5782_v33 = vrot.slane %v5780_v20, 5 }
 0x27d   : > { %8747 = vmatmul.mubr.bf16.gmra.mrb[40].mxu0 %v11065_v43  ;;  %v12692_v43 = vrot.slane %v5738_v51, 5  ;;  %v2949_v51 = vrot.slane %v2947_v2, 4 }
 0x27e   : > { %8754 = vmatprep.mubr.bf16.mxu0 %v9900_v16  ;;  %v11071_v16 = vld [vmem:[#allocation2 + $0x180] sm:$0xff]   ;;  %v5759_v27 = vor.u32 %v5758_v58, %v5755_v48  ;;  %v2957_v48 = vrot.slane %v2635_v32, 5  ;;  %v5796_v58 = vshll.u32 %v5346_v13, 16 }
 0x27f   : > { %v5745_v36 = vor.u32 %v5744_v30, %v12692_v43  ;;  %v11074_v30 = vld [vmem:[#allocation2 + $0x18c] sm:$0xff]   ;;  %v12714_v3 = vsel %vm11479_vm13, %v2949_v51, %v2950_v10  ;;  %v5801_v51 = vshrl.u32 %v5347_v59, 16  ;;  %v5804_v10 = vshll.u32 %v5347_v59, 16 }
 0x280   : > { %8305 = vmatmul.mubr.bf16.gmra.mrb[108].mxu1 %v9724_v45  ;;  %v5717_v45 = vsel %vm11375_vm6, %v5712_v22, %v12678_v38  ;;  %v12703_v38 = vrot.slane %v5762_v49, 5  ;;  %v2954_v49 = vrot.slane %v2634_v8, 5  ;;  %v11072_v8 = vld [vmem:[#allocation2 + $0xb4] sm:$0xff]   ;;  %v5798_v60 = vrot.slane %v5796_v58, 5  ;;  %v5350_v58 = vld [vmem:[#allocation2 + $0x108] sm:$0xf] }
 0x281   : > { %8312 = vmatprep.mubr.bf16.mxu1 %v11069_v25  ;;  %v5748_v25 = vshll.u32 %v5340_v61, 16  ;;  %v9902_v50 = vcombine.low %v5717_v45, %v5727_v12  ;;  %v5746_v22 = vrot.slane %v5745_v36, 4  ;;  %v12710_v61 = vsel %vm11479_vm13, %v9695_v34, %v2947_v2  ;;  %v12718_v45 = vld [vmem:[#allocation2 + $0x1c] sm:$0xf]  ;;  %v5348_v12 = vld [vmem:[#allocation2 + $0x100] sm:$0xf] }
 0x282   : > { %v5769_v31 = vor.u32 %v5768_v9, %v12703_v38  ;;  %v5741_v2 = vsel %vm11375_vm6, %v5736_v24, %v12692_v43  ;;  %v5760_v36 = vrot.slane %v5759_v27, 4  ;;  %v9727_v39 = vcombine.low %v12710_v61, %v12714_v3  ;;  %v6322_v34 = vld [vmem:[#allocation2 + $0x20] sm:$0x1]  ;;  %v6323_v24 = vld [vmem:[#allocation2 + $0x24] sm:$0xe] }
 0x283   : > { %v2956_v4 = vrot.slane %v2954_v49, 4  ;;  %v12732_v20 = vsel %vm11479_vm13, %v9696_v11, %v2954_v49  ;;  %v6514_v46 = vrot.slane %v12718_v45, 5  ;;  %v5814_v27 = vshrl.u32 %v5348_v12, 16  ;;  %v6327_v61 = vld [vmem:[#allocation2 + $0x34] sm:$0xf] }
 0x284   : > { %v5349_v49 = vld [vmem:[#allocation2 + $0x104] sm:$0x1]  ;;  %v5806_v13 = vrot.slane %v5804_v10, 5  ;;  %v6528_v11 = vrot.slane %v6327_v61, 5 }
 0x285   : > { %8755 = vmatmul.mubr.bf16.gmra.mrb[44].mxu0 %v11068_v37  ;;  %v5772_v37 = vshll.u32 %v5343_v7, 16 }
 0x286   : > { %8762 = vmatprep.mubr.bf16.mxu0 %v9901_v63  ;;  %v5750_v63 = vrot.slane %v5748_v25, 5  ;;  %v5770_v25 = vrot.slane %v5769_v31, 4  ;;  %v11076_v31 = vld [vmem:[#allocation2 + $0x198] sm:$0xff]  }
 0x287   : > { %v5774_v7 = vrot.slane %v5772_v37, 5  ;;  %v12743_v37 = vsel %vm11479_vm13, %v2956_v4, %v2957_v48 }
 0x288   : > { %8313 = vmatmul.mubr.bf16.gmra.mrb[112].mxu1 %v9725_v6  ;;  %v5779_v6 = vrot.slane %v5777_v28, 4  ;;  %v5751_v14 = vsel %vm11375_vm6, %v5746_v22, %v5750_v63  ;;  %v6325_v63 = vld [vmem:[#allocation2 + $0x2c] sm:$0x1]  ;;  %v5810_v22 = vshll.u32 %v5348_v12, 16  ;;  %v9728_v12 = vcombine.low %v12732_v20, %v12743_v37  ;;  %v5353_v37 = vld [vmem:[#allocation2 + $0x114] sm:$0xf] }
 0x289   : > { %8320 = vmatprep.mubr.bf16.mxu1 %v11071_v16  ;;  %v5792_v16 = vrot.slane %v5790_v19, 4  ;;  %v9903_v28 = vcombine.low %v5741_v2, %v5751_v14  ;;  %v6521_v19 = vrot.slane %v12720_v47, 5  ;;  %v6524_v45 = vrot.slane %v6325_v63, 5  ;;  %v6326_v14 = vld [vmem:[#allocation2 + $0x30] sm:$0xe] }
 0x28a   : > { %v5783_v9 = vor.u32 %v5782_v33, %v5779_v6  ;;  %v6516_v6 = vrot.slane %v6514_v46, 4  ;;  %v9922_v33 = vrot.slane %v6323_v24, 9  ;;  %v12745_v47 = vrot.slane %v5810_v22, 5 }
 0x28b   : > { %v5793_v43 = vor.u32 %v5792_v16, %v12716_v1  ;;  %v6523_v16 = vrot.slane %v6521_v19, 4  ;;  %v5816_v2 = vrot.slane %v5814_v27, 4  ;;  %v5828_v24 = vshll.u32 %v5350_v58, 16 }
 0x28c   : > { %v5784_v3 = vrot.slane %v5783_v9, 4  ;;  %v11075_v9 = vld [vmem:[#allocation2 + $0xc0] sm:$0xff]  }
 0x28d   : > { %8763 = vmatmul.mubr.bf16.gmra.mrb[48].mxu0 %v11070_v23  ;;  %v5765_v23 = vsel %vm11375_vm6, %v5760_v36, %v12703_v38  ;;  %v5794_v32 = vrot.slane %v5793_v43, 4  ;;  %v5803_v38 = vrot.slane %v5801_v51, 4  ;;  %v6328_v36 = vld [vmem:[#allocation2 + $0x38] sm:$0x1]  ;;  %v6329_v51 = vld [vmem:[#allocation2 + $0x3c] sm:$0xe]  ;;  %v5817_v10 = vor.u32 %v5816_v2, %v12745_v47 }
 0x28e   : > { %8770 = vmatprep.mubr.bf16.mxu0 %v9902_v50  ;;  %v5775_v50 = vsel %vm11375_vm6, %v5770_v25, %v5774_v7  ;;  %v5789_v25 = vsel %vm11375_vm6, %v5784_v3, %v12716_v1  ;;  %v12764_v1 = vsel %vm11479_vm13, %v6523_v16, %v6524_v45  ;;  %v6531_v20 = vrot.slane %v6328_v36, 5 }
 0x28f   : > { %v9904_v59 = vcombine.low %v5765_v23, %v5775_v50  ;;  %v5799_v7 = vsel %vm11375_vm6, %v5794_v32, %v5798_v60  ;;  %v5807_v48 = vor.u32 %v5806_v13, %v5803_v38  ;;  %v6331_v23 = vld [vmem:[#allocation2 + $0x44] sm:$0x1]  ;;  %v5825_v50 = vshrl.u32 %v5350_v58, 16  ;;  %v5352_v13 = vld [vmem:[#allocation2 + $0x110] sm:$0x1] }
 0x290   : > { %8321 = vmatmul.mubr.bf16.gmra.mrb[116].mxu1 %v9726_v44  ;;  %v9921_v44 = vrot.slane %v6320_v56, 9  ;;  %v12760_v56 = vsel %vm11479_vm13, %v9922_v33, %v6521_v19  ;;  %v9905_v60 = vcombine.low %v5789_v25, %v5799_v7  ;;  %v5818_v3 = vrot.slane %v5817_v10, 4 }
 0x291   : > { %8328 = vmatprep.mubr.bf16.mxu1 %v11074_v30  ;;  %v6517_v30 = vrot.slane %v6322_v34, 5  ;;  %v5820_v34 = vshll.u32 %v5349_v49, 16  ;;  %v5808_v19 = vrot.slane %v5807_v48, 4  ;;  %v5827_v33 = vrot.slane %v5825_v50, 4 }
 0x292   : > { %v6515_v4 = vsel %vm11479_vm13, %v9921_v44, %v6514_v46  ;;  %v6330_v46 = vld [vmem:[#allocation2 + $0x40] sm:$0xf]  ;;  %v9954_v44 = vcombine.low %v12760_v56, %v12764_v1  ;;  %v5830_v16 = vrot.slane %v5828_v24, 5  ;;  %v6538_v36 = vrot.slane %v6331_v23, 5  ;;  %v6335_v1 = vld [vmem:[#allocation2 + $0x54] sm:$0xe] }
 0x293   : > { %v6518_v43 = vsel %vm11479_vm13, %v6516_v6, %v6517_v30  ;;  %v9924_v30 = vrot.slane %v6329_v51, 9  ;;  %v6535_v61 = vrot.slane %v6330_v46, 5  ;;  %v5822_v32 = vrot.slane %v5820_v34, 5  ;;  %v6332_v6 = vld [vmem:[#allocation2 + $0x48] sm:$0xe] }
 0x294   : > { %v9953_v27 = vcombine.low %v6515_v4, %v6518_v43  ;;  %v5849_v7 = vshrl.u32 %v5353_v37, 16  ;;  %v5852_v4 = vshll.u32 %v5353_v37, 16  ;;  %v5813_v48 = vsel %vm11375_vm6, %v5808_v19, %v12745_v47  ;;  %v6337_v34 = vld [vmem:[#allocation2 + $0x5c] sm:$0x1]  ;;  %v12788_v46 = vld [vmem:[#allocation2 + $0x64] sm:$0xf] }
 0x295   : > { %8771 = vmatmul.mubr.bf16.gmra.mrb[52].mxu0 %v11072_v8  ;;  %v9923_v8 = vrot.slane %v6326_v14, 9  ;;  %v5354_v14 = vld [vmem:[#allocation2 + $0x118] sm:$0xf]  ;;  %v6537_v58 = vrot.slane %v6535_v61, 4  ;;  %v5823_v43 = vsel %vm11375_vm6, %v5818_v3, %v5822_v32  ;;  %v5356_v23 = vld [vmem:[#allocation2 + $0x120] sm:$0xf] }
 0x296   : > { %8778 = vmatprep.mubr.bf16.mxu0 %v9903_v28  ;;  %v6530_v28 = vrot.slane %v6528_v11, 4  ;;  %v5858_v51 = vshll.u32 %v5354_v14, 16  ;;  %v5862_v10 = vshrl.u32 %v5354_v14, 16  ;;  %v6338_v19 = vld [vmem:[#allocation2 + $0x60] sm:$0xe]  ;;  %v6552_v32 = vrot.slane %v6337_v34, 5 }
 0x297   : > { %v6529_v49 = vsel %vm11479_vm13, %v9923_v8, %v6528_v11  ;;  %v11077_v11 = vld [vmem:[#allocation2 + $0xcc] sm:$0xff]   ;;  %v5831_v8 = vor.u32 %v5830_v16, %v5827_v33  ;;  %v6539_v37 = vsel %vm11479_vm13, %v6537_v58, %v6538_v36  ;;  %v6340_v3 = vld [vmem:[#allocation2 + $0x68] sm:$0x1]  ;;  %v5873_v14 = vshrl.u32 %v5356_v23, 16  ;;  %v6343_v34 = vld [vmem:[#allocation2 + $0x74] sm:$0x1] }
 0x298   : > { %8329 = vmatmul.mubr.bf16.gmra.mrb[120].mxu1 %v9727_v39  ;;  %v5351_v39 = vld [vmem:[#allocation2 + $0x10c] sm:$0xf]  ;;  %v6532_v38 = vsel %vm11479_vm13, %v6530_v28, %v6531_v20  ;;  %v9925_v20 = vrot.slane %v6332_v6, 9  ;;  %v5357_v6 = vld [vmem:[#allocation2 + $0x124] sm:$0xf]  ;;  %v11078_v36 = vld [vmem:[#allocation2 + $0xf0] sm:$0xff]  }
 0x299   : > { %8336 = vmatprep.mubr.bf16.mxu1 %v11076_v31  ;;  %v5834_v63 = vshll.u32 %v5351_v39, 16  ;;  %v5838_v22 = vshrl.u32 %v5351_v39, 16  ;;  %v12767_v31 = vld [vmem:[#allocation2 + $0x4c] sm:$0xf]  ;;  %v5844_v39 = vshll.u32 %v5352_v13, 16  ;;  %v9955_v56 = vcombine.low %v6529_v49, %v6532_v38 }
 0x29a   : > { %v6542_v25 = vrot.slane %v12767_v31, 5  ;;  %v9906_v31 = vcombine.low %v5813_v48, %v5823_v43  ;;  %v12792_v49 = vrot.slane %v5858_v51, 5  ;;  %v5864_v38 = vrot.slane %v5862_v10, 4 }
 0x29b   : > { %v12775_v45 = vrot.slane %v5834_v63, 5  ;;  %v5840_v2 = vrot.slane %v5838_v22, 4  ;;  %v5355_v63 = vld [vmem:[#allocation2 + $0x11c] sm:$0x1]  ;;  %v5851_v22 = vrot.slane %v5849_v7, 4  ;;  %v6556_v13 = vrot.slane %v12788_v46, 5 }
 0x29c   : > { %v6544_v50 = vrot.slane %v6542_v25, 4  ;;  %v5832_v33 = vrot.slane %v5831_v8, 4  ;;  %v6543_v16 = vsel %vm11479_vm13, %v9925_v20, %v6542_v25  ;;  %v5868_v48 = vshll.u32 %v5355_v63, 16  ;;  %v6345_v63 = vld [vmem:[#allocation2 + $0x7c] sm:$0xf] }
 0x29d   : > { %8779 = vmatmul.mubr.bf16.gmra.mrb[56].mxu0 %v11075_v9  ;;  %v6336_v9 = vld [vmem:[#allocation2 + $0x58] sm:$0xf]  ;;  %v5841_v28 = vor.u32 %v5840_v2, %v12775_v45  ;;  %v6342_v2 = vld [vmem:[#allocation2 + $0x70] sm:$0xf]  ;;  %v9927_v58 = vrot.slane %v6338_v19, 9  ;;  %v5865_v43 = vor.u32 %v5864_v38, %v12792_v49  ;;  %v6559_v25 = vrot.slane %v6340_v3, 5 }
 0x29e   : > { %8786 = vmatprep.mubr.bf16.mxu0 %v9904_v59  ;;  %v6334_v59 = vld [vmem:[#allocation2 + $0x50] sm:$0x1]  ;;  %v6549_v24 = vrot.slane %v6336_v9, 5  ;;  %v5882_v9 = vshll.u32 %v5357_v6, 16  ;;  %v6563_v51 = vrot.slane %v6342_v2, 5  ;;  %v5875_v8 = vrot.slane %v5873_v14, 4 }
 0x29f   : > { %v6545_v47 = vrot.slane %v6334_v59, 5  ;;  %v5876_v59 = vshll.u32 %v5356_v23, 16  ;;  %v5842_v7 = vrot.slane %v5841_v28, 4  ;;  %v5837_v20 = vsel %vm11375_vm6, %v5832_v33, %v12775_v45  ;;  %v6348_v19 = vld [vmem:[#allocation2 + $0x88] sm:$0xf] }
 0x2a0   : > { %8337 = vmatmul.mubr.bf16.gmra.mrb[124].mxu1 %v9728_v12  ;;  %v12783_v12 = vsel %vm11479_vm13, %v9924_v30, %v6535_v61  ;;  %v5846_v30 = vrot.slane %v5844_v39, 5  ;;  %v9926_v61 = vrot.slane %v6335_v1, 9  ;;  %v6341_v39 = vld [vmem:[#allocation2 + $0x6c] sm:$0xe]  ;;  %v6558_v1 = vrot.slane %v6556_v13, 4 }
 0x2a1   : > { %10437 = vmatprep.mubr.bf16.mxu1 %v9953_v27  ;;  %v5854_v27 = vrot.slane %v5852_v4, 5  ;;  %v6551_v4 = vrot.slane %v6549_v24, 4  ;;  %v9956_v10 = vcombine.low %v12783_v12, %v6539_v37  ;;  %v5878_v28 = vrot.slane %v5876_v59, 5  ;;  %v6344_v33 = vld [vmem:[#allocation2 + $0x78] sm:$0xe] }
 0x2a2   : > { %v5866_v37 = vrot.slane %v5865_v43, 4  ;;  %v6565_v45 = vrot.slane %v6563_v51, 4  ;;  %v6566_v3 = vrot.slane %v6343_v34, 5  ;;  %v6346_v2 = vld [vmem:[#allocation2 + $0x80] sm:$0x1]  ;;  %v6570_v14 = vrot.slane %v6345_v63, 5 }
 0x2a3   : > { %v6553_v23 = vsel %vm11479_vm13, %v6551_v4, %v6552_v32  ;;  %v6560_v32 = vsel %vm11479_vm13, %v6558_v1, %v6559_v25  ;;  %v5879_v38 = vor.u32 %v5878_v28, %v5875_v8  ;;  %v6347_v59 = vld [vmem:[#allocation2 + $0x84] sm:$0xe]  ;;  %v5360_v43 = vld [vmem:[#allocation2 + $0x130] sm:$0xf]  ;;  %v6573_v25 = vrot.slane %v6346_v2, 5 }
 0x2a4   : > { %v9930_v34 = vrot.slane %v6347_v59, 9  ;;  %v6351_v28 = vld [vmem:[#allocation2 + $0x94] sm:$0xf] }
 0x2a5   : > { %8787 = vmatmul.mubr.bf16.gmra.mrb[60].mxu0 %v11077_v11  ;;  %v5855_v11 = vor.u32 %v5854_v27, %v5851_v22  ;;  %v9928_v22 = vrot.slane %v6341_v39, 9  ;;  %v12810_v27 = vrot.slane %v5882_v9, 5  ;;  %v12828_v9 = vsel %vm11479_vm13, %v6565_v45, %v6566_v3  ;;  %v5361_v63 = vld [vmem:[#allocation2 + $0x134] sm:$0x1] }
 0x2a6   : > { %8794 = vmatprep.mubr.bf16.mxu0 %v9905_v60  ;;  %v6546_v60 = vsel %vm11479_vm13, %v6544_v50, %v6545_v47  ;;  %v5847_v47 = vsel %vm11375_vm6, %v5842_v7, %v5846_v30  ;;  %v5358_v50 = vld [vmem:[#allocation2 + $0x128] sm:$0x1]  ;;  %v6557_v30 = vsel %vm11479_vm13, %v9927_v58, %v6556_v13  ;;  %v5880_v1 = vrot.slane %v5879_v38, 4  ;;  %v6352_v38 = vld [vmem:[#allocation2 + $0x98] sm:$0x1] }
 0x2a7   : > { %v9957_v46 = vcombine.low %v6543_v16, %v6546_v60  ;;  %v5856_v12 = vrot.slane %v5855_v11, 4  ;;  %v9907_v16 = vcombine.low %v5837_v20, %v5847_v47  ;;  %v12821_v13 = vsel %vm11479_vm13, %v9928_v22, %v6563_v51  ;;  %v6349_v11 = vld [vmem:[#allocation2 + $0x8c] sm:$0x1] }
 0x2a8   : > { %10438 = vmatmul.mubr.bf16.vlgmr.msra.gmra.mrb[128].mxu1 %v9954_v44  ;;  %v5886_v44 = vshrl.u32 %v5357_v6, 16  ;;  %v5892_v6 = vshll.u32 %v5358_v50, 16  ;;  %v9959_v39 = vcombine.low %v6557_v30, %v6560_v32  ;;  %v6572_v51 = vrot.slane %v6570_v14, 4 }
 0x2a9   : > { %10441 = vmatprep.mubr.bf16.mxu1 %v9955_v56  ;;  %v6550_v56 = vsel %vm11479_vm13, %v9926_v61, %v6549_v24  ;;  %v5870_v61 = vrot.slane %v5868_v48, 5  ;;  %v5861_v60 = vsel %vm11375_vm6, %v5856_v12, %v12792_v49  ;;  %v5359_v48 = vld [vmem:[#allocation2 + $0x12c] sm:$0xf]  ;;  %v9960_v50 = vcombine.low %v12821_v13, %v12828_v9 }
 0x2aa   : > { %v5888_v24 = vrot.slane %v5886_v44, 4  ;;  %v9958_v7 = vcombine.low %v6550_v56, %v6553_v23  ;;  %v9929_v44 = vrot.slane %v6344_v33, 9  ;;  %v5894_v49 = vrot.slane %v5892_v6, 5  ;;  %v5363_v6 = vld [vmem:[#allocation2 + $0x13c] sm:$0xf]  ;;  %v11080_v33 = vld [vmem:[#allocation2 + $0x108] sm:$0xff]  }
 0x2ab   : > { %v5871_v58 = vsel %vm11375_vm6, %v5866_v37, %v5870_v61  ;;  %v6580_v56 = vrot.slane %v6349_v11, 5  ;;  %v5897_v8 = vshrl.u32 %v5359_v48, 16  ;;  %v5900_v47 = vshll.u32 %v5359_v48, 16  ;;  %v5362_v61 = vld [vmem:[#allocation2 + $0x138] sm:$0xf] }
 0x2ac   : > { %v5889_v4 = vor.u32 %v5888_v24, %v12810_v27  ;;  %v5910_v23 = vshrl.u32 %v5360_v43, 16  ;;  %v9908_v12 = vcombine.low %v5861_v60, %v5871_v58  ;;  %v6571_v22 = vsel %vm11479_vm13, %v9929_v44, %v6570_v14 }
 0x2ad   : > { %8795 = vmatmul.mubr.bf16.gmra.mrb[64].mxu0 %v11078_v36  ;;  %v11079_v36 = vld [vmem:[#allocation2 + $0xfc] sm:$0xff]   ;;  %v6584_v37 = vrot.slane %v6351_v28, 5  ;;  %v5885_v45 = vsel %vm11375_vm6, %v5880_v1, %v12810_v27  ;;  %v6574_v3 = vsel %vm11479_vm13, %v6572_v51, %v6573_v25  ;;  %v5899_v32 = vrot.slane %v5897_v8, 4  ;;  %v6355_v1 = vld [vmem:[#allocation2 + $0xa4] sm:$0x1] }
 0x2ae   : > { %8802 = vmatprep.mubr.bf16.mxu0 %v9906_v31  ;;  %v6577_v31 = vrot.slane %v6348_v19, 5  ;;  %v5890_v20 = vrot.slane %v5889_v4, 4  ;;  %v6350_v19 = vld [vmem:[#allocation2 + $0x90] sm:$0xe]  ;;  %v5902_v2 = vrot.slane %v5900_v47, 5  ;;  %v5912_v59 = vrot.slane %v5910_v23, 4 }
 0x2af   : > { %v5921_v60 = vshrl.u32 %v5362_v61, 16  ;;  %v5924_v13 = vshll.u32 %v5362_v61, 16  ;;  %v6586_v11 = vrot.slane %v6584_v37, 4  ;;  %v6587_v48 = vrot.slane %v6352_v38, 5  ;;  %v5365_v8 = vld [vmem:[#allocation2 + $0x144] sm:$0xf] }
 0x2b0   : > { %10442 = vmatmul.mubr.bf16.gmra.mrb[132].mxu1 %v9956_v10  ;;  %v6579_v10 = vrot.slane %v6577_v31, 4  ;;  %v12836_v24 = vsel %vm11479_vm13, %v9930_v34, %v6577_v31  ;;  %v12851_v31 = vld [vmem:[#allocation2 + $0xa0] sm:$0xf]  ;;  %v5930_v58 = vshll.u32 %v5363_v6, 16  ;;  %v9961_v44 = vcombine.low %v6571_v22, %v6574_v3  ;;  %v6356_v3 = vld [vmem:[#allocation2 + $0xa8] sm:$0xe] }
 0x2b1   : > { %10445 = vmatprep.mubr.bf16.mxu1 %v9957_v46  ;;  %v5906_v46 = vshll.u32 %v5360_v43, 16  ;;  %v6353_v43 = vld [vmem:[#allocation2 + $0x9c] sm:$0xe]  ;;  %v5903_v34 = vor.u32 %v5902_v2, %v5899_v32  ;;  %v5364_v47 = vld [vmem:[#allocation2 + $0x140] sm:$0x1]  ;;  %v5926_v23 = vrot.slane %v5924_v13, 5 }
 0x2b2   : > { %v12845_v30 = vsel %vm11479_vm13, %v6579_v10, %v6580_v56  ;;  %v6591_v10 = vrot.slane %v12851_v31, 5  ;;  %v12861_v56 = vld [vmem:[#allocation2 + $0xac] sm:$0xf]  ;;  %v6360_v32 = vld [vmem:[#allocation2 + $0xb8] sm:$0xf]  ;;  %v5945_v38 = vshrl.u32 %v5365_v8, 16 }
 0x2b3   : > { %v12849_v14 = vrot.slane %v5906_v46, 5  ;;  %v9962_v25 = vcombine.low %v12836_v24, %v12845_v30  ;;  %v5923_v46 = vrot.slane %v5921_v60, 4  ;;  %v6588_v24 = vsel %vm11479_vm13, %v6586_v11, %v6587_v48  ;;  %v5366_v30 = vld [vmem:[#allocation2 + $0x148] sm:$0xf] }
 0x2b4   : > { %v6594_v2 = vrot.slane %v6355_v1, 5  ;;  %v5954_v60 = vshll.u32 %v5366_v30, 16  ;;  %v5958_v13 = vshrl.u32 %v5366_v30, 16  ;;  %v5940_v48 = vshll.u32 %v5364_v47, 16  ;;  %v5368_v30 = vld [vmem:[#allocation2 + $0x150] sm:$0xf] }
 0x2b5   : > { %8803 = vmatmul.mubr.bf16.gmra.mrb[68].mxu0 %v11079_v36  ;;  %v5916_v36 = vshll.u32 %v5361_v63, 16  ;;  %v5913_v51 = vor.u32 %v5912_v59, %v12849_v14  ;;  %v11081_v63 = vld [vmem:[#allocation2 + $0x114] sm:$0xff]   ;;  %v5947_v1 = vrot.slane %v5945_v38, 4 }
 0x2b6   : > { %8810 = vmatprep.mubr.bf16.mxu0 %v9907_v16  ;;  %v5895_v16 = vsel %vm11375_vm6, %v5890_v20, %v5894_v49 }
 0x2b7   : > { %v9909_v28 = vcombine.low %v5885_v45, %v5895_v16  ;;  %v12863_v20 = vrot.slane %v5916_v36, 5  ;;  %v6598_v45 = vrot.slane %v12861_v56, 5  ;;  %v6593_v16 = vrot.slane %v6591_v10, 4 }
 0x2b8   : > { %10446 = vmatmul.mubr.bf16.gmra.mrb[136].mxu1 %v9958_v7  ;;  %v9931_v7 = vrot.slane %v6350_v19, 9  ;;  %v12869_v19 = vrot.slane %v5930_v58, 5  ;;  %v5927_v36 = vor.u32 %v5926_v23, %v5923_v46  ;;  %v9933_v58 = vrot.slane %v6356_v3, 9 }
 0x2b9   : > { %10449 = vmatprep.mubr.bf16.mxu1 %v9959_v39  ;;  %v5934_v39 = vshrl.u32 %v5363_v6, 16  ;;  %v5948_v6 = vshll.u32 %v5365_v8, 16  ;;  %v6595_v23 = vsel %vm11479_vm13, %v6593_v16, %v6594_v2  ;;  %v5960_v3 = vrot.slane %v5958_v13, 4  ;;  %v6366_v16 = vld [vmem:[#allocation2 + $0xd0] sm:$0xf] }
 0x2ba   : > { %v6585_v22 = vsel %vm11479_vm13, %v9931_v7, %v6584_v37  ;;  %v6358_v37 = vld [vmem:[#allocation2 + $0xb0] sm:$0x1]  ;;  %v6359_v7 = vld [vmem:[#allocation2 + $0xb4] sm:$0xe] }
 0x2bb   : > { %v12853_v27 = vpop.f32.mrb[32].mxu1  ;;  %v5936_v61 = vrot.slane %v5934_v39, 4  ;;  %v9963_v31 = vcombine.low %v6585_v22, %v6588_v24  ;;  %v6361_v39 = vld [vmem:[#allocation2 + $0xbc] sm:$0x1]  ;;  %v12887_v22 = vld [vmem:[#allocation2 + $0xc4] sm:$0xf] }
 0x2bc   : > { %v8156_v4 = vpop.f32.mrb[33].mxu1  ;;  %v5928_v24 = vrot.slane %v5927_v36, 4  ;;  %v6364_v36 = vld [vmem:[#allocation2 + $0xc8] sm:$0x1] }
 0x2bd   : > { %v12855_v9 = vpop.f32.mrb[34].mxu1  ;;  %8811 = vmatmul.mubr.bf16.gmra.mrb[72].mxu0 %v11080_v33  ;;  %v5904_v33 = vrot.slane %v5903_v34, 4  ;;  %v5937_v11 = vor.u32 %v5936_v61, %v12869_v19  ;;  %v6601_v34 = vrot.slane %v6358_v37, 5  ;;  %v12889_v61 = vrot.slane %v5954_v60, 5 }
 0x2be   : > { %v8159_v49 = vpop.f32.mrb[35].mxu1  ;;  %8818 = vmatprep.mubr.bf16.mxu0 %v9908_v12  ;;  %v9932_v12 = vrot.slane %v6353_v43, 9  ;;  %v5972_v60 = vshll.u32 %v5368_v30, 16 }
 0x2bf   : > { %v6600_v49 = vrot.slane %v6598_v45, 4  ;;  %v5909_v8 = vsel %vm11375_vm6, %v5904_v33, %v12849_v14  ;;  %v5938_v14 = vrot.slane %v5937_v11, 4  ;;  %v11082_v33 = vld [vmem:[#allocation2 + $0x120] sm:$0xff]  }
 0x2c0   : > { %10450 = vmatmul.mubr.bf16.gmra.mrb[140].mxu1 %v9960_v50  ;;  %v5914_v50 = vrot.slane %v5913_v51, 4  ;;  %v5950_v51 = vrot.slane %v5948_v6, 5  ;;  %v6592_v47 = vsel %vm11479_vm13, %v9932_v12, %v6591_v10  ;;  %v5367_v6 = vld [vmem:[#allocation2 + $0x14c] sm:$0x1]  ;;  %v6599_v10 = vsel %vm11479_vm13, %v9933_v58, %v6598_v45  ;;  %v5369_v58 = vld [vmem:[#allocation2 + $0x154] sm:$0xf] }
 0x2c1   : > { %10453 = vmatprep.mubr.bf16.mxu1 %v9961_v44  ;;  %v6605_v44 = vrot.slane %v6360_v32, 5  ;;  %v5942_v32 = vrot.slane %v5940_v48, 5  ;;  %v9964_v37 = vcombine.low %v6592_v47, %v6595_v23  ;;  %v5964_v11 = vshll.u32 %v5367_v6, 16  ;;  %v6365_v48 = vld [vmem:[#allocation2 + $0xcc] sm:$0xe] }
 0x2c2   : > { %v5919_v46 = vsel %vm11375_vm6, %v5914_v50, %v12863_v20  ;;  %v6608_v20 = vrot.slane %v6361_v39, 5  ;;  %v5951_v12 = vor.u32 %v5950_v51, %v5947_v1  ;;  %v6612_v50 = vrot.slane %v12887_v22, 5  ;;  %v6367_v51 = vld [vmem:[#allocation2 + $0xd4] sm:$0x1] }
 0x2c3   : > { %v12872_v59 = vpop.f32.mrb[36].mxu1  ;;  %v6607_v38 = vrot.slane %v6605_v44, 4  ;;  %v9910_v2 = vcombine.low %v5909_v8, %v5919_v46  ;;  %v6615_v23 = vrot.slane %v6364_v36, 5 }
 0x2c4   : > { %v8164_v4 = vpop.f32.mrb[37].mxu1  ;;  %v5952_v8 = vrot.slane %v5951_v12, 4  ;;  %v6614_v47 = vrot.slane %v6612_v50, 4  ;;  %v11083_v12 = vld [vmem:[#allocation2 + $0x12c] sm:$0xff]  }
 0x2c5   : > { %v12875_v43 = vpop.f32.mrb[38].mxu1  ;;  %8819 = vmatmul.mubr.bf16.gmra.mrb[76].mxu0 %v11081_v63  ;;  %v9934_v63 = vrot.slane %v6359_v7, 9  ;;  %v5969_v7 = vshrl.u32 %v5368_v30, 16  ;;  %v5961_v4 = vor.u32 %v5960_v3, %v12889_v61  ;;  %v12910_v1 = vsel %vm11479_vm13, %v6607_v38, %v6608_v20 }
 0x2c6   : > { %v8167_v56 = vpop.f32.mrb[39].mxu1  ;;  %8826 = vmatprep.mubr.bf16.mxu0 %v9909_v28  ;;  %v6602_v28 = vsel %vm11479_vm13, %v6600_v49, %v6601_v34  ;;  %v5943_v49 = vsel %vm11375_vm6, %v5938_v14, %v5942_v32  ;;  %v5978_v3 = vshll.u32 %v5369_v58, 16  ;;  %v5982_v30 = vshrl.u32 %v5369_v58, 16 }
 0x2c7   : > { %v12903_v45 = vsel %vm11479_vm13, %v9934_v63, %v6605_v44  ;;  %v9965_v34 = vcombine.low %v6599_v10, %v6602_v28  ;;  %v12912_v56 = vld [vmem:[#allocation2 + $0xf4] sm:$0xf]  ;;  %v5974_v63 = vrot.slane %v5972_v60, 5  ;;  %v5962_v14 = vrot.slane %v5961_v4, 4  ;;  %v5371_v28 = vld [vmem:[#allocation2 + $0x15c] sm:$0xf] }
 0x2c8   : > { %10454 = vmatmul.mubr.bf16.gmra.mrb[144].mxu1 %v9962_v25  ;;  %v6362_v25 = vld [vmem:[#allocation2 + $0xc0] sm:$0xe]  ;;  %v5966_v32 = vrot.slane %v5964_v11, 5  ;;  %v9936_v38 = vrot.slane %v6365_v48, 9  ;;  %v9966_v20 = vcombine.low %v12903_v45, %v12910_v1  ;;  %v6622_v10 = vrot.slane %v6367_v51, 5 }
 0x2c9   : > { %10457 = vmatprep.mubr.bf16.mxu1 %v9963_v31  ;;  %v5933_v31 = vsel %vm11375_vm6, %v5928_v24, %v12869_v19  ;;  %v6619_v19 = vrot.slane %v6366_v16, 5  ;;  %v9935_v46 = vrot.slane %v6362_v25, 9  ;;  %v5971_v24 = vrot.slane %v5969_v7, 4  ;;  %v5372_v7 = vld [vmem:[#allocation2 + $0x160] sm:$0xf] }
 0x2ca   : > { %v9911_v16 = vcombine.low %v5933_v31, %v5943_v49  ;;  %v6616_v25 = vsel %vm11479_vm13, %v6614_v47, %v6615_v23  ;;  %v6626_v36 = vrot.slane %v12912_v56, 5  ;;  %v12926_v45 = vrot.slane %v5978_v3, 5  ;;  %v6368_v31 = vld [vmem:[#allocation2 + $0xf0] sm:$0xe]  ;;  %v6370_v11 = vld [vmem:[#allocation2 + $0xf8] sm:$0x1] }
 0x2cb   : > { %v12896_v13 = vpop.f32.mrb[40].mxu1  ;;  %v6621_v6 = vrot.slane %v6619_v19, 4  ;;  %v5975_v60 = vor.u32 %v5974_v63, %v5971_v24  ;;  %v5984_v4 = vrot.slane %v5982_v30, 4  ;;  %v12934_v58 = vsel %vm11479_vm13, %v9936_v38, %v6619_v19  ;;  %v6371_v56 = vld [vmem:[#allocation2 + $0xfc] sm:$0xe] }
 0x2cc   : > { %v8172_v39 = vpop.f32.mrb[41].mxu1  ;;  %v5993_v49 = vshrl.u32 %v5371_v28, 16  ;;  %v6628_v24 = vrot.slane %v6626_v36, 4  ;;  %v6629_v19 = vrot.slane %v6370_v11, 5  ;;  %v6373_v63 = vld [vmem:[#allocation2 + $0x104] sm:$0x1] }
 0x2cd   : > { %v12914_v44 = vpop.f32.mrb[42].mxu1  ;;  %8827 = vmatmul.mubr.bf16.gmra.mrb[80].mxu0 %v11082_v33  ;;  %v6613_v33 = vsel %vm11479_vm13, %v9935_v46, %v6612_v50  ;;  %v5967_v50 = vsel %vm11375_vm6, %v5962_v14, %v5966_v32  ;;  %v12936_v39 = vld [vmem:[#allocation2 + $0x100] sm:$0xf]  ;;  %v12940_v51 = vsel %vm11479_vm13, %v6621_v6, %v6622_v10  ;;  %v6006_v46 = vshrl.u32 %v5372_v7, 16  ;;  %v6375_v38 = vld [vmem:[#allocation2 + $0x10c] sm:$0xf] }
 0x2ce   : > { %13548 = vst [vmem:[#allocation4_spill] sm:$0xff] %v12914_v44  ;;  %v8175_v22 = vpop.f32.mrb[43].mxu1  ;;  %8834 = vmatprep.mubr.bf16.mxu0 %v9910_v2  ;;  %v5370_v2 = vld [vmem:[#allocation2 + $0x158] sm:$0x1]  ;;  %v9967_v1 = vcombine.low %v6613_v33, %v6616_v25  ;;  %v12944_v30 = vrot.slane %v5975_v60, 4  ;;  %v5985_v14 = vor.u32 %v5984_v4, %v12926_v45  ;;  %v6633_v32 = vrot.slane %v12936_v39, 5 }
 0x2cf   : > { %v5988_v23 = vshll.u32 %v5370_v2, 16  ;;  %v9937_v22 = vrot.slane %v6368_v31, 9  ;;  %v5373_v10 = vld [vmem:[#allocation2 + $0x164] sm:$0x1]  ;;  %v6374_v25 = vld [vmem:[#allocation2 + $0x108] sm:$0xe]  ;;  %v9968_v2 = vcombine.low %v12934_v58, %v12940_v51 }
 0x2d0   : > { %10458 = vmatmul.mubr.bf16.gmra.mrb[148].mxu1 %v9964_v37  ;;  %v5957_v37 = vsel %vm11375_vm6, %v5952_v8, %v12889_v61  ;;  %v6002_v8 = vshll.u32 %v5372_v7, 16  ;;  %v9938_v7 = vrot.slane %v6371_v56, 9  ;;  %v6008_v60 = vrot.slane %v6006_v46, 4  ;;  %v5374_v31 = vld [vmem:[#allocation2 + $0x168] sm:$0xf] }
 0x2d1   : > { %10461 = vmatprep.mubr.bf16.mxu1 %v9965_v34  ;;  %v5996_v34 = vshll.u32 %v5371_v28, 16  ;;  %v9912_v6 = vcombine.low %v5957_v37, %v5967_v50  ;;  %v5995_v28 = vrot.slane %v5993_v49, 4  ;;  %v5990_v4 = vrot.slane %v5988_v23, 5  ;;  %v6376_v37 = vld [vmem:[#allocation2 + $0x110] sm:$0x1] }
 0x2d2   : > { %v6627_v11 = vsel %vm11479_vm13, %v9937_v22, %v6626_v36  ;;  %v6640_v50 = vrot.slane %v6375_v38, 5  ;;  %v6378_v39 = vld [vmem:[#allocation2 + $0x118] sm:$0xf]  ;;  %v5981_v58 = vsel %vm11375_vm6, %v12944_v30, %v12926_v45  ;;  %v5986_v49 = vrot.slane %v5985_v14, 4  ;;  %v6379_v38 = vld [vmem:[#allocation2 + $0x11c] sm:$0x1] }
 0x2d3   : > { %v12928_v48 = vpop.f32.mrb[44].mxu1  ;;  %v5998_v33 = vrot.slane %v5996_v34, 5  ;;  %v6635_v34 = vrot.slane %v6633_v32, 4  ;;  %v6012_v36 = vshll.u32 %v5373_v10, 16  ;;  %v6017_v46 = vshrl.u32 %v5374_v31, 16 }
 0x2d4   : > { %13549 = vst [vmem:[#allocation5_spill] sm:$0xff] %v12928_v48  ;;  %v8180_v61 = vpop.f32.mrb[45].mxu1  ;;  %v6020_v23 = vshll.u32 %v5374_v31, 16  ;;  %v6642_v45 = vrot.slane %v6640_v50, 4  ;;  %v6643_v30 = vrot.slane %v6376_v37, 5  ;;  %v5991_v10 = vsel %vm11375_vm6, %v5986_v49, %v5990_v4 }
 0x2d5   : > { %v12942_v47 = vpop.f32.mrb[46].mxu1  ;;  %8835 = vmatmul.mubr.bf16.gmra.mrb[84].mxu0 %v11083_v12  ;;  %v12950_v12 = vrot.slane %v6002_v8, 5  ;;  %v6636_v61 = vrot.slane %v6373_v63, 5  ;;  %v5999_v56 = vor.u32 %v5998_v33, %v5995_v28  ;;  %v6377_v8 = vld [vmem:[#allocation2 + $0x114] sm:$0xe]  ;;  %v6634_v28 = vsel %vm11479_vm13, %v9938_v7, %v6633_v32 }
 0x2d6   : > { %13550 = vst [vmem:[#allocation6_spill] sm:$0xff] %v12942_v47  ;;  %v8183_v3 = vpop.f32.mrb[47].mxu1  ;;  %8842 = vmatprep.mubr.bf16.mxu0 %v9911_v16  ;;  %v6630_v16 = vsel %vm11479_vm13, %v6628_v24, %v6629_v19  ;;  %v6647_v47 = vrot.slane %v6378_v39, 5  ;;  %v6022_v37 = vrot.slane %v6020_v23, 5  ;;  %v6650_v4 = vrot.slane %v6379_v38, 5 }
 0x2d7   : > { %v9969_v24 = vcombine.low %v6627_v11, %v6630_v16  ;;  %v6009_v19 = vor.u32 %v6008_v60, %v12950_v12  ;;  %v9939_v3 = vrot.slane %v6374_v25, 9  ;;  %v6637_v33 = vsel %vm11479_vm13, %v6635_v34, %v6636_v61  ;;  %v6381_v60 = vld [vmem:[#allocation2 + $0x124] sm:$0xf]  ;;  %v5376_v7 = vld [vmem:[#allocation2 + $0x170] sm:$0x1] }
 0x2d8   : > { %10462 = vmatmul.mubr.bf16.gmra.mrb[152].mxu1 %v9966_v20  ;;  %v11084_v20 = vld [vmem:[#allocation2 + $0x138] sm:$0xff]   ;;  %v9940_v25 = vrot.slane %v6377_v8, 9  ;;  %v6000_v31 = vrot.slane %v5999_v56, 4  ;;  %v6014_v11 = vrot.slane %v6012_v36, 5  ;;  %v6019_v16 = vrot.slane %v6017_v46, 4  ;;  %v11085_v61 = vld [vmem:[#allocation2 + $0x144] sm:$0xff]  }
 0x2d9   : > { %10465 = vmatprep.mubr.bf16.mxu1 %v9967_v1  ;;  %v5375_v1 = vld [vmem:[#allocation2 + $0x16c] sm:$0xf]  ;;  %v6010_v39 = vrot.slane %v6009_v19, 4  ;;  %v6644_v32 = vsel %vm11479_vm13, %v6642_v45, %v6643_v30  ;;  %v6380_v56 = vld [vmem:[#allocation2 + $0x120] sm:$0xe]  ;;  %v9913_v8 = vcombine.low %v5981_v58, %v5991_v10  ;;  %v6036_v58 = vshll.u32 %v5376_v7, 16 }
 0x2da   : > { %v6026_v63 = vshll.u32 %v5375_v1, 16  ;;  %v6030_v14 = vshrl.u32 %v5375_v1, 16  ;;  %v6649_v1 = vrot.slane %v6647_v47, 4  ;;  %v6382_v36 = vld [vmem:[#allocation2 + $0x128] sm:$0x1]  ;;  %v12984_v46 = vsel %vm11479_vm13, %v9940_v25, %v6647_v47 }
 0x2db   : > { %v12960_v51 = vpop.f32.mrb[48].mxu1  ;;  %v6023_v23 = vor.u32 %v6022_v37, %v6019_v16  ;;  %v6015_v19 = vsel %vm11375_vm6, %v6010_v39, %v6014_v11  ;;  %v5378_v45 = vld [vmem:[#allocation2 + $0x178] sm:$0xf]  ;;  %v12995_v10 = vld [vmem:[#allocation2 + $0x130] sm:$0xf] }
 0x2dc   : > { %13551 = vst [vmem:[#allocation7_spill] sm:$0xff] %v12960_v51  ;;  %v8188_v22 = vpop.f32.mrb[49].mxu1  ;;  %v12975_v49 = vrot.slane %v6026_v63, 5  ;;  %v6032_v34 = vrot.slane %v6030_v14, 4  ;;  %v12990_v38 = vsel %vm11479_vm13, %v6649_v1, %v6650_v4  ;;  %v9941_v63 = vrot.slane %v6380_v56, 9  ;;  %v11086_v39 = vld [vmem:[#allocation2 + $0x150] sm:$0xff]  }
 0x2dd   : > { %v12963_v48 = vpop.f32.mrb[50].mxu1  ;;  %8843 = vmatmul.mubr.bf16.gmra.mrb[88].mxu0 %v11084_v20  ;;  %v6641_v20 = vsel %vm11479_vm13, %v9939_v3, %v6640_v50  ;;  %v6005_v50 = vsel %vm11375_vm6, %v6000_v31, %v12950_v12  ;;  %v5377_v22 = vld [vmem:[#allocation2 + $0x174] sm:$0xf]  ;;  %v6657_v14 = vrot.slane %v6382_v36, 5  ;;  %v12997_v31 = vrot.slane %v6023_v23, 4 }
 0x2de   : > { %13552 = vst [vmem:[#allocation8_spill] sm:$0xff] %v12963_v48  ;;  %v8191_v51 = vpop.f32.mrb[51].mxu1  ;;  %8850 = vmatprep.mubr.bf16.mxu0 %v9912_v6  ;;  %v6654_v6 = vrot.slane %v6381_v60, 5  ;;  %v9971_v3 = vcombine.low %v6641_v20, %v6644_v32  ;;  %v6033_v12 = vor.u32 %v6032_v34, %v12975_v49  ;;  %v6041_v25 = vshrl.u32 %v5377_v22, 16  ;;  %v12999_v37 = vld [vmem:[#allocation2 + $0x13c] sm:$0xf] }
 0x2df   : > { %v9970_v51 = vcombine.low %v6634_v28, %v6637_v33  ;;  %v6383_v33 = vld [vmem:[#allocation2 + $0x12c] sm:$0xe]  ;;  %v6044_v60 = vshll.u32 %v5377_v22, 16  ;;  %v6050_v11 = vshll.u32 %v5378_v45, 16  ;;  %v6054_v16 = vshrl.u32 %v5378_v45, 16 }
 0x2e0   : > { %10466 = vmatmul.mubr.bf16.gmra.mrb[156].mxu1 %v9968_v2  ;;  %v6656_v47 = vrot.slane %v6654_v6, 4  ;;  %v9914_v20 = vcombine.low %v6005_v50, %v6015_v19  ;;  %v9972_v1 = vcombine.low %v12984_v46, %v12990_v38  ;;  %v6385_v4 = vld [vmem:[#allocation2 + $0x134] sm:$0x1]  ;;  %v6661_v32 = vrot.slane %v12995_v10, 5  ;;  %v5379_v7 = vld [vmem:[#allocation2 + $0x17c] sm:$0x1] }
 0x2e1   : > { %10469 = vmatprep.mubr.bf16.mxu1 %v9969_v24  ;;  %v6034_v34 = vrot.slane %v6033_v12, 4  ;;  %v6655_v56 = vsel %vm11479_vm13, %v9941_v63, %v6654_v6  ;;  %v5380_v23 = vld [vmem:[#allocation2 + $0x180] sm:$0xf]  ;;  %v9942_v50 = vrot.slane %v6383_v33, 9  ;;  %v6043_v46 = vrot.slane %v6041_v25, 4 }
 0x2e2   : > { %v6658_v36 = vsel %vm11479_vm13, %v6656_v47, %v6657_v14  ;;  %v6046_v22 = vrot.slane %v6044_v60, 5  ;;  %v5381_v19 = vld [vmem:[#allocation2 + $0x184] sm:$0xf]  ;;  %v6029_v6 = vsel %vm11375_vm6, %v12997_v31, %v12975_v49  ;;  %v6664_v38 = vrot.slane %v6385_v4, 5  ;;  %v6388_v12 = vld [vmem:[#allocation2 + $0x140] sm:$0x1] }
 0x2e3   : > { %v12977_v2 = vpop.f32.mrb[52].mxu1  ;;  %v6056_v45 = vrot.slane %v6054_v16, 4  ;;  %v9973_v47 = vcombine.low %v6655_v56, %v6658_v36  ;;  %v6663_v14 = vrot.slane %v6661_v32, 4  ;;  %v13022_v10 = vld [vmem:[#allocation2 + $0x148] sm:$0xf]  ;;  %v6068_v33 = vshll.u32 %v5380_v23, 16 }
 0x2e4   : > { %13553 = vst [vmem:[#allocation9_spill] sm:$0xff] %v12977_v2  ;;  %v8196_v24 = vpop.f32.mrb[53].mxu1  ;;  %v6078_v49 = vshrl.u32 %v5381_v19, 16  ;;  %v6389_v56 = vld [vmem:[#allocation2 + $0x144] sm:$0xe] }
 0x2e5   : > { %v12992_v30 = vpop.f32.mrb[54].mxu1  ;;  %8851 = vmatmul.mubr.bf16.gmra.mrb[92].mxu0 %v11085_v61  ;;  %v6038_v61 = vrot.slane %v6036_v58, 5  ;;  %v6668_v24 = vrot.slane %v12999_v37, 5  ;;  %v13020_v58 = vrot.slane %v6050_v11, 5  ;;  %v6060_v37 = vshll.u32 %v5379_v7, 16 }
 0x2e6   : > { %13554 = vst [vmem:[#allocation10_spill] sm:$0xff] %v12992_v30  ;;  %v8199_v28 = vpop.f32.mrb[55].mxu1  ;;  %8858 = vmatprep.mubr.bf16.mxu0 %v9913_v8  ;;  %v6386_v8 = vld [vmem:[#allocation2 + $0x138] sm:$0xe]  ;;  %v6047_v11 = vor.u32 %v6046_v22, %v6043_v46  ;;  %v6665_v46 = vsel %vm11479_vm13, %v6663_v14, %v6664_v38  ;;  %v5384_v14 = vld [vmem:[#allocation2 + $0x190] sm:$0xf] }
 0x2e7   : > { %v6065_v28 = vshrl.u32 %v5380_v23, 16  ;;  %v6039_v60 = vsel %vm11375_vm6, %v6034_v34, %v6038_v61  ;;  %v9943_v16 = vrot.slane %v6386_v8, 9  ;;  %v6670_v4 = vrot.slane %v6668_v24, 4  ;;  %v6391_v34 = vld [vmem:[#allocation2 + $0x14c] sm:$0x1] }
 0x2e8   : > { %10470 = vmatmul.mubr.bf16.gmra.mrb[160].mxu1 %v9970_v51  ;;  %v13011_v51 = vld [vmem:[%s13536_s2] ss:$0 sm:$0xff]  ;;  %v6057_v7 = vor.u32 %v6056_v45, %v13020_v58  ;;  %v6393_v61 = vld [vmem:[#allocation2 + $0x154] sm:$0xf]  ;;  %v6662_v8 = vsel %vm11479_vm13, %v9942_v50, %v6661_v32  ;;  %v6048_v30 = vrot.slane %v6047_v11, 4 }
 0x2e9   : > { %10473 = vmatprep.mubr.bf16.mxu1 %v9971_v3  ;;  %v13030_v36 = vadd.f32 %v13011_v51, %v11985_v53  ;;  %v13034_v23 = vadd.f32 %v13011_v51, %v11989_v29  ;;  %v5382_v53 = vld [vmem:[#allocation2 + $0x188] sm:$0x1]  ;;  %v6067_v22 = vrot.slane %v6065_v28, 4  ;;  %v11087_v29 = vld [vmem:[#allocation2 + $0x15c] sm:$0xff]   ;;  %v6394_v50 = vld [vmem:[#allocation2 + $0x158] sm:$0x1] }
 0x2ea   : > { %v6682_v38 = vrot.slane %v6393_v61, 5  ;;  %v13050_v2 = vld [vmem:[#allocation2 + $0x15c] sm:$0xe]  ;;  %v6396_v44 = vld [vmem:[#allocation2 + $0x160] sm:$0xf] }
 0x2eb   : > { %v13014_v3 = vpop.f32.mrb[56].mxu1 }
 0x2ec   : > { %13555 = vst [vmem:[#allocation11_spill] sm:$0xff] %v13014_v3  ;;  %v8204_v63 = vpop.f32.mrb[57].mxu1  ;;  %v6074_v3 = vshll.u32 %v5381_v19, 16  ;;  %v6070_v19 = vrot.slane %v6068_v33, 5  ;;  %v6058_v33 = vrot.slane %v6057_v7, 4 }
 0x2ed   : > { %v13024_v25 = vpop.f32.mrb[58].mxu1  ;;  %8859 = vmatmul.mubr.bf16.gmra.mrb[96].mxu0 %v11086_v39  ;;  %v6671_v63 = vrot.slane %v6388_v12, 5  ;;  %v6675_v39 = vrot.slane %v13022_v10, 5  ;;  %v6392_v12 = vld [vmem:[#allocation2 + $0x150] sm:$0xe] }
 0x2ee   : > { %13556 = vst [vmem:[#allocation12_spill] sm:$0xff] %v13024_v25  ;;  %v8207_v31 = vpop.f32.mrb[59].mxu1  ;;  %8866 = vmatprep.mubr.bf16.mxu0 %v9914_v20  ;;  %v6062_v20 = vrot.slane %v6060_v37, 5  ;;  %v13042_v45 = vrot.slane %v6074_v3, 5  ;;  %v6080_v25 = vrot.slane %v6078_v49, 4  ;;  %v9974_v37 = vcombine.low %v6662_v8, %v6665_v46 }
 0x2ef   : > { %v9915_v31 = vcombine.low %v6029_v6, %v6039_v60  ;;  %v5383_v10 = vld [vmem:[#allocation2 + $0x18c] sm:$0xf]  ;;  %v6672_v32 = vsel %vm11479_vm13, %v6670_v4, %v6671_v63  ;;  %v9944_v6 = vrot.slane %v6389_v56, 9  ;;  %v6678_v60 = vrot.slane %v6391_v34, 5 }
 0x2f0   : > { %10474 = vmatmul.mubr.bf16.gmra.mrb[164].mxu1 %v9972_v1  ;;  %v6669_v1 = vsel %vm11479_vm13, %v9943_v16, %v6668_v24  ;;  %v6071_v49 = vor.u32 %v6070_v19, %v6067_v22  ;;  %v6089_v11 = vshrl.u32 %v5383_v10, 16  ;;  %v6092_v48 = vshll.u32 %v5383_v10, 16  ;;  %v6397_v22 = vld [vmem:[#allocation2 + $0x164] sm:$0x1]  ;;  %v6399_v19 = vld [vmem:[#allocation2 + $0x16c] sm:$0xf] }
 0x2f1   : > { %10477 = vmatprep.mubr.bf16.mxu1 %v9973_v47  ;;  %v6677_v47 = vrot.slane %v6675_v39, 4  ;;  %v9975_v16 = vcombine.low %v6669_v1, %v6672_v32  ;;  %v6081_v4 = vor.u32 %v6080_v25, %v13042_v45  ;;  %v6084_v63 = vshll.u32 %v5382_v53, 16  ;;  %v5385_v10 = vld [vmem:[#allocation2 + $0x194] sm:$0x1] }
 0x2f2   : > { %v9945_v61 = vrot.slane %v6392_v12, 9  ;;  %v6684_v56 = vrot.slane %v6682_v38, 4  ;;  %v6098_v34 = vshll.u32 %v5384_v14, 16  ;;  %v6053_v8 = vsel %vm11375_vm6, %v6048_v30, %v13020_v58 }
 0x2f3   : > { %v13048_v28 = vpop.f32.mrb[60].mxu1  ;;  %v6063_v46 = vsel %vm11375_vm6, %v6058_v33, %v6062_v20  ;;  %v6676_v25 = vsel %vm11479_vm13, %v9944_v6, %v6675_v39  ;;  %v6679_v53 = vsel %vm11479_vm13, %v6677_v47, %v6678_v60  ;;  %v6072_v12 = vrot.slane %v6071_v49, 4  ;;  %v6398_v39 = vld [vmem:[#allocation2 + $0x168] sm:$0xe]  ;;  %v13071_v47 = vld [vmem:[#allocation2 + $0x178] sm:$0xf] }
 0x2f4   : > { %13557 = vst [vmem:[#allocation13_spill] sm:$0xff] %v13048_v28  ;;  %v8212_v3 = vpop.f32.mrb[61].mxu1  ;;  %v6685_v28 = vrot.slane %v6394_v50, 5  ;;  %v6094_v1 = vrot.slane %v6092_v48, 5  ;;  %v6082_v32 = vrot.slane %v6081_v4, 4  ;;  %v6086_v30 = vrot.slane %v6084_v63, 5 }
 0x2f5   : > { %v13052_v24 = vpop.f32.mrb[62].mxu1  ;;  %8867 = vmatmul.mubr.bf16.gmra.mrb[100].mxu0 %v11087_v29  ;;  %v6102_v3 = vshrl.u32 %v5384_v14, 16  ;;  %v6689_v29 = vrot.slane %v6396_v44, 5  ;;  %v6683_v58 = vsel %vm11479_vm13, %v9945_v61, %v6682_v38  ;;  %v9946_v20 = vrot.slane %v13050_v2, 9  ;;  %v11088_v50 = vld [vmem:[#allocation2 + $0x168] sm:$0xff]  }
 0x2f6   : > { %v8215_v7 = vpop.f32.mrb[63].mxu1  ;;  %8874 = vmatprep.mubr.bf16.mxu0 %v9915_v31  ;;  %v6091_v31 = vrot.slane %v6089_v11, 4  ;;  %v6686_v14 = vsel %vm11479_vm13, %v6684_v56, %v6685_v28  ;;  %v13069_v33 = vrot.slane %v6098_v34, 5  ;;  %v6696_v44 = vrot.slane %v6399_v19, 5  ;;  %v6400_v49 = vld [vmem:[#allocation2 + $0x170] sm:$0x1] }
 0x2f7   : > { %v6104_v6 = vrot.slane %v6102_v3, 4  ;;  %v13075_v48 = vadd.f32 %v13011_v51, %v12014_v26  ;;  %v9916_v38 = vcombine.low %v6053_v8, %v6063_v46  ;;  %v6692_v2 = vrot.slane %v6397_v22, 5  ;;  %v5386_v11 = vld [vmem:[#allocation2 + $0x198] sm:$0xf]  ;;  %v5387_v7 = vld [vmem:[#allocation2 + $0x19c] sm:$0xf] }
 0x2f8   : > { %10478 = vmatmul.mubr.bf16.gmra.mrb[168].mxu1 %v9974_v37  ;;  %v9976_v37 = vcombine.low %v6676_v25, %v6679_v53  ;;  %v6077_v28 = vsel %vm11375_vm6, %v6072_v12, %v13042_v45  ;;  %v6691_v4 = vrot.slane %v6689_v29, 4  ;;  %v6095_v63 = vor.u32 %v6094_v1, %v6091_v31  ;;  %v6401_v8 = vld [vmem:[#allocation2 + $0x174] sm:$0xe]  ;;  %v6403_v12 = vld [vmem:[#allocation2 + $0x17c] sm:$0x1] }
 0x2f9   : > { %10481 = vmatprep.mubr.bf16.mxu1 %v9975_v16  ;;  %v6108_v61 = vshll.u32 %v5385_v10, 16  ;;  %v6087_v26 = vsel %vm11375_vm6, %v6082_v32, %v6086_v30  ;;  %v9977_v34 = vcombine.low %v6683_v58, %v6686_v14  ;;  %v9947_v3 = vrot.slane %v6398_v39, 9  ;;  %v13092_v30 = vld [vmem:[#allocation2 + $0x184] sm:$0xf] }
 0x2fa   : > { %v6703_v46 = vrot.slane %v13071_v47, 5  ;;  %v13089_v53 = vsel %vm11479_vm13, %v9946_v20, %v6689_v29  ;;  %v6105_v45 = vor.u32 %v6104_v6, %v13069_v33  ;;  %v6698_v22 = vrot.slane %v6696_v44, 4  ;;  %v5388_v20 = vld [vmem:[#allocation2 + $0x1a0] sm:$0x1] }
 0x2fb   : > { %v13077_v60 = vpop.f32.mrb[64].mxu1  ;;  %v6699_v19 = vrot.slane %v6400_v49, 5  ;;  %v6113_v10 = vshrl.u32 %v5386_v11, 16  ;;  %v6116_v31 = vshll.u32 %v5386_v11, 16  ;;  %v6122_v1 = vshll.u32 %v5387_v7, 16 }
 0x2fc   : > { %v8220_v16 = vpop.f32.mrb[65].mxu1  ;;  %v6126_v32 = vshrl.u32 %v5387_v7, 16  ;;  %v9917_v58 = vcombine.low %v6077_v28, %v6087_v26  ;;  %v6693_v39 = vsel %vm11479_vm13, %v6691_v4, %v6692_v2  ;;  %v6110_v29 = vrot.slane %v6108_v61, 5  ;;  %v6404_v11 = vld [vmem:[#allocation2 + $0x180] sm:$0xe]  ;;  %v11089_v28 = vld [vmem:[#allocation2 + $0x174] sm:$0xff]  }
 0x2fd   : > { %v13082_v56 = vpop.f32.mrb[66].mxu1  ;;  %8875 = vmatmul.mubr.bf16.gmra.mrb[104].mxu0 %v11088_v50  ;;  %v6096_v50 = vrot.slane %v6095_v63, 4  ;;  %v6697_v6 = vsel %vm11479_vm13, %v9947_v3, %v6696_v44  ;;  %v9948_v47 = vrot.slane %v6401_v8, 9  ;;  %v6706_v49 = vrot.slane %v6403_v12, 5  ;;  %v6406_v4 = vld [vmem:[#allocation2 + $0x188] sm:$0x1] }
 0x2fe   : > { %v8223_v25 = vpop.f32.mrb[67].mxu1  ;;  %8882 = vmatprep.mubr.bf16.mxu0 %v9916_v38  ;;  %v6705_v38 = vrot.slane %v6703_v46, 4  ;;  %v6106_v7 = vrot.slane %v6105_v45, 4  ;;  %v6700_v2 = vsel %vm11479_vm13, %v6698_v22, %v6699_v19  ;;  %v6710_v63 = vrot.slane %v13092_v30, 5  ;;  %v13117_v30 = vld [vmem:[#allocation2 + $0x190] sm:$0xf] }
 0x2ff   : > { %v6115_v44 = vrot.slane %v6113_v10, 4  ;;  %v13106_v3 = vrot.slane %v6122_v1, 5  ;;  %v6128_v8 = vrot.slane %v6126_v32, 4  ;;  %v9978_v22 = vcombine.low %v13089_v53, %v6693_v39  ;;  %v5389_v10 = vld [vmem:[#allocation2 + $0x1a4] sm:$0xf] }
 0x300   : > { %10482 = vmatmul.mubr.bf16.gmra.mrb[172].mxu1 %v9976_v37  ;;  %v8668_v14 = vpop.f32.mrb[0].mxu0  ;;  %v6101_v19 = vsel %vm11375_vm6, %v6096_v50, %v13069_v33  ;;  %v9979_v1 = vcombine.low %v6697_v6, %v6700_v2  ;;  %v6132_v32 = vshll.u32 %v5388_v20, 16  ;;  %v6407_v53 = vld [vmem:[#allocation2 + $0x18c] sm:$0xe]  ;;  %v5390_v39 = vld [vmem:[#allocation2 + $0x1a8] sm:$0xf]  ;;  %v6111_v33 = vsel %vm11375_vm6, %v6106_v7, %v6110_v29 }
 0x301   : > { %10485 = vmatprep.mubr.bf16.mxu1 %v9977_v34  ;;  %v13099_v16 = vadd.f32 %v8668_v14, %v13030_v36  ;;  %v8670_v37 = vpop.f32.mrb[1].mxu0  ;;  %v6118_v34 = vrot.slane %v6116_v31, 5  ;;  %v7813_v36 = vadd.f32 %v13011_v51, %v12023_v55  ;;  %v13123_v55 = vsel %vm11479_vm13, %v9948_v47, %v6703_v46  ;;  %v6409_v6 = vld [vmem:[#allocation2 + $0x194] sm:$0x1] }
 0x302   : > { %v8671_v61 = vpop.f32.mrb[2].mxu0  ;;  %v9949_v50 = vrot.slane %v6404_v11, 9  ;;  %v6712_v37 = vrot.slane %v6710_v63, 4  ;;  %v6129_v46 = vor.u32 %v6128_v8, %v13106_v3  ;;  %v6717_v47 = vrot.slane %v13117_v30, 5  ;;  %v11090_v11 = vld [vmem:[#allocation2 + $0x180] sm:$0xff]  }
 0x303   : > { %v13104_v26 = vpop.f32.mrb[68].mxu1  ;;  %v13111_v25 = vadd.f32 %v8671_v61, %v13034_v23  ;;  %v8673_v45 = vpop.f32.mrb[3].mxu0  ;;  %v13127_v23 = vsel %vm11479_vm13, %v6705_v38, %v6706_v49  ;;  %v6713_v61 = vrot.slane %v6406_v4, 5  ;;  %v6119_v2 = vor.u32 %v6118_v34, %v6115_v44  ;;  %v6411_v49 = vld [vmem:[#allocation2 + $0x19c] sm:$0xf] }
 0x304   : > { %v8228_v12 = vpop.f32.mrb[69].mxu1  ;;  %v6137_v38 = vshrl.u32 %v5389_v10, 16  ;;  %v9980_v20 = vcombine.low %v13123_v55, %v13127_v23  ;;  %v6146_v45 = vshll.u32 %v5390_v39, 16  ;;  %v9918_v7 = vcombine.low %v6101_v19, %v6111_v33  ;;  %v6412_v55 = vld [vmem:[#allocation2 + $0x1a0] sm:$0x1] }
 0x305   : > { %v13119_v31 = vpop.f32.mrb[70].mxu1  ;;  %8883 = vmatmul.mubr.bf16.gmra.mrb[108].mxu0 %v11089_v28  ;;  %v6140_v28 = vshll.u32 %v5389_v10, 16  ;;  %v6150_v12 = vshrl.u32 %v5390_v39, 16  ;;  %v6134_v4 = vrot.slane %v6132_v32, 5  ;;  %v6720_v44 = vrot.slane %v6409_v6, 5 }
 0x306   : > { %13558 = vst [vmem:[#allocation14_spill] sm:$0xff] %v13119_v31  ;;  %v8231_v14 = vpop.f32.mrb[71].mxu1  ;;  %8890 = vmatprep.mubr.bf16.mxu0 %v9917_v58  ;;  %v9950_v58 = vrot.slane %v6407_v53, 9  ;;  %v6714_v30 = vsel %vm11479_vm13, %v6712_v37, %v6713_v61  ;;  %v6410_v10 = vld [vmem:[#allocation2 + $0x198] sm:$0xe]  ;;  %v6724_v23 = vrot.slane %v6411_v49, 5 }
 0x307   : > { %v6120_v19 = vrot.slane %v6119_v2, 4  ;;  %v6719_v32 = vrot.slane %v6717_v47, 4  ;;  %v6139_v53 = vrot.slane %v6137_v38, 4  ;;  %v5391_v61 = vld [vmem:[#allocation2 + $0x1ac] sm:$0x1]  ;;  %v9951_v31 = vrot.slane %v6410_v10, 9 }
 0x308   : > { %10486 = vmatmul.mubr.bf16.gmra.mrb[176].mxu1 %v9978_v22  ;;  %v8676_v29 = vpop.f32.mrb[4].mxu0  ;;  %v6711_v22 = vsel %vm11479_vm13, %v9949_v50, %v6710_v63  ;;  %v6152_v63 = vrot.slane %v6150_v12, 4  ;;  %v6727_v2 = vrot.slane %v6412_v55, 5  ;;  %v11091_v55 = vld [vmem:[#allocation2 + $0x18c] sm:$0xff]  }
 0x309   : > { %10489 = vmatprep.mubr.bf16.mxu1 %v9979_v1  ;;  %v13136_v34 = vadd.f32 %v8676_v29, %v13075_v48  ;;  %v8678_v8 = vpop.f32.mrb[5].mxu0  ;;  %v6130_v1 = vrot.slane %v6129_v46, 4  ;;  %v6142_v29 = vrot.slane %v6140_v28, 5  ;;  %v9981_v37 = vcombine.low %v6711_v22, %v6714_v30  ;;  %v6414_v46 = vld [vmem:[#allocation2 + $0x1a8] sm:$0xf] }
 0x30a   : > { %v8679_v39 = vpop.f32.mrb[6].mxu0  ;;  %v13146_v8 = vrot.slane %v6146_v45, 5  ;;  %v6125_v38 = vsel %vm11375_vm6, %v6120_v19, %v13106_v3  ;;  %v6718_v45 = vsel %vm11479_vm13, %v9950_v58, %v6717_v47  ;;  %v6721_v12 = vsel %vm11479_vm13, %v6719_v32, %v6720_v44  ;;  %v6413_v58 = vld [vmem:[#allocation2 + $0x1a4] sm:$0xe]  ;;  %v6415_v44 = vld [vmem:[#allocation2 + $0x1ac] sm:$0x1] }
 0x30b   : > { %v13142_v14 = vpop.f32.mrb[72].mxu1  ;;  %v13144_v33 = vadd.f32 %v8679_v39, %v7813_v36  ;;  %v8681_v48 = vpop.f32.mrb[7].mxu0  ;;  %v7818_v36 = vadd.f32 %v13011_v51, %v12043_v42  ;;  %v6135_v28 = vsel %vm11375_vm6, %v6130_v1, %v6134_v4  ;;  %v6156_v30 = vshll.u32 %v5391_v61, 16 }
 0x30c   : > { %13559 = vst [vmem:[#allocation15_spill] sm:$0xff] %v13142_v14  ;;  %v8236_v6 = vpop.f32.mrb[73].mxu1  ;;  %v6726_v14 = vrot.slane %v6724_v23, 4  ;;  %v6153_v22 = vor.u32 %v6152_v63, %v13146_v8  ;;  %v7821_v3 = vadd.f32 %v13011_v51, %v12055_v21  ;;  %v6725_v47 = vsel %vm11479_vm13, %v9951_v31, %v6724_v23 }
 0x30d   : > { %v13148_v50 = vpop.f32.mrb[74].mxu1  ;;  %8891 = vmatmul.mubr.bf16.gmra.mrb[112].mxu0 %v11090_v11  ;;  %v6143_v11 = vor.u32 %v6142_v29, %v6139_v53  ;;  %v9919_v1 = vcombine.low %v6125_v38, %v6135_v28  ;;  %v9982_v32 = vcombine.low %v6718_v45, %v6721_v12  ;;  %v6158_v63 = vrot.slane %v6156_v30, 5 }
 0x30e   : > { %v8239_v49 = vpop.f32.mrb[75].mxu1  ;;  %8898 = vmatprep.mubr.bf16.mxu0 %v9918_v7  ;;  %v6731_v7 = vrot.slane %v6414_v46, 5  ;;  %v6154_v29 = vrot.slane %v6153_v22, 4  ;;  %v9952_v23 = vrot.slane %v6413_v58, 9  ;;  %v7829_v12 = vadd.f32 %v13011_v51, %v12065_v41  ;;  %v11092_v22 = vld [vmem:[#allocation2 + $0x198] sm:$0xff]  }
 0x30f   : > { %v6144_v6 = vrot.slane %v6143_v11, 4  ;;  %v7834_v41 = vadd.f32 %v13011_v51, %v12081_v17 }
 0x310   : > { %10490 = vmatmul.mubr.bf16.gmra.mrb[180].mxu1 %v9980_v20  ;;  %v8684_v42 = vpop.f32.mrb[8].mxu0  ;;  %v6728_v20 = vsel %vm11479_vm13, %v6726_v14, %v6727_v2  ;;  %v6733_v61 = vrot.slane %v6731_v7, 4  ;;  %v6734_v14 = vrot.slane %v6415_v44, 5  ;;  %v7826_v2 = vadd.f32 %v13011_v51, %v12059_v35 }
 0x311   : > { %10493 = vmatprep.mubr.bf16.mxu1 %v9981_v37  ;;  %v13164_v10 = vadd.f32 %v8684_v42, %v7818_v36  ;;  %v8686_v4 = vpop.f32.mrb[9].mxu0  ;;  %v9983_v31 = vcombine.low %v6725_v47, %v6728_v20  ;;  %v6149_v46 = vsel %vm11375_vm6, %v6144_v6, %v13146_v8  ;;  %v6159_v36 = vsel %vm11375_vm6, %v6154_v29, %v6158_v63 }
 0x312   : > { %v8687_v39 = vpop.f32.mrb[10].mxu0  ;;  %v6732_v28 = vsel %vm11479_vm13, %v9952_v23, %v6731_v7  ;;  %v6735_v45 = vsel %vm11479_vm13, %v6733_v61, %v6734_v14  ;;  %v9920_v40 = vcombine.low %v6149_v46, %v6159_v36  ;;  %v7837_v20 = vadd.f32 %v13011_v51, %v12089_v52 }
 0x313   : > { %v13170_v19 = vpop.f32.mrb[76].mxu1  ;;  %v13172_v53 = vadd.f32 %v8687_v39, %v7821_v3  ;;  %v8689_v21 = vpop.f32.mrb[11].mxu0  ;;  %v11093_v39 = vld [vmem:[#allocation2 + $0x1a4] sm:$0xff]   ;;  %v7842_v63 = vadd.f32 %v13011_v51, %v12115_v54  ;;  %v7845_v52 = vadd.f32 %v13011_v51, %v12134_v5  ;;  %v7850_v54 = vadd.f32 %v13011_v51, %v12146_v62 }
 0x314   : > { %v8244_v48 = vpop.f32.mrb[77].mxu1  ;;  %v7853_v5 = vadd.f32 %v13011_v51, %v12157_v0  ;;  %v7858_v62 = vadd.f32 %v13011_v51, %v12180_v18  ;;  %v7861_v0 = vadd.f32 %v13011_v51, %v12186_v15  ;;  %v10565_v18 = vadd.f32 %v13011_v51, %v12853_v27 }
 0x315   : > { %v13174_v37 = vpop.f32.mrb[78].mxu1  ;;  %8899 = vmatmul.mubr.bf16.gmra.mrb[116].mxu0 %v11091_v55  ;;  %v9984_v55 = vcombine.low %v6732_v28, %v6735_v45  ;;  %v10567_v15 = vadd.f32 %v13011_v51, %v12855_v9  ;;  %v10569_v27 = vadd.f32 %v13011_v51, %v12872_v59  ;;  %v10571_v9 = vadd.f32 %v13011_v51, %v12875_v43 }
 0x316   : > { %v8247_v49 = vpop.f32.mrb[79].mxu1  ;;  %8906 = vmatprep.mubr.bf16.mxu0 %v9919_v1  ;;  %v10573_v59 = vadd.f32 %v13011_v51, %v12896_v13 }
 0x318   : > { %10494 = vmatmul.mubr.bf16.gmra.mrb[184].mxu1 %v9982_v32  ;;  %v8692_v38 = vpop.f32.mrb[12].mxu0 }
 0x319   : > { %10497 = vmatprep.mubr.bf16.mxu1 %v9983_v31  ;;  %v13189_v35 = vadd.f32 %v8692_v38, %v7826_v2  ;;  %v8694_v11 = vpop.f32.mrb[13].mxu0 }
 0x31a   : > { %v8695_v30 = vpop.f32.mrb[14].mxu0 }
 0x31b   : > { %v13191_v8 = vpop.f32.mrb[80].mxu1  ;;  %v13193_v42 = vadd.f32 %v8695_v30, %v7829_v12  ;;  %v8697_v3 = vpop.f32.mrb[15].mxu0 }
 0x31c   : > { %v8252_v4 = vpop.f32.mrb[81].mxu1 }
 0x31d   : > { %v13195_v7 = vpop.f32.mrb[82].mxu1  ;;  %8907 = vmatmul.mubr.bf16.gmra.mrb[120].mxu0 %v11092_v22 }
 0x31e   : > { %v8255_v57 = vpop.f32.mrb[83].mxu1  ;;  %8914 = vmatprep.mubr.bf16.mxu0 %v9920_v40 }
 0x320   : > { %10498 = vmatmul.mubr.bf16.gmra.mrb[188].mxu1 %v9984_v55  ;;  %v8700_v47 = vpop.f32.mrb[16].mxu0 }
 0x321   : > { %v13201_v58 = vadd.f32 %v8700_v47, %v7834_v41  ;;  %v8702_v44 = vpop.f32.mrb[17].mxu0 }
 0x322   : > { %v8703_v1 = vpop.f32.mrb[18].mxu0 }
 0x323   : > { %v13203_v32 = vpop.f32.mrb[84].mxu1  ;;  %v13205_v21 = vadd.f32 %v8703_v1, %v7837_v20  ;;  %v8705_v48 = vpop.f32.mrb[19].mxu0 }
 0x324   : > { %v8260_v6 = vpop.f32.mrb[85].mxu1 }
 0x325   : > { %v13207_v29 = vpop.f32.mrb[86].mxu1  ;;  %8915 = vmatmul.mubr.bf16.gmra.mrb[124].mxu0 %v11093_v39 }
 0x326   : > { %v8263_v17 = vpop.f32.mrb[87].mxu1 }
 0x328   : > { %v8708_v31 = vpop.f32.mrb[20].mxu0 }
 0x329   : > { %v13213_v23 = vadd.f32 %v8708_v31, %v7842_v63  ;;  %v8710_v61 = vpop.f32.mrb[21].mxu0 }
 0x32a   : > { %v8711_v14 = vpop.f32.mrb[22].mxu0 }
 0x32b   : > { %v13215_v49 = vpop.f32.mrb[88].mxu1  ;;  %v13217_v2 = vadd.f32 %v8711_v14, %v7845_v52  ;;  %v8713_v46 = vpop.f32.mrb[23].mxu0 }
 0x32c   : > { %v8268_v36 = vpop.f32.mrb[89].mxu1 }
 0x32d   : > { %v13219_v38 = vpop.f32.mrb[90].mxu1 }
 0x32e   : > { %v8271_v28 = vpop.f32.mrb[91].mxu1 }
 0x330   : > { %v8716_v45 = vpop.f32.mrb[24].mxu0 }
 0x331   : > { %v13225_v12 = vadd.f32 %v8716_v45, %v7850_v54  ;;  %v8718_v11 = vpop.f32.mrb[25].mxu0 }
 0x332   : > { %v8719_v22 = vpop.f32.mrb[26].mxu0 }
 0x333   : > { %v13227_v30 = vpop.f32.mrb[92].mxu1  ;;  %v13229_v40 = vadd.f32 %v8719_v22, %v7853_v5  ;;  %v8721_v3 = vpop.f32.mrb[27].mxu0 }
 0x334   : > { %v8276_v4 = vpop.f32.mrb[93].mxu1 }
 0x335   : > { %v13231_v55 = vpop.f32.mrb[94].mxu1 }
 0x336   : > { %v8279_v57 = vpop.f32.mrb[95].mxu1 }
 0x338   : > { %v8724_v41 = vpop.f32.mrb[28].mxu0 }
 0x339   : > { %v13237_v47 = vadd.f32 %v8724_v41, %v7858_v62  ;;  %v8726_v20 = vpop.f32.mrb[29].mxu0 }
 0x33a   : > { %v8727_v44 = vpop.f32.mrb[30].mxu0 }
 0x33b   : > { %v13239_v39 = vpop.f32.mrb[96].mxu1  ;;  %v13241_v1 = vadd.f32 %v8727_v44, %v7861_v0  ;;  %v8729_v48 = vpop.f32.mrb[31].mxu0 }
 0x33c   : > { %v8284_v6 = vpop.f32.mrb[97].mxu1 }
 0x33d   : > { %v13243_v17 = vpop.f32.mrb[98].mxu1  ;;  %v13563_v6 = vld [vmem:[#allocation4_spill] sm:$0xff] }
 0x33e   : > { %v8287_v63 = vpop.f32.mrb[99].mxu1  ;;  %v10575_v43 = vadd.f32 %v13011_v51, %v13563_v6 }
 0x340   : > { %v8732_v31 = vpop.f32.mrb[32].mxu0 }
 0x341   : > { %v13249_v52 = vadd.f32 %v10565_v18, %v8732_v31  ;;  %v8734_v61 = vpop.f32.mrb[33].mxu0 }
 0x342   : > { %v8735_v14 = vpop.f32.mrb[34].mxu0 }
 0x343   : > { %v13251_v46 = vpop.f32.mrb[100].mxu1  ;;  %v13253_v36 = vadd.f32 %v10567_v15, %v8735_v14  ;;  %v8737_v28 = vpop.f32.mrb[35].mxu0 }
 0x344   : > { %v8292_v54 = vpop.f32.mrb[101].mxu1 }
 0x345   : > { %v13255_v45 = vpop.f32.mrb[102].mxu1 }
 0x346   : > { %13560 = vst [vmem:[#allocation16_spill] sm:$0xff] %v13255_v45  ;;  %v8295_v5 = vpop.f32.mrb[103].mxu1 }
 0x348   : > { %v8740_v11 = vpop.f32.mrb[36].mxu0 }
 0x349   : > { %v13261_v22 = vadd.f32 %v10569_v27, %v8740_v11  ;;  %v8742_v3 = vpop.f32.mrb[37].mxu0  ;;  %v13566_v27 = vld [vmem:[#allocation5_spill] sm:$0xff] }
 0x34a   : > { %v8743_v4 = vpop.f32.mrb[38].mxu0  ;;  %v10577_v13 = vadd.f32 %v13011_v51, %v13566_v27 }
 0x34b   : > { %v13263_v57 = vpop.f32.mrb[104].mxu1  ;;  %v13265_v62 = vadd.f32 %v10571_v9, %v8743_v4  ;;  %v8745_v41 = vpop.f32.mrb[39].mxu0  ;;  %v13567_v9 = vld [vmem:[#allocation6_spill] sm:$0xff] }
 0x34c   : > { %13561 = vst [vmem:[#allocation17_spill] sm:$0xff] %v13263_v57  ;;  %v8300_v0 = vpop.f32.mrb[105].mxu1  ;;  %v10579_v3 = vadd.f32 %v13011_v51, %v13567_v9 }
 0x34d   : > { %v13267_v20 = vpop.f32.mrb[106].mxu1 }
 0x34e   : > { %13562 = vst [vmem:[#allocation18_spill] sm:$0xff] %v13267_v20  ;;  %v8303_v44 = vpop.f32.mrb[107].mxu1  ;;  %v13579_v20 = vld [vmem:[#allocation12_spill] sm:$0xff] }
 0x350   : > { %v8748_v48 = vpop.f32.mrb[40].mxu0 }
 0x351   : > { %v13273_v63 = vadd.f32 %v10573_v59, %v8748_v48  ;;  %v8750_v18 = vpop.f32.mrb[41].mxu0 }
 0x352   : > { %v8751_v31 = vpop.f32.mrb[42].mxu0 }
 0x353   : > { %v13275_v15 = vpop.f32.mrb[108].mxu1  ;;  %v13277_v61 = vadd.f32 %v10575_v43, %v8751_v31  ;;  %v8753_v14 = vpop.f32.mrb[43].mxu0  ;;  %v13570_v31 = vld [vmem:[#allocation7_spill] sm:$0xff] }
 0x354   : > { %13564 = vst [vmem:[#allocation4_spill] sm:$0xff] %v13275_v15  ;;  %v8308_v28 = vpop.f32.mrb[109].mxu1  ;;  %v10581_v14 = vadd.f32 %v13011_v51, %v13570_v31 }
 0x355   : > { %v13279_v54 = vpop.f32.mrb[110].mxu1 }
 0x356   : > { %13565 = vst [vmem:[#allocation19_spill] sm:$0xff] %v13279_v54  ;;  %v8311_v5 = vpop.f32.mrb[111].mxu1  ;;  %v13575_v54 = vld [vmem:[#allocation10_spill] sm:$0xff] }
 0x357   : > { %v13571_v5 = vld [vmem:[#allocation8_spill] sm:$0xff] }
 0x358   : > { %v8756_v11 = vpop.f32.mrb[44].mxu0  ;;  %v10583_v27 = vadd.f32 %v13011_v51, %v13571_v5  ;;  %v10587_v5 = vadd.f32 %v13011_v51, %v13575_v54  ;;  %v10591_v54 = vadd.f32 %v13011_v51, %v13579_v20  ;;  %v10595_v20 = vadd.f32 %v13011_v51, %v13052_v24 }
 0x359   : > { %v13285_v4 = vadd.f32 %v10577_v13, %v8756_v11  ;;  %v8758_v41 = vpop.f32.mrb[45].mxu0 }
 0x35a   : > { %v8759_v0 = vpop.f32.mrb[46].mxu0 }
 0x35b   : > { %v13287_v44 = vpop.f32.mrb[112].mxu1  ;;  %v13289_v59 = vadd.f32 %v10579_v3, %v8759_v0  ;;  %v8761_v48 = vpop.f32.mrb[47].mxu0 }
 0x35c   : > { %13568 = vst [vmem:[#allocation5_spill] sm:$0xff] %v13287_v44  ;;  %v8316_v6 = vpop.f32.mrb[113].mxu1 }
 0x35d   : > { %v13291_v43 = vpop.f32.mrb[114].mxu1 }
 0x35e   : > { %13569 = vst [vmem:[#allocation6_spill] sm:$0xff] %v13291_v43  ;;  %v8319_v18 = vpop.f32.mrb[115].mxu1  ;;  %v13574_v43 = vld [vmem:[#allocation9_spill] sm:$0xff] }
 0x35f   : > { %v10585_v31 = vadd.f32 %v13011_v51, %v13574_v43 }
 0x360   : > { %v8764_v28 = vpop.f32.mrb[48].mxu0 }
 0x361   : > { %v13297_v13 = vadd.f32 %v10581_v14, %v8764_v28  ;;  %v8766_v11 = vpop.f32.mrb[49].mxu0 }
 0x362   : > { %v8767_v9 = vpop.f32.mrb[50].mxu0 }
 0x363   : > { %v13299_v41 = vpop.f32.mrb[116].mxu1  ;;  %v13301_v3 = vadd.f32 %v10583_v27, %v8767_v9  ;;  %v8769_v0 = vpop.f32.mrb[51].mxu0 }
 0x364   : > { %13572 = vst [vmem:[#allocation7_spill] sm:$0xff] %v13299_v41  ;;  %v8324_v48 = vpop.f32.mrb[117].mxu1 }
 0x365   : > { %v13303_v6 = vpop.f32.mrb[118].mxu1 }
 0x366   : > { %13573 = vst [vmem:[#allocation8_spill] sm:$0xff] %v13303_v6  ;;  %v8327_v18 = vpop.f32.mrb[119].mxu1  ;;  %v13578_v6 = vld [vmem:[#allocation11_spill] sm:$0xff] }
 0x367   : > { %v10589_v43 = vadd.f32 %v13011_v51, %v13578_v6 }
 0x368   : > { %v8772_v44 = vpop.f32.mrb[52].mxu0 }
 0x369   : > { %v13309_v14 = vadd.f32 %v10585_v31, %v8772_v44  ;;  %v8774_v28 = vpop.f32.mrb[53].mxu0 }
 0x36a   : > { %v8775_v11 = vpop.f32.mrb[54].mxu0 }
 0x36b   : > { %v13311_v15 = vpop.f32.mrb[120].mxu1  ;;  %v13313_v27 = vadd.f32 %v10587_v5, %v8775_v11  ;;  %v8777_v9 = vpop.f32.mrb[55].mxu0 }
 0x36c   : > { %13576 = vst [vmem:[#allocation9_spill] sm:$0xff] %v13311_v15  ;;  %v8332_v0 = vpop.f32.mrb[121].mxu1 }
 0x36d   : > { %v13315_v48 = vpop.f32.mrb[122].mxu1 }
 0x36e   : > { %13577 = vst [vmem:[#allocation10_spill] sm:$0xff] %v13315_v48  ;;  %v8335_v18 = vpop.f32.mrb[123].mxu1  ;;  %v13582_v48 = vld [vmem:[#allocation13_spill] sm:$0xff] }
 0x36f   : > { %v10593_v6 = vadd.f32 %v13011_v51, %v13582_v48 }
 0x370   : > { %v8780_v41 = vpop.f32.mrb[56].mxu0 }
 0x371   : > { %v13321_v44 = vadd.f32 %v10589_v43, %v8780_v41  ;;  %v8782_v31 = vpop.f32.mrb[57].mxu0 }
 0x372   : > { %v8783_v28 = vpop.f32.mrb[58].mxu0 }
 0x373   : > { %v13323_v57 = vpop.f32.mrb[124].mxu1  ;;  %v13325_v5 = vadd.f32 %v10591_v54, %v8783_v28  ;;  %v8785_v11 = vpop.f32.mrb[59].mxu0 }
 0x374   : > { %13580 = vst [vmem:[#allocation11_spill] sm:$0xff] %v13323_v57  ;;  %v8340_v9 = vpop.f32.mrb[125].mxu1 }
 0x375   : > { %v13327_v0 = vpop.f32.mrb[126].mxu1 }
 0x376   : > { %13581 = vst [vmem:[#allocation12_spill] sm:$0xff] %v13327_v0  ;;  %v8343_v18 = vpop.f32.mrb[127].mxu1 }
 0x378   : > { %v8788_v15 = vpop.f32.mrb[60].mxu0 }
 0x379   : > { %v13333_v41 = vadd.f32 %v10593_v6, %v8788_v15  ;;  %v8790_v43 = vpop.f32.mrb[61].mxu0 }
 0x37a   : > { %v8791_v31 = vpop.f32.mrb[62].mxu0 }
 0x37b   : > { %v10439_v57 = vpop.f32.mrb[128].mxu1  ;;  %v13335_v54 = vadd.f32 %v10595_v20, %v8791_v31  ;;  %v8793_v28 = vpop.f32.mrb[63].mxu0 }
 0x37c   : > { %v8966_v11 = vadd.f32 %v13136_v34, %v10439_v57  ;;  %v8957_v9 = vpop.f32.mrb[129].mxu1  ;;  %v10597_v34 = vadd.f32 %v13011_v51, %v13077_v60 }
 0x37d   : > { %v8958_v18 = vadd.f32 %v13099_v16, %v8957_v9  ;;  %v10440_v0 = vpop.f32.mrb[130].mxu1 }
 0x37e   : > { %v8969_v48 = vadd.f32 %v13144_v33, %v10440_v0  ;;  %v8960_v45 = vpop.f32.mrb[131].mxu1  ;;  %v10599_v33 = vadd.f32 %v13011_v51, %v13082_v56 }
 0x37f   : > { %v8961_v24 = vadd.f32 %v13111_v25, %v8960_v45 }
 0x380   : > { %v10198_v57 = vpack.c.bf16 %v8969_v48, %v8966_v11  ;;  %v8796_v15 = vpop.f32.mrb[64].mxu0  ;;  %v10601_v48 = vadd.f32 %v13011_v51, %v13104_v26 }
 0x381   : > { %v10193_v16 = vpack.c.bf16 %v8961_v24, %v8958_v18  ;;  %v13352_v0 = vadd.f32 %v10597_v34, %v8796_v15  ;;  %v8798_v6 = vpop.f32.mrb[65].mxu0  ;;  %v13583_v15 = vld [vmem:[#allocation14_spill] sm:$0xff] }
 0x382   : > { %10350 = vst [vmem:[%s13345_s6 + $0x8] sm:$0xff] %v10198_v57   ;;  %v8799_v20 = vpop.f32.mrb[66].mxu0 }
 0x383   : > { %10194 = vst [vmem:[%s13345_s6] sm:$0xff] %v10193_v16   ;;  %v10443_v43 = vpop.f32.mrb[132].mxu1  ;;  %v13356_v31 = vadd.f32 %v10599_v33, %v8799_v20  ;;  %v8801_v25 = vpop.f32.mrb[67].mxu0  ;;  %v10603_v16 = vadd.f32 %v13011_v51, %v13583_v15 }
 0x384   : > { %v8982_v45 = vadd.f32 %v13189_v35, %v10443_v43  ;;  %v8973_v60 = vpop.f32.mrb[133].mxu1 }
 0x385   : > { %v8974_v28 = vadd.f32 %v13164_v10, %v8973_v60  ;;  %v10444_v11 = vpop.f32.mrb[134].mxu1 }
 0x386   : > { %v8985_v56 = vadd.f32 %v13193_v42, %v10444_v11  ;;  %v8976_v9 = vpop.f32.mrb[135].mxu1  ;;  %v13584_v11 = vld [vmem:[#allocation15_spill] sm:$0xff] }
 0x387   : > { %v8977_v18 = vadd.f32 %v13172_v53, %v8976_v9 }
 0x388   : > { %v10208_v24 = vpack.c.bf16 %v8985_v56, %v8982_v45  ;;  %v8804_v34 = vpop.f32.mrb[68].mxu0  ;;  %v10605_v56 = vadd.f32 %v13011_v51, %v13584_v11 }
 0x389   : > { %v10203_v57 = vpack.c.bf16 %v8977_v18, %v8974_v28  ;;  %v13366_v35 = vadd.f32 %v10601_v48, %v8804_v34  ;;  %v8806_v33 = vpop.f32.mrb[69].mxu0 }
 0x38a   : > { %10352 = vst [vmem:[%s13345_s6 + $0x18] sm:$0xff] %v10208_v24   ;;  %v8807_v10 = vpop.f32.mrb[70].mxu0  ;;  %v10607_v24 = vadd.f32 %v13011_v51, %v13148_v50 }
 0x38b   : > { %10351 = vst [vmem:[%s13345_s6 + $0x10] sm:$0xff] %v10203_v57   ;;  %v10447_v6 = vpop.f32.mrb[136].mxu1  ;;  %v13370_v42 = vadd.f32 %v10603_v16, %v8807_v10  ;;  %v8809_v53 = vpop.f32.mrb[71].mxu0 }
 0x38c   : > { %v8998_v20 = vadd.f32 %v13213_v23, %v10447_v6  ;;  %v8989_v26 = vpop.f32.mrb[137].mxu1 }
 0x38d   : > { %v8990_v43 = vadd.f32 %v13201_v58, %v8989_v26  ;;  %v10448_v25 = vpop.f32.mrb[138].mxu1 }
 0x38e   : > { %v9001_v45 = vadd.f32 %v13217_v2, %v10448_v25  ;;  %v8992_v60 = vpop.f32.mrb[139].mxu1 }
 0x38f   : > { %v8993_v28 = vadd.f32 %v13205_v21, %v8992_v60 }
 0x390   : > { %v10218_v9 = vpack.c.bf16 %v9001_v45, %v8998_v20  ;;  %v8812_v18 = vpop.f32.mrb[72].mxu0  ;;  %v10609_v20 = vadd.f32 %v13011_v51, %v13170_v19  ;;  %v10611_v45 = vadd.f32 %v13011_v51, %v13174_v37 }
 0x391   : > { %v10213_v48 = vpack.c.bf16 %v8993_v28, %v8990_v43  ;;  %v13380_v23 = vadd.f32 %v10605_v56, %v8812_v18  ;;  %v8814_v34 = vpop.f32.mrb[73].mxu0 }
 0x392   : > { %10354 = vst [vmem:[%s13345_s6 + $0x28] sm:$0xff] %v10218_v9   ;;  %v8815_v58 = vpop.f32.mrb[74].mxu0 }
 0x393   : > { %10353 = vst [vmem:[%s13345_s6 + $0x20] sm:$0xff] %v10213_v48   ;;  %v10451_v57 = vpop.f32.mrb[140].mxu1  ;;  %v13384_v2 = vadd.f32 %v10607_v24, %v8815_v58  ;;  %v8817_v21 = vpop.f32.mrb[75].mxu0  ;;  %v13407_v48 = vld [vmem:[%s13536_s2] ss:$0 sm:$0xff] }
 0x394   : > { %v9014_v15 = vadd.f32 %v13237_v47, %v10451_v57  ;;  %v9005_v16 = vpop.f32.mrb[141].mxu1  ;;  %v10613_v24 = vadd.f32 %v13407_v48, %v13191_v8 }
 0x395   : > { %v9006_v33 = vadd.f32 %v13225_v12, %v9005_v16  ;;  %v10452_v10 = vpop.f32.mrb[142].mxu1 }
 0x396   : > { %v9017_v50 = vadd.f32 %v13241_v1, %v10452_v10  ;;  %v9008_v6 = vpop.f32.mrb[143].mxu1 }
 0x397   : > { %v9009_v53 = vadd.f32 %v13229_v40, %v9008_v6 }
 0x398   : > { %v10228_v26 = vpack.c.bf16 %v9017_v50, %v9014_v15  ;;  %v8820_v43 = vpop.f32.mrb[76].mxu0 }
 0x399   : > { %v10223_v25 = vpack.c.bf16 %v9009_v53, %v9006_v33  ;;  %v13394_v47 = vadd.f32 %v10609_v20, %v8820_v43  ;;  %v8822_v60 = vpop.f32.mrb[77].mxu0  ;;  %v10617_v20 = vadd.f32 %v13407_v48, %v13203_v32 }
 0x39a   : > { %10356 = vst [vmem:[%s13345_s6 + $0x38] sm:$0xff] %v10228_v26   ;;  %v8823_v12 = vpop.f32.mrb[78].mxu0 }
 0x39b   : > { %10355 = vst [vmem:[%s13345_s6 + $0x30] sm:$0xff] %v10223_v25   ;;  %v10455_v28 = vpop.f32.mrb[144].mxu1  ;;  %v13398_v1 = vadd.f32 %v10611_v45, %v8823_v12  ;;  %v8825_v11 = vpop.f32.mrb[79].mxu0  ;;  %v10619_v45 = vadd.f32 %v13407_v48, %v13207_v29 }
 0x39c   : > { %v9030_v40 = vadd.f32 %v13261_v22, %v10455_v28  ;;  %v9021_v19 = vpop.f32.mrb[145].mxu1 }
 0x39d   : > { %v9022_v56 = vadd.f32 %v13249_v52, %v9021_v19  ;;  %v10456_v9 = vpop.f32.mrb[146].mxu1  ;;  %v10615_v52 = vadd.f32 %v13407_v48, %v13195_v7 }
 0x39e   : > { %v9033_v51 = vadd.f32 %v13265_v62, %v10456_v9  ;;  %v9024_v37 = vpop.f32.mrb[147].mxu1  ;;  %v10621_v9 = vadd.f32 %v13407_v48, %v13215_v49 }
 0x39f   : > { %v9025_v18 = vadd.f32 %v13253_v36, %v9024_v37 }
 0x3a0   : > { %v10238_v34 = vpack.c.bf16 %v9033_v51, %v9030_v40  ;;  %v8828_v22 = vpop.f32.mrb[80].mxu0 }
 0x3a1   : > { %v10233_v58 = vpack.c.bf16 %v9025_v18, %v9022_v56  ;;  %v13413_v57 = vadd.f32 %v10613_v24, %v8828_v22  ;;  %v8830_v62 = vpop.f32.mrb[81].mxu0  ;;  %v10623_v24 = vadd.f32 %v13407_v48, %v13219_v38 }
 0x3a2   : > { %10358 = vst [vmem:[%s13345_s6 + $0x48] sm:$0xff] %v10238_v34   ;;  %v8831_v21 = vpop.f32.mrb[82].mxu0 }
 0x3a3   : > { %10357 = vst [vmem:[%s13345_s6 + $0x40] sm:$0xff] %v10233_v58   ;;  %v10459_v36 = vpop.f32.mrb[148].mxu1  ;;  %v13417_v15 = vadd.f32 %v10615_v52, %v8831_v21  ;;  %v8833_v16 = vpop.f32.mrb[83].mxu0 }
 0x3a4   : > { %v9046_v33 = vadd.f32 %v13285_v4, %v10459_v36  ;;  %v9037_v8 = vpop.f32.mrb[149].mxu1  ;;  %v10625_v16 = vadd.f32 %v13407_v48, %v13227_v30 }
 0x3a5   : > { %v9038_v10 = vadd.f32 %v13273_v63, %v9037_v8  ;;  %v10460_v50 = vpop.f32.mrb[150].mxu1 }
 0x3a6   : > { %v9049_v7 = vadd.f32 %v13289_v59, %v10460_v50  ;;  %v9040_v6 = vpop.f32.mrb[151].mxu1  ;;  %v10627_v50 = vadd.f32 %v13407_v48, %v13231_v55 }
 0x3a7   : > { %v9041_v53 = vadd.f32 %v13277_v61, %v9040_v6 }
 0x3a8   : > { %v10248_v26 = vpack.c.bf16 %v9049_v7, %v9046_v33  ;;  %v8836_v43 = vpop.f32.mrb[84].mxu0 }
 0x3a9   : > { %v10243_v25 = vpack.c.bf16 %v9041_v53, %v9038_v10  ;;  %v13427_v4 = vadd.f32 %v10617_v20, %v8836_v43  ;;  %v8838_v60 = vpop.f32.mrb[85].mxu0 }
 0x3aa   : > { %10360 = vst [vmem:[%s13345_s6 + $0x58] sm:$0xff] %v10248_v26   ;;  %v8839_v63 = vpop.f32.mrb[86].mxu0 }
 0x3ab   : > { %10359 = vst [vmem:[%s13345_s6 + $0x50] sm:$0xff] %v10243_v25   ;;  %v10463_v12 = vpop.f32.mrb[152].mxu1  ;;  %v13431_v59 = vadd.f32 %v10619_v45, %v8839_v63  ;;  %v8841_v61 = vpop.f32.mrb[87].mxu0  ;;  %v10629_v45 = vadd.f32 %v13407_v48, %v13239_v39 }
 0x3ac   : > { %v9062_v28 = vadd.f32 %v13309_v14, %v10463_v12  ;;  %v9053_v32 = vpop.f32.mrb[153].mxu1  ;;  %v10631_v61 = vadd.f32 %v13407_v48, %v13243_v17 }
 0x3ad   : > { %v9054_v11 = vadd.f32 %v13297_v13, %v9053_v32  ;;  %v10464_v40 = vpop.f32.mrb[154].mxu1 }
 0x3ae   : > { %v9065_v29 = vadd.f32 %v13313_v27, %v10464_v40  ;;  %v9056_v19 = vpop.f32.mrb[155].mxu1 }
 0x3af   : > { %v9057_v56 = vadd.f32 %v13301_v3, %v9056_v19 }
 0x3b0   : > { %v10258_v51 = vpack.c.bf16 %v9065_v29, %v9062_v28  ;;  %v8844_v37 = vpop.f32.mrb[88].mxu0 }
 0x3b1   : > { %v10253_v18 = vpack.c.bf16 %v9057_v56, %v9054_v11  ;;  %v13441_v14 = vadd.f32 %v10621_v9, %v8844_v37  ;;  %v8846_v34 = vpop.f32.mrb[89].mxu0  ;;  %v10633_v9 = vadd.f32 %v13407_v48, %v13251_v46 }
 0x3b2   : > { %10362 = vst [vmem:[%s13345_s6 + $0x68] sm:$0xff] %v10258_v51   ;;  %v8847_v13 = vpop.f32.mrb[90].mxu0 }
 0x3b3   : > { %10361 = vst [vmem:[%s13345_s6 + $0x60] sm:$0xff] %v10253_v18   ;;  %v10467_v22 = vpop.f32.mrb[156].mxu1  ;;  %v13445_v27 = vadd.f32 %v10623_v24, %v8847_v13  ;;  %v8849_v3 = vpop.f32.mrb[91].mxu0  ;;  %v13585_v24 = vld [vmem:[#allocation16_spill] sm:$0xff] }
 0x3b4   : > { %v9078_v58 = vadd.f32 %v13333_v41, %v10467_v22  ;;  %v9069_v49 = vpop.f32.mrb[157].mxu1  ;;  %v10635_v34 = vadd.f32 %v13407_v48, %v13585_v24 }
 0x3b5   : > { %v9070_v52 = vadd.f32 %v13321_v44, %v9069_v49  ;;  %v10468_v62 = vpop.f32.mrb[158].mxu1 }
 0x3b6   : > { %v9081_v38 = vadd.f32 %v13335_v54, %v10468_v62  ;;  %v9072_v21 = vpop.f32.mrb[159].mxu1 }
 0x3b7   : > { %v9073_v36 = vadd.f32 %v13325_v5, %v9072_v21  ;;  %v13586_v21 = vld [vmem:[#allocation17_spill] sm:$0xff] }
 0x3b8   : > { %v10268_v33 = vpack.c.bf16 %v9081_v38, %v9078_v58  ;;  %v8852_v8 = vpop.f32.mrb[92].mxu0 }
 0x3b9   : > { %v10263_v10 = vpack.c.bf16 %v9073_v36, %v9070_v52  ;;  %v13455_v41 = vadd.f32 %v10625_v16, %v8852_v8  ;;  %v8854_v7 = vpop.f32.mrb[93].mxu0  ;;  %v10637_v36 = vadd.f32 %v13407_v48, %v13586_v21 }
 0x3ba   : > { %10364 = vst [vmem:[%s13345_s6 + $0x78] sm:$0xff] %v10268_v33   ;;  %v8855_v44 = vpop.f32.mrb[94].mxu0 }
 0x3bb   : > { %10363 = vst [vmem:[%s13345_s6 + $0x70] sm:$0xff] %v10263_v10   ;;  %v10471_v6 = vpop.f32.mrb[160].mxu1  ;;  %v13459_v54 = vadd.f32 %v10627_v50, %v8855_v44  ;;  %v8857_v5 = vpop.f32.mrb[95].mxu0  ;;  %v13587_v10 = vld [vmem:[#allocation18_spill] sm:$0xff] }
 0x3bc   : > { %v9094_v53 = vadd.f32 %v13366_v35, %v10471_v6  ;;  %v9085_v30 = vpop.f32.mrb[161].mxu1  ;;  %v10639_v50 = vadd.f32 %v13407_v48, %v13587_v10 }
 0x3bd   : > { %v9086_v20 = vadd.f32 %v13352_v0, %v9085_v30  ;;  %v10472_v26 = vpop.f32.mrb[162].mxu1 }
 0x3be   : > { %v9097_v55 = vadd.f32 %v13370_v42, %v10472_v26  ;;  %v9088_v43 = vpop.f32.mrb[163].mxu1 }
 0x3bf   : > { %v9089_v25 = vadd.f32 %v13356_v31, %v9088_v43  ;;  %v13588_v43 = vld [vmem:[#allocation4_spill] sm:$0xff] }
 0x3c0   : > { %v10278_v60 = vpack.c.bf16 %v9097_v55, %v9094_v53  ;;  %v8860_v63 = vpop.f32.mrb[96].mxu0 }
 0x3c1   : > { %v10273_v12 = vpack.c.bf16 %v9089_v25, %v9086_v20  ;;  %v13469_v35 = vadd.f32 %v10629_v45, %v8860_v63  ;;  %v8862_v28 = vpop.f32.mrb[97].mxu0  ;;  %v10641_v25 = vadd.f32 %v13407_v48, %v13588_v43 }
 0x3c2   : > { %10366 = vst [vmem:[%s13345_s6 + $0x88] sm:$0xff] %v10278_v60   ;;  %v8863_v0 = vpop.f32.mrb[98].mxu0 }
 0x3c3   : > { %10365 = vst [vmem:[%s13345_s6 + $0x80] sm:$0xff] %v10273_v12   ;;  %v10475_v32 = vpop.f32.mrb[164].mxu1  ;;  %v13473_v42 = vadd.f32 %v10631_v61, %v8863_v0  ;;  %v8865_v31 = vpop.f32.mrb[99].mxu0  ;;  %v13589_v12 = vld [vmem:[#allocation19_spill] sm:$0xff] }
 0x3c4   : > { %v9110_v11 = vadd.f32 %v13394_v47, %v10475_v32  ;;  %v9101_v39 = vpop.f32.mrb[165].mxu1  ;;  %v10643_v61 = vadd.f32 %v13407_v48, %v13589_v12 }
 0x3c5   : > { %v9102_v40 = vadd.f32 %v13380_v23, %v9101_v39  ;;  %v10476_v29 = vpop.f32.mrb[166].mxu1 }
 0x3c6   : > { %v9113_v17 = vadd.f32 %v13398_v1, %v10476_v29  ;;  %v9104_v19 = vpop.f32.mrb[167].mxu1 }
 0x3c7   : > { %v9105_v56 = vadd.f32 %v13384_v2, %v9104_v19  ;;  %v13590_v19 = vld [vmem:[#allocation5_spill] sm:$0xff] }
 0x3c8   : > { %v10288_v51 = vpack.c.bf16 %v9113_v17, %v9110_v11  ;;  %v8868_v37 = vpop.f32.mrb[100].mxu0 }
 0x3c9   : > { %v10283_v18 = vpack.c.bf16 %v9105_v56, %v9102_v40  ;;  %v10634_v47 = vadd.f32 %v10633_v9, %v8868_v37  ;;  %v8870_v13 = vpop.f32.mrb[101].mxu0  ;;  %v10645_v56 = vadd.f32 %v13407_v48, %v13590_v19 }
 0x3ca   : > { %10368 = vst [vmem:[%s13345_s6 + $0x98] sm:$0xff] %v10288_v51   ;;  %v8871_v22 = vpop.f32.mrb[102].mxu0 }
 0x3cb   : > { %10367 = vst [vmem:[%s13345_s6 + $0x90] sm:$0xff] %v10283_v18   ;;  %v10479_v23 = vpop.f32.mrb[168].mxu1  ;;  %v10636_v3 = vadd.f32 %v10635_v34, %v8871_v22  ;;  %v8873_v1 = vpop.f32.mrb[103].mxu0  ;;  %v13591_v18 = vld [vmem:[#allocation6_spill] sm:$0xff] }
 0x3cc   : > { %v9126_v2 = vadd.f32 %v13427_v4, %v10479_v23  ;;  %v9117_v58 = vpop.f32.mrb[169].mxu1  ;;  %v10647_v24 = vadd.f32 %v13407_v48, %v13591_v18 }
 0x3cd   : > { %v9118_v46 = vadd.f32 %v13413_v57, %v9117_v58  ;;  %v10480_v49 = vpop.f32.mrb[170].mxu1 }
 0x3ce   : > { %v9129_v52 = vadd.f32 %v13431_v59, %v10480_v49  ;;  %v9120_v62 = vpop.f32.mrb[171].mxu1 }
 0x3cf   : > { %v9121_v38 = vadd.f32 %v13417_v15, %v9120_v62 }
 0x3d0   : > { %v10298_v16 = vpack.c.bf16 %v9129_v52, %v9126_v2  ;;  %v8876_v33 = vpop.f32.mrb[104].mxu0  ;;  %v13592_v52 = vld [vmem:[#allocation7_spill] sm:$0xff] }
 0x3d1   : > { %v10293_v8 = vpack.c.bf16 %v9121_v38, %v9118_v46  ;;  %v10638_v4 = vadd.f32 %v10637_v36, %v8876_v33  ;;  %v8878_v7 = vpop.f32.mrb[105].mxu0  ;;  %v10649_v62 = vadd.f32 %v13407_v48, %v13592_v52 }
 0x3d2   : > { %10370 = vst [vmem:[%s13345_s6 + $0xa8] sm:$0xff] %v10298_v16   ;;  %v8879_v44 = vpop.f32.mrb[106].mxu0  ;;  %v13593_v16 = vld [vmem:[#allocation8_spill] sm:$0xff] }
 0x3d3   : > { %10369 = vst [vmem:[%s13345_s6 + $0xa0] sm:$0xff] %v10293_v8   ;;  %v10483_v57 = vpop.f32.mrb[172].mxu1  ;;  %v10640_v6 = vadd.f32 %v10639_v50, %v8879_v44  ;;  %v8881_v59 = vpop.f32.mrb[107].mxu0  ;;  %v10651_v33 = vadd.f32 %v13407_v48, %v13593_v16 }
 0x3d4   : > { %v9142_v15 = vadd.f32 %v13455_v41, %v10483_v57  ;;  %v9133_v5 = vpop.f32.mrb[173].mxu1 }
 0x3d5   : > { %v9134_v53 = vadd.f32 %v13441_v14, %v9133_v5  ;;  %v10484_v30 = vpop.f32.mrb[174].mxu1 }
 0x3d6   : > { %v9145_v20 = vadd.f32 %v13459_v54, %v10484_v30  ;;  %v9136_v26 = vpop.f32.mrb[175].mxu1 }
 0x3d7   : > { %v9137_v55 = vadd.f32 %v13445_v27, %v9136_v26 }
 0x3d8   : > { %v10308_v45 = vpack.c.bf16 %v9145_v20, %v9142_v15  ;;  %v8884_v60 = vpop.f32.mrb[108].mxu0  ;;  %v13594_v20 = vld [vmem:[#allocation9_spill] sm:$0xff] }
 0x3d9   : > { %v10303_v63 = vpack.c.bf16 %v9137_v55, %v9134_v53  ;;  %v10642_v41 = vadd.f32 %v10641_v25, %v8884_v60  ;;  %v8886_v28 = vpop.f32.mrb[109].mxu0  ;;  %v10653_v26 = vadd.f32 %v13407_v48, %v13594_v20 }
 0x3da   : > { %10372 = vst [vmem:[%s13345_s6 + $0xb8] sm:$0xff] %v10308_v45   ;;  %v8887_v0 = vpop.f32.mrb[110].mxu0  ;;  %v13595_v45 = vld [vmem:[#allocation10_spill] sm:$0xff] }
 0x3db   : > { %10371 = vst [vmem:[%s13345_s6 + $0xb0] sm:$0xff] %v10303_v63   ;;  %v10487_v14 = vpop.f32.mrb[176].mxu1  ;;  %v10644_v32 = vadd.f32 %v10643_v61, %v8887_v0  ;;  %v8889_v54 = vpop.f32.mrb[111].mxu0  ;;  %v10655_v60 = vadd.f32 %v13407_v48, %v13595_v45 }
 0x3dc   : > { %v9158_v31 = vadd.f32 %v10634_v47, %v10487_v14  ;;  %v9149_v27 = vpop.f32.mrb[177].mxu1 }
 0x3dd   : > { %v9150_v11 = vadd.f32 %v13469_v35, %v9149_v27  ;;  %v10488_v39 = vpop.f32.mrb[178].mxu1 }
 0x3de   : > { %v9161_v40 = vadd.f32 %v10636_v3, %v10488_v39  ;;  %v9152_v29 = vpop.f32.mrb[179].mxu1 }
 0x3df   : > { %v9153_v17 = vadd.f32 %v13473_v42, %v9152_v29 }
 0x3e0   : > { %v10318_v9 = vpack.c.bf16 %v9161_v40, %v9158_v31  ;;  %v8892_v51 = vpop.f32.mrb[112].mxu0 }
 0x3e1   : > { %v10313_v37 = vpack.c.bf16 %v9153_v17, %v9150_v11  ;;  %v10646_v34 = vadd.f32 %v10645_v56, %v8892_v51  ;;  %v8894_v47 = vpop.f32.mrb[113].mxu0  ;;  %v13596_v11 = vld [vmem:[#allocation11_spill] sm:$0xff]  ;;  %v13597_v17 = vld [vmem:[#allocation12_spill] sm:$0xff] }
 0x3e2   : > { %10374 = vst [vmem:[%s13345_s6 + $0xc8] sm:$0xff] %v10318_v9   ;;  %v8895_v13 = vpop.f32.mrb[114].mxu0  ;;  %v10657_v39 = vadd.f32 %v13407_v48, %v13596_v11  ;;  %v10659_v19 = vadd.f32 %v13407_v48, %v13597_v17 }
 0x3e3   : > { %10373 = vst [vmem:[%s13345_s6 + $0xc0] sm:$0xff] %v10313_v37   ;;  %v10491_v35 = vpop.f32.mrb[180].mxu1  ;;  %v10648_v22 = vadd.f32 %v10647_v24, %v8895_v13  ;;  %v8897_v23 = vpop.f32.mrb[115].mxu0 }
 0x3e4   : > { %v9174_v3 = vadd.f32 %v10642_v41, %v10491_v35  ;;  %v9165_v42 = vpop.f32.mrb[181].mxu1 }
 0x3e5   : > { %v9166_v1 = vadd.f32 %v10638_v4, %v9165_v42  ;;  %v10492_v2 = vpop.f32.mrb[182].mxu1 }
 0x3e6   : > { %v9177_v58 = vadd.f32 %v10644_v32, %v10492_v2  ;;  %v9168_v46 = vpop.f32.mrb[183].mxu1 }
 0x3e7   : > { %v9169_v49 = vadd.f32 %v10640_v6, %v9168_v46 }
 0x3e8   : > { %v10328_v38 = vpack.c.bf16 %v9177_v58, %v9174_v3  ;;  %v8900_v21 = vpop.f32.mrb[116].mxu0 }
 0x3e9   : > { %v10323_v36 = vpack.c.bf16 %v9169_v49, %v9166_v1  ;;  %v10650_v8 = vadd.f32 %v10649_v62, %v8900_v21  ;;  %v8902_v10 = vpop.f32.mrb[117].mxu0 }
 0x3ea   : > { %10376 = vst [vmem:[%s13345_s6 + $0xd8] sm:$0xff] %v10328_v38   ;;  %v8903_v50 = vpop.f32.mrb[118].mxu0 }
 0x3eb   : > { %10375 = vst [vmem:[%s13345_s6 + $0xd0] sm:$0xff] %v10323_v36   ;;  %v10495_v7 = vpop.f32.mrb[184].mxu1  ;;  %v10652_v4 = vadd.f32 %v10651_v33, %v8903_v50  ;;  %v8905_v44 = vpop.f32.mrb[119].mxu0 }
 0x3ec   : > { %v9190_v57 = vadd.f32 %v10650_v8, %v10495_v7  ;;  %v9181_v6 = vpop.f32.mrb[185].mxu1 }
 0x3ed   : > { %v9182_v59 = vadd.f32 %v10646_v34, %v9181_v6  ;;  %v10496_v15 = vpop.f32.mrb[186].mxu1 }
 0x3ee   : > { %v9193_v5 = vadd.f32 %v10652_v4, %v10496_v15  ;;  %v9184_v53 = vpop.f32.mrb[187].mxu1 }
 0x3ef   : > { %v9185_v30 = vadd.f32 %v10648_v22, %v9184_v53 }
 0x3f0   : > { %v10338_v55 = vpack.c.bf16 %v9193_v5, %v9190_v57  ;;  %v8908_v43 = vpop.f32.mrb[120].mxu0 }
 0x3f1   : > { %v10333_v25 = vpack.c.bf16 %v9185_v30, %v9182_v59  ;;  %v10654_v63 = vadd.f32 %v10653_v26, %v8908_v43  ;;  %v8910_v12 = vpop.f32.mrb[121].mxu0 }
 0x3f2   : > { %10378 = vst [vmem:[%s13345_s6 + $0xe8] sm:$0xff] %v10338_v55   ;;  %v8911_v61 = vpop.f32.mrb[122].mxu0 }
 0x3f3   : > { %10377 = vst [vmem:[%s13345_s6 + $0xe0] sm:$0xff] %v10333_v25   ;;  %v10499_v41 = vpop.f32.mrb[188].mxu1  ;;  %v10656_v28 = vadd.f32 %v10655_v60, %v8911_v61  ;;  %v8913_v0 = vpop.f32.mrb[123].mxu0 }
 0x3f4   : > { %v9197_v14 = vpop.f32.mrb[189].mxu1 }
 0x3f5   : > { %v9198_v32 = vadd.f32 %v10654_v63, %v9197_v14  ;;  %v10500_v54 = vpop.f32.mrb[190].mxu1 }
 0x3f6   : > { %v9200_v31 = vpop.f32.mrb[191].mxu1 }
 0x3f7   : > { %v9201_v27 = vadd.f32 %v10656_v28, %v9200_v31 }
 0x3f8   : > { %v8916_v40 = vpop.f32.mrb[124].mxu0 }
 0x3f9   : > { %v10343_v29 = vpack.c.bf16 %v9201_v27, %v9198_v32  ;;  %v10658_v56 = vadd.f32 %v10657_v39, %v8916_v40  ;;  %v8918_v9 = vpop.f32.mrb[125].mxu0 }
 0x3fa   : > { %v8919_v51 = vpop.f32.mrb[126].mxu0 }
 0x3fb   : > { %10379 = vst [vmem:[%s13345_s6 + $0xf0] sm:$0xff] %v10343_v29   ;;  %v9206_v37 = vadd.f32 %v10658_v56, %v10499_v41  ;;  %v10660_v18 = vadd.f32 %v10659_v19, %v8919_v51  ;;  %v8921_v24 = vpop.f32.mrb[127].mxu0 }
 0x3fd   : > { %v9209_v34 = vadd.f32 %v10660_v18, %v10500_v54 }
 0x3ff   : > { %v10348_v47 = vpack.c.bf16 %v9209_v34, %v9206_v37 }
 0x401   : > { %10380 = vst [vmem:[%s13345_s6 + $0xf8] sm:$0xff] %v10348_v47  }
 0x402 PF: > { %s13_s12 = sadd.s32 1, %s11105_s12  }
 0x403   : > { %p10_p4 = scmp.ge.s32.totalorder %s13_s12, 4  }
 0x405   :  { %12 = sbr.rel (!%p10_p4) target bundleno = 1 (0x1), region = 64 }

</bundles_post_ra>
